<compile_context>
chip_gen: v7x
topology: tpu7x:2x2x1
jax: 0.10.0
libtpu: 0.0.40
codegen_flags: <defaults>
</compile_context>

<pallas_src>
import functools

import jax
import jax.numpy as jnp
from jax.experimental import pallas as pl
from jax.experimental.pallas import tpu as pltpu

_KH = 5
_KW = 5
_PAD = 2
_HALO = 8            # halo rows fetched below each tile (>=4 needed; 8 keeps maps aligned)
_LANES = 128


def _round_up(x, m):
    return -(-x // m) * m


def _vmem_capacity_bytes():
    try:
        return int(pltpu.get_tpu_info().vmem_capacity_bytes)
    except Exception:          # conservative default (v7x: 64 MiB / TC)
        return 64 * 1024 * 1024


def _vmem_estimate(tile_h, W, Cin, Cout, cout_p, isz):
    """Rough per-grid-step VMEM footprint (padded layouts, double buffers)."""
    wp = W + 2 * _PAD
    k25 = _KH * _KW * Cin
    cin_l = _round_up(Cin, _LANES)
    tile_m = tile_h * W
    main = tile_h * _round_up(wp, 8) * cin_l * isz
    halo = _HALO * _round_up(wp, 8) * cin_l * isz
    wts = _round_up(k25, 8) * cout_p * isz
    conv = max(_round_up(Cout, 8) * _round_up(tile_m, _LANES),
               _round_up(tile_m, 8) * _round_up(Cout, _LANES)) * isz
    stats = 8 * cout_p * 4
    patch = tile_h * _round_up(W, 8) * _round_up(k25, _LANES) * isz
    acc = 2 * tile_m * cout_p * 4              # f32 acc + one temporary
    return 2 * (main + halo + wts + conv + stats) + patch + acc


def _pick_tile_h(H, W, Cin, Cout, cout_p, isz, budget):
    """Largest multiple-of-8 row tile that fits the VMEM budget (<=8192 pixels);
    prefer tiles whose flat pixel count is lane-aligned (enables fused NCHW out)."""
    h_cap = _round_up(H, 8)
    best_any, best_aligned = 8, None
    t = 8
    while t <= h_cap:
        if t * W <= 8192 and _vmem_estimate(t, W, Cin, Cout, cout_p, isz) <= budget:
            best_any = t
            if (t * W) % _LANES == 0:
                best_aligned = t
        t += 8
    return best_aligned if best_aligned is not None else best_any


def _conv_stats_kernel(main_ref, halo_ref, w_ref, conv_ref, stats_ref, patch_ref,
                       *, tile_h, H, W, Cin, Cout, mask_rows, transpose_out):
    """One row-tile: im2col patch -> single big-K MXU dot -> conv tile + BN stats."""
    tile_m = tile_h * W
    k25 = _KH * _KW * Cin

    # ---- build the im2col patch in VMEM scratch: fold all 25 taps into K ----
    # main_ref: (tile_h, wp, Cin) padded rows of this tile
    # halo_ref: (8, wp, Cin) padded rows directly below the tile
    for kh in range(_KH):
        for kw in range(_KW):
            csl = slice((kh * _KW + kw) * Cin, (kh * _KW + kw + 1) * Cin)
            if kh == 0:
                patch_ref[:, :, csl] = main_ref[:, kw:kw + W, :]
            else:
                patch_ref[:tile_h - kh, :, csl] = main_ref[kh:, kw:kw + W, :]
                patch_ref[tile_h - kh:, :, csl] = halo_ref[:kh, kw:kw + W, :]

    # ---- one MXU matmul: (tile_m, 25*Cin) x (25*Cin, Cout_pad) -> f32 ----
    # (the (tile_h, W) -> tile_h*W merge is layout-free when W % 8 == 0)
    patch = patch_ref[...].reshape(tile_m, k25)
    acc = jnp.dot(patch, w_ref[...], preferred_element_type=jnp.float32)

    # ---- conv intermediate: true Cout width, compute dtype; on the fused path
    #      it is stored channel-major so pass 2 writes NCHW with no relayout.
    if transpose_out:
        conv_ref[...] = acc.T[:Cout].astype(conv_ref.dtype)       # (Cout, tile_m)
    else:
        conv_ref[...] = acc[:, :Cout].astype(conv_ref.dtype)      # (tile_m, Cout)

    # ---- streamed BN statistics: per-tile channel sum + *centered* sumsq ----
    if mask_rows:      # only traced when H % tile_h != 0
        t = pl.program_id(1)
        valid = jnp.minimum(tile_m, (H - t * tile_h) * W)
        m_idx = jax.lax.broadcasted_iota(jnp.int32, (tile_m, 1), 0)
        msk = (m_idx < valid).astype(jnp.float32)
        s = jnp.sum(acc * msk, axis=0, keepdims=True)
        mean_t = s * (1.0 / valid.astype(jnp.float32))
        cen = (acc - mean_t) * msk
    else:
        s = jnp.sum(acc, axis=0, keepdims=True)
        mean_t = s * (1.0 / tile_m)
        cen = acc - mean_t
    stats_ref[0:1, :] = s
    stats_ref[1:2, :] = jnp.sum(cen * cen, axis=0, keepdims=True)


def _bn_relu_kernel(conv_ref, scale_ref, shift_ref, o_ref):
    """Per-channel FMA + ReLU (works for both channel-major and channel-minor tiles)."""
    x = conv_ref[...].astype(jnp.float32)
    o_ref[...] = jnp.maximum(x * scale_ref[...] + shift_ref[...], 0.0).astype(o_ref.dtype)


def upblock_forward(x_nchw, w_oihw, gamma, beta, eps=1e-5,
                    compute_dtype=jnp.bfloat16):
    """Conv2d(5x5, s=1, p=2, bias=False) -> BatchNorm2d(batch stats) -> ReLU.

    x_nchw: (N, Cin, H, W) f32. w_oihw: (Cout, Cin, 5, 5). Returns NCHW f32.
    """
    N, Cin, H, W = x_nchw.shape
    Cout = w_oihw.shape[0]
    assert w_oihw.shape == (Cout, Cin, _KH, _KW)

    isz = jnp.dtype(compute_dtype).itemsize
    cout_p = _round_up(Cout, _LANES)
    k25 = _KH * _KW * Cin

    vmem_cap = _vmem_capacity_bytes()              # 128 MiB (v5e/v6e) / 64 MiB (v7x)
    vmem_budget = vmem_cap // 3
    vmem_limit = vmem_cap * 3 // 4

    tile_h = _pick_tile_h(H, W, Cin, Cout, cout_p, isz, vmem_budget)
    n_h = -(-H // tile_h)
    h_t = n_h * tile_h
    tile_m = tile_h * W
    m_total = N * H * W
    wp = W + 2 * _PAD
    hp = h_t + _HALO            # 2 top pad rows + H real rows + zero tail
    hblk = tile_h // _HALO
    mask_rows = (H % tile_h) != 0
    # NCHW output can be produced directly by pass 2 only if every tile's flat
    # spatial chunk is lane-aligned (or there is a single row-tile per image).
    fused_nchw = (tile_m % _LANES == 0) or (n_h == 1)

    # ---- glue: NCHW -> NHWC, spatial zero-pad, cast (input read once) ------
    x_nhwc = jnp.transpose(x_nchw, (0, 2, 3, 1))
    xp = jnp.pad(x_nhwc, ((0, 0), (_PAD, hp - _PAD - H), (_PAD, _PAD), (0, 0)))
    xp = xp.astype(compute_dtype)

    # weights -> (25*Cin, Cout_pad); K ordered (kh, kw, cin) to match the patch
    wt = jnp.transpose(w_oihw, (2, 3, 1, 0)).reshape(k25, Cout)
    wt = jnp.pad(wt, ((0, 0), (0, cout_p - Cout))).astype(compute_dtype)

    if fused_nchw:
        conv_shape = (N, Cout, h_t * W)
        conv_spec = pl.BlockSpec((None, Cout, tile_m), lambda n, t: (n, 0, t))
    else:
        conv_shape = (N, h_t * W, Cout)
        conv_spec = pl.BlockSpec((None, tile_m, Cout), lambda n, t: (n, t, 0))

    # ---- pass 1: tiled conv (single big-K dot) + streamed BN statistics ----
    flops1 = 2 * N * h_t * W * k25 * cout_p
    bytes1 = (N * n_h * (tile_h + _HALO) * wp * Cin * isz + k25 * cout_p * isz
              + N * h_t * W * Cout * isz + N * n_h * 2 * cout_p * 4)
    conv_i, stats = pl.pallas_call(
        functools.partial(_conv_stats_kernel, tile_h=tile_h, H=H, W=W, Cin=Cin,
                          Cout=Cout, mask_rows=mask_rows, transpose_out=fused_nchw),
        grid=(N, n_h),
        in_specs=[
            # main rows of the tile (read directly, no slab copy)
            pl.BlockSpec((None, tile_h, wp, Cin), lambda n, t: (n, t, 0, 0)),
            # 8-row halo directly below the tile (same array, second view)
            pl.BlockSpec((None, _HALO, wp, Cin), lambda n, t: (n, (t + 1) * hblk, 0, 0)),
            # folded weights, resident across the grid
            pl.BlockSpec((k25, cout_p), lambda n, t: (0, 0)),
        ],
        out_specs=[
            conv_spec,
            pl.BlockSpec((None, None, 2, cout_p), lambda n, t: (n, t, 0, 0)),
        ],
        out_shape=[
            jax.ShapeDtypeStruct(conv_shape, compute_dtype),
            jax.ShapeDtypeStruct((N, n_h, 2, cout_p), jnp.float32),
        ],
        scratch_shapes=[pltpu.VMEM((tile_h, W, k25), compute_dtype)],
        compiler_params=pltpu.CompilerParams(
            dimension_semantics=("parallel", "parallel"),
            vmem_limit_bytes=int(vmem_limit)),
        cost_estimate=pl.CostEstimate(flops=flops1, transcendentals=0,
                                      bytes_accessed=int(bytes1)),
    )(xp, xp, wt)

    # ---- BN finalize (tiny per-channel math, exact pooled variance) --------
    sums = stats[:, :, 0, :]                  # (N, n_h, cout_p) per-tile sums
    m2s = stats[:, :, 1, :]                   # per-tile centered sum-of-squares
    cnt_last = float((H - (n_h - 1) * tile_h) * W)
    counts = jnp.concatenate([jnp.full((n_h - 1,), float(tile_m), jnp.float32),
                              jnp.full((1,), cnt_last, jnp.float32)])[None, :, None]
    mean = jnp.sum(sums, axis=(0, 1)) / m_total
    mean_t = sums / counts
    m2 = jnp.sum(m2s, axis=(0, 1)) + jnp.sum(counts * (mean_t - mean) ** 2, axis=(0, 1))
    var = jnp.maximum(m2 / m_total, 0.0)
    inv = jax.lax.rsqrt(var + eps)
    gamma_p = jnp.pad(gamma.astype(jnp.float32), (0, cout_p - Cout))
    beta_p = jnp.pad(beta.astype(jnp.float32), (0, cout_p - Cout))
    scale = (gamma_p * inv)[:Cout]
    shift = (beta_p - mean * gamma_p * inv)[:Cout]

    # ---- pass 2: per-channel FMA + ReLU; fused path writes NCHW directly ---
    out_dtype = x_nchw.dtype
    if fused_nchw:
        scale2, shift2 = scale.reshape(Cout, 1), shift.reshape(Cout, 1)
        ss_spec = pl.BlockSpec((Cout, 1), lambda n, t: (0, 0))
        in_spec_c = pl.BlockSpec((None, Cout, tile_m), lambda n, t: (n, 0, t))
        out_spec = pl.BlockSpec((None, Cout, tile_m), lambda n, t: (n, 0, t))
        out_shape2 = jax.ShapeDtypeStruct((N, Cout, h_t * W), out_dtype)
    else:
        scale2, shift2 = scale.reshape(1, Cout), shift.reshape(1, Cout)
        ss_spec = pl.BlockSpec((1, Cout), lambda n, t: (0, 0))
        in_spec_c = pl.BlockSpec((None, tile_m, Cout), lambda n, t: (n, t, 0))
        out_spec = pl.BlockSpec((None, tile_m, Cout), lambda n, t: (n, t, 0))
        out_shape2 = jax.ShapeDtypeStruct((N, h_t * W, Cout), out_dtype)

    flops2 = 3 * N * h_t * W * Cout
    bytes2 = N * h_t * W * Cout * (isz + jnp.dtype(out_dtype).itemsize)
    y = pl.pallas_call(
        _bn_relu_kernel,
        grid=(N, n_h),
        in_specs=[in_spec_c, ss_spec, ss_spec],
        out_specs=out_spec,
        out_shape=out_shape2,
        compiler_params=pltpu.CompilerParams(
            dimension_semantics=("parallel", "parallel"),
            vmem_limit_bytes=int(vmem_limit)),
        cost_estimate=pl.CostEstimate(flops=flops2, transcendentals=0,
                                      bytes_accessed=int(bytes2)),
    )(conv_i, scale2, shift2)

    if fused_nchw:
        out = y.reshape(N, Cout, h_t, W)          # free row-major view
        if h_t != H:
            out = out[:, :, :H, :]
        return out
    # TODO(synk): rare fallback (flat spatial tile not lane-aligned): the final
    # NHWC->NCHW transpose is left to XLA here.
    out = y.reshape(N, h_t, W, Cout)[:, :H]
    return jnp.transpose(out, (0, 3, 1, 2))


def _reference(x_nchw, w_oihw, gamma, beta, eps=1e-5):
    conv = jax.lax.conv_general_dilated(
        x_nchw, w_oihw, window_strides=(1, 1), padding=((2, 2), (2, 2)),
        dimension_numbers=("NCHW", "OIHW", "NCHW"))
    mean = jnp.mean(conv, axis=(0, 2, 3), keepdims=True)
    var = jnp.mean((conv - mean) ** 2, axis=(0, 2, 3), keepdims=True)
    yy = (conv - mean) * jax.lax.rsqrt(var + eps)
    yy = yy * gamma.reshape(1, -1, 1, 1) + beta.reshape(1, -1, 1, 1)
    return jnp.maximum(yy, 0.0)


if __name__ == "__main__":
    key = jax.random.PRNGKey(0)
    k_x, k_w = jax.random.split(key)

    N, Cin, H, W = 2, 4, 16, 16
    Cout = 8

    x = jax.random.normal(k_x, (N, Cin, H, W), dtype=jnp.float32)
    # Conv2d 5x5, no bias
    w = 0.1 * jax.random.normal(k_w, (Cout, Cin, 5, 5), dtype=jnp.float32)
    # BatchNorm2d default init: weight=1, bias=0
    gamma = jnp.ones((Cout,), dtype=jnp.float32)
    beta = jnp.zeros((Cout,), dtype=jnp.float32)

    ref = jax.block_until_ready(_reference(x, w, gamma, beta))

    # Strict correctness check: f32 compute path.
    out_f32 = jax.block_until_ready(
        upblock_forward(x, w, gamma, beta, compute_dtype=jnp.float32))
    assert out_f32.shape == (N, Cout, H, W)
    assert jnp.allclose(out_f32, ref, atol=1e-4, rtol=1e-4), "f32 path mismatch"

    # Performance path: bf16 inputs/weights/intermediate, f32 accumulation + stats.
    out_bf16 = jax.block_until_ready(upblock_forward(x, w, gamma, beta))
    assert out_bf16.shape == (N, Cout, H, W)
    assert jnp.allclose(out_bf16, ref, atol=5e-2, rtol=5e-2), "bf16 path mismatch"

    print("KERNEL_OK")
</pallas_src>

<mosaic_0001>
module attributes {stable_mosaic.version = 11 : i64} {
  func.func @_conv_stats_kernel(%arg0: i32, %arg1: i32, %arg2: memref<1x16x20x4xf32, #tpu.memory_space<vmem>>, %arg3: memref<1x8x20x4xf32, #tpu.memory_space<vmem>>, %arg4: memref<100x128xf32, #tpu.memory_space<vmem>>, %arg5: memref<1x8x256xf32, #tpu.memory_space<vmem>>, %arg6: memref<1x1x2x128xf32, #tpu.memory_space<vmem>>, %arg7: memref<16x16x100xf32, #tpu.memory_space<vmem>>) attributes {dimension_semantics = [#tpu.dimension_semantics<parallel>, #tpu.dimension_semantics<parallel>], iteration_bounds = array<i64: 2, 1>, scalar_prefetch = 0 : i64, scratch_operands = 1 : i64, tpu.core_type = #tpu.core_type<tc>, window_params = [{transform_indices = @transform_0, window_bounds = array<i64: 1, 16, 20, 4>}, {transform_indices = @transform_1, window_bounds = array<i64: 1, 8, 20, 4>}, {pipeline_mode = #tpu.pipeline_mode<synchronous>, transform_indices = @transform_2, window_bounds = array<i64: 100, 128>}, {transform_indices = @transform_3, window_bounds = array<i64: 1, 8, 256>}, {transform_indices = @transform_4, window_bounds = array<i64: 1, 1, 2, 128>}]} {
    %c0 = arith.constant 0 : index
    %c0_0 = arith.constant 0 : index
    %c0_1 = arith.constant 0 : index
    %c0_2 = arith.constant 0 : index
    %0 = vector.load %arg2[%c0, %c0_0, %c0_1, %c0_2] : memref<1x16x20x4xf32, #tpu.memory_space<vmem>>, vector<1x16x16x4xf32>
    %1 = vector.shape_cast %0 : vector<1x16x16x4xf32> to vector<16x16x4xf32>
    %c0_3 = arith.constant 0 : index
    %c0_4 = arith.constant 0 : index
    %c0_5 = arith.constant 0 : index
    %2 = vector.load %arg7[%c0_3, %c0_4, %c0_5] : memref<16x16x100xf32, #tpu.memory_space<vmem>>, vector<16x16x4xf32>
    tpu.vector_store %arg7[%c0_3, %c0_4, %c0_5], %1 {strides = array<i32>} : memref<16x16x100xf32, #tpu.memory_space<vmem>>, vector<16x16x4xf32>,
    %c0_6 = arith.constant 0 : index
    %c0_7 = arith.constant 0 : index
    %c1 = arith.constant 1 : index
    %c0_8 = arith.constant 0 : index
    %3 = vector.load %arg2[%c0_6, %c0_7, %c1, %c0_8] : memref<1x16x20x4xf32, #tpu.memory_space<vmem>>, vector<1x16x16x4xf32>
    %4 = vector.shape_cast %3 : vector<1x16x16x4xf32> to vector<16x16x4xf32>
    %c0_9 = arith.constant 0 : index
    %c0_10 = arith.constant 0 : index
    %c4 = arith.constant 4 : index
    %5 = vector.load %arg7[%c0_9, %c0_10, %c4] : memref<16x16x100xf32, #tpu.memory_space<vmem>>, vector<16x16x4xf32>
    tpu.vector_store %arg7[%c0_9, %c0_10, %c4], %4 {strides = array<i32>} : memref<16x16x100xf32, #tpu.memory_space<vmem>>, vector<16x16x4xf32>,
    %c0_11 = arith.constant 0 : index
    %c0_12 = arith.constant 0 : index
    %c2 = arith.constant 2 : index
    %c0_13 = arith.constant 0 : index
    %6 = vector.load %arg2[%c0_11, %c0_12, %c2, %c0_13] : memref<1x16x20x4xf32, #tpu.memory_space<vmem>>, vector<1x16x16x4xf32>
    %7 = vector.shape_cast %6 : vector<1x16x16x4xf32> to vector<16x16x4xf32>
    %c0_14 = arith.constant 0 : index
    %c0_15 = arith.constant 0 : index
    %c8 = arith.constant 8 : index
    %8 = vector.load %arg7[%c0_14, %c0_15, %c8] : memref<16x16x100xf32, #tpu.memory_space<vmem>>, vector<16x16x4xf32>
    tpu.vector_store %arg7[%c0_14, %c0_15, %c8], %7 {strides = array<i32>} : memref<16x16x100xf32, #tpu.memory_space<vmem>>, vector<16x16x4xf32>,
    %c0_16 = arith.constant 0 : index
    %c0_17 = arith.constant 0 : index
    %c3 = arith.constant 3 : index
    %c0_18 = arith.constant 0 : index
    %9 = vector.load %arg2[%c0_16, %c0_17, %c3, %c0_18] : memref<1x16x20x4xf32, #tpu.memory_space<vmem>>, vector<1x16x16x4xf32>
    %10 = vector.shape_cast %9 : vector<1x16x16x4xf32> to vector<16x16x4xf32>
    %c0_19 = arith.constant 0 : index
    %c0_20 = arith.constant 0 : index
    %c12 = arith.constant 12 : index
    %11 = vector.load %arg7[%c0_19, %c0_20, %c12] : memref<16x16x100xf32, #tpu.memory_space<vmem>>, vector<16x16x4xf32>
    tpu.vector_store %arg7[%c0_19, %c0_20, %c12], %10 {strides = array<i32>} : memref<16x16x100xf32, #tpu.memory_space<vmem>>, vector<16x16x4xf32>,
    %c0_21 = arith.constant 0 : index
    %c0_22 = arith.constant 0 : index
    %c4_23 = arith.constant 4 : index
    %c0_24 = arith.constant 0 : index
    %12 = vector.load %arg2[%c0_21, %c0_22, %c4_23, %c0_24] : memref<1x16x20x4xf32, #tpu.memory_space<vmem>>, vector<1x16x16x4xf32>
    %13 = vector.shape_cast %12 : vector<1x16x16x4xf32> to vector<16x16x4xf32>
    %c0_25 = arith.constant 0 : index
    %c0_26 = arith.constant 0 : index
    %c16 = arith.constant 16 : index
    %14 = vector.load %arg7[%c0_25, %c0_26, %c16] : memref<16x16x100xf32, #tpu.memory_space<vmem>>, vector<16x16x4xf32>
    tpu.vector_store %arg7[%c0_25, %c0_26, %c16], %13 {strides = array<i32>} : memref<16x16x100xf32, #tpu.memory_space<vmem>>, vector<16x16x4xf32>,
    %c0_27 = arith.constant 0 : index
    %c1_28 = arith.constant 1 : index
    %c0_29 = arith.constant 0 : index
    %c0_30 = arith.constant 0 : index
    %15 = vector.load %arg2[%c0_27, %c1_28, %c0_29, %c0_30] : memref<1x16x20x4xf32, #tpu.memory_space<vmem>>, vector<1x15x16x4xf32>
    %16 = vector.shape_cast %15 : vector<1x15x16x4xf32> to vector<15x16x4xf32>
    %c0_31 = arith.constant 0 : index
    %c0_32 = arith.constant 0 : index
    %c20 = arith.constant 20 : index
    %17 = vector.load %arg7[%c0_31, %c0_32, %c20] : memref<16x16x100xf32, #tpu.memory_space<vmem>>, vector<15x16x4xf32>
    tpu.vector_store %arg7[%c0_31, %c0_32, %c20], %16 {strides = array<i32>} : memref<16x16x100xf32, #tpu.memory_space<vmem>>, vector<15x16x4xf32>,
    %c0_33 = arith.constant 0 : index
    %c0_34 = arith.constant 0 : index
    %c0_35 = arith.constant 0 : index
    %c0_36 = arith.constant 0 : index
    %18 = vector.load %arg3[%c0_33, %c0_34, %c0_35, %c0_36] : memref<1x8x20x4xf32, #tpu.memory_space<vmem>>, vector<1x1x16x4xf32>
    %19 = vector.shape_cast %18 : vector<1x1x16x4xf32> to vector<1x16x4xf32>
    %c15 = arith.constant 15 : index
    %c0_37 = arith.constant 0 : index
    %c20_38 = arith.constant 20 : index
    %20 = vector.load %arg7[%c15, %c0_37, %c20_38] : memref<16x16x100xf32, #tpu.memory_space<vmem>>, vector<1x16x4xf32>
    tpu.vector_store %arg7[%c15, %c0_37, %c20_38], %19 {strides = array<i32>} : memref<16x16x100xf32, #tpu.memory_space<vmem>>, vector<1x16x4xf32>,
    %c0_39 = arith.constant 0 : index
    %c1_40 = arith.constant 1 : index
    %c1_41 = arith.constant 1 : index
    %c0_42 = arith.constant 0 : index
    %21 = vector.load %arg2[%c0_39, %c1_40, %c1_41, %c0_42] : memref<1x16x20x4xf32, #tpu.memory_space<vmem>>, vector<1x15x16x4xf32>
    %22 = vector.shape_cast %21 : vector<1x15x16x4xf32> to vector<15x16x4xf32>
    %c0_43 = arith.constant 0 : index
    %c0_44 = arith.constant 0 : index
    %c24 = arith.constant 24 : index
    %23 = vector.load %arg7[%c0_43, %c0_44, %c24] : memref<16x16x100xf32, #tpu.memory_space<vmem>>, vector<15x16x4xf32>
    tpu.vector_store %arg7[%c0_43, %c0_44, %c24], %22 {strides = array<i32>} : memref<16x16x100xf32, #tpu.memory_space<vmem>>, vector<15x16x4xf32>,
    %c0_45 = arith.constant 0 : index
    %c0_46 = arith.constant 0 : index
    %c1_47 = arith.constant 1 : index
    %c0_48 = arith.constant 0 : index
    %24 = vector.load %arg3[%c0_45, %c0_46, %c1_47, %c0_48] : memref<1x8x20x4xf32, #tpu.memory_space<vmem>>, vector<1x1x16x4xf32>
    %25 = vector.shape_cast %24 : vector<1x1x16x4xf32> to vector<1x16x4xf32>
    %c15_49 = arith.constant 15 : index
    %c0_50 = arith.constant 0 : index
    %c24_51 = arith.constant 24 : index
    %26 = vector.load %arg7[%c15_49, %c0_50, %c24_51] : memref<16x16x100xf32, #tpu.memory_space<vmem>>, vector<1x16x4xf32>
    tpu.vector_store %arg7[%c15_49, %c0_50, %c24_51], %25 {strides = array<i32>} : memref<16x16x100xf32, #tpu.memory_space<vmem>>, vector<1x16x4xf32>,
    %c0_52 = arith.constant 0 : index
    %c1_53 = arith.constant 1 : index
    %c2_54 = arith.constant 2 : index
    %c0_55 = arith.constant 0 : index
    %27 = vector.load %arg2[%c0_52, %c1_53, %c2_54, %c0_55] : memref<1x16x20x4xf32, #tpu.memory_space<vmem>>, vector<1x15x16x4xf32>
    %28 = vector.shape_cast %27 : vector<1x15x16x4xf32> to vector<15x16x4xf32>
    %c0_56 = arith.constant 0 : index
    %c0_57 = arith.constant 0 : index
    %c28 = arith.constant 28 : index
    %29 = vector.load %arg7[%c0_56, %c0_57, %c28] : memref<16x16x100xf32, #tpu.memory_space<vmem>>, vector<15x16x4xf32>
    tpu.vector_store %arg7[%c0_56, %c0_57, %c28], %28 {strides = array<i32>} : memref<16x16x100xf32, #tpu.memory_space<vmem>>, vector<15x16x4xf32>,
    %c0_58 = arith.constant 0 : index
    %c0_59 = arith.constant 0 : index
    %c2_60 = arith.constant 2 : index
    %c0_61 = arith.constant 0 : index
    %30 = vector.load %arg3[%c0_58, %c0_59, %c2_60, %c0_61] : memref<1x8x20x4xf32, #tpu.memory_space<vmem>>, vector<1x1x16x4xf32>
    %31 = vector.shape_cast %30 : vector<1x1x16x4xf32> to vector<1x16x4xf32>
    %c15_62 = arith.constant 15 : index
    %c0_63 = arith.constant 0 : index
    %c28_64 = arith.constant 28 : index
    %32 = vector.load %arg7[%c15_62, %c0_63, %c28_64] : memref<16x16x100xf32, #tpu.memory_space<vmem>>, vector<1x16x4xf32>
    tpu.vector_store %arg7[%c15_62, %c0_63, %c28_64], %31 {strides = array<i32>} : memref<16x16x100xf32, #tpu.memory_space<vmem>>, vector<1x16x4xf32>,
    %c0_65 = arith.constant 0 : index
    %c1_66 = arith.constant 1 : index
    %c3_67 = arith.constant 3 : index
    %c0_68 = arith.constant 0 : index
    %33 = vector.load %arg2[%c0_65, %c1_66, %c3_67, %c0_68] : memref<1x16x20x4xf32, #tpu.memory_space<vmem>>, vector<1x15x16x4xf32>
    %34 = vector.shape_cast %33 : vector<1x15x16x4xf32> to vector<15x16x4xf32>
    %c0_69 = arith.constant 0 : index
    %c0_70 = arith.constant 0 : index
    %c32 = arith.constant 32 : index
    %35 = vector.load %arg7[%c0_69, %c0_70, %c32] : memref<16x16x100xf32, #tpu.memory_space<vmem>>, vector<15x16x4xf32>
    tpu.vector_store %arg7[%c0_69, %c0_70, %c32], %34 {strides = array<i32>} : memref<16x16x100xf32, #tpu.memory_space<vmem>>, vector<15x16x4xf32>,
    %c0_71 = arith.constant 0 : index
    %c0_72 = arith.constant 0 : index
    %c3_73 = arith.constant 3 : index
    %c0_74 = arith.constant 0 : index
    %36 = vector.load %arg3[%c0_71, %c0_72, %c3_73, %c0_74] : memref<1x8x20x4xf32, #tpu.memory_space<vmem>>, vector<1x1x16x4xf32>
    %37 = vector.shape_cast %36 : vector<1x1x16x4xf32> to vector<1x16x4xf32>
    %c15_75 = arith.constant 15 : index
    %c0_76 = arith.constant 0 : index
    %c32_77 = arith.constant 32 : index
    %38 = vector.load %arg7[%c15_75, %c0_76, %c32_77] : memref<16x16x100xf32, #tpu.memory_space<vmem>>, vector<1x16x4xf32>
    tpu.vector_store %arg7[%c15_75, %c0_76, %c32_77], %37 {strides = array<i32>} : memref<16x16x100xf32, #tpu.memory_space<vmem>>, vector<1x16x4xf32>,
    %c0_78 = arith.constant 0 : index
    %c1_79 = arith.constant 1 : index
    %c4_80 = arith.constant 4 : index
    %c0_81 = arith.constant 0 : index
    %39 = vector.load %arg2[%c0_78, %c1_79, %c4_80, %c0_81] : memref<1x16x20x4xf32, #tpu.memory_space<vmem>>, vector<1x15x16x4xf32>
    %40 = vector.shape_cast %39 : vector<1x15x16x4xf32> to vector<15x16x4xf32>
    %c0_82 = arith.constant 0 : index
    %c0_83 = arith.constant 0 : index
    %c36 = arith.constant 36 : index
    %41 = vector.load %arg7[%c0_82, %c0_83, %c36] : memref<16x16x100xf32, #tpu.memory_space<vmem>>, vector<15x16x4xf32>
    tpu.vector_store %arg7[%c0_82, %c0_83, %c36], %40 {strides = array<i32>} : memref<16x16x100xf32, #tpu.memory_space<vmem>>, vector<15x16x4xf32>,
    %c0_84 = arith.constant 0 : index
    %c0_85 = arith.constant 0 : index
    %c4_86 = arith.constant 4 : index
    %c0_87 = arith.constant 0 : index
    %42 = vector.load %arg3[%c0_84, %c0_85, %c4_86, %c0_87] : memref<1x8x20x4xf32, #tpu.memory_space<vmem>>, vector<1x1x16x4xf32>
    %43 = vector.shape_cast %42 : vector<1x1x16x4xf32> to vector<1x16x4xf32>
    %c15_88 = arith.constant 15 : index
    %c0_89 = arith.constant 0 : index
    %c36_90 = arith.constant 36 : index
    %44 = vector.load %arg7[%c15_88, %c0_89, %c36_90] : memref<16x16x100xf32, #tpu.memory_space<vmem>>, vector<1x16x4xf32>
    tpu.vector_store %arg7[%c15_88, %c0_89, %c36_90], %43 {strides = array<i32>} : memref<16x16x100xf32, #tpu.memory_space<vmem>>, vector<1x16x4xf32>,
    %c0_91 = arith.constant 0 : index
    %c2_92 = arith.constant 2 : index
    %c0_93 = arith.constant 0 : index
    %c0_94 = arith.constant 0 : index
    %45 = vector.load %arg2[%c0_91, %c2_92, %c0_93, %c0_94] : memref<1x16x20x4xf32, #tpu.memory_space<vmem>>, vector<1x14x16x4xf32>
    %46 = vector.shape_cast %45 : vector<1x14x16x4xf32> to vector<14x16x4xf32>
    %c0_95 = arith.constant 0 : index
    %c0_96 = arith.constant 0 : index
    %c40 = arith.constant 40 : index
    %47 = vector.load %arg7[%c0_95, %c0_96, %c40] : memref<16x16x100xf32, #tpu.memory_space<vmem>>, vector<14x16x4xf32>
    tpu.vector_store %arg7[%c0_95, %c0_96, %c40], %46 {strides = array<i32>} : memref<16x16x100xf32, #tpu.memory_space<vmem>>, vector<14x16x4xf32>,
    %c0_97 = arith.constant 0 : index
    %c0_98 = arith.constant 0 : index
    %c0_99 = arith.constant 0 : index
    %c0_100 = arith.constant 0 : index
    %48 = vector.load %arg3[%c0_97, %c0_98, %c0_99, %c0_100] : memref<1x8x20x4xf32, #tpu.memory_space<vmem>>, vector<1x2x16x4xf32>
    %49 = vector.shape_cast %48 : vector<1x2x16x4xf32> to vector<2x16x4xf32>
    %c14 = arith.constant 14 : index
    %c0_101 = arith.constant 0 : index
    %c40_102 = arith.constant 40 : index
    %50 = vector.load %arg7[%c14, %c0_101, %c40_102] : memref<16x16x100xf32, #tpu.memory_space<vmem>>, vector<2x16x4xf32>
    tpu.vector_store %arg7[%c14, %c0_101, %c40_102], %49 {strides = array<i32>} : memref<16x16x100xf32, #tpu.memory_space<vmem>>, vector<2x16x4xf32>,
    %c0_103 = arith.constant 0 : index
    %c2_104 = arith.constant 2 : index
    %c1_105 = arith.constant 1 : index
    %c0_106 = arith.constant 0 : index
    %51 = vector.load %arg2[%c0_103, %c2_104, %c1_105, %c0_106] : memref<1x16x20x4xf32, #tpu.memory_space<vmem>>, vector<1x14x16x4xf32>
    %52 = vector.shape_cast %51 : vector<1x14x16x4xf32> to vector<14x16x4xf32>
    %c0_107 = arith.constant 0 : index
    %c0_108 = arith.constant 0 : index
    %c44 = arith.constant 44 : index
    %53 = vector.load %arg7[%c0_107, %c0_108, %c44] : memref<16x16x100xf32, #tpu.memory_space<vmem>>, vector<14x16x4xf32>
    tpu.vector_store %arg7[%c0_107, %c0_108, %c44], %52 {strides = array<i32>} : memref<16x16x100xf32, #tpu.memory_space<vmem>>, vector<14x16x4xf32>,
    %c0_109 = arith.constant 0 : index
    %c0_110 = arith.constant 0 : index
    %c1_111 = arith.constant 1 : index
    %c0_112 = arith.constant 0 : index
    %54 = vector.load %arg3[%c0_109, %c0_110, %c1_111, %c0_112] : memref<1x8x20x4xf32, #tpu.memory_space<vmem>>, vector<1x2x16x4xf32>
    %55 = vector.shape_cast %54 : vector<1x2x16x4xf32> to vector<2x16x4xf32>
    %c14_113 = arith.constant 14 : index
    %c0_114 = arith.constant 0 : index
    %c44_115 = arith.constant 44 : index
    %56 = vector.load %arg7[%c14_113, %c0_114, %c44_115] : memref<16x16x100xf32, #tpu.memory_space<vmem>>, vector<2x16x4xf32>
    tpu.vector_store %arg7[%c14_113, %c0_114, %c44_115], %55 {strides = array<i32>} : memref<16x16x100xf32, #tpu.memory_space<vmem>>, vector<2x16x4xf32>,
    %c0_116 = arith.constant 0 : index
    %c2_117 = arith.constant 2 : index
    %c2_118 = arith.constant 2 : index
    %c0_119 = arith.constant 0 : index
    %57 = vector.load %arg2[%c0_116, %c2_117, %c2_118, %c0_119] : memref<1x16x20x4xf32, #tpu.memory_space<vmem>>, vector<1x14x16x4xf32>
    %58 = vector.shape_cast %57 : vector<1x14x16x4xf32> to vector<14x16x4xf32>
    %c0_120 = arith.constant 0 : index
    %c0_121 = arith.constant 0 : index
    %c48 = arith.constant 48 : index
    %59 = vector.load %arg7[%c0_120, %c0_121, %c48] : memref<16x16x100xf32, #tpu.memory_space<vmem>>, vector<14x16x4xf32>
    tpu.vector_store %arg7[%c0_120, %c0_121, %c48], %58 {strides = array<i32>} : memref<16x16x100xf32, #tpu.memory_space<vmem>>, vector<14x16x4xf32>,
    %c0_122 = arith.constant 0 : index
    %c0_123 = arith.constant 0 : index
    %c2_124 = arith.constant 2 : index
    %c0_125 = arith.constant 0 : index
    %60 = vector.load %arg3[%c0_122, %c0_123, %c2_124, %c0_125] : memref<1x8x20x4xf32, #tpu.memory_space<vmem>>, vector<1x2x16x4xf32>
    %61 = vector.shape_cast %60 : vector<1x2x16x4xf32> to vector<2x16x4xf32>
    %c14_126 = arith.constant 14 : index
    %c0_127 = arith.constant 0 : index
    %c48_128 = arith.constant 48 : index
    %62 = vector.load %arg7[%c14_126, %c0_127, %c48_128] : memref<16x16x100xf32, #tpu.memory_space<vmem>>, vector<2x16x4xf32>
    tpu.vector_store %arg7[%c14_126, %c0_127, %c48_128], %61 {strides = array<i32>} : memref<16x16x100xf32, #tpu.memory_space<vmem>>, vector<2x16x4xf32>,
    %c0_129 = arith.constant 0 : index
    %c2_130 = arith.constant 2 : index
    %c3_131 = arith.constant 3 : index
    %c0_132 = arith.constant 0 : index
    %63 = vector.load %arg2[%c0_129, %c2_130, %c3_131, %c0_132] : memref<1x16x20x4xf32, #tpu.memory_space<vmem>>, vector<1x14x16x4xf32>
    %64 = vector.shape_cast %63 : vector<1x14x16x4xf32> to vector<14x16x4xf32>
    %c0_133 = arith.constant 0 : index
    %c0_134 = arith.constant 0 : index
    %c52 = arith.constant 52 : index
    %65 = vector.load %arg7[%c0_133, %c0_134, %c52] : memref<16x16x100xf32, #tpu.memory_space<vmem>>, vector<14x16x4xf32>
    tpu.vector_store %arg7[%c0_133, %c0_134, %c52], %64 {strides = array<i32>} : memref<16x16x100xf32, #tpu.memory_space<vmem>>, vector<14x16x4xf32>,
    %c0_135 = arith.constant 0 : index
    %c0_136 = arith.constant 0 : index
    %c3_137 = arith.constant 3 : index
    %c0_138 = arith.constant 0 : index
    %66 = vector.load %arg3[%c0_135, %c0_136, %c3_137, %c0_138] : memref<1x8x20x4xf32, #tpu.memory_space<vmem>>, vector<1x2x16x4xf32>
    %67 = vector.shape_cast %66 : vector<1x2x16x4xf32> to vector<2x16x4xf32>
    %c14_139 = arith.constant 14 : index
    %c0_140 = arith.constant 0 : index
    %c52_141 = arith.constant 52 : index
    %68 = vector.load %arg7[%c14_139, %c0_140, %c52_141] : memref<16x16x100xf32, #tpu.memory_space<vmem>>, vector<2x16x4xf32>
    tpu.vector_store %arg7[%c14_139, %c0_140, %c52_141], %67 {strides = array<i32>} : memref<16x16x100xf32, #tpu.memory_space<vmem>>, vector<2x16x4xf32>,
    %c0_142 = arith.constant 0 : index
    %c2_143 = arith.constant 2 : index
    %c4_144 = arith.constant 4 : index
    %c0_145 = arith.constant 0 : index
    %69 = vector.load %arg2[%c0_142, %c2_143, %c4_144, %c0_145] : memref<1x16x20x4xf32, #tpu.memory_space<vmem>>, vector<1x14x16x4xf32>
    %70 = vector.shape_cast %69 : vector<1x14x16x4xf32> to vector<14x16x4xf32>
    %c0_146 = arith.constant 0 : index
    %c0_147 = arith.constant 0 : index
    %c56 = arith.constant 56 : index
    %71 = vector.load %arg7[%c0_146, %c0_147, %c56] : memref<16x16x100xf32, #tpu.memory_space<vmem>>, vector<14x16x4xf32>
    tpu.vector_store %arg7[%c0_146, %c0_147, %c56], %70 {strides = array<i32>} : memref<16x16x100xf32, #tpu.memory_space<vmem>>, vector<14x16x4xf32>,
    %c0_148 = arith.constant 0 : index
    %c0_149 = arith.constant 0 : index
    %c4_150 = arith.constant 4 : index
    %c0_151 = arith.constant 0 : index
    %72 = vector.load %arg3[%c0_148, %c0_149, %c4_150, %c0_151] : memref<1x8x20x4xf32, #tpu.memory_space<vmem>>, vector<1x2x16x4xf32>
    %73 = vector.shape_cast %72 : vector<1x2x16x4xf32> to vector<2x16x4xf32>
    %c14_152 = arith.constant 14 : index
    %c0_153 = arith.constant 0 : index
    %c56_154 = arith.constant 56 : index
    %74 = vector.load %arg7[%c14_152, %c0_153, %c56_154] : memref<16x16x100xf32, #tpu.memory_space<vmem>>, vector<2x16x4xf32>
    tpu.vector_store %arg7[%c14_152, %c0_153, %c56_154], %73 {strides = array<i32>} : memref<16x16x100xf32, #tpu.memory_space<vmem>>, vector<2x16x4xf32>,
    %c0_155 = arith.constant 0 : index
    %c3_156 = arith.constant 3 : index
    %c0_157 = arith.constant 0 : index
    %c0_158 = arith.constant 0 : index
    %75 = vector.load %arg2[%c0_155, %c3_156, %c0_157, %c0_158] : memref<1x16x20x4xf32, #tpu.memory_space<vmem>>, vector<1x13x16x4xf32>
    %76 = vector.shape_cast %75 : vector<1x13x16x4xf32> to vector<13x16x4xf32>
    %c0_159 = arith.constant 0 : index
    %c0_160 = arith.constant 0 : index
    %c60 = arith.constant 60 : index
    %77 = vector.load %arg7[%c0_159, %c0_160, %c60] : memref<16x16x100xf32, #tpu.memory_space<vmem>>, vector<13x16x4xf32>
    tpu.vector_store %arg7[%c0_159, %c0_160, %c60], %76 {strides = array<i32>} : memref<16x16x100xf32, #tpu.memory_space<vmem>>, vector<13x16x4xf32>,
    %c0_161 = arith.constant 0 : index
    %c0_162 = arith.constant 0 : index
    %c0_163 = arith.constant 0 : index
    %c0_164 = arith.constant 0 : index
    %78 = vector.load %arg3[%c0_161, %c0_162, %c0_163, %c0_164] : memref<1x8x20x4xf32, #tpu.memory_space<vmem>>, vector<1x3x16x4xf32>
    %79 = vector.shape_cast %78 : vector<1x3x16x4xf32> to vector<3x16x4xf32>
    %c13 = arith.constant 13 : index
    %c0_165 = arith.constant 0 : index
    %c60_166 = arith.constant 60 : index
    %80 = vector.load %arg7[%c13, %c0_165, %c60_166] : memref<16x16x100xf32, #tpu.memory_space<vmem>>, vector<3x16x4xf32>
    tpu.vector_store %arg7[%c13, %c0_165, %c60_166], %79 {strides = array<i32>} : memref<16x16x100xf32, #tpu.memory_space<vmem>>, vector<3x16x4xf32>,
    %c0_167 = arith.constant 0 : index
    %c3_168 = arith.constant 3 : index
    %c1_169 = arith.constant 1 : index
    %c0_170 = arith.constant 0 : index
    %81 = vector.load %arg2[%c0_167, %c3_168, %c1_169, %c0_170] : memref<1x16x20x4xf32, #tpu.memory_space<vmem>>, vector<1x13x16x4xf32>
    %82 = vector.shape_cast %81 : vector<1x13x16x4xf32> to vector<13x16x4xf32>
    %c0_171 = arith.constant 0 : index
    %c0_172 = arith.constant 0 : index
    %c64 = arith.constant 64 : index
    %83 = vector.load %arg7[%c0_171, %c0_172, %c64] : memref<16x16x100xf32, #tpu.memory_space<vmem>>, vector<13x16x4xf32>
    tpu.vector_store %arg7[%c0_171, %c0_172, %c64], %82 {strides = array<i32>} : memref<16x16x100xf32, #tpu.memory_space<vmem>>, vector<13x16x4xf32>,
    %c0_173 = arith.constant 0 : index
    %c0_174 = arith.constant 0 : index
    %c1_175 = arith.constant 1 : index
    %c0_176 = arith.constant 0 : index
    %84 = vector.load %arg3[%c0_173, %c0_174, %c1_175, %c0_176] : memref<1x8x20x4xf32, #tpu.memory_space<vmem>>, vector<1x3x16x4xf32>
    %85 = vector.shape_cast %84 : vector<1x3x16x4xf32> to vector<3x16x4xf32>
    %c13_177 = arith.constant 13 : index
    %c0_178 = arith.constant 0 : index
    %c64_179 = arith.constant 64 : index
    %86 = vector.load %arg7[%c13_177, %c0_178, %c64_179] : memref<16x16x100xf32, #tpu.memory_space<vmem>>, vector<3x16x4xf32>
    tpu.vector_store %arg7[%c13_177, %c0_178, %c64_179], %85 {strides = array<i32>} : memref<16x16x100xf32, #tpu.memory_space<vmem>>, vector<3x16x4xf32>,
    %c0_180 = arith.constant 0 : index
    %c3_181 = arith.constant 3 : index
    %c2_182 = arith.constant 2 : index
    %c0_183 = arith.constant 0 : index
    %87 = vector.load %arg2[%c0_180, %c3_181, %c2_182, %c0_183] : memref<1x16x20x4xf32, #tpu.memory_space<vmem>>, vector<1x13x16x4xf32>
    %88 = vector.shape_cast %87 : vector<1x13x16x4xf32> to vector<13x16x4xf32>
    %c0_184 = arith.constant 0 : index
    %c0_185 = arith.constant 0 : index
    %c68 = arith.constant 68 : index
    %89 = vector.load %arg7[%c0_184, %c0_185, %c68] : memref<16x16x100xf32, #tpu.memory_space<vmem>>, vector<13x16x4xf32>
    tpu.vector_store %arg7[%c0_184, %c0_185, %c68], %88 {strides = array<i32>} : memref<16x16x100xf32, #tpu.memory_space<vmem>>, vector<13x16x4xf32>,
    %c0_186 = arith.constant 0 : index
    %c0_187 = arith.constant 0 : index
    %c2_188 = arith.constant 2 : index
    %c0_189 = arith.constant 0 : index
    %90 = vector.load %arg3[%c0_186, %c0_187, %c2_188, %c0_189] : memref<1x8x20x4xf32, #tpu.memory_space<vmem>>, vector<1x3x16x4xf32>
    %91 = vector.shape_cast %90 : vector<1x3x16x4xf32> to vector<3x16x4xf32>
    %c13_190 = arith.constant 13 : index
    %c0_191 = arith.constant 0 : index
    %c68_192 = arith.constant 68 : index
    %92 = vector.load %arg7[%c13_190, %c0_191, %c68_192] : memref<16x16x100xf32, #tpu.memory_space<vmem>>, vector<3x16x4xf32>
    tpu.vector_store %arg7[%c13_190, %c0_191, %c68_192], %91 {strides = array<i32>} : memref<16x16x100xf32, #tpu.memory_space<vmem>>, vector<3x16x4xf32>,
    %c0_193 = arith.constant 0 : index
    %c3_194 = arith.constant 3 : index
    %c3_195 = arith.constant 3 : index
    %c0_196 = arith.constant 0 : index
    %93 = vector.load %arg2[%c0_193, %c3_194, %c3_195, %c0_196] : memref<1x16x20x4xf32, #tpu.memory_space<vmem>>, vector<1x13x16x4xf32>
    %94 = vector.shape_cast %93 : vector<1x13x16x4xf32> to vector<13x16x4xf32>
    %c0_197 = arith.constant 0 : index
    %c0_198 = arith.constant 0 : index
    %c72 = arith.constant 72 : index
    %95 = vector.load %arg7[%c0_197, %c0_198, %c72] : memref<16x16x100xf32, #tpu.memory_space<vmem>>, vector<13x16x4xf32>
    tpu.vector_store %arg7[%c0_197, %c0_198, %c72], %94 {strides = array<i32>} : memref<16x16x100xf32, #tpu.memory_space<vmem>>, vector<13x16x4xf32>,
    %c0_199 = arith.constant 0 : index
    %c0_200 = arith.constant 0 : index
    %c3_201 = arith.constant 3 : index
    %c0_202 = arith.constant 0 : index
    %96 = vector.load %arg3[%c0_199, %c0_200, %c3_201, %c0_202] : memref<1x8x20x4xf32, #tpu.memory_space<vmem>>, vector<1x3x16x4xf32>
    %97 = vector.shape_cast %96 : vector<1x3x16x4xf32> to vector<3x16x4xf32>
    %c13_203 = arith.constant 13 : index
    %c0_204 = arith.constant 0 : index
    %c72_205 = arith.constant 72 : index
    %98 = vector.load %arg7[%c13_203, %c0_204, %c72_205] : memref<16x16x100xf32, #tpu.memory_space<vmem>>, vector<3x16x4xf32>
    tpu.vector_store %arg7[%c13_203, %c0_204, %c72_205], %97 {strides = array<i32>} : memref<16x16x100xf32, #tpu.memory_space<vmem>>, vector<3x16x4xf32>,
    %c0_206 = arith.constant 0 : index
    %c3_207 = arith.constant 3 : index
    %c4_208 = arith.constant 4 : index
    %c0_209 = arith.constant 0 : index
    %99 = vector.load %arg2[%c0_206, %c3_207, %c4_208, %c0_209] : memref<1x16x20x4xf32, #tpu.memory_space<vmem>>, vector<1x13x16x4xf32>
    %100 = vector.shape_cast %99 : vector<1x13x16x4xf32> to vector<13x16x4xf32>
    %c0_210 = arith.constant 0 : index
    %c0_211 = arith.constant 0 : index
    %c76 = arith.constant 76 : index
    %101 = vector.load %arg7[%c0_210, %c0_211, %c76] : memref<16x16x100xf32, #tpu.memory_space<vmem>>, vector<13x16x4xf32>
    tpu.vector_store %arg7[%c0_210, %c0_211, %c76], %100 {strides = array<i32>} : memref<16x16x100xf32, #tpu.memory_space<vmem>>, vector<13x16x4xf32>,
    %c0_212 = arith.constant 0 : index
    %c0_213 = arith.constant 0 : index
    %c4_214 = arith.constant 4 : index
    %c0_215 = arith.constant 0 : index
    %102 = vector.load %arg3[%c0_212, %c0_213, %c4_214, %c0_215] : memref<1x8x20x4xf32, #tpu.memory_space<vmem>>, vector<1x3x16x4xf32>
    %103 = vector.shape_cast %102 : vector<1x3x16x4xf32> to vector<3x16x4xf32>
    %c13_216 = arith.constant 13 : index
    %c0_217 = arith.constant 0 : index
    %c76_218 = arith.constant 76 : index
    %104 = vector.load %arg7[%c13_216, %c0_217, %c76_218] : memref<16x16x100xf32, #tpu.memory_space<vmem>>, vector<3x16x4xf32>
    tpu.vector_store %arg7[%c13_216, %c0_217, %c76_218], %103 {strides = array<i32>} : memref<16x16x100xf32, #tpu.memory_space<vmem>>, vector<3x16x4xf32>,
    %c0_219 = arith.constant 0 : index
    %c4_220 = arith.constant 4 : index
    %c0_221 = arith.constant 0 : index
    %c0_222 = arith.constant 0 : index
    %105 = vector.load %arg2[%c0_219, %c4_220, %c0_221, %c0_222] : memref<1x16x20x4xf32, #tpu.memory_space<vmem>>, vector<1x12x16x4xf32>
    %106 = vector.shape_cast %105 : vector<1x12x16x4xf32> to vector<12x16x4xf32>
    %c0_223 = arith.constant 0 : index
    %c0_224 = arith.constant 0 : index
    %c80 = arith.constant 80 : index
    %107 = vector.load %arg7[%c0_223, %c0_224, %c80] : memref<16x16x100xf32, #tpu.memory_space<vmem>>, vector<12x16x4xf32>
    tpu.vector_store %arg7[%c0_223, %c0_224, %c80], %106 {strides = array<i32>} : memref<16x16x100xf32, #tpu.memory_space<vmem>>, vector<12x16x4xf32>,
    %c0_225 = arith.constant 0 : index
    %c0_226 = arith.constant 0 : index
    %c0_227 = arith.constant 0 : index
    %c0_228 = arith.constant 0 : index
    %108 = vector.load %arg3[%c0_225, %c0_226, %c0_227, %c0_228] : memref<1x8x20x4xf32, #tpu.memory_space<vmem>>, vector<1x4x16x4xf32>
    %109 = vector.shape_cast %108 : vector<1x4x16x4xf32> to vector<4x16x4xf32>
    %c12_229 = arith.constant 12 : index
    %c0_230 = arith.constant 0 : index
    %c80_231 = arith.constant 80 : index
    %110 = vector.load %arg7[%c12_229, %c0_230, %c80_231] : memref<16x16x100xf32, #tpu.memory_space<vmem>>, vector<4x16x4xf32>
    tpu.vector_store %arg7[%c12_229, %c0_230, %c80_231], %109 {strides = array<i32>} : memref<16x16x100xf32, #tpu.memory_space<vmem>>, vector<4x16x4xf32>,
    %c0_232 = arith.constant 0 : index
    %c4_233 = arith.constant 4 : index
    %c1_234 = arith.constant 1 : index
    %c0_235 = arith.constant 0 : index
    %111 = vector.load %arg2[%c0_232, %c4_233, %c1_234, %c0_235] : memref<1x16x20x4xf32, #tpu.memory_space<vmem>>, vector<1x12x16x4xf32>
    %112 = vector.shape_cast %111 : vector<1x12x16x4xf32> to vector<12x16x4xf32>
    %c0_236 = arith.constant 0 : index
    %c0_237 = arith.constant 0 : index
    %c84 = arith.constant 84 : index
    %113 = vector.load %arg7[%c0_236, %c0_237, %c84] : memref<16x16x100xf32, #tpu.memory_space<vmem>>, vector<12x16x4xf32>
    tpu.vector_store %arg7[%c0_236, %c0_237, %c84], %112 {strides = array<i32>} : memref<16x16x100xf32, #tpu.memory_space<vmem>>, vector<12x16x4xf32>,
    %c0_238 = arith.constant 0 : index
    %c0_239 = arith.constant 0 : index
    %c1_240 = arith.constant 1 : index
    %c0_241 = arith.constant 0 : index
    %114 = vector.load %arg3[%c0_238, %c0_239, %c1_240, %c0_241] : memref<1x8x20x4xf32, #tpu.memory_space<vmem>>, vector<1x4x16x4xf32>
    %115 = vector.shape_cast %114 : vector<1x4x16x4xf32> to vector<4x16x4xf32>
    %c12_242 = arith.constant 12 : index
    %c0_243 = arith.constant 0 : index
    %c84_244 = arith.constant 84 : index
    %116 = vector.load %arg7[%c12_242, %c0_243, %c84_244] : memref<16x16x100xf32, #tpu.memory_space<vmem>>, vector<4x16x4xf32>
    tpu.vector_store %arg7[%c12_242, %c0_243, %c84_244], %115 {strides = array<i32>} : memref<16x16x100xf32, #tpu.memory_space<vmem>>, vector<4x16x4xf32>,
    %c0_245 = arith.constant 0 : index
    %c4_246 = arith.constant 4 : index
    %c2_247 = arith.constant 2 : index
    %c0_248 = arith.constant 0 : index
    %117 = vector.load %arg2[%c0_245, %c4_246, %c2_247, %c0_248] : memref<1x16x20x4xf32, #tpu.memory_space<vmem>>, vector<1x12x16x4xf32>
    %118 = vector.shape_cast %117 : vector<1x12x16x4xf32> to vector<12x16x4xf32>
    %c0_249 = arith.constant 0 : index
    %c0_250 = arith.constant 0 : index
    %c88 = arith.constant 88 : index
    %119 = vector.load %arg7[%c0_249, %c0_250, %c88] : memref<16x16x100xf32, #tpu.memory_space<vmem>>, vector<12x16x4xf32>
    tpu.vector_store %arg7[%c0_249, %c0_250, %c88], %118 {strides = array<i32>} : memref<16x16x100xf32, #tpu.memory_space<vmem>>, vector<12x16x4xf32>,
    %c0_251 = arith.constant 0 : index
    %c0_252 = arith.constant 0 : index
    %c2_253 = arith.constant 2 : index
    %c0_254 = arith.constant 0 : index
    %120 = vector.load %arg3[%c0_251, %c0_252, %c2_253, %c0_254] : memref<1x8x20x4xf32, #tpu.memory_space<vmem>>, vector<1x4x16x4xf32>
    %121 = vector.shape_cast %120 : vector<1x4x16x4xf32> to vector<4x16x4xf32>
    %c12_255 = arith.constant 12 : index
    %c0_256 = arith.constant 0 : index
    %c88_257 = arith.constant 88 : index
    %122 = vector.load %arg7[%c12_255, %c0_256, %c88_257] : memref<16x16x100xf32, #tpu.memory_space<vmem>>, vector<4x16x4xf32>
    tpu.vector_store %arg7[%c12_255, %c0_256, %c88_257], %121 {strides = array<i32>} : memref<16x16x100xf32, #tpu.memory_space<vmem>>, vector<4x16x4xf32>,
    %c0_258 = arith.constant 0 : index
    %c4_259 = arith.constant 4 : index
    %c3_260 = arith.constant 3 : index
    %c0_261 = arith.constant 0 : index
    %123 = vector.load %arg2[%c0_258, %c4_259, %c3_260, %c0_261] : memref<1x16x20x4xf32, #tpu.memory_space<vmem>>, vector<1x12x16x4xf32>
    %124 = vector.shape_cast %123 : vector<1x12x16x4xf32> to vector<12x16x4xf32>
    %c0_262 = arith.constant 0 : index
    %c0_263 = arith.constant 0 : index
    %c92 = arith.constant 92 : index
    %125 = vector.load %arg7[%c0_262, %c0_263, %c92] : memref<16x16x100xf32, #tpu.memory_space<vmem>>, vector<12x16x4xf32>
    tpu.vector_store %arg7[%c0_262, %c0_263, %c92], %124 {strides = array<i32>} : memref<16x16x100xf32, #tpu.memory_space<vmem>>, vector<12x16x4xf32>,
    %c0_264 = arith.constant 0 : index
    %c0_265 = arith.constant 0 : index
    %c3_266 = arith.constant 3 : index
    %c0_267 = arith.constant 0 : index
    %126 = vector.load %arg3[%c0_264, %c0_265, %c3_266, %c0_267] : memref<1x8x20x4xf32, #tpu.memory_space<vmem>>, vector<1x4x16x4xf32>
    %127 = vector.shape_cast %126 : vector<1x4x16x4xf32> to vector<4x16x4xf32>
    %c12_268 = arith.constant 12 : index
    %c0_269 = arith.constant 0 : index
    %c92_270 = arith.constant 92 : index
    %128 = vector.load %arg7[%c12_268, %c0_269, %c92_270] : memref<16x16x100xf32, #tpu.memory_space<vmem>>, vector<4x16x4xf32>
    tpu.vector_store %arg7[%c12_268, %c0_269, %c92_270], %127 {strides = array<i32>} : memref<16x16x100xf32, #tpu.memory_space<vmem>>, vector<4x16x4xf32>,
    %c0_271 = arith.constant 0 : index
    %c4_272 = arith.constant 4 : index
    %c4_273 = arith.constant 4 : index
    %c0_274 = arith.constant 0 : index
    %129 = vector.load %arg2[%c0_271, %c4_272, %c4_273, %c0_274] : memref<1x16x20x4xf32, #tpu.memory_space<vmem>>, vector<1x12x16x4xf32>
    %130 = vector.shape_cast %129 : vector<1x12x16x4xf32> to vector<12x16x4xf32>
    %c0_275 = arith.constant 0 : index
    %c0_276 = arith.constant 0 : index
    %c96 = arith.constant 96 : index
    %131 = vector.load %arg7[%c0_275, %c0_276, %c96] : memref<16x16x100xf32, #tpu.memory_space<vmem>>, vector<12x16x4xf32>
    tpu.vector_store %arg7[%c0_275, %c0_276, %c96], %130 {strides = array<i32>} : memref<16x16x100xf32, #tpu.memory_space<vmem>>, vector<12x16x4xf32>,
    %c0_277 = arith.constant 0 : index
    %c0_278 = arith.constant 0 : index
    %c4_279 = arith.constant 4 : index
    %c0_280 = arith.constant 0 : index
    %132 = vector.load %arg3[%c0_277, %c0_278, %c4_279, %c0_280] : memref<1x8x20x4xf32, #tpu.memory_space<vmem>>, vector<1x4x16x4xf32>
    %133 = vector.shape_cast %132 : vector<1x4x16x4xf32> to vector<4x16x4xf32>
    %c12_281 = arith.constant 12 : index
    %c0_282 = arith.constant 0 : index
    %c96_283 = arith.constant 96 : index
    %134 = vector.load %arg7[%c12_281, %c0_282, %c96_283] : memref<16x16x100xf32, #tpu.memory_space<vmem>>, vector<4x16x4xf32>
    tpu.vector_store %arg7[%c12_281, %c0_282, %c96_283], %133 {strides = array<i32>} : memref<16x16x100xf32, #tpu.memory_space<vmem>>, vector<4x16x4xf32>,
    %c0_284 = arith.constant 0 : index
    %c0_285 = arith.constant 0 : index
    %c0_286 = arith.constant 0 : index
    %135 = vector.load %arg7[%c0_284, %c0_285, %c0_286] : memref<16x16x100xf32, #tpu.memory_space<vmem>>, vector<16x16x100xf32>
    %136 = vector.shape_cast %135 : vector<16x16x100xf32> to vector<256x100xf32>
    %c0_287 = arith.constant 0 : index
    %c0_288 = arith.constant 0 : index
    %137 = vector.load %arg4[%c0_287, %c0_288] : memref<100x128xf32, #tpu.memory_space<vmem>>, vector<100x128xf32>
    %cst = arith.constant dense<0.000000e+00> : vector<256x128xf32>
    %138 = tpu.matmul %136, %137, %cst {dimension_numbers = #tpu.dot_dimension_numbers<[1], [0], [0], [1], [0, 0, 1, 1], [], []>} : vector<256x100xf32>, vector<100x128xf32>, vector<256x128xf32> -> vector<256x128xf32>
    %139 = tpu.transpose %138, [1, 0] : vector<256x128xf32> -> vector<128x256xf32>
    %140 = vector.extract_strided_slice %139 {offsets = [0, 0], sizes = [8, 256], strides = [1, 1]} : vector<128x256xf32> to vector<8x256xf32>
    %c0_289 = arith.constant 0 : index
    %c0_290 = arith.constant 0 : index
    %c0_291 = arith.constant 0 : index
    %141 = vector.load %arg5[%c0_289, %c0_290, %c0_291] : memref<1x8x256xf32, #tpu.memory_space<vmem>>, vector<1x8x256xf32>
    %142 = vector.shape_cast %141 : vector<1x8x256xf32> to vector<8x256xf32>
    %143 = vector.shape_cast %140 : vector<8x256xf32> to vector<1x8x256xf32>
    tpu.vector_store %arg5[%c0_289, %c0_290, %c0_291], %143 {strides = array<i32>} : memref<1x8x256xf32, #tpu.memory_space<vmem>>, vector<1x8x256xf32>,
    %cst_292 = arith.constant dense<0.000000e+00> : vector<128xf32>
    %144 = vector.multi_reduction <add>, %138, %cst_292 [0] : vector<256x128xf32> to vector<128xf32>
    %145 = vector.shape_cast %144 : vector<128xf32> to vector<1x128xf32>
    %cst_293 = arith.constant 3.906250e-03 : f32
    %146 = vector.broadcast %cst_293 : f32 to vector<1x128xf32>
    %147 = arith.mulf %145, %146 : vector<1x128xf32>
    %148 = vector.broadcast %147 : vector<1x128xf32> to vector<256x128xf32>
    %149 = arith.subf %138, %148 : vector<256x128xf32>
    %c0_294 = arith.constant 0 : index
    %c0_295 = arith.constant 0 : index
    %c0_296 = arith.constant 0 : index
    %c0_297 = arith.constant 0 : index
    %150 = vector.load %arg6[%c0_294, %c0_295, %c0_296, %c0_297] : memref<1x1x2x128xf32, #tpu.memory_space<vmem>>, vector<1x1x1x128xf32>
    %151 = vector.shape_cast %150 : vector<1x1x1x128xf32> to vector<1x128xf32>
    %152 = vector.shape_cast %145 : vector<1x128xf32> to vector<1x1x1x128xf32>
    tpu.vector_store %arg6[%c0_294, %c0_295, %c0_296, %c0_297], %152 {strides = array<i32>} : memref<1x1x2x128xf32, #tpu.memory_space<vmem>>, vector<1x1x1x128xf32>,
    %153 = arith.mulf %149, %149 : vector<256x128xf32>
    %cst_298 = arith.constant dense<0.000000e+00> : vector<128xf32>
    %154 = vector.multi_reduction <add>, %153, %cst_298 [0] : vector<256x128xf32> to vector<128xf32>
    %155 = vector.shape_cast %154 : vector<128xf32> to vector<1x128xf32>
    %c0_299 = arith.constant 0 : index
    %c0_300 = arith.constant 0 : index
    %c1_301 = arith.constant 1 : index
    %c0_302 = arith.constant 0 : index
    %156 = vector.load %arg6[%c0_299, %c0_300, %c1_301, %c0_302] : memref<1x1x2x128xf32, #tpu.memory_space<vmem>>, vector<1x1x1x128xf32>
    %157 = vector.shape_cast %156 : vector<1x1x1x128xf32> to vector<1x128xf32>
    %158 = vector.shape_cast %155 : vector<1x128xf32> to vector<1x1x1x128xf32>
    tpu.vector_store %arg6[%c0_299, %c0_300, %c1_301, %c0_302], %158 {strides = array<i32>} : memref<1x1x2x128xf32, #tpu.memory_space<vmem>>, vector<1x1x1x128xf32>,
    return
  }
  func.func @transform_0(%arg0: i32, %arg1: i32) -> (i32, i32, i32, i32) {
    %c0_i32 = arith.constant 0 : i32
    %c0_i32_0 = arith.constant 0 : i32
    %c0_i32_1 = arith.constant 0 : i32
    return %arg0, %arg1, %c0_i32, %c0_i32_0 : i32, i32, i32, i32
  }
  func.func @transform_1(%arg0: i32, %arg1: i32) -> (i32, i32, i32, i32) {
    %c1_i32 = arith.constant 1 : i32
    %0 = arith.addi %arg1, %c1_i32 : i32
    %c2_i32 = arith.constant 2 : i32
    %1 = arith.muli %0, %c2_i32 : i32
    %c0_i32 = arith.constant 0 : i32
    %c0_i32_0 = arith.constant 0 : i32
    %c0_i32_1 = arith.constant 0 : i32
    return %arg0, %1, %c0_i32, %c0_i32_0 : i32, i32, i32, i32
  }
  func.func @transform_2(%arg0: i32, %arg1: i32) -> (i32, i32) {
    %c0_i32 = arith.constant 0 : i32
    %c0_i32_0 = arith.constant 0 : i32
    %c0_i32_1 = arith.constant 0 : i32
    return %c0_i32, %c0_i32_0 : i32, i32
  }
  func.func @transform_3(%arg0: i32, %arg1: i32) -> (i32, i32, i32) {
    %c0_i32 = arith.constant 0 : i32
    %c0_i32_0 = arith.constant 0 : i32
    return %arg0, %c0_i32, %arg1 : i32, i32, i32
  }
  func.func @transform_4(%arg0: i32, %arg1: i32) -> (i32, i32, i32, i32) {
    %c0_i32 = arith.constant 0 : i32
    %c0_i32_0 = arith.constant 0 : i32
    %c0_i32_1 = arith.constant 0 : i32
    return %arg0, %arg1, %c0_i32, %c0_i32_0 : i32, i32, i32, i32
  }
}

</mosaic_0001>

<bundles_post_ra>
// kernel: tpu_custom_call.1
= control target key start
LH: loop header
LB: loop body
LE: loop exit
PB: predicated region body
PF: predicated region fallthrough
CT: control target
= control target key end

     0   :  { %10 = vsyncpa [#allocation4], 0  ;;  %s9733_s0 = inlined_call_operand.vmem [shape: f32[2,24,20,4], index: 0, kind: input, shape index: {}]   ;;  %s9734_s1 = inlined_call_operand.vmem [shape: f32[2,24,20,4], index: 1, kind: input, shape index: {}]   ;;  %s9735_s2 = inlined_call_operand.vmem [shape: f32[100,128], index: 2, kind: input, shape index: {}]   ;;  %s9736_s3 = inlined_call_operand.hbm [shape: f32[2,8,256], index: 3, kind: output, shape index: {0}]   ;;  %s9737_s4 = inlined_call_operand.hbm [shape: f32[2,1,2,128], index: 4, kind: output, shape index: {1}]  }
   0x1   :  { %12 = vsyncpa [#allocation4 + $0x1], 0 }
   0x2   :  { %13 = vsyncpa [#allocation6], 0 }
   0x3   :  { %15 = vsyncpa [#allocation6 + $0x1], 0  ;;  %s6774_s15 = smov 0   ;;  %s6776_s16 = smov 0  }
   0x4   :  { %s6778_s17 = smov 0   ;;  %s6780_s18 = smov 0  }
   0x5   :  { %s6782_s19 = smov 0   ;;  %s6784_s20 = smov 0  }
   0x6 LB: > { %s5773_s21 = sadd.s32 4294967295, %s6721_s20   ;;  %s5774_s22 = sadd.s32 4294967294, %s6721_s20   ;;  %s6721_s20 = sphi %s6784_s20, %s21_s20   ;;  %s6717_s19 = sphi %s6782_s19, %s9744_s19   ;;  %s6713_s18 = sphi %s6780_s18, %s9743_s18   ;;  %s6709_s17 = sphi %s6778_s17, %s9742_s17   ;;  %s6705_s16 = sphi %s6776_s16, %s9741_s16   ;;  %s6701_s15 = sphi %s6774_s15, %s9740_s15  }
   0x7   : > { %s33_s23 = sadd.s32 1, %s6717_s19  ;;  %s123_s24 = sadd.s32 1, %s6709_s17 }
   0x8   : > { %p35_p0 = scmp.ge.s32.totalorder %s33_s23, 2  ;;  %p133_p1 = scmp.ne.s32.totalorder %s6709_s17, %s6705_s16 }
   0x9   : > { %p134_p2 = scmp.eq.s32.totalorder %s5773_s21, 1  ;;  %p139_p3 = scmp.ne.s32.totalorder %s6705_s16, %s6701_s15 }
   0xa   : > { %s9746_s23 = smov (%p35_p0, %s33_s23), 0  ;;  %p140_p5 = scmp.eq.s32.totalorder %s5774_s22, 1 }
   0xb   : > { %p6814_p4 = por %p134_p2, %p133_p1  ;;  %s118_s26 = ssub.s32 %s6717_s19, %s9746_s23 }
   0xc   : > { %p5777_p6 = scmp.ge.s32.totalorder %s6721_s20, 1  ;;  %p121_p7 = scmp.eq.s32.totalorder %s118_s26, 0 }
   0xd   : > { %p6821_p8 = por %p140_p5, %p139_p3  ;;  %p231_p9 = scmp.lt.s32.totalorder %s6721_s20, 3 }
   0xe   : > { %s6827_s28 = scalar_select %p121_p7, %s6709_s17, %s123_s24  }
   0xf   : > { %p232_p10 = pnand %p5777_p6, %p231_p9 }
  0x10   : > { %p290_p11 = scmp.lt.s32.totalorder (!%p232_p10), %s6713_s18, 1  ;;  %s6723_s8 = smov (!%p232_p10), 4   ;;  %vm353_vm0 = vcmask (!%p232_p10), 31744   ;;  %vm546_vm1 = vcmask (!%p232_p10), 64544   ;;  %vm739_vm2 = vcmask (!%p232_p10), 97344   ;;  %vm932_vm3 = vcmask (!%p232_p10), 130144  }
  0x11   : > { %235 = sbr.rel (%p232_p10) target bundleno = 2031 (0x7ef), region = 32  ;;  %s6724_s9 = smov (!%p232_p10), 8   ;;  %vm1125_vm4 = vcmask (!%p232_p10), 162944   ;;  %vm1309_vm5 = vcmask (!%p232_p10), 195744   ;;  %vm1503_vm6 = vcmask (!%p232_p10), 228544   ;;  %vm1696_vm7 = vcmask (!%p232_p10), 261344  }
  0x12   : > { %s6725_s10 = smov (!%p232_p10), 12   ;;  %s6726_s11 = smov (!%p232_p10), 16   ;;  %vm1889_vm8 = vcmask (!%p232_p10), 294144   ;;  %vm2082_vm9 = vcmask (!%p232_p10), 326944   ;;  %vm2266_vm10 = vcmask (!%p232_p10), 359744   ;;  %vm2460_vm11 = vcmask (!%p232_p10), 392544  }
  0x13   : > { %s6727_s12 = smov (!%p232_p10), 20   ;;  %s6728_s24 = smov (!%p232_p10), 24   ;;  %vm2653_vm12 = vcmask (!%p232_p10), 425344   ;;  %vm2846_vm13 = vcmask (!%p232_p10), 458144   ;;  %vm3039_vm14 = vcmask (!%p232_p10), 490944   ;;  %vm3223_vm15 = vcmask (!%p232_p10), 523744  }
  0x14   : > { %s6729_s26 = smov (!%p232_p10), 28   ;;  %s6732_s5 = smov (!%p232_p10), 40  }
  0x15   : > { %s6733_s6 = smov (!%p232_p10), 44   ;;  %s6740_s14 = smov (!%p232_p10), 72  }
  0x16   : > { %s6741_s21 = smov (!%p232_p10), 76  }
  0x18   : > { %s6831_s29 = scalar_select %p290_p11, %s6713_s18, 1 }
  0x1a   : > { %s6522_s30 = smul.u32 576, %s6831_s29  ;;  %s6730_s29 = smov 32  }
  0x1c   : > { %s6839_s7 = scalar_lea.vmem %s9733_s0, %s6522_s30  ;;  %s6363_s13 = sadd.s32 384, %s6522_s30 }
  0x1d   : > { %v386_v0 = vld [vmem:[%s6839_s7 + $0x1] sm:$0xff]  ;;  %v388_v1 = vld [vmem:[%s6839_s7 + $0x19] sm:$0xff]  ;;  %v387_v2 = vld [vmem:[%s6839_s7 + $0x9] sm:$0xff]  ;;  %s7410_s22 = scalar_lea.vmem %s9734_s1, %s6363_s13  ;;  %s6731_s30 = smov 36  }
  0x1e   : > { %450 = vrot.lane.b32.xlu0 %v386_v0, %s6723_s8  ;;  %454 = vrot.lane.b32.xlu1 %v388_v1, %s6723_s8  ;;  %v389_v3 = vld [vmem:[%s6839_s7 + $0x21] sm:$0xff]  ;;  %v390_v4 = vld [vmem:[%s6839_s7 + $0x31] sm:$0xff]  ;;  %s6739_s13 = smov 68  }
  0x1f   : > { %v391_v5 = vld [vmem:[%s6839_s7 + $0x39] sm:$0xff]  ;;  %v392_v6 = vld [vmem:[%s6839_s7 + $0x49] sm:$0xff]  ;;  %v393_v7 = vld [vmem:[%s6839_s7 + $0x51] sm:$0xff] }
  0x20   : > { %v394_v8 = vld [vmem:[%s6839_s7 + $0x61] sm:$0xff]  ;;  %v395_v9 = vld [vmem:[%s6839_s7 + $0x69] sm:$0xff]  ;;  %v396_v10 = vld [vmem:[%s6839_s7 + $0x79] sm:$0xff] }
  0x21   : > { %v397_v11 = vld [vmem:[%s6839_s7 + $0x81] sm:$0xff]  ;;  %v6867_v13 = vld [vmem:[%s6839_s7 + $0x18] sm:$0xff]  ;;  %v6882_v18 = vld [vmem:[%s6839_s7 + $0x30] sm:$0xff] }
  0x22   : > { %452 = vrot.lane.b32.xlu0 %v387_v2, %s6723_s8  ;;  %456 = vrot.lane.b32.xlu1 %v389_v3, %s6723_s8  ;;  %v321_v12 = vld [vmem:[%s6839_s7] sm:$0xff]  ;;  %v398_v14 = vld [vmem:[%s6839_s7 + $0x91] sm:$0xff]  ;;  %356 = vst.msk [vmem:[#allocation2 + $0x10] sm:$0xff] %vm353_vm0, %v6867_v13  ;;  %358 = vst.msk [vmem:[#allocation2 + $0x20] sm:$0xff] %vm353_vm0, %v6882_v18 }
  0x23   : > { %v399_v15 = vld [vmem:[%s6839_s7 + $0x99] sm:$0xff]  ;;  %354 = vst.msk [vmem:[#allocation2] sm:$0xff] %vm353_vm0, %v321_v12  ;;  %v322_v16 = vld [vmem:[%s6839_s7 + $0x8] sm:$0xff]  ;;  %v401_v22 = vld [vmem:[%s6839_s7 + $0xb1] sm:$0xff] }
  0x24   : > { %355 = vst.msk [vmem:[#allocation2 + $0x8] sm:$0xff] %vm353_vm0, %v322_v16  ;;  %v6877_v17 = vld [vmem:[%s6839_s7 + $0x20] sm:$0xff]  ;;  %v6885_v19 = vld [vmem:[%s6839_s7 + $0x38] sm:$0xff]  ;;  %v6894_v20 = vld [vmem:[%s6839_s7 + $0x48] sm:$0xff] }
  0x25   : > { %357 = vst.msk [vmem:[#allocation2 + $0x18] sm:$0xff] %vm353_vm0, %v6877_v17  ;;  %359 = vst.msk [vmem:[#allocation2 + $0x28] sm:$0xff] %vm353_vm0, %v6885_v19  ;;  %v400_v21 = vld [vmem:[%s6839_s7 + $0xa9] sm:$0xff]  ;;  %v6906_v24 = vld [vmem:[%s6839_s7 + $0x60] sm:$0xff] }
  0x26   : > { %458 = vrot.lane.b32.xlu0 %v390_v4, %s6723_s8  ;;  %460 = vrot.lane.b32.xlu1 %v391_v5, %s6723_s8  ;;  %360 = vst.msk [vmem:[#allocation2 + $0x30] sm:$0xff] %vm353_vm0, %v6894_v20  ;;  %v6901_v23 = vld [vmem:[%s6839_s7 + $0x50] sm:$0xff]  ;;  %v6909_v25 = vld [vmem:[%s6839_s7 + $0x68] sm:$0xff]  ;;  %362 = vst.msk [vmem:[#allocation2 + $0x40] sm:$0xff] %vm353_vm0, %v6906_v24 }
  0x27   : > { %361 = vst.msk [vmem:[#allocation2 + $0x38] sm:$0xff] %vm353_vm0, %v6901_v23  ;;  %363 = vst.msk [vmem:[#allocation2 + $0x48] sm:$0xff] %vm353_vm0, %v6909_v25  ;;  %v6916_v26 = vld [vmem:[%s6839_s7 + $0x78] sm:$0xff]  ;;  %v6919_v27 = vld [vmem:[%s6839_s7 + $0x80] sm:$0xff] }
  0x28   : > { %v402_v28 = vld [vmem:[%s6839_s7 + $0xc1] sm:$0xff]  ;;  %364 = vst.msk [vmem:[#allocation2 + $0x50] sm:$0xff] %vm353_vm0, %v6916_v26  ;;  %365 = vst.msk [vmem:[#allocation2 + $0x58] sm:$0xff] %vm353_vm0, %v6919_v27  ;;  %v403_v29 = vld [vmem:[%s6839_s7 + $0xc9] sm:$0xff] }
  0x29   : > { %v6930_v30 = vld [vmem:[%s6839_s7 + $0x90] sm:$0xff]  ;;  %v6933_v31 = vld [vmem:[%s6839_s7 + $0x98] sm:$0xff]  ;;  %v6940_v32 = vld [vmem:[%s6839_s7 + $0xa8] sm:$0xff] }
  0x2a   : > { %462 = vrot.lane.b32.xlu0 %v392_v6, %s6723_s8  ;;  %464 = vrot.lane.b32.xlu1 %v393_v7, %s6723_s8  ;;  %366 = vst.msk [vmem:[#allocation2 + $0x60] sm:$0xff] %vm353_vm0, %v6930_v30  ;;  %367 = vst.msk [vmem:[#allocation2 + $0x68] sm:$0xff] %vm353_vm0, %v6933_v31  ;;  %v6943_v33 = vld [vmem:[%s6839_s7 + $0xb0] sm:$0xff]  ;;  %v6950_v34 = vld [vmem:[%s6839_s7 + $0xc0] sm:$0xff] }
  0x2b   : > { %368 = vst.msk [vmem:[#allocation2 + $0x70] sm:$0xff] %vm353_vm0, %v6940_v32  ;;  %369 = vst.msk [vmem:[#allocation2 + $0x78] sm:$0xff] %vm353_vm0, %v6943_v33  ;;  %v404_v35 = vld [vmem:[%s6839_s7 + $0xd9] sm:$0xff]  ;;  %v6958_v36 = vld [vmem:[%s6839_s7 + $0xc8] sm:$0xff] }
  0x2c   : > { %370 = vst.msk [vmem:[#allocation2 + $0x80] sm:$0xff] %vm353_vm0, %v6950_v34  ;;  %v405_v37 = vld [vmem:[%s6839_s7 + $0xe1] sm:$0xff]  ;;  %371 = vst.msk [vmem:[#allocation2 + $0x88] sm:$0xff] %vm353_vm0, %v6958_v36  ;;  %v6964_v38 = vld [vmem:[%s6839_s7 + $0xd8] sm:$0xff] }
  0x2d   : > { %v6967_v39 = vld [vmem:[%s6839_s7 + $0xe0] sm:$0xff]  ;;  %372 = vst.msk [vmem:[#allocation2 + $0x90] sm:$0xff] %vm353_vm0, %v6964_v38  ;;  %v6974_v40 = vld [vmem:[%s6839_s7 + $0xf0] sm:$0xff]  ;;  %v6979_v41 = vld [vmem:[%s6839_s7 + $0xf8] sm:$0xff] }
  0x2e   : > { %466 = vrot.lane.b32.xlu0 %v394_v8, %s6723_s8  ;;  %468 = vrot.lane.b32.xlu1 %v395_v9, %s6723_s8  ;;  %373 = vst.msk [vmem:[#allocation2 + $0x98] sm:$0xff] %vm353_vm0, %v6967_v39  ;;  %374 = vst.msk [vmem:[#allocation2 + $0xa0] sm:$0xff] %vm353_vm0, %v6974_v40  ;;  %v6986_v42 = vld [vmem:[%s6839_s7 + $0x108] sm:$0xff]  ;;  %v6989_v43 = vld [vmem:[%s6839_s7 + $0x110] sm:$0xff] }
  0x2f   : > { %375 = vst.msk [vmem:[#allocation2 + $0xa8] sm:$0xff] %vm353_vm0, %v6979_v41  ;;  %v406_v44 = vld [vmem:[%s6839_s7 + $0xf1] sm:$0xff]  ;;  %v407_v45 = vld [vmem:[%s6839_s7 + $0xf9] sm:$0xff]  ;;  %376 = vst.msk [vmem:[#allocation2 + $0xb0] sm:$0xff] %vm353_vm0, %v6986_v42 }
  0x30   : > { %377 = vst.msk [vmem:[#allocation2 + $0xb8] sm:$0xff] %vm353_vm0, %v6989_v43  ;;  %v6998_v46 = vld [vmem:[%s6839_s7 + $0x120] sm:$0xff]  ;;  %v7003_v47 = vld [vmem:[%s6839_s7 + $0x128] sm:$0xff]  ;;  %v7008_v48 = vld [vmem:[%s6839_s7 + $0x138] sm:$0xff] }
  0x31   : > { %378 = vst.msk [vmem:[#allocation2 + $0xc0] sm:$0xff] %vm353_vm0, %v6998_v46  ;;  %379 = vst.msk [vmem:[#allocation2 + $0xc8] sm:$0xff] %vm353_vm0, %v7003_v47  ;;  %v7011_v49 = vld [vmem:[%s6839_s7 + $0x140] sm:$0xff]  ;;  %v408_v50 = vld [vmem:[%s6839_s7 + $0x109] sm:$0xff] }
  0x32   : > { %470 = vrot.lane.b32.xlu0 %v396_v10, %s6723_s8  ;;  %472 = vrot.lane.b32.xlu1 %v397_v11, %s6723_s8  ;;  %380 = vst.msk [vmem:[#allocation2 + $0xd0] sm:$0xff] %vm353_vm0, %v7008_v48  ;;  %381 = vst.msk [vmem:[#allocation2 + $0xd8] sm:$0xff] %vm353_vm0, %v7011_v49  ;;  %v409_v51 = vld [vmem:[%s6839_s7 + $0x111] sm:$0xff]  ;;  %v410_v54 = vld [vmem:[%s6839_s7 + $0x121] sm:$0xff] }
  0x33   : > { %v7022_v52 = vld [vmem:[%s6839_s7 + $0x150] sm:$0xff]  ;;  %v7027_v53 = vld [vmem:[%s6839_s7 + $0x158] sm:$0xff]  ;;  %v7036_v56 = vld [vmem:[%s6839_s7 + $0x168] sm:$0xff] }
  0x34   : > { %382 = vst.msk [vmem:[#allocation2 + $0xe0] sm:$0xff] %vm353_vm0, %v7022_v52  ;;  %383 = vst.msk [vmem:[#allocation2 + $0xe8] sm:$0xff] %vm353_vm0, %v7027_v53  ;;  %v411_v55 = vld [vmem:[%s6839_s7 + $0x129] sm:$0xff]  ;;  %v412_v58 = vld [vmem:[%s6839_s7 + $0x139] sm:$0xff] }
  0x35   : > { %384 = vst.msk [vmem:[#allocation2 + $0xf0] sm:$0xff] %vm353_vm0, %v7036_v56  ;;  %v7041_v57 = vld [vmem:[%s6839_s7 + $0x170] sm:$0xff]  ;;  %v413_v59 = vld [vmem:[%s6839_s7 + $0x141] sm:$0xff]  ;;  %v415_v61 = vld [vmem:[%s6839_s7 + $0x159] sm:$0xff] }
  0x36   : > { %474 = vrot.lane.b32.xlu0 %v398_v14, %s6723_s8  ;;  %476 = vrot.lane.b32.xlu1 %v399_v15, %s6723_s8  ;;  %385 = vst.msk [vmem:[#allocation2 + $0xf8] sm:$0xff] %vm353_vm0, %v7041_v57  ;;  %v414_v60 = vld [vmem:[%s6839_s7 + $0x151] sm:$0xff]  ;;  %v416_v62 = vld [vmem:[%s6839_s7 + $0x169] sm:$0xff]  ;;  %vm3417_vm0 = vcmask 556544  }
  0x37   : > { %v417_v63 = vld [vmem:[%s6839_s7 + $0x171] sm:$0xff]  ;;  %v579_v0 = vld [vmem:[%s6839_s7 + $0x2] sm:$0xff]  ;;  %v581_v2 = vld [vmem:[%s6839_s7 + $0x1a] sm:$0xff] }
  0x38   : > { %v580_v1 = vld [vmem:[%s6839_s7 + $0xa] sm:$0xff]  ;;  %v582_v3 = vld [vmem:[%s6839_s7 + $0x22] sm:$0xff]  ;;  %v583_v4 = vld [vmem:[%s6839_s7 + $0x32] sm:$0xff] }
  0x39   : > { %v584_v5 = vld [vmem:[%s6839_s7 + $0x3a] sm:$0xff]  ;;  %v585_v6 = vld [vmem:[%s6839_s7 + $0x4a] sm:$0xff]  ;;  %v586_v7 = vld [vmem:[%s6839_s7 + $0x52] sm:$0xff] }
  0x3a   : > { %478 = vrot.lane.b32.xlu0 %v400_v21, %s6723_s8  ;;  %480 = vrot.lane.b32.xlu1 %v401_v22, %s6723_s8  ;;  %v587_v8 = vld [vmem:[%s6839_s7 + $0x62] sm:$0xff]  ;;  %v588_v9 = vld [vmem:[%s6839_s7 + $0x6a] sm:$0xff] }
  0x3b   : > { %v589_v10 = vld [vmem:[%s6839_s7 + $0x7a] sm:$0xff]  ;;  %v590_v11 = vld [vmem:[%s6839_s7 + $0x82] sm:$0xff]  ;;  %v591_v12 = vld [vmem:[%s6839_s7 + $0x92] sm:$0xff] }
  0x3c   : > { %v592_v14 = vld [vmem:[%s6839_s7 + $0x9a] sm:$0xff]  ;;  %v593_v15 = vld [vmem:[%s6839_s7 + $0xaa] sm:$0xff]  ;;  %v594_v16 = vld [vmem:[%s6839_s7 + $0xb2] sm:$0xff] }
  0x3d   : > { %v595_v21 = vld [vmem:[%s6839_s7 + $0xc2] sm:$0xff]  ;;  %v596_v22 = vld [vmem:[%s6839_s7 + $0xca] sm:$0xff] }
  0x3e   : > { %482 = vrot.lane.b32.xlu0 %v402_v28, %s6723_s8  ;;  %484 = vrot.lane.b32.xlu1 %v403_v29, %s6723_s8  ;;  %v597_v28 = vld [vmem:[%s6839_s7 + $0xda] sm:$0xff]  ;;  %v598_v29 = vld [vmem:[%s6839_s7 + $0xe2] sm:$0xff] }
  0x42   : > { %486 = vrot.lane.b32.xlu0 %v404_v35, %s6723_s8  ;;  %488 = vrot.lane.b32.xlu1 %v405_v37, %s6723_s8  ;;  %v599_v35 = vld [vmem:[%s6839_s7 + $0xf2] sm:$0xff]  ;;  %v600_v37 = vld [vmem:[%s6839_s7 + $0xfa] sm:$0xff] }
  0x46   : > { %490 = vrot.lane.b32.xlu0 %v406_v44, %s6723_s8  ;;  %492 = vrot.lane.b32.xlu1 %v407_v45, %s6723_s8  ;;  %v601_v44 = vld [vmem:[%s6839_s7 + $0x10a] sm:$0xff]  ;;  %v602_v45 = vld [vmem:[%s6839_s7 + $0x112] sm:$0xff] }
  0x4a   : > { %494 = vrot.lane.b32.xlu0 %v408_v50, %s6723_s8  ;;  %496 = vrot.lane.b32.xlu1 %v409_v51, %s6723_s8  ;;  %v603_v50 = vld [vmem:[%s6839_s7 + $0x122] sm:$0xff]  ;;  %v604_v51 = vld [vmem:[%s6839_s7 + $0x12a] sm:$0xff] }
  0x4e   : > { %498 = vrot.lane.b32.xlu0 %v410_v54, %s6723_s8  ;;  %500 = vrot.lane.b32.xlu1 %v411_v55, %s6723_s8  ;;  %v605_v54 = vld [vmem:[%s6839_s7 + $0x13a] sm:$0xff]  ;;  %v606_v55 = vld [vmem:[%s6839_s7 + $0x142] sm:$0xff] }
  0x52   : > { %502 = vrot.lane.b32.xlu0 %v412_v58, %s6723_s8  ;;  %504 = vrot.lane.b32.xlu1 %v413_v59, %s6723_s8 }
  0x56   : > { %506 = vrot.lane.b32.xlu0 %v414_v60, %s6723_s8  ;;  %508 = vrot.lane.b32.xlu1 %v415_v61, %s6723_s8  ;;  %v607_v60 = vld [vmem:[%s6839_s7 + $0x152] sm:$0xff]  ;;  %v608_v61 = vld [vmem:[%s6839_s7 + $0x15a] sm:$0xff] }
  0x5a   : > { %510 = vrot.lane.b32.xlu0 %v416_v62, %s6723_s8  ;;  %512 = vrot.lane.b32.xlu1 %v417_v63, %s6723_s8  ;;  %s6734_s8 = smov 48  }
  0x5e   : > { %643 = vrot.lane.b32.xlu0 %v579_v0, %s6724_s9  ;;  %645 = vrot.lane.b32.xlu1 %v580_v1, %s6724_s9  ;;  %v609_v0 = vld [vmem:[%s6839_s7 + $0x16a] sm:$0xff]  ;;  %v610_v1 = vld [vmem:[%s6839_s7 + $0x172] sm:$0xff] }
  0x62   : > { %647 = vrot.lane.b32.xlu0 %v581_v2, %s6724_s9  ;;  %649 = vrot.lane.b32.xlu1 %v582_v3, %s6724_s9 }
  0x66   : > { %651 = vrot.lane.b32.xlu0 %v583_v4, %s6724_s9  ;;  %653 = vrot.lane.b32.xlu1 %v584_v5, %s6724_s9  ;;  %v772_v4 = vld [vmem:[%s6839_s7 + $0x3] sm:$0xff]  ;;  %v773_v5 = vld [vmem:[%s6839_s7 + $0xb] sm:$0xff] }
  0x6a   : > { %655 = vrot.lane.b32.xlu0 %v585_v6, %s6724_s9  ;;  %657 = vrot.lane.b32.xlu1 %v586_v7, %s6724_s9 }
  0x6e   : > { %659 = vrot.lane.b32.xlu0 %v587_v8, %s6724_s9  ;;  %661 = vrot.lane.b32.xlu1 %v588_v9, %s6724_s9  ;;  %v774_v8 = vld [vmem:[%s6839_s7 + $0x1b] sm:$0xff]  ;;  %v775_v9 = vld [vmem:[%s6839_s7 + $0x23] sm:$0xff] }
  0x72   : > { %663 = vrot.lane.b32.xlu0 %v589_v10, %s6724_s9  ;;  %665 = vrot.lane.b32.xlu1 %v590_v11, %s6724_s9 }
  0x76   : > { %667 = vrot.lane.b32.xlu0 %v591_v12, %s6724_s9  ;;  %669 = vrot.lane.b32.xlu1 %v592_v14, %s6724_s9  ;;  %v776_v12 = vld [vmem:[%s6839_s7 + $0x33] sm:$0xff]  ;;  %v777_v14 = vld [vmem:[%s6839_s7 + $0x3b] sm:$0xff] }
  0x7a   : > { %671 = vrot.lane.b32.xlu0 %v593_v15, %s6724_s9  ;;  %673 = vrot.lane.b32.xlu1 %v594_v16, %s6724_s9 }
  0x7e   : > { %675 = vrot.lane.b32.xlu0 %v595_v21, %s6724_s9  ;;  %677 = vrot.lane.b32.xlu1 %v596_v22, %s6724_s9  ;;  %v778_v21 = vld [vmem:[%s6839_s7 + $0x4b] sm:$0xff]  ;;  %v779_v22 = vld [vmem:[%s6839_s7 + $0x53] sm:$0xff] }
  0x82   : > { %679 = vrot.lane.b32.xlu0 %v597_v28, %s6724_s9  ;;  %681 = vrot.lane.b32.xlu1 %v598_v29, %s6724_s9 }
  0x86   : > { %683 = vrot.lane.b32.xlu0 %v599_v35, %s6724_s9  ;;  %685 = vrot.lane.b32.xlu1 %v600_v37, %s6724_s9  ;;  %v780_v35 = vld [vmem:[%s6839_s7 + $0x63] sm:$0xff]  ;;  %v781_v37 = vld [vmem:[%s6839_s7 + $0x6b] sm:$0xff] }
  0x8a   : > { %687 = vrot.lane.b32.xlu0 %v601_v44, %s6724_s9  ;;  %689 = vrot.lane.b32.xlu1 %v602_v45, %s6724_s9 }
  0x8e   : > { %691 = vrot.lane.b32.xlu0 %v603_v50, %s6724_s9  ;;  %693 = vrot.lane.b32.xlu1 %v604_v51, %s6724_s9  ;;  %v782_v50 = vld [vmem:[%s6839_s7 + $0x7b] sm:$0xff]  ;;  %v783_v51 = vld [vmem:[%s6839_s7 + $0x83] sm:$0xff] }
  0x90   : > { %v451_v58 = vpop.permute.xlu0 %450  ;;  %v455_v59 = vpop.permute.xlu1 %454 }
  0x91   : > { %547 = vst.msk [vmem:[#allocation2] sm:$0xff] %vm546_vm1, %v451_v58  ;;  %549 = vst.msk [vmem:[#allocation2 + $0x10] sm:$0xff] %vm546_vm1, %v455_v59  ;;  %v784_v58 = vld [vmem:[%s6839_s7 + $0x93] sm:$0xff]  ;;  %v785_v59 = vld [vmem:[%s6839_s7 + $0x9b] sm:$0xff] }
  0x92   : > { %695 = vrot.lane.b32.xlu0 %v605_v54, %s6724_s9  ;;  %697 = vrot.lane.b32.xlu1 %v606_v55, %s6724_s9 }
  0x94   : > { %v453_v62 = vpop.permute.xlu0 %452  ;;  %v457_v63 = vpop.permute.xlu1 %456 }
  0x95   : > { %548 = vst.msk [vmem:[#allocation2 + $0x8] sm:$0xff] %vm546_vm1, %v453_v62  ;;  %550 = vst.msk [vmem:[#allocation2 + $0x18] sm:$0xff] %vm546_vm1, %v457_v63  ;;  %v786_v62 = vld [vmem:[%s6839_s7 + $0xab] sm:$0xff]  ;;  %v787_v63 = vld [vmem:[%s6839_s7 + $0xb3] sm:$0xff] }
  0x96   : > { %699 = vrot.lane.b32.xlu0 %v607_v60, %s6724_s9  ;;  %701 = vrot.lane.b32.xlu1 %v608_v61, %s6724_s9 }
  0x98   : > { %v459_v2 = vpop.permute.xlu0 %458  ;;  %v461_v3 = vpop.permute.xlu1 %460 }
  0x99   : > { %551 = vst.msk [vmem:[#allocation2 + $0x20] sm:$0xff] %vm546_vm1, %v459_v2  ;;  %552 = vst.msk [vmem:[#allocation2 + $0x28] sm:$0xff] %vm546_vm1, %v461_v3  ;;  %v788_v2 = vld [vmem:[%s6839_s7 + $0xc3] sm:$0xff]  ;;  %v789_v3 = vld [vmem:[%s6839_s7 + $0xcb] sm:$0xff] }
  0x9a   : > { %703 = vrot.lane.b32.xlu0 %v609_v0, %s6724_s9  ;;  %705 = vrot.lane.b32.xlu1 %v610_v1, %s6724_s9  ;;  %s6735_s9 = smov 52  }
  0x9c   : > { %v463_v6 = vpop.permute.xlu0 %462  ;;  %v465_v7 = vpop.permute.xlu1 %464 }
  0x9d   : > { %553 = vst.msk [vmem:[#allocation2 + $0x30] sm:$0xff] %vm546_vm1, %v463_v6  ;;  %554 = vst.msk [vmem:[#allocation2 + $0x38] sm:$0xff] %vm546_vm1, %v465_v7  ;;  %v790_v6 = vld [vmem:[%s6839_s7 + $0xdb] sm:$0xff]  ;;  %v791_v7 = vld [vmem:[%s6839_s7 + $0xe3] sm:$0xff] }
  0x9e   : > { %836 = vrot.lane.b32.xlu0 %v772_v4, %s6725_s10  ;;  %838 = vrot.lane.b32.xlu1 %v773_v5, %s6725_s10 }
  0xa0   : > { %v467_v10 = vpop.permute.xlu0 %466  ;;  %v469_v11 = vpop.permute.xlu1 %468 }
  0xa1   : > { %555 = vst.msk [vmem:[#allocation2 + $0x40] sm:$0xff] %vm546_vm1, %v467_v10  ;;  %556 = vst.msk [vmem:[#allocation2 + $0x48] sm:$0xff] %vm546_vm1, %v469_v11  ;;  %v792_v10 = vld [vmem:[%s6839_s7 + $0xf3] sm:$0xff]  ;;  %v793_v11 = vld [vmem:[%s6839_s7 + $0xfb] sm:$0xff] }
  0xa2   : > { %840 = vrot.lane.b32.xlu0 %v774_v8, %s6725_s10  ;;  %842 = vrot.lane.b32.xlu1 %v775_v9, %s6725_s10 }
  0xa4   : > { %v471_v15 = vpop.permute.xlu0 %470  ;;  %v473_v16 = vpop.permute.xlu1 %472 }
  0xa5   : > { %557 = vst.msk [vmem:[#allocation2 + $0x50] sm:$0xff] %vm546_vm1, %v471_v15  ;;  %558 = vst.msk [vmem:[#allocation2 + $0x58] sm:$0xff] %vm546_vm1, %v473_v16  ;;  %v794_v15 = vld [vmem:[%s6839_s7 + $0x10b] sm:$0xff]  ;;  %v795_v16 = vld [vmem:[%s6839_s7 + $0x113] sm:$0xff] }
  0xa6   : > { %844 = vrot.lane.b32.xlu0 %v776_v12, %s6725_s10  ;;  %846 = vrot.lane.b32.xlu1 %v777_v14, %s6725_s10 }
  0xa8   : > { %v475_v28 = vpop.permute.xlu0 %474  ;;  %v477_v29 = vpop.permute.xlu1 %476 }
  0xa9   : > { %559 = vst.msk [vmem:[#allocation2 + $0x60] sm:$0xff] %vm546_vm1, %v475_v28  ;;  %560 = vst.msk [vmem:[#allocation2 + $0x68] sm:$0xff] %vm546_vm1, %v477_v29  ;;  %v796_v28 = vld [vmem:[%s6839_s7 + $0x123] sm:$0xff]  ;;  %v797_v29 = vld [vmem:[%s6839_s7 + $0x12b] sm:$0xff] }
  0xaa   : > { %848 = vrot.lane.b32.xlu0 %v778_v21, %s6725_s10  ;;  %850 = vrot.lane.b32.xlu1 %v779_v22, %s6725_s10 }
  0xac   : > { %v479_v44 = vpop.permute.xlu0 %478  ;;  %v481_v45 = vpop.permute.xlu1 %480 }
  0xad   : > { %561 = vst.msk [vmem:[#allocation2 + $0x70] sm:$0xff] %vm546_vm1, %v479_v44  ;;  %562 = vst.msk [vmem:[#allocation2 + $0x78] sm:$0xff] %vm546_vm1, %v481_v45  ;;  %v798_v44 = vld [vmem:[%s6839_s7 + $0x13b] sm:$0xff]  ;;  %v799_v45 = vld [vmem:[%s6839_s7 + $0x143] sm:$0xff] }
  0xae   : > { %852 = vrot.lane.b32.xlu0 %v780_v35, %s6725_s10  ;;  %854 = vrot.lane.b32.xlu1 %v781_v37, %s6725_s10 }
  0xb0   : > { %v483_v54 = vpop.permute.xlu0 %482  ;;  %v485_v55 = vpop.permute.xlu1 %484 }
  0xb1   : > { %563 = vst.msk [vmem:[#allocation2 + $0x80] sm:$0xff] %vm546_vm1, %v483_v54  ;;  %564 = vst.msk [vmem:[#allocation2 + $0x88] sm:$0xff] %vm546_vm1, %v485_v55  ;;  %v800_v54 = vld [vmem:[%s6839_s7 + $0x153] sm:$0xff]  ;;  %v801_v55 = vld [vmem:[%s6839_s7 + $0x15b] sm:$0xff] }
  0xb2   : > { %856 = vrot.lane.b32.xlu0 %v782_v50, %s6725_s10  ;;  %858 = vrot.lane.b32.xlu1 %v783_v51, %s6725_s10 }
  0xb4   : > { %v487_v60 = vpop.permute.xlu0 %486  ;;  %v489_v61 = vpop.permute.xlu1 %488 }
  0xb5   : > { %565 = vst.msk [vmem:[#allocation2 + $0x90] sm:$0xff] %vm546_vm1, %v487_v60  ;;  %566 = vst.msk [vmem:[#allocation2 + $0x98] sm:$0xff] %vm546_vm1, %v489_v61  ;;  %v802_v60 = vld [vmem:[%s6839_s7 + $0x16b] sm:$0xff]  ;;  %v803_v61 = vld [vmem:[%s6839_s7 + $0x173] sm:$0xff] }
  0xb6   : > { %860 = vrot.lane.b32.xlu0 %v784_v58, %s6725_s10  ;;  %862 = vrot.lane.b32.xlu1 %v785_v59, %s6725_s10 }
  0xb8   : > { %v491_v0 = vpop.permute.xlu0 %490  ;;  %v493_v1 = vpop.permute.xlu1 %492 }
  0xb9   : > { %567 = vst.msk [vmem:[#allocation2 + $0xa0] sm:$0xff] %vm546_vm1, %v491_v0  ;;  %568 = vst.msk [vmem:[#allocation2 + $0xa8] sm:$0xff] %vm546_vm1, %v493_v1  ;;  %v965_v0 = vld [vmem:[%s6839_s7 + $0x4] sm:$0xff]  ;;  %v966_v1 = vld [vmem:[%s6839_s7 + $0xc] sm:$0xff] }
  0xba   : > { %864 = vrot.lane.b32.xlu0 %v786_v62, %s6725_s10  ;;  %866 = vrot.lane.b32.xlu1 %v787_v63, %s6725_s10 }
  0xbc   : > { %v495_v4 = vpop.permute.xlu0 %494  ;;  %v497_v5 = vpop.permute.xlu1 %496 }
  0xbd   : > { %569 = vst.msk [vmem:[#allocation2 + $0xb0] sm:$0xff] %vm546_vm1, %v495_v4  ;;  %570 = vst.msk [vmem:[#allocation2 + $0xb8] sm:$0xff] %vm546_vm1, %v497_v5  ;;  %v967_v4 = vld [vmem:[%s6839_s7 + $0x1c] sm:$0xff]  ;;  %v968_v5 = vld [vmem:[%s6839_s7 + $0x24] sm:$0xff] }
  0xbe   : > { %868 = vrot.lane.b32.xlu0 %v788_v2, %s6725_s10  ;;  %870 = vrot.lane.b32.xlu1 %v789_v3, %s6725_s10 }
  0xc0   : > { %v499_v8 = vpop.permute.xlu0 %498  ;;  %v501_v9 = vpop.permute.xlu1 %500 }
  0xc1   : > { %571 = vst.msk [vmem:[#allocation2 + $0xc0] sm:$0xff] %vm546_vm1, %v499_v8  ;;  %572 = vst.msk [vmem:[#allocation2 + $0xc8] sm:$0xff] %vm546_vm1, %v501_v9  ;;  %v969_v8 = vld [vmem:[%s6839_s7 + $0x34] sm:$0xff]  ;;  %v970_v9 = vld [vmem:[%s6839_s7 + $0x3c] sm:$0xff] }
  0xc2   : > { %872 = vrot.lane.b32.xlu0 %v790_v6, %s6725_s10  ;;  %874 = vrot.lane.b32.xlu1 %v791_v7, %s6725_s10 }
  0xc4   : > { %v503_v12 = vpop.permute.xlu0 %502  ;;  %v505_v14 = vpop.permute.xlu1 %504 }
  0xc5   : > { %573 = vst.msk [vmem:[#allocation2 + $0xd0] sm:$0xff] %vm546_vm1, %v503_v12  ;;  %574 = vst.msk [vmem:[#allocation2 + $0xd8] sm:$0xff] %vm546_vm1, %v505_v14  ;;  %v971_v12 = vld [vmem:[%s6839_s7 + $0x4c] sm:$0xff]  ;;  %v972_v14 = vld [vmem:[%s6839_s7 + $0x54] sm:$0xff] }
  0xc6   : > { %876 = vrot.lane.b32.xlu0 %v792_v10, %s6725_s10  ;;  %878 = vrot.lane.b32.xlu1 %v793_v11, %s6725_s10 }
  0xc8   : > { %v507_v21 = vpop.permute.xlu0 %506  ;;  %v509_v22 = vpop.permute.xlu1 %508 }
  0xc9   : > { %575 = vst.msk [vmem:[#allocation2 + $0xe0] sm:$0xff] %vm546_vm1, %v507_v21  ;;  %576 = vst.msk [vmem:[#allocation2 + $0xe8] sm:$0xff] %vm546_vm1, %v509_v22  ;;  %v973_v21 = vld [vmem:[%s6839_s7 + $0x64] sm:$0xff]  ;;  %v974_v22 = vld [vmem:[%s6839_s7 + $0x6c] sm:$0xff] }
  0xca   : > { %880 = vrot.lane.b32.xlu0 %v794_v15, %s6725_s10  ;;  %882 = vrot.lane.b32.xlu1 %v795_v16, %s6725_s10 }
  0xcc   : > { %v511_v35 = vpop.permute.xlu0 %510  ;;  %v513_v37 = vpop.permute.xlu1 %512 }
  0xcd   : > { %577 = vst.msk [vmem:[#allocation2 + $0xf0] sm:$0xff] %vm546_vm1, %v511_v35  ;;  %578 = vst.msk [vmem:[#allocation2 + $0xf8] sm:$0xff] %vm546_vm1, %v513_v37  ;;  %v975_v35 = vld [vmem:[%s6839_s7 + $0x7c] sm:$0xff]  ;;  %v976_v37 = vld [vmem:[%s6839_s7 + $0x84] sm:$0xff]  ;;  %vm3610_vm1 = vcmask 589344  }
  0xce   : > { %884 = vrot.lane.b32.xlu0 %v796_v28, %s6725_s10  ;;  %886 = vrot.lane.b32.xlu1 %v797_v29, %s6725_s10 }
  0xd0   : > { %v644_v50 = vpop.permute.xlu0 %643  ;;  %v646_v51 = vpop.permute.xlu1 %645 }
  0xd1   : > { %740 = vst.msk [vmem:[#allocation2] sm:$0xff] %vm739_vm2, %v644_v50  ;;  %741 = vst.msk [vmem:[#allocation2 + $0x8] sm:$0xff] %vm739_vm2, %v646_v51  ;;  %v977_v50 = vld [vmem:[%s6839_s7 + $0x94] sm:$0xff]  ;;  %v978_v51 = vld [vmem:[%s6839_s7 + $0x9c] sm:$0xff] }
  0xd2   : > { %888 = vrot.lane.b32.xlu0 %v798_v44, %s6725_s10  ;;  %890 = vrot.lane.b32.xlu1 %v799_v45, %s6725_s10 }
  0xd4   : > { %v648_v58 = vpop.permute.xlu0 %647  ;;  %v650_v59 = vpop.permute.xlu1 %649 }
  0xd5   : > { %742 = vst.msk [vmem:[#allocation2 + $0x10] sm:$0xff] %vm739_vm2, %v648_v58  ;;  %743 = vst.msk [vmem:[#allocation2 + $0x18] sm:$0xff] %vm739_vm2, %v650_v59  ;;  %v979_v58 = vld [vmem:[%s6839_s7 + $0xac] sm:$0xff]  ;;  %v980_v59 = vld [vmem:[%s6839_s7 + $0xb4] sm:$0xff] }
  0xd6   : > { %892 = vrot.lane.b32.xlu0 %v800_v54, %s6725_s10  ;;  %894 = vrot.lane.b32.xlu1 %v801_v55, %s6725_s10 }
  0xd8   : > { %v652_v62 = vpop.permute.xlu0 %651  ;;  %v654_v63 = vpop.permute.xlu1 %653 }
  0xd9   : > { %744 = vst.msk [vmem:[#allocation2 + $0x20] sm:$0xff] %vm739_vm2, %v652_v62  ;;  %745 = vst.msk [vmem:[#allocation2 + $0x28] sm:$0xff] %vm739_vm2, %v654_v63  ;;  %v981_v62 = vld [vmem:[%s6839_s7 + $0xc4] sm:$0xff]  ;;  %v982_v63 = vld [vmem:[%s6839_s7 + $0xcc] sm:$0xff] }
  0xda   : > { %896 = vrot.lane.b32.xlu0 %v802_v60, %s6725_s10  ;;  %898 = vrot.lane.b32.xlu1 %v803_v61, %s6725_s10  ;;  %s6736_s10 = smov 56  }
  0xdc   : > { %v656_v2 = vpop.permute.xlu0 %655  ;;  %v658_v3 = vpop.permute.xlu1 %657 }
  0xdd   : > { %746 = vst.msk [vmem:[#allocation2 + $0x30] sm:$0xff] %vm739_vm2, %v656_v2  ;;  %747 = vst.msk [vmem:[#allocation2 + $0x38] sm:$0xff] %vm739_vm2, %v658_v3  ;;  %v983_v2 = vld [vmem:[%s6839_s7 + $0xdc] sm:$0xff]  ;;  %v984_v3 = vld [vmem:[%s6839_s7 + $0xe4] sm:$0xff] }
  0xde   : > { %1029 = vrot.lane.b32.xlu0 %v965_v0, %s6726_s11  ;;  %1031 = vrot.lane.b32.xlu1 %v966_v1, %s6726_s11 }
  0xe0   : > { %v660_v6 = vpop.permute.xlu0 %659  ;;  %v662_v7 = vpop.permute.xlu1 %661 }
  0xe1   : > { %748 = vst.msk [vmem:[#allocation2 + $0x40] sm:$0xff] %vm739_vm2, %v660_v6  ;;  %749 = vst.msk [vmem:[#allocation2 + $0x48] sm:$0xff] %vm739_vm2, %v662_v7  ;;  %v985_v6 = vld [vmem:[%s6839_s7 + $0xf4] sm:$0xff]  ;;  %v986_v7 = vld [vmem:[%s6839_s7 + $0xfc] sm:$0xff] }
  0xe2   : > { %1033 = vrot.lane.b32.xlu0 %v967_v4, %s6726_s11  ;;  %1035 = vrot.lane.b32.xlu1 %v968_v5, %s6726_s11 }
  0xe4   : > { %v664_v10 = vpop.permute.xlu0 %663  ;;  %v666_v11 = vpop.permute.xlu1 %665 }
  0xe5   : > { %750 = vst.msk [vmem:[#allocation2 + $0x50] sm:$0xff] %vm739_vm2, %v664_v10  ;;  %751 = vst.msk [vmem:[#allocation2 + $0x58] sm:$0xff] %vm739_vm2, %v666_v11  ;;  %v987_v10 = vld [vmem:[%s6839_s7 + $0x10c] sm:$0xff]  ;;  %v988_v11 = vld [vmem:[%s6839_s7 + $0x114] sm:$0xff] }
  0xe6   : > { %1037 = vrot.lane.b32.xlu0 %v969_v8, %s6726_s11  ;;  %1039 = vrot.lane.b32.xlu1 %v970_v9, %s6726_s11 }
  0xe8   : > { %v668_v15 = vpop.permute.xlu0 %667  ;;  %v670_v16 = vpop.permute.xlu1 %669 }
  0xe9   : > { %752 = vst.msk [vmem:[#allocation2 + $0x60] sm:$0xff] %vm739_vm2, %v668_v15  ;;  %753 = vst.msk [vmem:[#allocation2 + $0x68] sm:$0xff] %vm739_vm2, %v670_v16  ;;  %v989_v15 = vld [vmem:[%s6839_s7 + $0x124] sm:$0xff]  ;;  %v990_v16 = vld [vmem:[%s6839_s7 + $0x12c] sm:$0xff] }
  0xea   : > { %1041 = vrot.lane.b32.xlu0 %v971_v12, %s6726_s11  ;;  %1043 = vrot.lane.b32.xlu1 %v972_v14, %s6726_s11 }
  0xec   : > { %v672_v28 = vpop.permute.xlu0 %671  ;;  %v674_v29 = vpop.permute.xlu1 %673 }
  0xed   : > { %754 = vst.msk [vmem:[#allocation2 + $0x70] sm:$0xff] %vm739_vm2, %v672_v28  ;;  %755 = vst.msk [vmem:[#allocation2 + $0x78] sm:$0xff] %vm739_vm2, %v674_v29  ;;  %v991_v28 = vld [vmem:[%s6839_s7 + $0x13c] sm:$0xff]  ;;  %v992_v29 = vld [vmem:[%s6839_s7 + $0x144] sm:$0xff] }
  0xee   : > { %1045 = vrot.lane.b32.xlu0 %v973_v21, %s6726_s11  ;;  %1047 = vrot.lane.b32.xlu1 %v974_v22, %s6726_s11 }
  0xf0   : > { %v676_v44 = vpop.permute.xlu0 %675  ;;  %v678_v45 = vpop.permute.xlu1 %677 }
  0xf1   : > { %756 = vst.msk [vmem:[#allocation2 + $0x80] sm:$0xff] %vm739_vm2, %v676_v44  ;;  %757 = vst.msk [vmem:[#allocation2 + $0x88] sm:$0xff] %vm739_vm2, %v678_v45  ;;  %v993_v44 = vld [vmem:[%s6839_s7 + $0x154] sm:$0xff]  ;;  %v994_v45 = vld [vmem:[%s6839_s7 + $0x15c] sm:$0xff] }
  0xf2   : > { %1049 = vrot.lane.b32.xlu0 %v975_v35, %s6726_s11  ;;  %1051 = vrot.lane.b32.xlu1 %v976_v37, %s6726_s11 }
  0xf4   : > { %v680_v54 = vpop.permute.xlu0 %679  ;;  %v682_v55 = vpop.permute.xlu1 %681 }
  0xf5   : > { %758 = vst.msk [vmem:[#allocation2 + $0x90] sm:$0xff] %vm739_vm2, %v680_v54  ;;  %759 = vst.msk [vmem:[#allocation2 + $0x98] sm:$0xff] %vm739_vm2, %v682_v55  ;;  %v995_v54 = vld [vmem:[%s6839_s7 + $0x16c] sm:$0xff]  ;;  %v996_v55 = vld [vmem:[%s6839_s7 + $0x174] sm:$0xff] }
  0xf6   : > { %1053 = vrot.lane.b32.xlu0 %v977_v50, %s6726_s11  ;;  %1055 = vrot.lane.b32.xlu1 %v978_v51, %s6726_s11 }
  0xf8   : > { %v684_v60 = vpop.permute.xlu0 %683  ;;  %v686_v61 = vpop.permute.xlu1 %685 }
  0xf9   : > { %760 = vst.msk [vmem:[#allocation2 + $0xa0] sm:$0xff] %vm739_vm2, %v684_v60  ;;  %761 = vst.msk [vmem:[#allocation2 + $0xa8] sm:$0xff] %vm739_vm2, %v686_v61 }
  0xfa   : > { %1057 = vrot.lane.b32.xlu0 %v979_v58, %s6726_s11  ;;  %1059 = vrot.lane.b32.xlu1 %v980_v59, %s6726_s11 }
  0xfc   : > { %v688_v0 = vpop.permute.xlu0 %687  ;;  %v690_v1 = vpop.permute.xlu1 %689 }
  0xfd   : > { %762 = vst.msk [vmem:[#allocation2 + $0xb0] sm:$0xff] %vm739_vm2, %v688_v0  ;;  %763 = vst.msk [vmem:[#allocation2 + $0xb8] sm:$0xff] %vm739_vm2, %v690_v1 }
  0xfe   : > { %1061 = vrot.lane.b32.xlu0 %v981_v62, %s6726_s11  ;;  %1063 = vrot.lane.b32.xlu1 %v982_v63, %s6726_s11 }
 0x100   : > { %v692_v4 = vpop.permute.xlu0 %691  ;;  %v694_v5 = vpop.permute.xlu1 %693 }
 0x101   : > { %764 = vst.msk [vmem:[#allocation2 + $0xc0] sm:$0xff] %vm739_vm2, %v692_v4  ;;  %765 = vst.msk [vmem:[#allocation2 + $0xc8] sm:$0xff] %vm739_vm2, %v694_v5  ;;  %v5814_v4 = vld [vmem:[%s6839_s7 + $0x31] sm:$0xff]  ;;  %v5815_v5 = vld [vmem:[%s6839_s7 + $0x39] sm:$0xff] }
 0x102   : > { %1065 = vrot.lane.b32.xlu0 %v983_v2, %s6726_s11  ;;  %1067 = vrot.lane.b32.xlu1 %v984_v3, %s6726_s11  ;;  %v5812_v2 = vld [vmem:[%s6839_s7 + $0x19] sm:$0xff]  ;;  %v5813_v3 = vld [vmem:[%s6839_s7 + $0x21] sm:$0xff] }
 0x104   : > { %v696_v8 = vpop.permute.xlu0 %695  ;;  %v698_v9 = vpop.permute.xlu1 %697 }
 0x105   : > { %766 = vst.msk [vmem:[#allocation2 + $0xd0] sm:$0xff] %vm739_vm2, %v696_v8  ;;  %767 = vst.msk [vmem:[#allocation2 + $0xd8] sm:$0xff] %vm739_vm2, %v698_v9  ;;  %v5816_v8 = vld [vmem:[%s6839_s7 + $0x49] sm:$0xff]  ;;  %v5817_v9 = vld [vmem:[%s6839_s7 + $0x51] sm:$0xff] }
 0x106   : > { %1069 = vrot.lane.b32.xlu0 %v985_v6, %s6726_s11  ;;  %1071 = vrot.lane.b32.xlu1 %v986_v7, %s6726_s11 }
 0x108   : > { %v700_v12 = vpop.permute.xlu0 %699  ;;  %v702_v14 = vpop.permute.xlu1 %701 }
 0x109   : > { %768 = vst.msk [vmem:[#allocation2 + $0xe0] sm:$0xff] %vm739_vm2, %v700_v12  ;;  %769 = vst.msk [vmem:[#allocation2 + $0xe8] sm:$0xff] %vm739_vm2, %v702_v14  ;;  %v5818_v12 = vld [vmem:[%s6839_s7 + $0x61] sm:$0xff]  ;;  %v5819_v14 = vld [vmem:[%s6839_s7 + $0x69] sm:$0xff] }
 0x10a   : > { %1073 = vrot.lane.b32.xlu0 %v987_v10, %s6726_s11  ;;  %1075 = vrot.lane.b32.xlu1 %v988_v11, %s6726_s11 }
 0x10c   : > { %v704_v21 = vpop.permute.xlu0 %703  ;;  %v706_v22 = vpop.permute.xlu1 %705 }
 0x10d   : > { %770 = vst.msk [vmem:[#allocation2 + $0xf0] sm:$0xff] %vm739_vm2, %v704_v21  ;;  %771 = vst.msk [vmem:[#allocation2 + $0xf8] sm:$0xff] %vm739_vm2, %v706_v22  ;;  %v5820_v21 = vld [vmem:[%s6839_s7 + $0x79] sm:$0xff]  ;;  %v5821_v22 = vld [vmem:[%s6839_s7 + $0x81] sm:$0xff]  ;;  %vm5168_vm2 = vcmask 1043456  }
 0x10e   : > { %1077 = vrot.lane.b32.xlu0 %v989_v15, %s6726_s11  ;;  %1079 = vrot.lane.b32.xlu1 %v990_v16, %s6726_s11 }
 0x110   : > { %v837_v35 = vpop.permute.xlu0 %836  ;;  %v839_v37 = vpop.permute.xlu1 %838 }
 0x111   : > { %933 = vst.msk [vmem:[#allocation2] sm:$0xff] %vm932_vm3, %v837_v35  ;;  %934 = vst.msk [vmem:[#allocation2 + $0x8] sm:$0xff] %vm932_vm3, %v839_v37  ;;  %v5822_v35 = vld [vmem:[%s6839_s7 + $0x91] sm:$0xff]  ;;  %v5823_v37 = vld [vmem:[%s6839_s7 + $0x99] sm:$0xff] }
 0x112   : > { %1081 = vrot.lane.b32.xlu0 %v991_v28, %s6726_s11  ;;  %1083 = vrot.lane.b32.xlu1 %v992_v29, %s6726_s11 }
 0x114   : > { %v841_v50 = vpop.permute.xlu0 %840  ;;  %v843_v51 = vpop.permute.xlu1 %842 }
 0x115   : > { %935 = vst.msk [vmem:[#allocation2 + $0x10] sm:$0xff] %vm932_vm3, %v841_v50  ;;  %936 = vst.msk [vmem:[#allocation2 + $0x18] sm:$0xff] %vm932_vm3, %v843_v51  ;;  %v5824_v50 = vld [vmem:[%s6839_s7 + $0xa9] sm:$0xff]  ;;  %v5825_v51 = vld [vmem:[%s6839_s7 + $0xb1] sm:$0xff] }
 0x116   : > { %1085 = vrot.lane.b32.xlu0 %v993_v44, %s6726_s11  ;;  %1087 = vrot.lane.b32.xlu1 %v994_v45, %s6726_s11 }
 0x118   : > { %v845_v58 = vpop.permute.xlu0 %844  ;;  %v847_v59 = vpop.permute.xlu1 %846 }
 0x119   : > { %937 = vst.msk [vmem:[#allocation2 + $0x20] sm:$0xff] %vm932_vm3, %v845_v58  ;;  %938 = vst.msk [vmem:[#allocation2 + $0x28] sm:$0xff] %vm932_vm3, %v847_v59  ;;  %v5826_v58 = vld [vmem:[%s6839_s7 + $0xc1] sm:$0xff]  ;;  %v5827_v59 = vld [vmem:[%s6839_s7 + $0xc9] sm:$0xff] }
 0x11a   : > { %1089 = vrot.lane.b32.xlu0 %v995_v54, %s6726_s11  ;;  %1091 = vrot.lane.b32.xlu1 %v996_v55, %s6726_s11  ;;  %s6737_s11 = smov 60  }
 0x11c   : > { %v849_v60 = vpop.permute.xlu0 %848  ;;  %v851_v61 = vpop.permute.xlu1 %850 }
 0x11d   : > { %939 = vst.msk [vmem:[#allocation2 + $0x30] sm:$0xff] %vm932_vm3, %v849_v60  ;;  %940 = vst.msk [vmem:[#allocation2 + $0x38] sm:$0xff] %vm932_vm3, %v851_v61 }
 0x11e   : > { %1219 = vrot.lane.b32.xlu0 %v6867_v13, %s6727_s12  ;;  %1221 = vrot.lane.b32.xlu1 %v6877_v17, %s6727_s12 }
 0x120   : > { %v853_v62 = vpop.permute.xlu0 %852  ;;  %v855_v63 = vpop.permute.xlu1 %854 }
 0x121   : > { %941 = vst.msk [vmem:[#allocation2 + $0x40] sm:$0xff] %vm932_vm3, %v853_v62  ;;  %942 = vst.msk [vmem:[#allocation2 + $0x48] sm:$0xff] %vm932_vm3, %v855_v63  ;;  %v5828_v62 = vld [vmem:[%s6839_s7 + $0xd9] sm:$0xff]  ;;  %v5829_v63 = vld [vmem:[%s6839_s7 + $0xe1] sm:$0xff] }
 0x122   : > { %1223 = vrot.lane.b32.xlu0 %v6882_v18, %s6727_s12  ;;  %1225 = vrot.lane.b32.xlu1 %v6885_v19, %s6727_s12 }
 0x124   : > { %v857_v0 = vpop.permute.xlu0 %856  ;;  %v859_v1 = vpop.permute.xlu1 %858 }
 0x125   : > { %943 = vst.msk [vmem:[#allocation2 + $0x50] sm:$0xff] %vm932_vm3, %v857_v0  ;;  %944 = vst.msk [vmem:[#allocation2 + $0x58] sm:$0xff] %vm932_vm3, %v859_v1 }
 0x126   : > { %1227 = vrot.lane.b32.xlu0 %v6894_v20, %s6727_s12  ;;  %1229 = vrot.lane.b32.xlu1 %v6901_v23, %s6727_s12 }
 0x128   : > { %v861_v13 = vpop.permute.xlu0 %860  ;;  %v863_v17 = vpop.permute.xlu1 %862 }
 0x129   : > { %945 = vst.msk [vmem:[#allocation2 + $0x60] sm:$0xff] %vm932_vm3, %v861_v13  ;;  %946 = vst.msk [vmem:[#allocation2 + $0x68] sm:$0xff] %vm932_vm3, %v863_v17  ;;  %v5830_v13 = vld [vmem:[%s6839_s7 + $0xf1] sm:$0xff]  ;;  %v5831_v17 = vld [vmem:[%s6839_s7 + $0xf9] sm:$0xff] }
 0x12a   : > { %1231 = vrot.lane.b32.xlu0 %v6906_v24, %s6727_s12  ;;  %1233 = vrot.lane.b32.xlu1 %v6909_v25, %s6727_s12 }
 0x12c   : > { %v865_v18 = vpop.permute.xlu0 %864  ;;  %v867_v19 = vpop.permute.xlu1 %866 }
 0x12d   : > { %947 = vst.msk [vmem:[#allocation2 + $0x70] sm:$0xff] %vm932_vm3, %v865_v18  ;;  %948 = vst.msk [vmem:[#allocation2 + $0x78] sm:$0xff] %vm932_vm3, %v867_v19 }
 0x12e   : > { %1235 = vrot.lane.b32.xlu0 %v6916_v26, %s6727_s12  ;;  %1237 = vrot.lane.b32.xlu1 %v6919_v27, %s6727_s12 }
 0x130   : > { %v869_v20 = vpop.permute.xlu0 %868  ;;  %v871_v23 = vpop.permute.xlu1 %870 }
 0x131   : > { %949 = vst.msk [vmem:[#allocation2 + $0x80] sm:$0xff] %vm932_vm3, %v869_v20  ;;  %950 = vst.msk [vmem:[#allocation2 + $0x88] sm:$0xff] %vm932_vm3, %v871_v23  ;;  %v5832_v20 = vld [vmem:[%s6839_s7 + $0x109] sm:$0xff]  ;;  %v5833_v23 = vld [vmem:[%s6839_s7 + $0x111] sm:$0xff] }
 0x132   : > { %1239 = vrot.lane.b32.xlu0 %v6930_v30, %s6727_s12  ;;  %1241 = vrot.lane.b32.xlu1 %v6933_v31, %s6727_s12 }
 0x134   : > { %v873_v24 = vpop.permute.xlu0 %872  ;;  %v875_v25 = vpop.permute.xlu1 %874 }
 0x135   : > { %951 = vst.msk [vmem:[#allocation2 + $0x90] sm:$0xff] %vm932_vm3, %v873_v24  ;;  %952 = vst.msk [vmem:[#allocation2 + $0x98] sm:$0xff] %vm932_vm3, %v875_v25 }
 0x136   : > { %1243 = vrot.lane.b32.xlu0 %v6940_v32, %s6727_s12  ;;  %1245 = vrot.lane.b32.xlu1 %v6943_v33, %s6727_s12 }
 0x138   : > { %v877_v26 = vpop.permute.xlu0 %876  ;;  %v879_v27 = vpop.permute.xlu1 %878 }
 0x139   : > { %953 = vst.msk [vmem:[#allocation2 + $0xa0] sm:$0xff] %vm932_vm3, %v877_v26  ;;  %954 = vst.msk [vmem:[#allocation2 + $0xa8] sm:$0xff] %vm932_vm3, %v879_v27  ;;  %v5834_v26 = vld [vmem:[%s6839_s7 + $0x121] sm:$0xff]  ;;  %v5835_v27 = vld [vmem:[%s6839_s7 + $0x129] sm:$0xff] }
 0x13a   : > { %1247 = vrot.lane.b32.xlu0 %v6950_v34, %s6727_s12  ;;  %1249 = vrot.lane.b32.xlu1 %v6958_v36, %s6727_s12 }
 0x13c   : > { %v881_v30 = vpop.permute.xlu0 %880  ;;  %v883_v31 = vpop.permute.xlu1 %882 }
 0x13d   : > { %955 = vst.msk [vmem:[#allocation2 + $0xb0] sm:$0xff] %vm932_vm3, %v881_v30  ;;  %956 = vst.msk [vmem:[#allocation2 + $0xb8] sm:$0xff] %vm932_vm3, %v883_v31 }
 0x13e   : > { %1251 = vrot.lane.b32.xlu0 %v6964_v38, %s6727_s12  ;;  %1253 = vrot.lane.b32.xlu1 %v6967_v39, %s6727_s12 }
 0x140   : > { %v885_v32 = vpop.permute.xlu0 %884  ;;  %v887_v33 = vpop.permute.xlu1 %886 }
 0x141   : > { %957 = vst.msk [vmem:[#allocation2 + $0xc0] sm:$0xff] %vm932_vm3, %v885_v32  ;;  %958 = vst.msk [vmem:[#allocation2 + $0xc8] sm:$0xff] %vm932_vm3, %v887_v33  ;;  %v5836_v32 = vld [vmem:[%s6839_s7 + $0x139] sm:$0xff]  ;;  %v5837_v33 = vld [vmem:[%s6839_s7 + $0x141] sm:$0xff] }
 0x142   : > { %1255 = vrot.lane.b32.xlu0 %v6974_v40, %s6727_s12  ;;  %1257 = vrot.lane.b32.xlu1 %v6979_v41, %s6727_s12 }
 0x144   : > { %v889_v34 = vpop.permute.xlu0 %888  ;;  %v891_v36 = vpop.permute.xlu1 %890 }
 0x145   : > { %959 = vst.msk [vmem:[#allocation2 + $0xd0] sm:$0xff] %vm932_vm3, %v889_v34  ;;  %960 = vst.msk [vmem:[#allocation2 + $0xd8] sm:$0xff] %vm932_vm3, %v891_v36 }
 0x146   : > { %1259 = vrot.lane.b32.xlu0 %v6986_v42, %s6727_s12  ;;  %1261 = vrot.lane.b32.xlu1 %v6989_v43, %s6727_s12 }
 0x148   : > { %v893_v38 = vpop.permute.xlu0 %892  ;;  %v895_v39 = vpop.permute.xlu1 %894 }
 0x149   : > { %961 = vst.msk [vmem:[#allocation2 + $0xe0] sm:$0xff] %vm932_vm3, %v893_v38  ;;  %962 = vst.msk [vmem:[#allocation2 + $0xe8] sm:$0xff] %vm932_vm3, %v895_v39  ;;  %v5838_v38 = vld [vmem:[%s6839_s7 + $0x151] sm:$0xff]  ;;  %v5839_v39 = vld [vmem:[%s6839_s7 + $0x159] sm:$0xff] }
 0x14a   : > { %1263 = vrot.lane.b32.xlu0 %v6998_v46, %s6727_s12  ;;  %1265 = vrot.lane.b32.xlu1 %v7003_v47, %s6727_s12 }
 0x14c   : > { %v897_v40 = vpop.permute.xlu0 %896  ;;  %v899_v41 = vpop.permute.xlu1 %898 }
 0x14d   : > { %963 = vst.msk [vmem:[#allocation2 + $0xf0] sm:$0xff] %vm932_vm3, %v897_v40  ;;  %964 = vst.msk [vmem:[#allocation2 + $0xf8] sm:$0xff] %vm932_vm3, %v899_v41  ;;  %vm3803_vm3 = vcmask 622144  }
 0x14e   : > { %1267 = vrot.lane.b32.xlu0 %v7008_v48, %s6727_s12  ;;  %1269 = vrot.lane.b32.xlu1 %v7011_v49, %s6727_s12  ;;  %v1340_v48 = vld [vmem:[%s7410_s22] sm:$0xff]  ;;  %v1341_v49 = vld [vmem:[%s7410_s22 + $0x8] sm:$0xff] }
 0x150   : > { %v1030_v42 = vpop.permute.xlu0 %1029  ;;  %v1032_v43 = vpop.permute.xlu1 %1031 }
 0x151   : > { %1126 = vst.msk [vmem:[#allocation2] sm:$0xff] %vm1125_vm4, %v1030_v42  ;;  %1127 = vst.msk [vmem:[#allocation2 + $0x8] sm:$0xff] %vm1125_vm4, %v1032_v43  ;;  %v5840_v42 = vld [vmem:[%s6839_s7 + $0x169] sm:$0xff]  ;;  %v5841_v43 = vld [vmem:[%s6839_s7 + $0x171] sm:$0xff] }
 0x152   : > { %1271 = vrot.lane.b32.xlu0 %v7022_v52, %s6727_s12  ;;  %1273 = vrot.lane.b32.xlu1 %v7027_v53, %s6727_s12 }
 0x154   : > { %v1034_v46 = vpop.permute.xlu0 %1033  ;;  %v1036_v47 = vpop.permute.xlu1 %1035 }
 0x155   : > { %1128 = vst.msk [vmem:[#allocation2 + $0x10] sm:$0xff] %vm1125_vm4, %v1034_v46  ;;  %1129 = vst.msk [vmem:[#allocation2 + $0x18] sm:$0xff] %vm1125_vm4, %v1036_v47 }
 0x156   : > { %1275 = vrot.lane.b32.xlu0 %v7036_v56, %s6727_s12  ;;  %1277 = vrot.lane.b32.xlu1 %v7041_v57, %s6727_s12 }
 0x158   : > { %v1038_v52 = vpop.permute.xlu0 %1037  ;;  %v1040_v53 = vpop.permute.xlu1 %1039 }
 0x159   : > { %1130 = vst.msk [vmem:[#allocation2 + $0x20] sm:$0xff] %vm1125_vm4, %v1038_v52  ;;  %1131 = vst.msk [vmem:[#allocation2 + $0x28] sm:$0xff] %vm1125_vm4, %v1040_v53 }
 0x15a   : > { %1344 = vrot.lane.b32.xlu0 %v1340_v48, %s6727_s12  ;;  %1346 = vrot.lane.b32.xlu1 %v1341_v49, %s6727_s12  ;;  %v1534_v48 = vld [vmem:[%s7410_s22 + $0x1] sm:$0xff]  ;;  %v1535_v49 = vld [vmem:[%s7410_s22 + $0x9] sm:$0xff]  ;;  %s6738_s12 = smov 64  }
 0x15c   : > { %v1042_v56 = vpop.permute.xlu0 %1041  ;;  %v1044_v57 = vpop.permute.xlu1 %1043 }
 0x15d   : > { %1132 = vst.msk [vmem:[#allocation2 + $0x30] sm:$0xff] %vm1125_vm4, %v1042_v56  ;;  %1133 = vst.msk [vmem:[#allocation2 + $0x38] sm:$0xff] %vm1125_vm4, %v1044_v57 }
 0x15e   : > { %1413 = vrot.lane.b32.xlu0 %v5812_v2, %s6728_s24  ;;  %1415 = vrot.lane.b32.xlu1 %v5813_v3, %s6728_s24  ;;  %v5842_v2 = vld [vmem:[%s6839_s7 + $0x1a] sm:$0xff]  ;;  %v5843_v3 = vld [vmem:[%s6839_s7 + $0x22] sm:$0xff] }
 0x160   : > { %v1046_v6 = vpop.permute.xlu0 %1045  ;;  %v1048_v7 = vpop.permute.xlu1 %1047 }
 0x161   : > { %1134 = vst.msk [vmem:[#allocation2 + $0x40] sm:$0xff] %vm1125_vm4, %v1046_v6  ;;  %1135 = vst.msk [vmem:[#allocation2 + $0x48] sm:$0xff] %vm1125_vm4, %v1048_v7 }
 0x162   : > { %1417 = vrot.lane.b32.xlu0 %v5814_v4, %s6728_s24  ;;  %1419 = vrot.lane.b32.xlu1 %v5815_v5, %s6728_s24  ;;  %v5844_v4 = vld [vmem:[%s6839_s7 + $0x32] sm:$0xff]  ;;  %v5845_v5 = vld [vmem:[%s6839_s7 + $0x3a] sm:$0xff] }
 0x164   : > { %v1050_v10 = vpop.permute.xlu0 %1049  ;;  %v1052_v11 = vpop.permute.xlu1 %1051 }
 0x165   : > { %1136 = vst.msk [vmem:[#allocation2 + $0x50] sm:$0xff] %vm1125_vm4, %v1050_v10  ;;  %1137 = vst.msk [vmem:[#allocation2 + $0x58] sm:$0xff] %vm1125_vm4, %v1052_v11 }
 0x166   : > { %1421 = vrot.lane.b32.xlu0 %v5816_v8, %s6728_s24  ;;  %1423 = vrot.lane.b32.xlu1 %v5817_v9, %s6728_s24  ;;  %v5846_v8 = vld [vmem:[%s6839_s7 + $0x4a] sm:$0xff]  ;;  %v5847_v9 = vld [vmem:[%s6839_s7 + $0x52] sm:$0xff] }
 0x168   : > { %v1054_v15 = vpop.permute.xlu0 %1053  ;;  %v1056_v16 = vpop.permute.xlu1 %1055 }
 0x169   : > { %1138 = vst.msk [vmem:[#allocation2 + $0x60] sm:$0xff] %vm1125_vm4, %v1054_v15  ;;  %1139 = vst.msk [vmem:[#allocation2 + $0x68] sm:$0xff] %vm1125_vm4, %v1056_v16 }
 0x16a   : > { %1425 = vrot.lane.b32.xlu0 %v5818_v12, %s6728_s24  ;;  %1427 = vrot.lane.b32.xlu1 %v5819_v14, %s6728_s24  ;;  %v5848_v12 = vld [vmem:[%s6839_s7 + $0x62] sm:$0xff]  ;;  %v5849_v14 = vld [vmem:[%s6839_s7 + $0x6a] sm:$0xff] }
 0x16c   : > { %v1058_v28 = vpop.permute.xlu0 %1057  ;;  %v1060_v29 = vpop.permute.xlu1 %1059 }
 0x16d   : > { %1140 = vst.msk [vmem:[#allocation2 + $0x70] sm:$0xff] %vm1125_vm4, %v1058_v28  ;;  %1141 = vst.msk [vmem:[#allocation2 + $0x78] sm:$0xff] %vm1125_vm4, %v1060_v29 }
 0x16e   : > { %1429 = vrot.lane.b32.xlu0 %v5820_v21, %s6728_s24  ;;  %1431 = vrot.lane.b32.xlu1 %v5821_v22, %s6728_s24  ;;  %v5850_v21 = vld [vmem:[%s6839_s7 + $0x7a] sm:$0xff]  ;;  %v5851_v22 = vld [vmem:[%s6839_s7 + $0x82] sm:$0xff] }
 0x170   : > { %v1062_v44 = vpop.permute.xlu0 %1061  ;;  %v1064_v45 = vpop.permute.xlu1 %1063 }
 0x171   : > { %1142 = vst.msk [vmem:[#allocation2 + $0x80] sm:$0xff] %vm1125_vm4, %v1062_v44  ;;  %1143 = vst.msk [vmem:[#allocation2 + $0x88] sm:$0xff] %vm1125_vm4, %v1064_v45 }
 0x172   : > { %1433 = vrot.lane.b32.xlu0 %v5822_v35, %s6728_s24  ;;  %1435 = vrot.lane.b32.xlu1 %v5823_v37, %s6728_s24  ;;  %v5852_v35 = vld [vmem:[%s6839_s7 + $0x92] sm:$0xff]  ;;  %v5853_v37 = vld [vmem:[%s6839_s7 + $0x9a] sm:$0xff] }
 0x174   : > { %v1066_v54 = vpop.permute.xlu0 %1065  ;;  %v1068_v55 = vpop.permute.xlu1 %1067 }
 0x175   : > { %1144 = vst.msk [vmem:[#allocation2 + $0x90] sm:$0xff] %vm1125_vm4, %v1066_v54  ;;  %1145 = vst.msk [vmem:[#allocation2 + $0x98] sm:$0xff] %vm1125_vm4, %v1068_v55 }
 0x176   : > { %1437 = vrot.lane.b32.xlu0 %v5824_v50, %s6728_s24  ;;  %1439 = vrot.lane.b32.xlu1 %v5825_v51, %s6728_s24  ;;  %v5854_v50 = vld [vmem:[%s6839_s7 + $0xaa] sm:$0xff]  ;;  %v5855_v51 = vld [vmem:[%s6839_s7 + $0xb2] sm:$0xff] }
 0x178   : > { %v1070_v60 = vpop.permute.xlu0 %1069  ;;  %v1072_v61 = vpop.permute.xlu1 %1071 }
 0x179   : > { %1146 = vst.msk [vmem:[#allocation2 + $0xa0] sm:$0xff] %vm1125_vm4, %v1070_v60  ;;  %1147 = vst.msk [vmem:[#allocation2 + $0xa8] sm:$0xff] %vm1125_vm4, %v1072_v61 }
 0x17a   : > { %1441 = vrot.lane.b32.xlu0 %v5826_v58, %s6728_s24  ;;  %1443 = vrot.lane.b32.xlu1 %v5827_v59, %s6728_s24  ;;  %v5856_v58 = vld [vmem:[%s6839_s7 + $0xc2] sm:$0xff]  ;;  %v5857_v59 = vld [vmem:[%s6839_s7 + $0xca] sm:$0xff] }
 0x17c   : > { %v1074_v0 = vpop.permute.xlu0 %1073  ;;  %v1076_v1 = vpop.permute.xlu1 %1075 }
 0x17d   : > { %1148 = vst.msk [vmem:[#allocation2 + $0xb0] sm:$0xff] %vm1125_vm4, %v1074_v0  ;;  %1149 = vst.msk [vmem:[#allocation2 + $0xb8] sm:$0xff] %vm1125_vm4, %v1076_v1 }
 0x17e   : > { %1445 = vrot.lane.b32.xlu0 %v5828_v62, %s6728_s24  ;;  %1447 = vrot.lane.b32.xlu1 %v5829_v63, %s6728_s24  ;;  %v5858_v62 = vld [vmem:[%s6839_s7 + $0xda] sm:$0xff]  ;;  %v5859_v63 = vld [vmem:[%s6839_s7 + $0xe2] sm:$0xff] }
 0x180   : > { %v1078_v18 = vpop.permute.xlu0 %1077  ;;  %v1080_v19 = vpop.permute.xlu1 %1079 }
 0x181   : > { %1150 = vst.msk [vmem:[#allocation2 + $0xc0] sm:$0xff] %vm1125_vm4, %v1078_v18  ;;  %1151 = vst.msk [vmem:[#allocation2 + $0xc8] sm:$0xff] %vm1125_vm4, %v1080_v19 }
 0x182   : > { %1449 = vrot.lane.b32.xlu0 %v5830_v13, %s6728_s24  ;;  %1451 = vrot.lane.b32.xlu1 %v5831_v17, %s6728_s24  ;;  %v5860_v13 = vld [vmem:[%s6839_s7 + $0xf2] sm:$0xff]  ;;  %v5861_v17 = vld [vmem:[%s6839_s7 + $0xfa] sm:$0xff] }
 0x184   : > { %v1082_v24 = vpop.permute.xlu0 %1081  ;;  %v1084_v25 = vpop.permute.xlu1 %1083 }
 0x185   : > { %1152 = vst.msk [vmem:[#allocation2 + $0xd0] sm:$0xff] %vm1125_vm4, %v1082_v24  ;;  %1153 = vst.msk [vmem:[#allocation2 + $0xd8] sm:$0xff] %vm1125_vm4, %v1084_v25 }
 0x186   : > { %1453 = vrot.lane.b32.xlu0 %v5832_v20, %s6728_s24  ;;  %1455 = vrot.lane.b32.xlu1 %v5833_v23, %s6728_s24  ;;  %v5862_v20 = vld [vmem:[%s6839_s7 + $0x10a] sm:$0xff]  ;;  %v5863_v23 = vld [vmem:[%s6839_s7 + $0x112] sm:$0xff] }
 0x188   : > { %v1086_v30 = vpop.permute.xlu0 %1085  ;;  %v1088_v31 = vpop.permute.xlu1 %1087 }
 0x189   : > { %1154 = vst.msk [vmem:[#allocation2 + $0xe0] sm:$0xff] %vm1125_vm4, %v1086_v30  ;;  %1155 = vst.msk [vmem:[#allocation2 + $0xe8] sm:$0xff] %vm1125_vm4, %v1088_v31 }
 0x18a   : > { %1457 = vrot.lane.b32.xlu0 %v5834_v26, %s6728_s24  ;;  %1459 = vrot.lane.b32.xlu1 %v5835_v27, %s6728_s24  ;;  %v5864_v26 = vld [vmem:[%s6839_s7 + $0x122] sm:$0xff]  ;;  %v5865_v27 = vld [vmem:[%s6839_s7 + $0x12a] sm:$0xff] }
 0x18c   : > { %v1090_v34 = vpop.permute.xlu0 %1089  ;;  %v1092_v36 = vpop.permute.xlu1 %1091 }
 0x18d   : > { %1156 = vst.msk [vmem:[#allocation2 + $0xf0] sm:$0xff] %vm1125_vm4, %v1090_v34  ;;  %1157 = vst.msk [vmem:[#allocation2 + $0xf8] sm:$0xff] %vm1125_vm4, %v1092_v36  ;;  %vm3996_vm4 = vcmask 654944  }
 0x18e   : > { %1461 = vrot.lane.b32.xlu0 %v5836_v32, %s6728_s24  ;;  %1463 = vrot.lane.b32.xlu1 %v5837_v33, %s6728_s24  ;;  %v5866_v32 = vld [vmem:[%s6839_s7 + $0x13a] sm:$0xff]  ;;  %v5867_v33 = vld [vmem:[%s6839_s7 + $0x142] sm:$0xff] }
 0x190   : > { %v1220_v40 = vpop.permute.xlu0 %1219  ;;  %v1222_v41 = vpop.permute.xlu1 %1221 }
 0x191   : > { %1310 = vst.msk [vmem:[#allocation2] sm:$0xff] %vm1309_vm5, %v1220_v40  ;;  %1311 = vst.msk [vmem:[#allocation2 + $0x8] sm:$0xff] %vm1309_vm5, %v1222_v41 }
 0x192   : > { %1465 = vrot.lane.b32.xlu0 %v5838_v38, %s6728_s24  ;;  %1467 = vrot.lane.b32.xlu1 %v5839_v39, %s6728_s24  ;;  %v5868_v38 = vld [vmem:[%s6839_s7 + $0x152] sm:$0xff]  ;;  %v5869_v39 = vld [vmem:[%s6839_s7 + $0x15a] sm:$0xff] }
 0x194   : > { %v1224_v46 = vpop.permute.xlu0 %1223  ;;  %v1226_v47 = vpop.permute.xlu1 %1225 }
 0x195   : > { %1312 = vst.msk [vmem:[#allocation2 + $0x10] sm:$0xff] %vm1309_vm5, %v1224_v46  ;;  %1313 = vst.msk [vmem:[#allocation2 + $0x18] sm:$0xff] %vm1309_vm5, %v1226_v47 }
 0x196   : > { %1469 = vrot.lane.b32.xlu0 %v5840_v42, %s6728_s24  ;;  %1471 = vrot.lane.b32.xlu1 %v5841_v43, %s6728_s24  ;;  %v5870_v42 = vld [vmem:[%s6839_s7 + $0x16a] sm:$0xff]  ;;  %v5871_v43 = vld [vmem:[%s6839_s7 + $0x172] sm:$0xff] }
 0x198   : > { %v1228_v52 = vpop.permute.xlu0 %1227  ;;  %v1230_v53 = vpop.permute.xlu1 %1229 }
 0x199   : > { %1314 = vst.msk [vmem:[#allocation2 + $0x20] sm:$0xff] %vm1309_vm5, %v1228_v52  ;;  %1315 = vst.msk [vmem:[#allocation2 + $0x28] sm:$0xff] %vm1309_vm5, %v1230_v53 }
 0x19a   : > { %1538 = vrot.lane.b32.xlu0 %v1534_v48, %s6728_s24  ;;  %1540 = vrot.lane.b32.xlu1 %v1535_v49, %s6728_s24  ;;  %v1727_v48 = vld [vmem:[%s7410_s22 + $0x2] sm:$0xff]  ;;  %v1728_v49 = vld [vmem:[%s7410_s22 + $0xa] sm:$0xff] }
 0x19c   : > { %v1232_v56 = vpop.permute.xlu0 %1231  ;;  %v1234_v57 = vpop.permute.xlu1 %1233 }
 0x19d   : > { %1316 = vst.msk [vmem:[#allocation2 + $0x30] sm:$0xff] %vm1309_vm5, %v1232_v56  ;;  %1317 = vst.msk [vmem:[#allocation2 + $0x38] sm:$0xff] %vm1309_vm5, %v1234_v57 }
 0x19e   : > { %1606 = vrot.lane.b32.xlu0 %v5842_v2, %s6729_s26  ;;  %1608 = vrot.lane.b32.xlu1 %v5843_v3, %s6729_s26  ;;  %v5872_v2 = vld [vmem:[%s6839_s7 + $0x1b] sm:$0xff]  ;;  %v5873_v3 = vld [vmem:[%s6839_s7 + $0x23] sm:$0xff] }
 0x1a0   : > { %v1236_v6 = vpop.permute.xlu0 %1235  ;;  %v1238_v7 = vpop.permute.xlu1 %1237 }
 0x1a1   : > { %1318 = vst.msk [vmem:[#allocation2 + $0x40] sm:$0xff] %vm1309_vm5, %v1236_v6  ;;  %1319 = vst.msk [vmem:[#allocation2 + $0x48] sm:$0xff] %vm1309_vm5, %v1238_v7 }
 0x1a2   : > { %1610 = vrot.lane.b32.xlu0 %v5844_v4, %s6729_s26  ;;  %1612 = vrot.lane.b32.xlu1 %v5845_v5, %s6729_s26  ;;  %v5874_v4 = vld [vmem:[%s6839_s7 + $0x33] sm:$0xff]  ;;  %v5875_v5 = vld [vmem:[%s6839_s7 + $0x3b] sm:$0xff] }
 0x1a4   : > { %v1240_v10 = vpop.permute.xlu0 %1239  ;;  %v1242_v11 = vpop.permute.xlu1 %1241 }
 0x1a5   : > { %1320 = vst.msk [vmem:[#allocation2 + $0x50] sm:$0xff] %vm1309_vm5, %v1240_v10  ;;  %1321 = vst.msk [vmem:[#allocation2 + $0x58] sm:$0xff] %vm1309_vm5, %v1242_v11 }
 0x1a6   : > { %1614 = vrot.lane.b32.xlu0 %v5846_v8, %s6729_s26  ;;  %1616 = vrot.lane.b32.xlu1 %v5847_v9, %s6729_s26  ;;  %v5876_v8 = vld [vmem:[%s6839_s7 + $0x4b] sm:$0xff]  ;;  %v5877_v9 = vld [vmem:[%s6839_s7 + $0x53] sm:$0xff] }
 0x1a8   : > { %v1244_v15 = vpop.permute.xlu0 %1243  ;;  %v1246_v16 = vpop.permute.xlu1 %1245 }
 0x1a9   : > { %1322 = vst.msk [vmem:[#allocation2 + $0x60] sm:$0xff] %vm1309_vm5, %v1244_v15  ;;  %1323 = vst.msk [vmem:[#allocation2 + $0x68] sm:$0xff] %vm1309_vm5, %v1246_v16 }
 0x1aa   : > { %1618 = vrot.lane.b32.xlu0 %v5848_v12, %s6729_s26  ;;  %1620 = vrot.lane.b32.xlu1 %v5849_v14, %s6729_s26  ;;  %v5878_v12 = vld [vmem:[%s6839_s7 + $0x63] sm:$0xff]  ;;  %v5879_v14 = vld [vmem:[%s6839_s7 + $0x6b] sm:$0xff] }
 0x1ac   : > { %v1248_v28 = vpop.permute.xlu0 %1247  ;;  %v1250_v29 = vpop.permute.xlu1 %1249 }
 0x1ad   : > { %1324 = vst.msk [vmem:[#allocation2 + $0x70] sm:$0xff] %vm1309_vm5, %v1248_v28  ;;  %1325 = vst.msk [vmem:[#allocation2 + $0x78] sm:$0xff] %vm1309_vm5, %v1250_v29 }
 0x1ae   : > { %1622 = vrot.lane.b32.xlu0 %v5850_v21, %s6729_s26  ;;  %1624 = vrot.lane.b32.xlu1 %v5851_v22, %s6729_s26  ;;  %v5880_v21 = vld [vmem:[%s6839_s7 + $0x7b] sm:$0xff]  ;;  %v5881_v22 = vld [vmem:[%s6839_s7 + $0x83] sm:$0xff] }
 0x1b0   : > { %v1252_v44 = vpop.permute.xlu0 %1251  ;;  %v1254_v45 = vpop.permute.xlu1 %1253 }
 0x1b1   : > { %1326 = vst.msk [vmem:[#allocation2 + $0x80] sm:$0xff] %vm1309_vm5, %v1252_v44  ;;  %1327 = vst.msk [vmem:[#allocation2 + $0x88] sm:$0xff] %vm1309_vm5, %v1254_v45 }
 0x1b2   : > { %1626 = vrot.lane.b32.xlu0 %v5852_v35, %s6729_s26  ;;  %1628 = vrot.lane.b32.xlu1 %v5853_v37, %s6729_s26  ;;  %v5882_v35 = vld [vmem:[%s6839_s7 + $0x93] sm:$0xff]  ;;  %v5883_v37 = vld [vmem:[%s6839_s7 + $0x9b] sm:$0xff] }
 0x1b4   : > { %v1256_v54 = vpop.permute.xlu0 %1255  ;;  %v1258_v55 = vpop.permute.xlu1 %1257 }
 0x1b5   : > { %1328 = vst.msk [vmem:[#allocation2 + $0x90] sm:$0xff] %vm1309_vm5, %v1256_v54  ;;  %1329 = vst.msk [vmem:[#allocation2 + $0x98] sm:$0xff] %vm1309_vm5, %v1258_v55 }
 0x1b6   : > { %1630 = vrot.lane.b32.xlu0 %v5854_v50, %s6729_s26  ;;  %1632 = vrot.lane.b32.xlu1 %v5855_v51, %s6729_s26  ;;  %v5884_v50 = vld [vmem:[%s6839_s7 + $0xab] sm:$0xff]  ;;  %v5885_v51 = vld [vmem:[%s6839_s7 + $0xb3] sm:$0xff] }
 0x1b8   : > { %v1260_v60 = vpop.permute.xlu0 %1259  ;;  %v1262_v61 = vpop.permute.xlu1 %1261 }
 0x1b9   : > { %1330 = vst.msk [vmem:[#allocation2 + $0xa0] sm:$0xff] %vm1309_vm5, %v1260_v60  ;;  %1331 = vst.msk [vmem:[#allocation2 + $0xa8] sm:$0xff] %vm1309_vm5, %v1262_v61 }
 0x1ba   : > { %1634 = vrot.lane.b32.xlu0 %v5856_v58, %s6729_s26  ;;  %1636 = vrot.lane.b32.xlu1 %v5857_v59, %s6729_s26  ;;  %v5886_v58 = vld [vmem:[%s6839_s7 + $0xc3] sm:$0xff]  ;;  %v5887_v59 = vld [vmem:[%s6839_s7 + $0xcb] sm:$0xff] }
 0x1bc   : > { %v1264_v0 = vpop.permute.xlu0 %1263  ;;  %v1266_v1 = vpop.permute.xlu1 %1265 }
 0x1bd   : > { %1332 = vst.msk [vmem:[#allocation2 + $0xb0] sm:$0xff] %vm1309_vm5, %v1264_v0  ;;  %1333 = vst.msk [vmem:[#allocation2 + $0xb8] sm:$0xff] %vm1309_vm5, %v1266_v1 }
 0x1be   : > { %1638 = vrot.lane.b32.xlu0 %v5858_v62, %s6729_s26  ;;  %1640 = vrot.lane.b32.xlu1 %v5859_v63, %s6729_s26  ;;  %v5888_v62 = vld [vmem:[%s6839_s7 + $0xdb] sm:$0xff]  ;;  %v5889_v63 = vld [vmem:[%s6839_s7 + $0xe3] sm:$0xff] }
 0x1c0   : > { %v1268_v18 = vpop.permute.xlu0 %1267  ;;  %v1270_v19 = vpop.permute.xlu1 %1269 }
 0x1c1   : > { %1334 = vst.msk [vmem:[#allocation2 + $0xc0] sm:$0xff] %vm1309_vm5, %v1268_v18  ;;  %1335 = vst.msk [vmem:[#allocation2 + $0xc8] sm:$0xff] %vm1309_vm5, %v1270_v19 }
 0x1c2   : > { %1642 = vrot.lane.b32.xlu0 %v5860_v13, %s6729_s26  ;;  %1644 = vrot.lane.b32.xlu1 %v5861_v17, %s6729_s26  ;;  %v5890_v13 = vld [vmem:[%s6839_s7 + $0xf3] sm:$0xff]  ;;  %v5891_v17 = vld [vmem:[%s6839_s7 + $0xfb] sm:$0xff] }
 0x1c4   : > { %v1272_v24 = vpop.permute.xlu0 %1271  ;;  %v1274_v25 = vpop.permute.xlu1 %1273 }
 0x1c5   : > { %1336 = vst.msk [vmem:[#allocation2 + $0xd0] sm:$0xff] %vm1309_vm5, %v1272_v24  ;;  %1337 = vst.msk [vmem:[#allocation2 + $0xd8] sm:$0xff] %vm1309_vm5, %v1274_v25 }
 0x1c6   : > { %1646 = vrot.lane.b32.xlu0 %v5862_v20, %s6729_s26  ;;  %1648 = vrot.lane.b32.xlu1 %v5863_v23, %s6729_s26  ;;  %v5892_v20 = vld [vmem:[%s6839_s7 + $0x10b] sm:$0xff]  ;;  %v5893_v23 = vld [vmem:[%s6839_s7 + $0x113] sm:$0xff] }
 0x1c8   : > { %v1276_v30 = vpop.permute.xlu0 %1275  ;;  %v1278_v31 = vpop.permute.xlu1 %1277 }
 0x1c9   : > { %1338 = vst.msk [vmem:[#allocation2 + $0xe0] sm:$0xff] %vm1309_vm5, %v1276_v30  ;;  %1339 = vst.msk [vmem:[#allocation2 + $0xe8] sm:$0xff] %vm1309_vm5, %v1278_v31 }
 0x1ca   : > { %1650 = vrot.lane.b32.xlu0 %v5864_v26, %s6729_s26  ;;  %1652 = vrot.lane.b32.xlu1 %v5865_v27, %s6729_s26  ;;  %v5894_v26 = vld [vmem:[%s6839_s7 + $0x123] sm:$0xff]  ;;  %v5895_v27 = vld [vmem:[%s6839_s7 + $0x12b] sm:$0xff] }
 0x1cc   : > { %v1345_v34 = vpop.permute.xlu0 %1344  ;;  %v1347_v36 = vpop.permute.xlu1 %1346 }
 0x1cd   : > { %1351 = vst.msk [vmem:[#allocation2 + $0xf0] sm:$0xff] %vm1309_vm5, %v1345_v34  ;;  %1352 = vst.msk [vmem:[#allocation2 + $0xf8] sm:$0xff] %vm1309_vm5, %v1347_v36  ;;  %vm4180_vm5 = vcmask 687744  }
 0x1ce   : > { %1654 = vrot.lane.b32.xlu0 %v5866_v32, %s6729_s26  ;;  %1656 = vrot.lane.b32.xlu1 %v5867_v33, %s6729_s26  ;;  %v5896_v32 = vld [vmem:[%s6839_s7 + $0x13b] sm:$0xff]  ;;  %v5897_v33 = vld [vmem:[%s6839_s7 + $0x143] sm:$0xff] }
 0x1d0   : > { %v1414_v40 = vpop.permute.xlu0 %1413  ;;  %v1416_v41 = vpop.permute.xlu1 %1415 }
 0x1d1   : > { %1504 = vst.msk [vmem:[#allocation2] sm:$0xff] %vm1503_vm6, %v1414_v40  ;;  %1505 = vst.msk [vmem:[#allocation2 + $0x8] sm:$0xff] %vm1503_vm6, %v1416_v41 }
 0x1d2   : > { %1658 = vrot.lane.b32.xlu0 %v5868_v38, %s6729_s26  ;;  %1660 = vrot.lane.b32.xlu1 %v5869_v39, %s6729_s26  ;;  %v5898_v38 = vld [vmem:[%s6839_s7 + $0x153] sm:$0xff]  ;;  %v5899_v39 = vld [vmem:[%s6839_s7 + $0x15b] sm:$0xff] }
 0x1d4   : > { %v1418_v46 = vpop.permute.xlu0 %1417  ;;  %v1420_v47 = vpop.permute.xlu1 %1419 }
 0x1d5   : > { %1506 = vst.msk [vmem:[#allocation2 + $0x10] sm:$0xff] %vm1503_vm6, %v1418_v46  ;;  %1507 = vst.msk [vmem:[#allocation2 + $0x18] sm:$0xff] %vm1503_vm6, %v1420_v47 }
 0x1d6   : > { %1662 = vrot.lane.b32.xlu0 %v5870_v42, %s6729_s26  ;;  %1664 = vrot.lane.b32.xlu1 %v5871_v43, %s6729_s26  ;;  %v5900_v42 = vld [vmem:[%s6839_s7 + $0x16b] sm:$0xff]  ;;  %v5901_v43 = vld [vmem:[%s6839_s7 + $0x173] sm:$0xff] }
 0x1d8   : > { %v1422_v52 = vpop.permute.xlu0 %1421  ;;  %v1424_v53 = vpop.permute.xlu1 %1423 }
 0x1d9   : > { %1508 = vst.msk [vmem:[#allocation2 + $0x20] sm:$0xff] %vm1503_vm6, %v1422_v52  ;;  %1509 = vst.msk [vmem:[#allocation2 + $0x28] sm:$0xff] %vm1503_vm6, %v1424_v53 }
 0x1da   : > { %1731 = vrot.lane.b32.xlu0 %v1727_v48, %s6729_s26  ;;  %1733 = vrot.lane.b32.xlu1 %v1728_v49, %s6729_s26  ;;  %v1920_v48 = vld [vmem:[%s7410_s22 + $0x3] sm:$0xff]  ;;  %v1921_v49 = vld [vmem:[%s7410_s22 + $0xb] sm:$0xff] }
 0x1dc   : > { %v1426_v56 = vpop.permute.xlu0 %1425  ;;  %v1428_v57 = vpop.permute.xlu1 %1427 }
 0x1dd   : > { %1510 = vst.msk [vmem:[#allocation2 + $0x30] sm:$0xff] %vm1503_vm6, %v1426_v56  ;;  %1511 = vst.msk [vmem:[#allocation2 + $0x38] sm:$0xff] %vm1503_vm6, %v1428_v57 }
 0x1de   : > { %1799 = vrot.lane.b32.xlu0 %v5872_v2, %s6730_s29  ;;  %1801 = vrot.lane.b32.xlu1 %v5873_v3, %s6730_s29  ;;  %v5902_v2 = vld [vmem:[%s6839_s7 + $0x1c] sm:$0xff]  ;;  %v5903_v3 = vld [vmem:[%s6839_s7 + $0x24] sm:$0xff] }
 0x1e0   : > { %v1430_v6 = vpop.permute.xlu0 %1429  ;;  %v1432_v7 = vpop.permute.xlu1 %1431 }
 0x1e1   : > { %1512 = vst.msk [vmem:[#allocation2 + $0x40] sm:$0xff] %vm1503_vm6, %v1430_v6  ;;  %1513 = vst.msk [vmem:[#allocation2 + $0x48] sm:$0xff] %vm1503_vm6, %v1432_v7 }
 0x1e2   : > { %1803 = vrot.lane.b32.xlu0 %v5874_v4, %s6730_s29  ;;  %1805 = vrot.lane.b32.xlu1 %v5875_v5, %s6730_s29  ;;  %v5904_v4 = vld [vmem:[%s6839_s7 + $0x34] sm:$0xff]  ;;  %v5905_v5 = vld [vmem:[%s6839_s7 + $0x3c] sm:$0xff] }
 0x1e4   : > { %v1434_v10 = vpop.permute.xlu0 %1433  ;;  %v1436_v11 = vpop.permute.xlu1 %1435 }
 0x1e5   : > { %1514 = vst.msk [vmem:[#allocation2 + $0x50] sm:$0xff] %vm1503_vm6, %v1434_v10  ;;  %1515 = vst.msk [vmem:[#allocation2 + $0x58] sm:$0xff] %vm1503_vm6, %v1436_v11 }
 0x1e6   : > { %1807 = vrot.lane.b32.xlu0 %v5876_v8, %s6730_s29  ;;  %1809 = vrot.lane.b32.xlu1 %v5877_v9, %s6730_s29  ;;  %v5906_v8 = vld [vmem:[%s6839_s7 + $0x4c] sm:$0xff]  ;;  %v5907_v9 = vld [vmem:[%s6839_s7 + $0x54] sm:$0xff] }
 0x1e8   : > { %v1438_v15 = vpop.permute.xlu0 %1437  ;;  %v1440_v16 = vpop.permute.xlu1 %1439 }
 0x1e9   : > { %1516 = vst.msk [vmem:[#allocation2 + $0x60] sm:$0xff] %vm1503_vm6, %v1438_v15  ;;  %1517 = vst.msk [vmem:[#allocation2 + $0x68] sm:$0xff] %vm1503_vm6, %v1440_v16 }
 0x1ea   : > { %1811 = vrot.lane.b32.xlu0 %v5878_v12, %s6730_s29  ;;  %1813 = vrot.lane.b32.xlu1 %v5879_v14, %s6730_s29  ;;  %v5908_v12 = vld [vmem:[%s6839_s7 + $0x64] sm:$0xff]  ;;  %v5909_v14 = vld [vmem:[%s6839_s7 + $0x6c] sm:$0xff] }
 0x1ec   : > { %v1442_v28 = vpop.permute.xlu0 %1441  ;;  %v1444_v29 = vpop.permute.xlu1 %1443 }
 0x1ed   : > { %1518 = vst.msk [vmem:[#allocation2 + $0x70] sm:$0xff] %vm1503_vm6, %v1442_v28  ;;  %1519 = vst.msk [vmem:[#allocation2 + $0x78] sm:$0xff] %vm1503_vm6, %v1444_v29 }
 0x1ee   : > { %1815 = vrot.lane.b32.xlu0 %v5880_v21, %s6730_s29  ;;  %1817 = vrot.lane.b32.xlu1 %v5881_v22, %s6730_s29  ;;  %v5910_v21 = vld [vmem:[%s6839_s7 + $0x7c] sm:$0xff]  ;;  %v5911_v22 = vld [vmem:[%s6839_s7 + $0x84] sm:$0xff] }
 0x1f0   : > { %v1446_v44 = vpop.permute.xlu0 %1445  ;;  %v1448_v45 = vpop.permute.xlu1 %1447 }
 0x1f1   : > { %1520 = vst.msk [vmem:[#allocation2 + $0x80] sm:$0xff] %vm1503_vm6, %v1446_v44  ;;  %1521 = vst.msk [vmem:[#allocation2 + $0x88] sm:$0xff] %vm1503_vm6, %v1448_v45 }
 0x1f2   : > { %1819 = vrot.lane.b32.xlu0 %v5882_v35, %s6730_s29  ;;  %1821 = vrot.lane.b32.xlu1 %v5883_v37, %s6730_s29  ;;  %v5912_v35 = vld [vmem:[%s6839_s7 + $0x94] sm:$0xff]  ;;  %v5913_v37 = vld [vmem:[%s6839_s7 + $0x9c] sm:$0xff] }
 0x1f4   : > { %v1450_v54 = vpop.permute.xlu0 %1449  ;;  %v1452_v55 = vpop.permute.xlu1 %1451 }
 0x1f5   : > { %1522 = vst.msk [vmem:[#allocation2 + $0x90] sm:$0xff] %vm1503_vm6, %v1450_v54  ;;  %1523 = vst.msk [vmem:[#allocation2 + $0x98] sm:$0xff] %vm1503_vm6, %v1452_v55 }
 0x1f6   : > { %1823 = vrot.lane.b32.xlu0 %v5884_v50, %s6730_s29  ;;  %1825 = vrot.lane.b32.xlu1 %v5885_v51, %s6730_s29  ;;  %v5914_v50 = vld [vmem:[%s6839_s7 + $0xac] sm:$0xff]  ;;  %v5915_v51 = vld [vmem:[%s6839_s7 + $0xb4] sm:$0xff] }
 0x1f8   : > { %v1454_v60 = vpop.permute.xlu0 %1453  ;;  %v1456_v61 = vpop.permute.xlu1 %1455 }
 0x1f9   : > { %1524 = vst.msk [vmem:[#allocation2 + $0xa0] sm:$0xff] %vm1503_vm6, %v1454_v60  ;;  %1525 = vst.msk [vmem:[#allocation2 + $0xa8] sm:$0xff] %vm1503_vm6, %v1456_v61 }
 0x1fa   : > { %1827 = vrot.lane.b32.xlu0 %v5886_v58, %s6730_s29  ;;  %1829 = vrot.lane.b32.xlu1 %v5887_v59, %s6730_s29  ;;  %v5916_v58 = vld [vmem:[%s6839_s7 + $0xc4] sm:$0xff]  ;;  %v5917_v59 = vld [vmem:[%s6839_s7 + $0xcc] sm:$0xff] }
 0x1fc   : > { %v1458_v0 = vpop.permute.xlu0 %1457  ;;  %v1460_v1 = vpop.permute.xlu1 %1459 }
 0x1fd   : > { %1526 = vst.msk [vmem:[#allocation2 + $0xb0] sm:$0xff] %vm1503_vm6, %v1458_v0  ;;  %1527 = vst.msk [vmem:[#allocation2 + $0xb8] sm:$0xff] %vm1503_vm6, %v1460_v1 }
 0x1fe   : > { %1831 = vrot.lane.b32.xlu0 %v5888_v62, %s6730_s29  ;;  %1833 = vrot.lane.b32.xlu1 %v5889_v63, %s6730_s29  ;;  %v5918_v62 = vld [vmem:[%s6839_s7 + $0xdc] sm:$0xff]  ;;  %v5919_v63 = vld [vmem:[%s6839_s7 + $0xe4] sm:$0xff] }
 0x200   : > { %v1462_v18 = vpop.permute.xlu0 %1461  ;;  %v1464_v19 = vpop.permute.xlu1 %1463 }
 0x201   : > { %1528 = vst.msk [vmem:[#allocation2 + $0xc0] sm:$0xff] %vm1503_vm6, %v1462_v18  ;;  %1529 = vst.msk [vmem:[#allocation2 + $0xc8] sm:$0xff] %vm1503_vm6, %v1464_v19 }
 0x202   : > { %1835 = vrot.lane.b32.xlu0 %v5890_v13, %s6730_s29  ;;  %1837 = vrot.lane.b32.xlu1 %v5891_v17, %s6730_s29  ;;  %v5920_v13 = vld [vmem:[%s6839_s7 + $0xf4] sm:$0xff]  ;;  %v5921_v17 = vld [vmem:[%s6839_s7 + $0xfc] sm:$0xff] }
 0x204   : > { %v1466_v24 = vpop.permute.xlu0 %1465  ;;  %v1468_v25 = vpop.permute.xlu1 %1467 }
 0x205   : > { %1530 = vst.msk [vmem:[#allocation2 + $0xd0] sm:$0xff] %vm1503_vm6, %v1466_v24  ;;  %1531 = vst.msk [vmem:[#allocation2 + $0xd8] sm:$0xff] %vm1503_vm6, %v1468_v25 }
 0x206   : > { %1839 = vrot.lane.b32.xlu0 %v5892_v20, %s6730_s29  ;;  %1841 = vrot.lane.b32.xlu1 %v5893_v23, %s6730_s29  ;;  %v5922_v20 = vld [vmem:[%s6839_s7 + $0x10c] sm:$0xff]  ;;  %v5923_v23 = vld [vmem:[%s6839_s7 + $0x114] sm:$0xff] }
 0x208   : > { %v1470_v30 = vpop.permute.xlu0 %1469  ;;  %v1472_v31 = vpop.permute.xlu1 %1471 }
 0x209   : > { %1532 = vst.msk [vmem:[#allocation2 + $0xe0] sm:$0xff] %vm1503_vm6, %v1470_v30  ;;  %1533 = vst.msk [vmem:[#allocation2 + $0xe8] sm:$0xff] %vm1503_vm6, %v1472_v31 }
 0x20a   : > { %1843 = vrot.lane.b32.xlu0 %v5894_v26, %s6730_s29  ;;  %1845 = vrot.lane.b32.xlu1 %v5895_v27, %s6730_s29  ;;  %v5924_v26 = vld [vmem:[%s6839_s7 + $0x124] sm:$0xff]  ;;  %v5925_v27 = vld [vmem:[%s6839_s7 + $0x12c] sm:$0xff] }
 0x20c   : > { %v1539_v34 = vpop.permute.xlu0 %1538  ;;  %v1541_v36 = vpop.permute.xlu1 %1540 }
 0x20d   : > { %1544 = vst.msk [vmem:[#allocation2 + $0xf0] sm:$0xff] %vm1503_vm6, %v1539_v34  ;;  %1545 = vst.msk [vmem:[#allocation2 + $0xf8] sm:$0xff] %vm1503_vm6, %v1541_v36  ;;  %vm4374_vm6 = vcmask 720544  }
 0x20e   : > { %1847 = vrot.lane.b32.xlu0 %v5896_v32, %s6730_s29  ;;  %1849 = vrot.lane.b32.xlu1 %v5897_v33, %s6730_s29  ;;  %v5926_v32 = vld [vmem:[%s6839_s7 + $0x13c] sm:$0xff]  ;;  %v5927_v33 = vld [vmem:[%s6839_s7 + $0x144] sm:$0xff] }
 0x210   : > { %v1607_v40 = vpop.permute.xlu0 %1606  ;;  %v1609_v41 = vpop.permute.xlu1 %1608 }
 0x211   : > { %1697 = vst.msk [vmem:[#allocation2] sm:$0xff] %vm1696_vm7, %v1607_v40  ;;  %1698 = vst.msk [vmem:[#allocation2 + $0x8] sm:$0xff] %vm1696_vm7, %v1609_v41 }
 0x212   : > { %1851 = vrot.lane.b32.xlu0 %v5898_v38, %s6730_s29  ;;  %1853 = vrot.lane.b32.xlu1 %v5899_v39, %s6730_s29  ;;  %v5928_v38 = vld [vmem:[%s6839_s7 + $0x154] sm:$0xff]  ;;  %v5929_v39 = vld [vmem:[%s6839_s7 + $0x15c] sm:$0xff] }
 0x214   : > { %v1611_v46 = vpop.permute.xlu0 %1610  ;;  %v1613_v47 = vpop.permute.xlu1 %1612 }
 0x215   : > { %1699 = vst.msk [vmem:[#allocation2 + $0x10] sm:$0xff] %vm1696_vm7, %v1611_v46  ;;  %1700 = vst.msk [vmem:[#allocation2 + $0x18] sm:$0xff] %vm1696_vm7, %v1613_v47 }
 0x216   : > { %1855 = vrot.lane.b32.xlu0 %v5900_v42, %s6730_s29  ;;  %1857 = vrot.lane.b32.xlu1 %v5901_v43, %s6730_s29  ;;  %v5930_v42 = vld [vmem:[%s6839_s7 + $0x16c] sm:$0xff]  ;;  %v5931_v43 = vld [vmem:[%s6839_s7 + $0x174] sm:$0xff] }
 0x218   : > { %v1615_v52 = vpop.permute.xlu0 %1614  ;;  %v1617_v53 = vpop.permute.xlu1 %1616 }
 0x219   : > { %1701 = vst.msk [vmem:[#allocation2 + $0x20] sm:$0xff] %vm1696_vm7, %v1615_v52  ;;  %1702 = vst.msk [vmem:[#allocation2 + $0x28] sm:$0xff] %vm1696_vm7, %v1617_v53 }
 0x21a   : > { %1924 = vrot.lane.b32.xlu0 %v1920_v48, %s6730_s29  ;;  %1926 = vrot.lane.b32.xlu1 %v1921_v49, %s6730_s29  ;;  %v2113_v48 = vld [vmem:[%s7410_s22 + $0x4] sm:$0xff]  ;;  %v2114_v49 = vld [vmem:[%s7410_s22 + $0xc] sm:$0xff]  ;;  %s6745_s29 = smov 92  }
 0x21c   : > { %v1619_v56 = vpop.permute.xlu0 %1618  ;;  %v1621_v57 = vpop.permute.xlu1 %1620 }
 0x21d   : > { %1703 = vst.msk [vmem:[#allocation2 + $0x30] sm:$0xff] %vm1696_vm7, %v1619_v56  ;;  %1704 = vst.msk [vmem:[#allocation2 + $0x38] sm:$0xff] %vm1696_vm7, %v1621_v57 }
 0x21e   : > { %1992 = vrot.lane.b32.xlu0 %v5902_v2, %s6731_s30  ;;  %1994 = vrot.lane.b32.xlu1 %v5903_v3, %s6731_s30  ;;  %v5932_v2 = vld [vmem:[%s6839_s7 + $0x30] sm:$0xff]  ;;  %v5933_v3 = vld [vmem:[%s6839_s7 + $0x38] sm:$0xff] }
 0x220   : > { %v1623_v6 = vpop.permute.xlu0 %1622  ;;  %v1625_v7 = vpop.permute.xlu1 %1624 }
 0x221   : > { %1705 = vst.msk [vmem:[#allocation2 + $0x40] sm:$0xff] %vm1696_vm7, %v1623_v6  ;;  %1706 = vst.msk [vmem:[#allocation2 + $0x48] sm:$0xff] %vm1696_vm7, %v1625_v7 }
 0x222   : > { %1996 = vrot.lane.b32.xlu0 %v5904_v4, %s6731_s30  ;;  %1998 = vrot.lane.b32.xlu1 %v5905_v5, %s6731_s30  ;;  %v5934_v4 = vld [vmem:[%s6839_s7 + $0x48] sm:$0xff]  ;;  %v5935_v5 = vld [vmem:[%s6839_s7 + $0x50] sm:$0xff] }
 0x224   : > { %v1627_v10 = vpop.permute.xlu0 %1626  ;;  %v1629_v11 = vpop.permute.xlu1 %1628 }
 0x225   : > { %1707 = vst.msk [vmem:[#allocation2 + $0x50] sm:$0xff] %vm1696_vm7, %v1627_v10  ;;  %1708 = vst.msk [vmem:[#allocation2 + $0x58] sm:$0xff] %vm1696_vm7, %v1629_v11 }
 0x226   : > { %2000 = vrot.lane.b32.xlu0 %v5906_v8, %s6731_s30  ;;  %2002 = vrot.lane.b32.xlu1 %v5907_v9, %s6731_s30  ;;  %v5936_v8 = vld [vmem:[%s6839_s7 + $0x60] sm:$0xff]  ;;  %v5937_v9 = vld [vmem:[%s6839_s7 + $0x68] sm:$0xff] }
 0x228   : > { %v1631_v15 = vpop.permute.xlu0 %1630  ;;  %v1633_v16 = vpop.permute.xlu1 %1632 }
 0x229   : > { %1709 = vst.msk [vmem:[#allocation2 + $0x60] sm:$0xff] %vm1696_vm7, %v1631_v15  ;;  %1710 = vst.msk [vmem:[#allocation2 + $0x68] sm:$0xff] %vm1696_vm7, %v1633_v16 }
 0x22a   : > { %2004 = vrot.lane.b32.xlu0 %v5908_v12, %s6731_s30  ;;  %2006 = vrot.lane.b32.xlu1 %v5909_v14, %s6731_s30  ;;  %v5938_v12 = vld [vmem:[%s6839_s7 + $0x78] sm:$0xff]  ;;  %v5939_v14 = vld [vmem:[%s6839_s7 + $0x80] sm:$0xff] }
 0x22c   : > { %v1635_v28 = vpop.permute.xlu0 %1634  ;;  %v1637_v29 = vpop.permute.xlu1 %1636 }
 0x22d   : > { %1711 = vst.msk [vmem:[#allocation2 + $0x70] sm:$0xff] %vm1696_vm7, %v1635_v28  ;;  %1712 = vst.msk [vmem:[#allocation2 + $0x78] sm:$0xff] %vm1696_vm7, %v1637_v29 }
 0x22e   : > { %2008 = vrot.lane.b32.xlu0 %v5910_v21, %s6731_s30  ;;  %2010 = vrot.lane.b32.xlu1 %v5911_v22, %s6731_s30  ;;  %v5940_v21 = vld [vmem:[%s6839_s7 + $0x90] sm:$0xff]  ;;  %v5941_v22 = vld [vmem:[%s6839_s7 + $0x98] sm:$0xff] }
 0x230   : > { %v1639_v44 = vpop.permute.xlu0 %1638  ;;  %v1641_v45 = vpop.permute.xlu1 %1640 }
 0x231   : > { %1713 = vst.msk [vmem:[#allocation2 + $0x80] sm:$0xff] %vm1696_vm7, %v1639_v44  ;;  %1714 = vst.msk [vmem:[#allocation2 + $0x88] sm:$0xff] %vm1696_vm7, %v1641_v45 }
 0x232   : > { %2012 = vrot.lane.b32.xlu0 %v5912_v35, %s6731_s30  ;;  %2014 = vrot.lane.b32.xlu1 %v5913_v37, %s6731_s30  ;;  %v5942_v35 = vld [vmem:[%s6839_s7 + $0xa8] sm:$0xff]  ;;  %v5943_v37 = vld [vmem:[%s6839_s7 + $0xb0] sm:$0xff] }
 0x234   : > { %v1643_v54 = vpop.permute.xlu0 %1642  ;;  %v1645_v55 = vpop.permute.xlu1 %1644 }
 0x235   : > { %1715 = vst.msk [vmem:[#allocation2 + $0x90] sm:$0xff] %vm1696_vm7, %v1643_v54  ;;  %1716 = vst.msk [vmem:[#allocation2 + $0x98] sm:$0xff] %vm1696_vm7, %v1645_v55 }
 0x236   : > { %2016 = vrot.lane.b32.xlu0 %v5914_v50, %s6731_s30  ;;  %2018 = vrot.lane.b32.xlu1 %v5915_v51, %s6731_s30  ;;  %v5944_v50 = vld [vmem:[%s6839_s7 + $0xc0] sm:$0xff]  ;;  %v5945_v51 = vld [vmem:[%s6839_s7 + $0xc8] sm:$0xff] }
 0x238   : > { %v1647_v60 = vpop.permute.xlu0 %1646  ;;  %v1649_v61 = vpop.permute.xlu1 %1648 }
 0x239   : > { %1717 = vst.msk [vmem:[#allocation2 + $0xa0] sm:$0xff] %vm1696_vm7, %v1647_v60  ;;  %1718 = vst.msk [vmem:[#allocation2 + $0xa8] sm:$0xff] %vm1696_vm7, %v1649_v61 }
 0x23a   : > { %2020 = vrot.lane.b32.xlu0 %v5916_v58, %s6731_s30  ;;  %2022 = vrot.lane.b32.xlu1 %v5917_v59, %s6731_s30  ;;  %v5946_v58 = vld [vmem:[%s6839_s7 + $0xd8] sm:$0xff]  ;;  %v5947_v59 = vld [vmem:[%s6839_s7 + $0xe0] sm:$0xff] }
 0x23c   : > { %v1651_v0 = vpop.permute.xlu0 %1650  ;;  %v1653_v1 = vpop.permute.xlu1 %1652 }
 0x23d   : > { %1719 = vst.msk [vmem:[#allocation2 + $0xb0] sm:$0xff] %vm1696_vm7, %v1651_v0  ;;  %1720 = vst.msk [vmem:[#allocation2 + $0xb8] sm:$0xff] %vm1696_vm7, %v1653_v1 }
 0x23e   : > { %2024 = vrot.lane.b32.xlu0 %v5918_v62, %s6731_s30  ;;  %2026 = vrot.lane.b32.xlu1 %v5919_v63, %s6731_s30  ;;  %v5948_v62 = vld [vmem:[%s6839_s7 + $0xf0] sm:$0xff]  ;;  %v5949_v63 = vld [vmem:[%s6839_s7 + $0xf8] sm:$0xff] }
 0x240   : > { %v1655_v18 = vpop.permute.xlu0 %1654  ;;  %v1657_v19 = vpop.permute.xlu1 %1656 }
 0x241   : > { %1721 = vst.msk [vmem:[#allocation2 + $0xc0] sm:$0xff] %vm1696_vm7, %v1655_v18  ;;  %1722 = vst.msk [vmem:[#allocation2 + $0xc8] sm:$0xff] %vm1696_vm7, %v1657_v19 }
 0x242   : > { %2028 = vrot.lane.b32.xlu0 %v5920_v13, %s6731_s30  ;;  %2030 = vrot.lane.b32.xlu1 %v5921_v17, %s6731_s30  ;;  %v5950_v13 = vld [vmem:[%s6839_s7 + $0x108] sm:$0xff]  ;;  %v5951_v17 = vld [vmem:[%s6839_s7 + $0x110] sm:$0xff] }
 0x244   : > { %v1659_v24 = vpop.permute.xlu0 %1658  ;;  %v1661_v25 = vpop.permute.xlu1 %1660 }
 0x245   : > { %1723 = vst.msk [vmem:[#allocation2 + $0xd0] sm:$0xff] %vm1696_vm7, %v1659_v24  ;;  %1724 = vst.msk [vmem:[#allocation2 + $0xd8] sm:$0xff] %vm1696_vm7, %v1661_v25 }
 0x246   : > { %2032 = vrot.lane.b32.xlu0 %v5922_v20, %s6731_s30  ;;  %2034 = vrot.lane.b32.xlu1 %v5923_v23, %s6731_s30  ;;  %v5952_v20 = vld [vmem:[%s6839_s7 + $0x120] sm:$0xff]  ;;  %v5953_v23 = vld [vmem:[%s6839_s7 + $0x128] sm:$0xff] }
 0x248   : > { %v1663_v30 = vpop.permute.xlu0 %1662  ;;  %v1665_v31 = vpop.permute.xlu1 %1664 }
 0x249   : > { %1725 = vst.msk [vmem:[#allocation2 + $0xe0] sm:$0xff] %vm1696_vm7, %v1663_v30  ;;  %1726 = vst.msk [vmem:[#allocation2 + $0xe8] sm:$0xff] %vm1696_vm7, %v1665_v31 }
 0x24a   : > { %2036 = vrot.lane.b32.xlu0 %v5924_v26, %s6731_s30  ;;  %2038 = vrot.lane.b32.xlu1 %v5925_v27, %s6731_s30  ;;  %v5954_v26 = vld [vmem:[%s6839_s7 + $0x138] sm:$0xff]  ;;  %v5955_v27 = vld [vmem:[%s6839_s7 + $0x140] sm:$0xff] }
 0x24c   : > { %v1732_v34 = vpop.permute.xlu0 %1731  ;;  %v1734_v36 = vpop.permute.xlu1 %1733 }
 0x24d   : > { %1737 = vst.msk [vmem:[#allocation2 + $0xf0] sm:$0xff] %vm1696_vm7, %v1732_v34  ;;  %1738 = vst.msk [vmem:[#allocation2 + $0xf8] sm:$0xff] %vm1696_vm7, %v1734_v36  ;;  %vm4567_vm7 = vcmask 753344  }
 0x24e   : > { %2040 = vrot.lane.b32.xlu0 %v5926_v32, %s6731_s30  ;;  %2042 = vrot.lane.b32.xlu1 %v5927_v33, %s6731_s30  ;;  %v5956_v32 = vld [vmem:[%s6839_s7 + $0x150] sm:$0xff]  ;;  %v5957_v33 = vld [vmem:[%s6839_s7 + $0x158] sm:$0xff] }
 0x250   : > { %v1800_v40 = vpop.permute.xlu0 %1799  ;;  %v1802_v41 = vpop.permute.xlu1 %1801 }
 0x251   : > { %1890 = vst.msk [vmem:[#allocation2] sm:$0xff] %vm1889_vm8, %v1800_v40  ;;  %1891 = vst.msk [vmem:[#allocation2 + $0x8] sm:$0xff] %vm1889_vm8, %v1802_v41 }
 0x252   : > { %2044 = vrot.lane.b32.xlu0 %v5928_v38, %s6731_s30  ;;  %2046 = vrot.lane.b32.xlu1 %v5929_v39, %s6731_s30  ;;  %v5958_v38 = vld [vmem:[%s6839_s7 + $0x168] sm:$0xff]  ;;  %v5959_v39 = vld [vmem:[%s6839_s7 + $0x170] sm:$0xff] }
 0x254   : > { %v1804_v46 = vpop.permute.xlu0 %1803  ;;  %v1806_v47 = vpop.permute.xlu1 %1805 }
 0x255   : > { %1892 = vst.msk [vmem:[#allocation2 + $0x10] sm:$0xff] %vm1889_vm8, %v1804_v46  ;;  %1893 = vst.msk [vmem:[#allocation2 + $0x18] sm:$0xff] %vm1889_vm8, %v1806_v47 }
 0x256   : > { %2048 = vrot.lane.b32.xlu0 %v5930_v42, %s6731_s30  ;;  %2050 = vrot.lane.b32.xlu1 %v5931_v43, %s6731_s30  ;;  %v2295_v42 = vld [vmem:[%s7410_s22] sm:$0xff]  ;;  %v2296_v43 = vld [vmem:[%s7410_s22 + $0x8] sm:$0xff] }
 0x258   : > { %v1808_v52 = vpop.permute.xlu0 %1807  ;;  %v1810_v53 = vpop.permute.xlu1 %1809 }
 0x259   : > { %1894 = vst.msk [vmem:[#allocation2 + $0x20] sm:$0xff] %vm1889_vm8, %v1808_v52  ;;  %1895 = vst.msk [vmem:[#allocation2 + $0x28] sm:$0xff] %vm1889_vm8, %v1810_v53 }
 0x25a   : > { %2117 = vrot.lane.b32.xlu0 %v2113_v48, %s6731_s30  ;;  %2119 = vrot.lane.b32.xlu1 %v2114_v49, %s6731_s30  ;;  %v2297_v48 = vld [vmem:[%s7410_s22 + $0x18] sm:$0xff]  ;;  %v2298_v49 = vld [vmem:[%s7410_s22 + $0x20] sm:$0xff]  ;;  %s6746_s30 = smov 96  }
 0x25c   : > { %v1812_v56 = vpop.permute.xlu0 %1811  ;;  %v1814_v57 = vpop.permute.xlu1 %1813 }
 0x25d   : > { %1896 = vst.msk [vmem:[#allocation2 + $0x30] sm:$0xff] %vm1889_vm8, %v1812_v56  ;;  %1897 = vst.msk [vmem:[#allocation2 + $0x38] sm:$0xff] %vm1889_vm8, %v1814_v57 }
 0x25e   : > { %2182 = vrot.lane.b32.xlu0 %v5932_v2, %s6732_s5  ;;  %2184 = vrot.lane.b32.xlu1 %v5933_v3, %s6732_s5  ;;  %v5960_v2 = vld [vmem:[%s6839_s7 + $0x31] sm:$0xff]  ;;  %v5961_v3 = vld [vmem:[%s6839_s7 + $0x39] sm:$0xff] }
 0x260   : > { %v1816_v6 = vpop.permute.xlu0 %1815  ;;  %v1818_v7 = vpop.permute.xlu1 %1817 }
 0x261   : > { %1898 = vst.msk [vmem:[#allocation2 + $0x40] sm:$0xff] %vm1889_vm8, %v1816_v6  ;;  %1899 = vst.msk [vmem:[#allocation2 + $0x48] sm:$0xff] %vm1889_vm8, %v1818_v7 }
 0x262   : > { %2186 = vrot.lane.b32.xlu0 %v5934_v4, %s6732_s5  ;;  %2188 = vrot.lane.b32.xlu1 %v5935_v5, %s6732_s5  ;;  %v5962_v4 = vld [vmem:[%s6839_s7 + $0x49] sm:$0xff]  ;;  %v5963_v5 = vld [vmem:[%s6839_s7 + $0x51] sm:$0xff] }
 0x264   : > { %v1820_v10 = vpop.permute.xlu0 %1819  ;;  %v1822_v11 = vpop.permute.xlu1 %1821 }
 0x265   : > { %1900 = vst.msk [vmem:[#allocation2 + $0x50] sm:$0xff] %vm1889_vm8, %v1820_v10  ;;  %1901 = vst.msk [vmem:[#allocation2 + $0x58] sm:$0xff] %vm1889_vm8, %v1822_v11 }
 0x266   : > { %2190 = vrot.lane.b32.xlu0 %v5936_v8, %s6732_s5  ;;  %2192 = vrot.lane.b32.xlu1 %v5937_v9, %s6732_s5  ;;  %v5964_v8 = vld [vmem:[%s6839_s7 + $0x61] sm:$0xff]  ;;  %v5965_v9 = vld [vmem:[%s6839_s7 + $0x69] sm:$0xff] }
 0x268   : > { %v1824_v15 = vpop.permute.xlu0 %1823  ;;  %v1826_v16 = vpop.permute.xlu1 %1825 }
 0x269   : > { %1902 = vst.msk [vmem:[#allocation2 + $0x60] sm:$0xff] %vm1889_vm8, %v1824_v15  ;;  %1903 = vst.msk [vmem:[#allocation2 + $0x68] sm:$0xff] %vm1889_vm8, %v1826_v16 }
 0x26a   : > { %2194 = vrot.lane.b32.xlu0 %v5938_v12, %s6732_s5  ;;  %2196 = vrot.lane.b32.xlu1 %v5939_v14, %s6732_s5  ;;  %v5966_v12 = vld [vmem:[%s6839_s7 + $0x79] sm:$0xff]  ;;  %v5967_v14 = vld [vmem:[%s6839_s7 + $0x81] sm:$0xff] }
 0x26c   : > { %v1828_v28 = vpop.permute.xlu0 %1827  ;;  %v1830_v29 = vpop.permute.xlu1 %1829 }
 0x26d   : > { %1904 = vst.msk [vmem:[#allocation2 + $0x70] sm:$0xff] %vm1889_vm8, %v1828_v28  ;;  %1905 = vst.msk [vmem:[#allocation2 + $0x78] sm:$0xff] %vm1889_vm8, %v1830_v29 }
 0x26e   : > { %2198 = vrot.lane.b32.xlu0 %v5940_v21, %s6732_s5  ;;  %2200 = vrot.lane.b32.xlu1 %v5941_v22, %s6732_s5  ;;  %v5968_v21 = vld [vmem:[%s6839_s7 + $0x91] sm:$0xff]  ;;  %v5969_v22 = vld [vmem:[%s6839_s7 + $0x99] sm:$0xff] }
 0x270   : > { %v1832_v44 = vpop.permute.xlu0 %1831  ;;  %v1834_v45 = vpop.permute.xlu1 %1833 }
 0x271   : > { %1906 = vst.msk [vmem:[#allocation2 + $0x80] sm:$0xff] %vm1889_vm8, %v1832_v44  ;;  %1907 = vst.msk [vmem:[#allocation2 + $0x88] sm:$0xff] %vm1889_vm8, %v1834_v45 }
 0x272   : > { %2202 = vrot.lane.b32.xlu0 %v5942_v35, %s6732_s5  ;;  %2204 = vrot.lane.b32.xlu1 %v5943_v37, %s6732_s5  ;;  %v5970_v35 = vld [vmem:[%s6839_s7 + $0xa9] sm:$0xff]  ;;  %v5971_v37 = vld [vmem:[%s6839_s7 + $0xb1] sm:$0xff] }
 0x274   : > { %v1836_v54 = vpop.permute.xlu0 %1835  ;;  %v1838_v55 = vpop.permute.xlu1 %1837 }
 0x275   : > { %1908 = vst.msk [vmem:[#allocation2 + $0x90] sm:$0xff] %vm1889_vm8, %v1836_v54  ;;  %1909 = vst.msk [vmem:[#allocation2 + $0x98] sm:$0xff] %vm1889_vm8, %v1838_v55 }
 0x276   : > { %2206 = vrot.lane.b32.xlu0 %v5944_v50, %s6732_s5  ;;  %2208 = vrot.lane.b32.xlu1 %v5945_v51, %s6732_s5  ;;  %v5972_v50 = vld [vmem:[%s6839_s7 + $0xc1] sm:$0xff]  ;;  %v5973_v51 = vld [vmem:[%s6839_s7 + $0xc9] sm:$0xff] }
 0x278   : > { %v1840_v60 = vpop.permute.xlu0 %1839  ;;  %v1842_v61 = vpop.permute.xlu1 %1841 }
 0x279   : > { %1910 = vst.msk [vmem:[#allocation2 + $0xa0] sm:$0xff] %vm1889_vm8, %v1840_v60  ;;  %1911 = vst.msk [vmem:[#allocation2 + $0xa8] sm:$0xff] %vm1889_vm8, %v1842_v61 }
 0x27a   : > { %2210 = vrot.lane.b32.xlu0 %v5946_v58, %s6732_s5  ;;  %2212 = vrot.lane.b32.xlu1 %v5947_v59, %s6732_s5  ;;  %v5974_v58 = vld [vmem:[%s6839_s7 + $0xd9] sm:$0xff]  ;;  %v5975_v59 = vld [vmem:[%s6839_s7 + $0xe1] sm:$0xff] }
 0x27c   : > { %v1844_v0 = vpop.permute.xlu0 %1843  ;;  %v1846_v1 = vpop.permute.xlu1 %1845 }
 0x27d   : > { %1912 = vst.msk [vmem:[#allocation2 + $0xb0] sm:$0xff] %vm1889_vm8, %v1844_v0  ;;  %1913 = vst.msk [vmem:[#allocation2 + $0xb8] sm:$0xff] %vm1889_vm8, %v1846_v1 }
 0x27e   : > { %2214 = vrot.lane.b32.xlu0 %v5948_v62, %s6732_s5  ;;  %2216 = vrot.lane.b32.xlu1 %v5949_v63, %s6732_s5  ;;  %v5976_v62 = vld [vmem:[%s6839_s7 + $0xf1] sm:$0xff]  ;;  %v5977_v63 = vld [vmem:[%s6839_s7 + $0xf9] sm:$0xff] }
 0x280   : > { %v1848_v18 = vpop.permute.xlu0 %1847  ;;  %v1850_v19 = vpop.permute.xlu1 %1849 }
 0x281   : > { %1914 = vst.msk [vmem:[#allocation2 + $0xc0] sm:$0xff] %vm1889_vm8, %v1848_v18  ;;  %1915 = vst.msk [vmem:[#allocation2 + $0xc8] sm:$0xff] %vm1889_vm8, %v1850_v19 }
 0x282   : > { %2218 = vrot.lane.b32.xlu0 %v5950_v13, %s6732_s5  ;;  %2220 = vrot.lane.b32.xlu1 %v5951_v17, %s6732_s5  ;;  %v5978_v13 = vld [vmem:[%s6839_s7 + $0x109] sm:$0xff]  ;;  %v5979_v17 = vld [vmem:[%s6839_s7 + $0x111] sm:$0xff] }
 0x284   : > { %v1852_v24 = vpop.permute.xlu0 %1851  ;;  %v1854_v25 = vpop.permute.xlu1 %1853 }
 0x285   : > { %1916 = vst.msk [vmem:[#allocation2 + $0xd0] sm:$0xff] %vm1889_vm8, %v1852_v24  ;;  %1917 = vst.msk [vmem:[#allocation2 + $0xd8] sm:$0xff] %vm1889_vm8, %v1854_v25 }
 0x286   : > { %2222 = vrot.lane.b32.xlu0 %v5952_v20, %s6732_s5  ;;  %2224 = vrot.lane.b32.xlu1 %v5953_v23, %s6732_s5  ;;  %v5980_v20 = vld [vmem:[%s6839_s7 + $0x121] sm:$0xff]  ;;  %v5981_v23 = vld [vmem:[%s6839_s7 + $0x129] sm:$0xff] }
 0x288   : > { %v1856_v30 = vpop.permute.xlu0 %1855  ;;  %v1858_v31 = vpop.permute.xlu1 %1857 }
 0x289   : > { %1918 = vst.msk [vmem:[#allocation2 + $0xe0] sm:$0xff] %vm1889_vm8, %v1856_v30  ;;  %1919 = vst.msk [vmem:[#allocation2 + $0xe8] sm:$0xff] %vm1889_vm8, %v1858_v31 }
 0x28a   : > { %2226 = vrot.lane.b32.xlu0 %v5954_v26, %s6732_s5  ;;  %2228 = vrot.lane.b32.xlu1 %v5955_v27, %s6732_s5  ;;  %v5982_v26 = vld [vmem:[%s6839_s7 + $0x139] sm:$0xff]  ;;  %v5983_v27 = vld [vmem:[%s6839_s7 + $0x141] sm:$0xff] }
 0x28c   : > { %v1925_v34 = vpop.permute.xlu0 %1924  ;;  %v1927_v36 = vpop.permute.xlu1 %1926 }
 0x28d   : > { %1930 = vst.msk [vmem:[#allocation2 + $0xf0] sm:$0xff] %vm1889_vm8, %v1925_v34  ;;  %1931 = vst.msk [vmem:[#allocation2 + $0xf8] sm:$0xff] %vm1889_vm8, %v1927_v36  ;;  %vm4760_vm8 = vcmask 786144  }
 0x28e   : > { %2230 = vrot.lane.b32.xlu0 %v5956_v32, %s6732_s5  ;;  %2232 = vrot.lane.b32.xlu1 %v5957_v33, %s6732_s5  ;;  %v5984_v32 = vld [vmem:[%s6839_s7 + $0x151] sm:$0xff]  ;;  %v5985_v33 = vld [vmem:[%s6839_s7 + $0x159] sm:$0xff] }
 0x290   : > { %v1993_v40 = vpop.permute.xlu0 %1992  ;;  %v1995_v41 = vpop.permute.xlu1 %1994 }
 0x291   : > { %2083 = vst.msk [vmem:[#allocation2] sm:$0xff] %vm2082_vm9, %v1993_v40  ;;  %2084 = vst.msk [vmem:[#allocation2 + $0x8] sm:$0xff] %vm2082_vm9, %v1995_v41 }
 0x292   : > { %2234 = vrot.lane.b32.xlu0 %v5958_v38, %s6732_s5  ;;  %2236 = vrot.lane.b32.xlu1 %v5959_v39, %s6732_s5  ;;  %v5986_v38 = vld [vmem:[%s6839_s7 + $0x169] sm:$0xff]  ;;  %v5987_v39 = vld [vmem:[%s6839_s7 + $0x171] sm:$0xff] }
 0x294   : > { %v1997_v46 = vpop.permute.xlu0 %1996  ;;  %v1999_v47 = vpop.permute.xlu1 %1998 }
 0x295   : > { %2085 = vst.msk [vmem:[#allocation2 + $0x10] sm:$0xff] %vm2082_vm9, %v1997_v46  ;;  %2086 = vst.msk [vmem:[#allocation2 + $0x18] sm:$0xff] %vm2082_vm9, %v1999_v47 }
 0x296   : > { %2303 = vrot.lane.b32.xlu0 %v2295_v42, %s6732_s5  ;;  %2305 = vrot.lane.b32.xlu1 %v2296_v43, %s6732_s5  ;;  %v2489_v42 = vld [vmem:[%s7410_s22 + $0x1] sm:$0xff]  ;;  %v2490_v43 = vld [vmem:[%s7410_s22 + $0x9] sm:$0xff] }
 0x298   : > { %v2001_v52 = vpop.permute.xlu0 %2000  ;;  %v2003_v53 = vpop.permute.xlu1 %2002 }
 0x299   : > { %2087 = vst.msk [vmem:[#allocation2 + $0x20] sm:$0xff] %vm2082_vm9, %v2001_v52  ;;  %2088 = vst.msk [vmem:[#allocation2 + $0x28] sm:$0xff] %vm2082_vm9, %v2003_v53 }
 0x29a   : > { %2307 = vrot.lane.b32.xlu0 %v2297_v48, %s6732_s5  ;;  %2309 = vrot.lane.b32.xlu1 %v2298_v49, %s6732_s5  ;;  %v2491_v48 = vld [vmem:[%s7410_s22 + $0x19] sm:$0xff]  ;;  %v2492_v49 = vld [vmem:[%s7410_s22 + $0x21] sm:$0xff]  ;;  %s6743_s5 = smov 84  }
 0x29c   : > { %v2005_v56 = vpop.permute.xlu0 %2004  ;;  %v2007_v57 = vpop.permute.xlu1 %2006 }
 0x29d   : > { %2089 = vst.msk [vmem:[#allocation2 + $0x30] sm:$0xff] %vm2082_vm9, %v2005_v56  ;;  %2090 = vst.msk [vmem:[#allocation2 + $0x38] sm:$0xff] %vm2082_vm9, %v2007_v57 }
 0x29e   : > { %2376 = vrot.lane.b32.xlu0 %v5960_v2, %s6733_s6  ;;  %2378 = vrot.lane.b32.xlu1 %v5961_v3, %s6733_s6  ;;  %v5988_v2 = vld [vmem:[%s6839_s7 + $0x32] sm:$0xff]  ;;  %v5989_v3 = vld [vmem:[%s6839_s7 + $0x3a] sm:$0xff] }
 0x2a0   : > { %v2009_v6 = vpop.permute.xlu0 %2008  ;;  %v2011_v7 = vpop.permute.xlu1 %2010 }
 0x2a1   : > { %2091 = vst.msk [vmem:[#allocation2 + $0x40] sm:$0xff] %vm2082_vm9, %v2009_v6  ;;  %2092 = vst.msk [vmem:[#allocation2 + $0x48] sm:$0xff] %vm2082_vm9, %v2011_v7 }
 0x2a2   : > { %2380 = vrot.lane.b32.xlu0 %v5962_v4, %s6733_s6  ;;  %2382 = vrot.lane.b32.xlu1 %v5963_v5, %s6733_s6  ;;  %v5990_v4 = vld [vmem:[%s6839_s7 + $0x4a] sm:$0xff]  ;;  %v5991_v5 = vld [vmem:[%s6839_s7 + $0x52] sm:$0xff] }
 0x2a4   : > { %v2013_v10 = vpop.permute.xlu0 %2012  ;;  %v2015_v11 = vpop.permute.xlu1 %2014 }
 0x2a5   : > { %2093 = vst.msk [vmem:[#allocation2 + $0x50] sm:$0xff] %vm2082_vm9, %v2013_v10  ;;  %2094 = vst.msk [vmem:[#allocation2 + $0x58] sm:$0xff] %vm2082_vm9, %v2015_v11 }
 0x2a6   : > { %2384 = vrot.lane.b32.xlu0 %v5964_v8, %s6733_s6  ;;  %2386 = vrot.lane.b32.xlu1 %v5965_v9, %s6733_s6  ;;  %v5992_v8 = vld [vmem:[%s6839_s7 + $0x62] sm:$0xff]  ;;  %v5993_v9 = vld [vmem:[%s6839_s7 + $0x6a] sm:$0xff] }
 0x2a8   : > { %v2017_v15 = vpop.permute.xlu0 %2016  ;;  %v2019_v16 = vpop.permute.xlu1 %2018 }
 0x2a9   : > { %2095 = vst.msk [vmem:[#allocation2 + $0x60] sm:$0xff] %vm2082_vm9, %v2017_v15  ;;  %2096 = vst.msk [vmem:[#allocation2 + $0x68] sm:$0xff] %vm2082_vm9, %v2019_v16 }
 0x2aa   : > { %2388 = vrot.lane.b32.xlu0 %v5966_v12, %s6733_s6  ;;  %2390 = vrot.lane.b32.xlu1 %v5967_v14, %s6733_s6  ;;  %v5994_v12 = vld [vmem:[%s6839_s7 + $0x7a] sm:$0xff]  ;;  %v5995_v14 = vld [vmem:[%s6839_s7 + $0x82] sm:$0xff] }
 0x2ac   : > { %v2021_v28 = vpop.permute.xlu0 %2020  ;;  %v2023_v29 = vpop.permute.xlu1 %2022 }
 0x2ad   : > { %2097 = vst.msk [vmem:[#allocation2 + $0x70] sm:$0xff] %vm2082_vm9, %v2021_v28  ;;  %2098 = vst.msk [vmem:[#allocation2 + $0x78] sm:$0xff] %vm2082_vm9, %v2023_v29 }
 0x2ae   : > { %2392 = vrot.lane.b32.xlu0 %v5968_v21, %s6733_s6  ;;  %2394 = vrot.lane.b32.xlu1 %v5969_v22, %s6733_s6  ;;  %v5996_v21 = vld [vmem:[%s6839_s7 + $0x92] sm:$0xff]  ;;  %v5997_v22 = vld [vmem:[%s6839_s7 + $0x9a] sm:$0xff] }
 0x2b0   : > { %v2025_v44 = vpop.permute.xlu0 %2024  ;;  %v2027_v45 = vpop.permute.xlu1 %2026 }
 0x2b1   : > { %2099 = vst.msk [vmem:[#allocation2 + $0x80] sm:$0xff] %vm2082_vm9, %v2025_v44  ;;  %2100 = vst.msk [vmem:[#allocation2 + $0x88] sm:$0xff] %vm2082_vm9, %v2027_v45 }
 0x2b2   : > { %2396 = vrot.lane.b32.xlu0 %v5970_v35, %s6733_s6  ;;  %2398 = vrot.lane.b32.xlu1 %v5971_v37, %s6733_s6  ;;  %v5998_v35 = vld [vmem:[%s6839_s7 + $0xaa] sm:$0xff]  ;;  %v5999_v37 = vld [vmem:[%s6839_s7 + $0xb2] sm:$0xff] }
 0x2b4   : > { %v2029_v54 = vpop.permute.xlu0 %2028  ;;  %v2031_v55 = vpop.permute.xlu1 %2030 }
 0x2b5   : > { %2101 = vst.msk [vmem:[#allocation2 + $0x90] sm:$0xff] %vm2082_vm9, %v2029_v54  ;;  %2102 = vst.msk [vmem:[#allocation2 + $0x98] sm:$0xff] %vm2082_vm9, %v2031_v55 }
 0x2b6   : > { %2400 = vrot.lane.b32.xlu0 %v5972_v50, %s6733_s6  ;;  %2402 = vrot.lane.b32.xlu1 %v5973_v51, %s6733_s6  ;;  %v6000_v50 = vld [vmem:[%s6839_s7 + $0xc2] sm:$0xff]  ;;  %v6001_v51 = vld [vmem:[%s6839_s7 + $0xca] sm:$0xff] }
 0x2b8   : > { %v2033_v60 = vpop.permute.xlu0 %2032  ;;  %v2035_v61 = vpop.permute.xlu1 %2034 }
 0x2b9   : > { %2103 = vst.msk [vmem:[#allocation2 + $0xa0] sm:$0xff] %vm2082_vm9, %v2033_v60  ;;  %2104 = vst.msk [vmem:[#allocation2 + $0xa8] sm:$0xff] %vm2082_vm9, %v2035_v61 }
 0x2ba   : > { %2404 = vrot.lane.b32.xlu0 %v5974_v58, %s6733_s6  ;;  %2406 = vrot.lane.b32.xlu1 %v5975_v59, %s6733_s6  ;;  %v6002_v58 = vld [vmem:[%s6839_s7 + $0xda] sm:$0xff]  ;;  %v6003_v59 = vld [vmem:[%s6839_s7 + $0xe2] sm:$0xff] }
 0x2bc   : > { %v2037_v0 = vpop.permute.xlu0 %2036  ;;  %v2039_v1 = vpop.permute.xlu1 %2038 }
 0x2bd   : > { %2105 = vst.msk [vmem:[#allocation2 + $0xb0] sm:$0xff] %vm2082_vm9, %v2037_v0  ;;  %2106 = vst.msk [vmem:[#allocation2 + $0xb8] sm:$0xff] %vm2082_vm9, %v2039_v1 }
 0x2be   : > { %2408 = vrot.lane.b32.xlu0 %v5976_v62, %s6733_s6  ;;  %2410 = vrot.lane.b32.xlu1 %v5977_v63, %s6733_s6  ;;  %v6004_v62 = vld [vmem:[%s6839_s7 + $0xf2] sm:$0xff]  ;;  %v6005_v63 = vld [vmem:[%s6839_s7 + $0xfa] sm:$0xff] }
 0x2c0   : > { %v2041_v18 = vpop.permute.xlu0 %2040  ;;  %v2043_v19 = vpop.permute.xlu1 %2042 }
 0x2c1   : > { %2107 = vst.msk [vmem:[#allocation2 + $0xc0] sm:$0xff] %vm2082_vm9, %v2041_v18  ;;  %2108 = vst.msk [vmem:[#allocation2 + $0xc8] sm:$0xff] %vm2082_vm9, %v2043_v19 }
 0x2c2   : > { %2412 = vrot.lane.b32.xlu0 %v5978_v13, %s6733_s6  ;;  %2414 = vrot.lane.b32.xlu1 %v5979_v17, %s6733_s6  ;;  %v6006_v13 = vld [vmem:[%s6839_s7 + $0x10a] sm:$0xff]  ;;  %v6007_v17 = vld [vmem:[%s6839_s7 + $0x112] sm:$0xff] }
 0x2c4   : > { %v2045_v24 = vpop.permute.xlu0 %2044  ;;  %v2047_v25 = vpop.permute.xlu1 %2046 }
 0x2c5   : > { %2109 = vst.msk [vmem:[#allocation2 + $0xd0] sm:$0xff] %vm2082_vm9, %v2045_v24  ;;  %2110 = vst.msk [vmem:[#allocation2 + $0xd8] sm:$0xff] %vm2082_vm9, %v2047_v25 }
 0x2c6   : > { %2416 = vrot.lane.b32.xlu0 %v5980_v20, %s6733_s6  ;;  %2418 = vrot.lane.b32.xlu1 %v5981_v23, %s6733_s6  ;;  %v6008_v20 = vld [vmem:[%s6839_s7 + $0x122] sm:$0xff]  ;;  %v6009_v23 = vld [vmem:[%s6839_s7 + $0x12a] sm:$0xff] }
 0x2c8   : > { %v2049_v30 = vpop.permute.xlu0 %2048  ;;  %v2051_v31 = vpop.permute.xlu1 %2050 }
 0x2c9   : > { %2111 = vst.msk [vmem:[#allocation2 + $0xe0] sm:$0xff] %vm2082_vm9, %v2049_v30  ;;  %2112 = vst.msk [vmem:[#allocation2 + $0xe8] sm:$0xff] %vm2082_vm9, %v2051_v31 }
 0x2ca   : > { %2420 = vrot.lane.b32.xlu0 %v5982_v26, %s6733_s6  ;;  %2422 = vrot.lane.b32.xlu1 %v5983_v27, %s6733_s6  ;;  %v6010_v26 = vld [vmem:[%s6839_s7 + $0x13a] sm:$0xff]  ;;  %v6011_v27 = vld [vmem:[%s6839_s7 + $0x142] sm:$0xff] }
 0x2cc   : > { %v2118_v34 = vpop.permute.xlu0 %2117  ;;  %v2120_v36 = vpop.permute.xlu1 %2119 }
 0x2cd   : > { %2123 = vst.msk [vmem:[#allocation2 + $0xf0] sm:$0xff] %vm2082_vm9, %v2118_v34  ;;  %2124 = vst.msk [vmem:[#allocation2 + $0xf8] sm:$0xff] %vm2082_vm9, %v2120_v36  ;;  %vm4953_vm9 = vcmask 818944  }
 0x2ce   : > { %2424 = vrot.lane.b32.xlu0 %v5984_v32, %s6733_s6  ;;  %2426 = vrot.lane.b32.xlu1 %v5985_v33, %s6733_s6  ;;  %v6012_v32 = vld [vmem:[%s6839_s7 + $0x152] sm:$0xff]  ;;  %v6013_v33 = vld [vmem:[%s6839_s7 + $0x15a] sm:$0xff] }
 0x2d0   : > { %v2183_v40 = vpop.permute.xlu0 %2182  ;;  %v2185_v41 = vpop.permute.xlu1 %2184 }
 0x2d1   : > { %2267 = vst.msk [vmem:[#allocation2] sm:$0xff] %vm2266_vm10, %v2183_v40  ;;  %2268 = vst.msk [vmem:[#allocation2 + $0x8] sm:$0xff] %vm2266_vm10, %v2185_v41 }
 0x2d2   : > { %2428 = vrot.lane.b32.xlu0 %v5986_v38, %s6733_s6  ;;  %2430 = vrot.lane.b32.xlu1 %v5987_v39, %s6733_s6  ;;  %v6014_v38 = vld [vmem:[%s6839_s7 + $0x16a] sm:$0xff]  ;;  %v6015_v39 = vld [vmem:[%s6839_s7 + $0x172] sm:$0xff] }
 0x2d4   : > { %v2187_v46 = vpop.permute.xlu0 %2186  ;;  %v2189_v47 = vpop.permute.xlu1 %2188 }
 0x2d5   : > { %2269 = vst.msk [vmem:[#allocation2 + $0x10] sm:$0xff] %vm2266_vm10, %v2187_v46  ;;  %2270 = vst.msk [vmem:[#allocation2 + $0x18] sm:$0xff] %vm2266_vm10, %v2189_v47 }
 0x2d6   : > { %2497 = vrot.lane.b32.xlu0 %v2489_v42, %s6733_s6  ;;  %2499 = vrot.lane.b32.xlu1 %v2490_v43, %s6733_s6  ;;  %v2682_v42 = vld [vmem:[%s7410_s22 + $0x2] sm:$0xff]  ;;  %v2683_v43 = vld [vmem:[%s7410_s22 + $0xa] sm:$0xff] }
 0x2d8   : > { %v2191_v52 = vpop.permute.xlu0 %2190  ;;  %v2193_v53 = vpop.permute.xlu1 %2192 }
 0x2d9   : > { %2271 = vst.msk [vmem:[#allocation2 + $0x20] sm:$0xff] %vm2266_vm10, %v2191_v52  ;;  %2272 = vst.msk [vmem:[#allocation2 + $0x28] sm:$0xff] %vm2266_vm10, %v2193_v53 }
 0x2da   : > { %2501 = vrot.lane.b32.xlu0 %v2491_v48, %s6733_s6  ;;  %2503 = vrot.lane.b32.xlu1 %v2492_v49, %s6733_s6  ;;  %v2684_v48 = vld [vmem:[%s7410_s22 + $0x1a] sm:$0xff]  ;;  %v2685_v49 = vld [vmem:[%s7410_s22 + $0x22] sm:$0xff] }
 0x2dc   : > { %v2195_v56 = vpop.permute.xlu0 %2194  ;;  %v2197_v57 = vpop.permute.xlu1 %2196 }
 0x2dd   : > { %2273 = vst.msk [vmem:[#allocation2 + $0x30] sm:$0xff] %vm2266_vm10, %v2195_v56  ;;  %2274 = vst.msk [vmem:[#allocation2 + $0x38] sm:$0xff] %vm2266_vm10, %v2197_v57 }
 0x2de   : > { %2569 = vrot.lane.b32.xlu0 %v5988_v2, %s6734_s8  ;;  %2571 = vrot.lane.b32.xlu1 %v5989_v3, %s6734_s8  ;;  %v6016_v2 = vld [vmem:[%s6839_s7 + $0x33] sm:$0xff]  ;;  %v6017_v3 = vld [vmem:[%s6839_s7 + $0x3b] sm:$0xff] }
 0x2e0   : > { %v2199_v6 = vpop.permute.xlu0 %2198  ;;  %v2201_v7 = vpop.permute.xlu1 %2200 }
 0x2e1   : > { %2275 = vst.msk [vmem:[#allocation2 + $0x40] sm:$0xff] %vm2266_vm10, %v2199_v6  ;;  %2276 = vst.msk [vmem:[#allocation2 + $0x48] sm:$0xff] %vm2266_vm10, %v2201_v7 }
 0x2e2   : > { %2573 = vrot.lane.b32.xlu0 %v5990_v4, %s6734_s8  ;;  %2575 = vrot.lane.b32.xlu1 %v5991_v5, %s6734_s8  ;;  %v6018_v4 = vld [vmem:[%s6839_s7 + $0x4b] sm:$0xff]  ;;  %v6019_v5 = vld [vmem:[%s6839_s7 + $0x53] sm:$0xff] }
 0x2e4   : > { %v2203_v10 = vpop.permute.xlu0 %2202  ;;  %v2205_v11 = vpop.permute.xlu1 %2204 }
 0x2e5   : > { %2277 = vst.msk [vmem:[#allocation2 + $0x50] sm:$0xff] %vm2266_vm10, %v2203_v10  ;;  %2278 = vst.msk [vmem:[#allocation2 + $0x58] sm:$0xff] %vm2266_vm10, %v2205_v11 }
 0x2e6   : > { %2577 = vrot.lane.b32.xlu0 %v5992_v8, %s6734_s8  ;;  %2579 = vrot.lane.b32.xlu1 %v5993_v9, %s6734_s8  ;;  %v6020_v8 = vld [vmem:[%s6839_s7 + $0x63] sm:$0xff]  ;;  %v6021_v9 = vld [vmem:[%s6839_s7 + $0x6b] sm:$0xff] }
 0x2e8   : > { %v2207_v15 = vpop.permute.xlu0 %2206  ;;  %v2209_v16 = vpop.permute.xlu1 %2208 }
 0x2e9   : > { %2279 = vst.msk [vmem:[#allocation2 + $0x60] sm:$0xff] %vm2266_vm10, %v2207_v15  ;;  %2280 = vst.msk [vmem:[#allocation2 + $0x68] sm:$0xff] %vm2266_vm10, %v2209_v16 }
 0x2ea   : > { %2581 = vrot.lane.b32.xlu0 %v5994_v12, %s6734_s8  ;;  %2583 = vrot.lane.b32.xlu1 %v5995_v14, %s6734_s8  ;;  %v6022_v12 = vld [vmem:[%s6839_s7 + $0x7b] sm:$0xff]  ;;  %v6023_v14 = vld [vmem:[%s6839_s7 + $0x83] sm:$0xff] }
 0x2ec   : > { %v2211_v28 = vpop.permute.xlu0 %2210  ;;  %v2213_v29 = vpop.permute.xlu1 %2212 }
 0x2ed   : > { %2281 = vst.msk [vmem:[#allocation2 + $0x70] sm:$0xff] %vm2266_vm10, %v2211_v28  ;;  %2282 = vst.msk [vmem:[#allocation2 + $0x78] sm:$0xff] %vm2266_vm10, %v2213_v29 }
 0x2ee   : > { %2585 = vrot.lane.b32.xlu0 %v5996_v21, %s6734_s8  ;;  %2587 = vrot.lane.b32.xlu1 %v5997_v22, %s6734_s8  ;;  %v6024_v21 = vld [vmem:[%s6839_s7 + $0x93] sm:$0xff]  ;;  %v6025_v22 = vld [vmem:[%s6839_s7 + $0x9b] sm:$0xff] }
 0x2f0   : > { %v2215_v44 = vpop.permute.xlu0 %2214  ;;  %v2217_v45 = vpop.permute.xlu1 %2216 }
 0x2f1   : > { %2283 = vst.msk [vmem:[#allocation2 + $0x80] sm:$0xff] %vm2266_vm10, %v2215_v44  ;;  %2284 = vst.msk [vmem:[#allocation2 + $0x88] sm:$0xff] %vm2266_vm10, %v2217_v45 }
 0x2f2   : > { %2589 = vrot.lane.b32.xlu0 %v5998_v35, %s6734_s8  ;;  %2591 = vrot.lane.b32.xlu1 %v5999_v37, %s6734_s8  ;;  %v6026_v35 = vld [vmem:[%s6839_s7 + $0xab] sm:$0xff]  ;;  %v6027_v37 = vld [vmem:[%s6839_s7 + $0xb3] sm:$0xff] }
 0x2f4   : > { %v2219_v54 = vpop.permute.xlu0 %2218  ;;  %v2221_v55 = vpop.permute.xlu1 %2220 }
 0x2f5   : > { %2285 = vst.msk [vmem:[#allocation2 + $0x90] sm:$0xff] %vm2266_vm10, %v2219_v54  ;;  %2286 = vst.msk [vmem:[#allocation2 + $0x98] sm:$0xff] %vm2266_vm10, %v2221_v55 }
 0x2f6   : > { %2593 = vrot.lane.b32.xlu0 %v6000_v50, %s6734_s8  ;;  %2595 = vrot.lane.b32.xlu1 %v6001_v51, %s6734_s8  ;;  %v6028_v50 = vld [vmem:[%s6839_s7 + $0xc3] sm:$0xff]  ;;  %v6029_v51 = vld [vmem:[%s6839_s7 + $0xcb] sm:$0xff] }
 0x2f8   : > { %v2223_v60 = vpop.permute.xlu0 %2222  ;;  %v2225_v61 = vpop.permute.xlu1 %2224 }
 0x2f9   : > { %2287 = vst.msk [vmem:[#allocation2 + $0xa0] sm:$0xff] %vm2266_vm10, %v2223_v60  ;;  %2288 = vst.msk [vmem:[#allocation2 + $0xa8] sm:$0xff] %vm2266_vm10, %v2225_v61 }
 0x2fa   : > { %2597 = vrot.lane.b32.xlu0 %v6002_v58, %s6734_s8  ;;  %2599 = vrot.lane.b32.xlu1 %v6003_v59, %s6734_s8  ;;  %v6030_v58 = vld [vmem:[%s6839_s7 + $0xdb] sm:$0xff]  ;;  %v6031_v59 = vld [vmem:[%s6839_s7 + $0xe3] sm:$0xff] }
 0x2fc   : > { %v2227_v0 = vpop.permute.xlu0 %2226  ;;  %v2229_v1 = vpop.permute.xlu1 %2228 }
 0x2fd   : > { %2289 = vst.msk [vmem:[#allocation2 + $0xb0] sm:$0xff] %vm2266_vm10, %v2227_v0  ;;  %2290 = vst.msk [vmem:[#allocation2 + $0xb8] sm:$0xff] %vm2266_vm10, %v2229_v1 }
 0x2fe   : > { %2601 = vrot.lane.b32.xlu0 %v6004_v62, %s6734_s8  ;;  %2603 = vrot.lane.b32.xlu1 %v6005_v63, %s6734_s8  ;;  %v6032_v62 = vld [vmem:[%s6839_s7 + $0xf3] sm:$0xff]  ;;  %v6033_v63 = vld [vmem:[%s6839_s7 + $0xfb] sm:$0xff] }
 0x300   : > { %v2231_v18 = vpop.permute.xlu0 %2230  ;;  %v2233_v19 = vpop.permute.xlu1 %2232 }
 0x301   : > { %2291 = vst.msk [vmem:[#allocation2 + $0xc0] sm:$0xff] %vm2266_vm10, %v2231_v18  ;;  %2292 = vst.msk [vmem:[#allocation2 + $0xc8] sm:$0xff] %vm2266_vm10, %v2233_v19 }
 0x302   : > { %2605 = vrot.lane.b32.xlu0 %v6006_v13, %s6734_s8  ;;  %2607 = vrot.lane.b32.xlu1 %v6007_v17, %s6734_s8  ;;  %v6034_v13 = vld [vmem:[%s6839_s7 + $0x10b] sm:$0xff]  ;;  %v6035_v17 = vld [vmem:[%s6839_s7 + $0x113] sm:$0xff] }
 0x304   : > { %v2235_v24 = vpop.permute.xlu0 %2234  ;;  %v2237_v25 = vpop.permute.xlu1 %2236 }
 0x305   : > { %2293 = vst.msk [vmem:[#allocation2 + $0xd0] sm:$0xff] %vm2266_vm10, %v2235_v24  ;;  %2294 = vst.msk [vmem:[#allocation2 + $0xd8] sm:$0xff] %vm2266_vm10, %v2237_v25 }
 0x306   : > { %2609 = vrot.lane.b32.xlu0 %v6008_v20, %s6734_s8  ;;  %2611 = vrot.lane.b32.xlu1 %v6009_v23, %s6734_s8  ;;  %v6036_v20 = vld [vmem:[%s6839_s7 + $0x123] sm:$0xff]  ;;  %v6037_v23 = vld [vmem:[%s6839_s7 + $0x12b] sm:$0xff] }
 0x308   : > { %v2304_v30 = vpop.permute.xlu0 %2303  ;;  %v2306_v31 = vpop.permute.xlu1 %2305 }
 0x309   : > { %2316 = vst.msk [vmem:[#allocation2 + $0xe0] sm:$0xff] %vm2266_vm10, %v2304_v30  ;;  %2317 = vst.msk [vmem:[#allocation2 + $0xe8] sm:$0xff] %vm2266_vm10, %v2306_v31 }
 0x30a   : > { %2613 = vrot.lane.b32.xlu0 %v6010_v26, %s6734_s8  ;;  %2615 = vrot.lane.b32.xlu1 %v6011_v27, %s6734_s8  ;;  %v6038_v26 = vld [vmem:[%s6839_s7 + $0x13b] sm:$0xff]  ;;  %v6039_v27 = vld [vmem:[%s6839_s7 + $0x143] sm:$0xff] }
 0x30c   : > { %v2308_v34 = vpop.permute.xlu0 %2307  ;;  %v2310_v36 = vpop.permute.xlu1 %2309 }
 0x30d   : > { %2318 = vst.msk [vmem:[#allocation2 + $0xf0] sm:$0xff] %vm2266_vm10, %v2308_v34  ;;  %2319 = vst.msk [vmem:[#allocation2 + $0xf8] sm:$0xff] %vm2266_vm10, %v2310_v36  ;;  %vm5071_vm10 = vcmask 818176  }
 0x30e   : > { %2617 = vrot.lane.b32.xlu0 %v6012_v32, %s6734_s8  ;;  %2619 = vrot.lane.b32.xlu1 %v6013_v33, %s6734_s8  ;;  %v6040_v32 = vld [vmem:[%s6839_s7 + $0x153] sm:$0xff]  ;;  %v6041_v33 = vld [vmem:[%s6839_s7 + $0x15b] sm:$0xff] }
 0x310   : > { %v2377_v40 = vpop.permute.xlu0 %2376  ;;  %v2379_v41 = vpop.permute.xlu1 %2378 }
 0x311   : > { %2461 = vst.msk [vmem:[#allocation2] sm:$0xff] %vm2460_vm11, %v2377_v40  ;;  %2462 = vst.msk [vmem:[#allocation2 + $0x8] sm:$0xff] %vm2460_vm11, %v2379_v41 }
 0x312   : > { %2621 = vrot.lane.b32.xlu0 %v6014_v38, %s6734_s8  ;;  %2623 = vrot.lane.b32.xlu1 %v6015_v39, %s6734_s8  ;;  %v6042_v38 = vld [vmem:[%s6839_s7 + $0x16b] sm:$0xff]  ;;  %v6043_v39 = vld [vmem:[%s6839_s7 + $0x173] sm:$0xff] }
 0x314   : > { %v2381_v46 = vpop.permute.xlu0 %2380  ;;  %v2383_v47 = vpop.permute.xlu1 %2382 }
 0x315   : > { %2463 = vst.msk [vmem:[#allocation2 + $0x10] sm:$0xff] %vm2460_vm11, %v2381_v46  ;;  %2464 = vst.msk [vmem:[#allocation2 + $0x18] sm:$0xff] %vm2460_vm11, %v2383_v47 }
 0x316   : > { %2690 = vrot.lane.b32.xlu0 %v2682_v42, %s6734_s8  ;;  %2692 = vrot.lane.b32.xlu1 %v2683_v43, %s6734_s8  ;;  %v2875_v42 = vld [vmem:[%s7410_s22 + $0x3] sm:$0xff]  ;;  %v2876_v43 = vld [vmem:[%s7410_s22 + $0xb] sm:$0xff] }
 0x318   : > { %v2385_v52 = vpop.permute.xlu0 %2384  ;;  %v2387_v53 = vpop.permute.xlu1 %2386 }
 0x319   : > { %2465 = vst.msk [vmem:[#allocation2 + $0x20] sm:$0xff] %vm2460_vm11, %v2385_v52  ;;  %2466 = vst.msk [vmem:[#allocation2 + $0x28] sm:$0xff] %vm2460_vm11, %v2387_v53 }
 0x31a   : > { %2694 = vrot.lane.b32.xlu0 %v2684_v48, %s6734_s8  ;;  %2696 = vrot.lane.b32.xlu1 %v2685_v49, %s6734_s8  ;;  %v2877_v48 = vld [vmem:[%s7410_s22 + $0x1b] sm:$0xff]  ;;  %v2878_v49 = vld [vmem:[%s7410_s22 + $0x23] sm:$0xff] }
 0x31c   : > { %v2389_v56 = vpop.permute.xlu0 %2388  ;;  %v2391_v57 = vpop.permute.xlu1 %2390 }
 0x31d   : > { %2467 = vst.msk [vmem:[#allocation2 + $0x30] sm:$0xff] %vm2460_vm11, %v2389_v56  ;;  %2468 = vst.msk [vmem:[#allocation2 + $0x38] sm:$0xff] %vm2460_vm11, %v2391_v57 }
 0x31e   : > { %2762 = vrot.lane.b32.xlu0 %v6016_v2, %s6735_s9  ;;  %2764 = vrot.lane.b32.xlu1 %v6017_v3, %s6735_s9  ;;  %v6044_v2 = vld [vmem:[%s6839_s7 + $0x34] sm:$0xff]  ;;  %v6045_v3 = vld [vmem:[%s6839_s7 + $0x3c] sm:$0xff] }
 0x320   : > { %v2393_v6 = vpop.permute.xlu0 %2392  ;;  %v2395_v7 = vpop.permute.xlu1 %2394 }
 0x321   : > { %2469 = vst.msk [vmem:[#allocation2 + $0x40] sm:$0xff] %vm2460_vm11, %v2393_v6  ;;  %2470 = vst.msk [vmem:[#allocation2 + $0x48] sm:$0xff] %vm2460_vm11, %v2395_v7 }
 0x322   : > { %2766 = vrot.lane.b32.xlu0 %v6018_v4, %s6735_s9  ;;  %2768 = vrot.lane.b32.xlu1 %v6019_v5, %s6735_s9  ;;  %v6046_v4 = vld [vmem:[%s6839_s7 + $0x4c] sm:$0xff]  ;;  %v6047_v5 = vld [vmem:[%s6839_s7 + $0x54] sm:$0xff] }
 0x324   : > { %v2397_v10 = vpop.permute.xlu0 %2396  ;;  %v2399_v11 = vpop.permute.xlu1 %2398 }
 0x325   : > { %2471 = vst.msk [vmem:[#allocation2 + $0x50] sm:$0xff] %vm2460_vm11, %v2397_v10  ;;  %2472 = vst.msk [vmem:[#allocation2 + $0x58] sm:$0xff] %vm2460_vm11, %v2399_v11 }
 0x326   : > { %2770 = vrot.lane.b32.xlu0 %v6020_v8, %s6735_s9  ;;  %2772 = vrot.lane.b32.xlu1 %v6021_v9, %s6735_s9  ;;  %v6048_v8 = vld [vmem:[%s6839_s7 + $0x64] sm:$0xff]  ;;  %v6049_v9 = vld [vmem:[%s6839_s7 + $0x6c] sm:$0xff] }
 0x328   : > { %v2401_v15 = vpop.permute.xlu0 %2400  ;;  %v2403_v16 = vpop.permute.xlu1 %2402 }
 0x329   : > { %2473 = vst.msk [vmem:[#allocation2 + $0x60] sm:$0xff] %vm2460_vm11, %v2401_v15  ;;  %2474 = vst.msk [vmem:[#allocation2 + $0x68] sm:$0xff] %vm2460_vm11, %v2403_v16 }
 0x32a   : > { %2774 = vrot.lane.b32.xlu0 %v6022_v12, %s6735_s9  ;;  %2776 = vrot.lane.b32.xlu1 %v6023_v14, %s6735_s9  ;;  %v6050_v12 = vld [vmem:[%s6839_s7 + $0x7c] sm:$0xff]  ;;  %v6051_v14 = vld [vmem:[%s6839_s7 + $0x84] sm:$0xff] }
 0x32c   : > { %v2405_v28 = vpop.permute.xlu0 %2404  ;;  %v2407_v29 = vpop.permute.xlu1 %2406 }
 0x32d   : > { %2475 = vst.msk [vmem:[#allocation2 + $0x70] sm:$0xff] %vm2460_vm11, %v2405_v28  ;;  %2476 = vst.msk [vmem:[#allocation2 + $0x78] sm:$0xff] %vm2460_vm11, %v2407_v29 }
 0x32e   : > { %2778 = vrot.lane.b32.xlu0 %v6024_v21, %s6735_s9  ;;  %2780 = vrot.lane.b32.xlu1 %v6025_v22, %s6735_s9  ;;  %v6052_v21 = vld [vmem:[%s6839_s7 + $0x94] sm:$0xff]  ;;  %v6053_v22 = vld [vmem:[%s6839_s7 + $0x9c] sm:$0xff] }
 0x330   : > { %v2409_v44 = vpop.permute.xlu0 %2408  ;;  %v2411_v45 = vpop.permute.xlu1 %2410 }
 0x331   : > { %2477 = vst.msk [vmem:[#allocation2 + $0x80] sm:$0xff] %vm2460_vm11, %v2409_v44  ;;  %2478 = vst.msk [vmem:[#allocation2 + $0x88] sm:$0xff] %vm2460_vm11, %v2411_v45 }
 0x332   : > { %2782 = vrot.lane.b32.xlu0 %v6026_v35, %s6735_s9  ;;  %2784 = vrot.lane.b32.xlu1 %v6027_v37, %s6735_s9  ;;  %v6054_v35 = vld [vmem:[%s6839_s7 + $0xac] sm:$0xff]  ;;  %v6055_v37 = vld [vmem:[%s6839_s7 + $0xb4] sm:$0xff] }
 0x334   : > { %v2413_v54 = vpop.permute.xlu0 %2412  ;;  %v2415_v55 = vpop.permute.xlu1 %2414 }
 0x335   : > { %2479 = vst.msk [vmem:[#allocation2 + $0x90] sm:$0xff] %vm2460_vm11, %v2413_v54  ;;  %2480 = vst.msk [vmem:[#allocation2 + $0x98] sm:$0xff] %vm2460_vm11, %v2415_v55 }
 0x336   : > { %2786 = vrot.lane.b32.xlu0 %v6028_v50, %s6735_s9  ;;  %2788 = vrot.lane.b32.xlu1 %v6029_v51, %s6735_s9  ;;  %v6056_v50 = vld [vmem:[%s6839_s7 + $0xc4] sm:$0xff]  ;;  %v6057_v51 = vld [vmem:[%s6839_s7 + $0xcc] sm:$0xff] }
 0x338   : > { %v2417_v60 = vpop.permute.xlu0 %2416  ;;  %v2419_v61 = vpop.permute.xlu1 %2418 }
 0x339   : > { %2481 = vst.msk [vmem:[#allocation2 + $0xa0] sm:$0xff] %vm2460_vm11, %v2417_v60  ;;  %2482 = vst.msk [vmem:[#allocation2 + $0xa8] sm:$0xff] %vm2460_vm11, %v2419_v61 }
 0x33a   : > { %2790 = vrot.lane.b32.xlu0 %v6030_v58, %s6735_s9  ;;  %2792 = vrot.lane.b32.xlu1 %v6031_v59, %s6735_s9  ;;  %v6058_v58 = vld [vmem:[%s6839_s7 + $0xdc] sm:$0xff]  ;;  %v6059_v59 = vld [vmem:[%s6839_s7 + $0xe4] sm:$0xff] }
 0x33c   : > { %v2421_v0 = vpop.permute.xlu0 %2420  ;;  %v2423_v1 = vpop.permute.xlu1 %2422 }
 0x33d   : > { %2483 = vst.msk [vmem:[#allocation2 + $0xb0] sm:$0xff] %vm2460_vm11, %v2421_v0  ;;  %2484 = vst.msk [vmem:[#allocation2 + $0xb8] sm:$0xff] %vm2460_vm11, %v2423_v1 }
 0x33e   : > { %2794 = vrot.lane.b32.xlu0 %v6032_v62, %s6735_s9  ;;  %2796 = vrot.lane.b32.xlu1 %v6033_v63, %s6735_s9  ;;  %v6060_v62 = vld [vmem:[%s6839_s7 + $0xf4] sm:$0xff]  ;;  %v6061_v63 = vld [vmem:[%s6839_s7 + $0xfc] sm:$0xff] }
 0x340   : > { %v2425_v18 = vpop.permute.xlu0 %2424  ;;  %v2427_v19 = vpop.permute.xlu1 %2426 }
 0x341   : > { %2485 = vst.msk [vmem:[#allocation2 + $0xc0] sm:$0xff] %vm2460_vm11, %v2425_v18  ;;  %2486 = vst.msk [vmem:[#allocation2 + $0xc8] sm:$0xff] %vm2460_vm11, %v2427_v19 }
 0x342   : > { %2798 = vrot.lane.b32.xlu0 %v6034_v13, %s6735_s9  ;;  %2800 = vrot.lane.b32.xlu1 %v6035_v17, %s6735_s9  ;;  %v6062_v13 = vld [vmem:[%s6839_s7 + $0x10c] sm:$0xff]  ;;  %v6063_v17 = vld [vmem:[%s6839_s7 + $0x114] sm:$0xff] }
 0x344   : > { %v2429_v24 = vpop.permute.xlu0 %2428  ;;  %v2431_v25 = vpop.permute.xlu1 %2430 }
 0x345   : > { %2487 = vst.msk [vmem:[#allocation2 + $0xd0] sm:$0xff] %vm2460_vm11, %v2429_v24  ;;  %2488 = vst.msk [vmem:[#allocation2 + $0xd8] sm:$0xff] %vm2460_vm11, %v2431_v25 }
 0x346   : > { %2802 = vrot.lane.b32.xlu0 %v6036_v20, %s6735_s9  ;;  %2804 = vrot.lane.b32.xlu1 %v6037_v23, %s6735_s9  ;;  %v6064_v20 = vld [vmem:[%s6839_s7 + $0x124] sm:$0xff]  ;;  %v6065_v23 = vld [vmem:[%s6839_s7 + $0x12c] sm:$0xff] }
 0x348   : > { %v2498_v30 = vpop.permute.xlu0 %2497  ;;  %v2500_v31 = vpop.permute.xlu1 %2499 }
 0x349   : > { %2509 = vst.msk [vmem:[#allocation2 + $0xe0] sm:$0xff] %vm2460_vm11, %v2498_v30  ;;  %2510 = vst.msk [vmem:[#allocation2 + $0xe8] sm:$0xff] %vm2460_vm11, %v2500_v31 }
 0x34a   : > { %2806 = vrot.lane.b32.xlu0 %v6038_v26, %s6735_s9  ;;  %2808 = vrot.lane.b32.xlu1 %v6039_v27, %s6735_s9  ;;  %v6066_v26 = vld [vmem:[%s6839_s7 + $0x13c] sm:$0xff]  ;;  %v6067_v27 = vld [vmem:[%s6839_s7 + $0x144] sm:$0xff] }
 0x34c   : > { %v2502_v34 = vpop.permute.xlu0 %2501  ;;  %v2504_v36 = vpop.permute.xlu1 %2503 }
 0x34d   : > { %2511 = vst.msk [vmem:[#allocation2 + $0xf0] sm:$0xff] %vm2460_vm11, %v2502_v34  ;;  %2512 = vst.msk [vmem:[#allocation2 + $0xf8] sm:$0xff] %vm2460_vm11, %v2504_v36 }
 0x34e   : > { %2810 = vrot.lane.b32.xlu0 %v6040_v32, %s6735_s9  ;;  %2812 = vrot.lane.b32.xlu1 %v6041_v33, %s6735_s9  ;;  %v6068_v32 = vld [vmem:[%s6839_s7 + $0x154] sm:$0xff]  ;;  %v6069_v33 = vld [vmem:[%s6839_s7 + $0x15c] sm:$0xff] }
 0x350   : > { %v2570_v40 = vpop.permute.xlu0 %2569  ;;  %v2572_v41 = vpop.permute.xlu1 %2571 }
 0x351   : > { %2654 = vst.msk [vmem:[#allocation2] sm:$0xff] %vm2653_vm12, %v2570_v40  ;;  %2655 = vst.msk [vmem:[#allocation2 + $0x8] sm:$0xff] %vm2653_vm12, %v2572_v41 }
 0x352   : > { %2814 = vrot.lane.b32.xlu0 %v6042_v38, %s6735_s9  ;;  %2816 = vrot.lane.b32.xlu1 %v6043_v39, %s6735_s9  ;;  %v6070_v38 = vld [vmem:[%s6839_s7 + $0x16c] sm:$0xff]  ;;  %v6071_v39 = vld [vmem:[%s6839_s7 + $0x174] sm:$0xff] }
 0x354   : > { %v2574_v46 = vpop.permute.xlu0 %2573  ;;  %v2576_v47 = vpop.permute.xlu1 %2575 }
 0x355   : > { %2656 = vst.msk [vmem:[#allocation2 + $0x10] sm:$0xff] %vm2653_vm12, %v2574_v46  ;;  %2657 = vst.msk [vmem:[#allocation2 + $0x18] sm:$0xff] %vm2653_vm12, %v2576_v47 }
 0x356   : > { %2883 = vrot.lane.b32.xlu0 %v2875_v42, %s6735_s9  ;;  %2885 = vrot.lane.b32.xlu1 %v2876_v43, %s6735_s9  ;;  %v3068_v42 = vld [vmem:[%s7410_s22 + $0x4] sm:$0xff]  ;;  %v3069_v43 = vld [vmem:[%s7410_s22 + $0xc] sm:$0xff] }
 0x358   : > { %v2578_v52 = vpop.permute.xlu0 %2577  ;;  %v2580_v53 = vpop.permute.xlu1 %2579 }
 0x359   : > { %2658 = vst.msk [vmem:[#allocation2 + $0x20] sm:$0xff] %vm2653_vm12, %v2578_v52  ;;  %2659 = vst.msk [vmem:[#allocation2 + $0x28] sm:$0xff] %vm2653_vm12, %v2580_v53 }
 0x35a   : > { %2887 = vrot.lane.b32.xlu0 %v2877_v48, %s6735_s9  ;;  %2889 = vrot.lane.b32.xlu1 %v2878_v49, %s6735_s9  ;;  %v3070_v48 = vld [vmem:[%s7410_s22 + $0x1c] sm:$0xff]  ;;  %v3071_v49 = vld [vmem:[%s7410_s22 + $0x24] sm:$0xff] }
 0x35c   : > { %v2582_v56 = vpop.permute.xlu0 %2581  ;;  %v2584_v57 = vpop.permute.xlu1 %2583 }
 0x35d   : > { %2660 = vst.msk [vmem:[#allocation2 + $0x30] sm:$0xff] %vm2653_vm12, %v2582_v56  ;;  %2661 = vst.msk [vmem:[#allocation2 + $0x38] sm:$0xff] %vm2653_vm12, %v2584_v57 }
 0x35e   : > { %2955 = vrot.lane.b32.xlu0 %v6044_v2, %s6736_s10  ;;  %2957 = vrot.lane.b32.xlu1 %v6045_v3, %s6736_s10  ;;  %v6072_v2 = vld [vmem:[%s6839_s7 + $0x48] sm:$0xff]  ;;  %v6073_v3 = vld [vmem:[%s6839_s7 + $0x50] sm:$0xff] }
 0x360   : > { %v2586_v6 = vpop.permute.xlu0 %2585  ;;  %v2588_v7 = vpop.permute.xlu1 %2587 }
 0x361   : > { %2662 = vst.msk [vmem:[#allocation2 + $0x40] sm:$0xff] %vm2653_vm12, %v2586_v6  ;;  %2663 = vst.msk [vmem:[#allocation2 + $0x48] sm:$0xff] %vm2653_vm12, %v2588_v7 }
 0x362   : > { %2959 = vrot.lane.b32.xlu0 %v6046_v4, %s6736_s10  ;;  %2961 = vrot.lane.b32.xlu1 %v6047_v5, %s6736_s10  ;;  %v6074_v4 = vld [vmem:[%s6839_s7 + $0x60] sm:$0xff]  ;;  %v6075_v5 = vld [vmem:[%s6839_s7 + $0x68] sm:$0xff] }
 0x364   : > { %v2590_v10 = vpop.permute.xlu0 %2589  ;;  %v2592_v11 = vpop.permute.xlu1 %2591 }
 0x365   : > { %2664 = vst.msk [vmem:[#allocation2 + $0x50] sm:$0xff] %vm2653_vm12, %v2590_v10  ;;  %2665 = vst.msk [vmem:[#allocation2 + $0x58] sm:$0xff] %vm2653_vm12, %v2592_v11 }
 0x366   : > { %2963 = vrot.lane.b32.xlu0 %v6048_v8, %s6736_s10  ;;  %2965 = vrot.lane.b32.xlu1 %v6049_v9, %s6736_s10  ;;  %v6076_v8 = vld [vmem:[%s6839_s7 + $0x78] sm:$0xff]  ;;  %v6077_v9 = vld [vmem:[%s6839_s7 + $0x80] sm:$0xff] }
 0x368   : > { %v2594_v15 = vpop.permute.xlu0 %2593  ;;  %v2596_v16 = vpop.permute.xlu1 %2595 }
 0x369   : > { %2666 = vst.msk [vmem:[#allocation2 + $0x60] sm:$0xff] %vm2653_vm12, %v2594_v15  ;;  %2667 = vst.msk [vmem:[#allocation2 + $0x68] sm:$0xff] %vm2653_vm12, %v2596_v16 }
 0x36a   : > { %2967 = vrot.lane.b32.xlu0 %v6050_v12, %s6736_s10  ;;  %2969 = vrot.lane.b32.xlu1 %v6051_v14, %s6736_s10  ;;  %v6078_v12 = vld [vmem:[%s6839_s7 + $0x90] sm:$0xff]  ;;  %v6079_v14 = vld [vmem:[%s6839_s7 + $0x98] sm:$0xff] }
 0x36c   : > { %v2598_v28 = vpop.permute.xlu0 %2597  ;;  %v2600_v29 = vpop.permute.xlu1 %2599 }
 0x36d   : > { %2668 = vst.msk [vmem:[#allocation2 + $0x70] sm:$0xff] %vm2653_vm12, %v2598_v28  ;;  %2669 = vst.msk [vmem:[#allocation2 + $0x78] sm:$0xff] %vm2653_vm12, %v2600_v29 }
 0x36e   : > { %2971 = vrot.lane.b32.xlu0 %v6052_v21, %s6736_s10  ;;  %2973 = vrot.lane.b32.xlu1 %v6053_v22, %s6736_s10  ;;  %v6080_v21 = vld [vmem:[%s6839_s7 + $0xa8] sm:$0xff]  ;;  %v6081_v22 = vld [vmem:[%s6839_s7 + $0xb0] sm:$0xff] }
 0x370   : > { %v2602_v44 = vpop.permute.xlu0 %2601  ;;  %v2604_v45 = vpop.permute.xlu1 %2603 }
 0x371   : > { %2670 = vst.msk [vmem:[#allocation2 + $0x80] sm:$0xff] %vm2653_vm12, %v2602_v44  ;;  %2671 = vst.msk [vmem:[#allocation2 + $0x88] sm:$0xff] %vm2653_vm12, %v2604_v45 }
 0x372   : > { %2975 = vrot.lane.b32.xlu0 %v6054_v35, %s6736_s10  ;;  %2977 = vrot.lane.b32.xlu1 %v6055_v37, %s6736_s10  ;;  %v6082_v35 = vld [vmem:[%s6839_s7 + $0xc0] sm:$0xff]  ;;  %v6083_v37 = vld [vmem:[%s6839_s7 + $0xc8] sm:$0xff] }
 0x374   : > { %v2606_v54 = vpop.permute.xlu0 %2605  ;;  %v2608_v55 = vpop.permute.xlu1 %2607 }
 0x375   : > { %2672 = vst.msk [vmem:[#allocation2 + $0x90] sm:$0xff] %vm2653_vm12, %v2606_v54  ;;  %2673 = vst.msk [vmem:[#allocation2 + $0x98] sm:$0xff] %vm2653_vm12, %v2608_v55 }
 0x376   : > { %2979 = vrot.lane.b32.xlu0 %v6056_v50, %s6736_s10  ;;  %2981 = vrot.lane.b32.xlu1 %v6057_v51, %s6736_s10  ;;  %v6084_v50 = vld [vmem:[%s6839_s7 + $0xd8] sm:$0xff]  ;;  %v6085_v51 = vld [vmem:[%s6839_s7 + $0xe0] sm:$0xff] }
 0x378   : > { %v2610_v60 = vpop.permute.xlu0 %2609  ;;  %v2612_v61 = vpop.permute.xlu1 %2611 }
 0x379   : > { %2674 = vst.msk [vmem:[#allocation2 + $0xa0] sm:$0xff] %vm2653_vm12, %v2610_v60  ;;  %2675 = vst.msk [vmem:[#allocation2 + $0xa8] sm:$0xff] %vm2653_vm12, %v2612_v61 }
 0x37a   : > { %2983 = vrot.lane.b32.xlu0 %v6058_v58, %s6736_s10  ;;  %2985 = vrot.lane.b32.xlu1 %v6059_v59, %s6736_s10  ;;  %v6086_v58 = vld [vmem:[%s6839_s7 + $0xf0] sm:$0xff]  ;;  %v6087_v59 = vld [vmem:[%s6839_s7 + $0xf8] sm:$0xff] }
 0x37c   : > { %v2614_v0 = vpop.permute.xlu0 %2613  ;;  %v2616_v1 = vpop.permute.xlu1 %2615 }
 0x37d   : > { %2676 = vst.msk [vmem:[#allocation2 + $0xb0] sm:$0xff] %vm2653_vm12, %v2614_v0  ;;  %2677 = vst.msk [vmem:[#allocation2 + $0xb8] sm:$0xff] %vm2653_vm12, %v2616_v1 }
 0x37e   : > { %2987 = vrot.lane.b32.xlu0 %v6060_v62, %s6736_s10  ;;  %2989 = vrot.lane.b32.xlu1 %v6061_v63, %s6736_s10  ;;  %v6088_v62 = vld [vmem:[%s6839_s7 + $0x108] sm:$0xff]  ;;  %v6089_v63 = vld [vmem:[%s6839_s7 + $0x110] sm:$0xff] }
 0x380   : > { %v2618_v18 = vpop.permute.xlu0 %2617  ;;  %v2620_v19 = vpop.permute.xlu1 %2619 }
 0x381   : > { %2678 = vst.msk [vmem:[#allocation2 + $0xc0] sm:$0xff] %vm2653_vm12, %v2618_v18  ;;  %2679 = vst.msk [vmem:[#allocation2 + $0xc8] sm:$0xff] %vm2653_vm12, %v2620_v19 }
 0x382   : > { %2991 = vrot.lane.b32.xlu0 %v6062_v13, %s6736_s10  ;;  %2993 = vrot.lane.b32.xlu1 %v6063_v17, %s6736_s10  ;;  %v6090_v13 = vld [vmem:[%s6839_s7 + $0x120] sm:$0xff]  ;;  %v6091_v17 = vld [vmem:[%s6839_s7 + $0x128] sm:$0xff] }
 0x384   : > { %v2622_v24 = vpop.permute.xlu0 %2621  ;;  %v2624_v25 = vpop.permute.xlu1 %2623 }
 0x385   : > { %2680 = vst.msk [vmem:[#allocation2 + $0xd0] sm:$0xff] %vm2653_vm12, %v2622_v24  ;;  %2681 = vst.msk [vmem:[#allocation2 + $0xd8] sm:$0xff] %vm2653_vm12, %v2624_v25 }
 0x386   : > { %2995 = vrot.lane.b32.xlu0 %v6064_v20, %s6736_s10  ;;  %2997 = vrot.lane.b32.xlu1 %v6065_v23, %s6736_s10  ;;  %v6092_v20 = vld [vmem:[%s6839_s7 + $0x138] sm:$0xff]  ;;  %v6093_v23 = vld [vmem:[%s6839_s7 + $0x140] sm:$0xff] }
 0x388   : > { %v2691_v30 = vpop.permute.xlu0 %2690  ;;  %v2693_v31 = vpop.permute.xlu1 %2692 }
 0x389   : > { %2702 = vst.msk [vmem:[#allocation2 + $0xe0] sm:$0xff] %vm2653_vm12, %v2691_v30  ;;  %2703 = vst.msk [vmem:[#allocation2 + $0xe8] sm:$0xff] %vm2653_vm12, %v2693_v31 }
 0x38a   : > { %2999 = vrot.lane.b32.xlu0 %v6066_v26, %s6736_s10  ;;  %3001 = vrot.lane.b32.xlu1 %v6067_v27, %s6736_s10  ;;  %v6094_v26 = vld [vmem:[%s6839_s7 + $0x150] sm:$0xff]  ;;  %v6095_v27 = vld [vmem:[%s6839_s7 + $0x158] sm:$0xff] }
 0x38c   : > { %v2695_v34 = vpop.permute.xlu0 %2694  ;;  %v2697_v36 = vpop.permute.xlu1 %2696 }
 0x38d   : > { %2704 = vst.msk [vmem:[#allocation2 + $0xf0] sm:$0xff] %vm2653_vm12, %v2695_v34  ;;  %2705 = vst.msk [vmem:[#allocation2 + $0xf8] sm:$0xff] %vm2653_vm12, %v2697_v36 }
 0x38e   : > { %3003 = vrot.lane.b32.xlu0 %v6068_v32, %s6736_s10  ;;  %3005 = vrot.lane.b32.xlu1 %v6069_v33, %s6736_s10  ;;  %v6096_v32 = vld [vmem:[%s6839_s7 + $0x168] sm:$0xff]  ;;  %v6097_v33 = vld [vmem:[%s6839_s7 + $0x170] sm:$0xff] }
 0x390   : > { %v2763_v40 = vpop.permute.xlu0 %2762  ;;  %v2765_v41 = vpop.permute.xlu1 %2764 }
 0x391   : > { %2847 = vst.msk [vmem:[#allocation2] sm:$0xff] %vm2846_vm13, %v2763_v40  ;;  %2848 = vst.msk [vmem:[#allocation2 + $0x8] sm:$0xff] %vm2846_vm13, %v2765_v41 }
 0x392   : > { %3007 = vrot.lane.b32.xlu0 %v6070_v38, %s6736_s10  ;;  %3009 = vrot.lane.b32.xlu1 %v6071_v39, %s6736_s10  ;;  %v3250_v38 = vld [vmem:[%s7410_s22] sm:$0xff]  ;;  %v3251_v39 = vld [vmem:[%s7410_s22 + $0x8] sm:$0xff] }
 0x394   : > { %v2767_v46 = vpop.permute.xlu0 %2766  ;;  %v2769_v47 = vpop.permute.xlu1 %2768 }
 0x395   : > { %2849 = vst.msk [vmem:[#allocation2 + $0x10] sm:$0xff] %vm2846_vm13, %v2767_v46  ;;  %2850 = vst.msk [vmem:[#allocation2 + $0x18] sm:$0xff] %vm2846_vm13, %v2769_v47 }
 0x396   : > { %3076 = vrot.lane.b32.xlu0 %v3068_v42, %s6736_s10  ;;  %3078 = vrot.lane.b32.xlu1 %v3069_v43, %s6736_s10  ;;  %v3252_v42 = vld [vmem:[%s7410_s22 + $0x18] sm:$0xff]  ;;  %v3253_v43 = vld [vmem:[%s7410_s22 + $0x20] sm:$0xff] }
 0x398   : > { %v2771_v52 = vpop.permute.xlu0 %2770  ;;  %v2773_v53 = vpop.permute.xlu1 %2772 }
 0x399   : > { %2851 = vst.msk [vmem:[#allocation2 + $0x20] sm:$0xff] %vm2846_vm13, %v2771_v52  ;;  %2852 = vst.msk [vmem:[#allocation2 + $0x28] sm:$0xff] %vm2846_vm13, %v2773_v53 }
 0x39a   : > { %3080 = vrot.lane.b32.xlu0 %v3070_v48, %s6736_s10  ;;  %3082 = vrot.lane.b32.xlu1 %v3071_v49, %s6736_s10  ;;  %v3254_v48 = vld [vmem:[%s7410_s22 + $0x30] sm:$0xff]  ;;  %v3255_v49 = vld [vmem:[%s7410_s22 + $0x38] sm:$0xff]  ;;  %s6364_s10 = sshll.u32 %s6713_s18, 8 }
 0x39c   : > { %v2775_v56 = vpop.permute.xlu0 %2774  ;;  %v2777_v57 = vpop.permute.xlu1 %2776 }
 0x39d   : > { %2853 = vst.msk [vmem:[#allocation2 + $0x30] sm:$0xff] %vm2846_vm13, %v2775_v56  ;;  %2854 = vst.msk [vmem:[#allocation2 + $0x38] sm:$0xff] %vm2846_vm13, %v2777_v57 }
 0x39e   : > { %3145 = vrot.lane.b32.xlu0 %v6072_v2, %s6737_s11  ;;  %3147 = vrot.lane.b32.xlu1 %v6073_v3, %s6737_s11  ;;  %v6098_v2 = vld [vmem:[%s6839_s7 + $0x49] sm:$0xff]  ;;  %v6099_v3 = vld [vmem:[%s6839_s7 + $0x51] sm:$0xff] }
 0x3a0   : > { %v2779_v6 = vpop.permute.xlu0 %2778  ;;  %v2781_v7 = vpop.permute.xlu1 %2780 }
 0x3a1   : > { %2855 = vst.msk [vmem:[#allocation2 + $0x40] sm:$0xff] %vm2846_vm13, %v2779_v6  ;;  %2856 = vst.msk [vmem:[#allocation2 + $0x48] sm:$0xff] %vm2846_vm13, %v2781_v7 }
 0x3a2   : > { %3149 = vrot.lane.b32.xlu0 %v6074_v4, %s6737_s11  ;;  %3151 = vrot.lane.b32.xlu1 %v6075_v5, %s6737_s11  ;;  %v8391_v4 = vld [vmem:[%s6839_s7 + $0x61] sm:$0xff]  ;;  %v8394_v5 = vld [vmem:[%s6839_s7 + $0x69] sm:$0xff] }
 0x3a4   : > { %v2783_v10 = vpop.permute.xlu0 %2782  ;;  %v2785_v11 = vpop.permute.xlu1 %2784 }
 0x3a5   : > { %2857 = vst.msk [vmem:[#allocation2 + $0x50] sm:$0xff] %vm2846_vm13, %v2783_v10  ;;  %2858 = vst.msk [vmem:[#allocation2 + $0x58] sm:$0xff] %vm2846_vm13, %v2785_v11 }
 0x3a6   : > { %3153 = vrot.lane.b32.xlu0 %v6076_v8, %s6737_s11  ;;  %3155 = vrot.lane.b32.xlu1 %v6077_v9, %s6737_s11  ;;  %v8403_v8 = vld [vmem:[%s6839_s7 + $0x79] sm:$0xff]  ;;  %v8406_v9 = vld [vmem:[%s6839_s7 + $0x81] sm:$0xff] }
 0x3a8   : > { %v2787_v15 = vpop.permute.xlu0 %2786  ;;  %v2789_v16 = vpop.permute.xlu1 %2788 }
 0x3a9   : > { %2859 = vst.msk [vmem:[#allocation2 + $0x60] sm:$0xff] %vm2846_vm13, %v2787_v15  ;;  %2860 = vst.msk [vmem:[#allocation2 + $0x68] sm:$0xff] %vm2846_vm13, %v2789_v16 }
 0x3aa   : > { %3157 = vrot.lane.b32.xlu0 %v6078_v12, %s6737_s11  ;;  %3159 = vrot.lane.b32.xlu1 %v6079_v14, %s6737_s11  ;;  %v6104_v12 = vld [vmem:[%s6839_s7 + $0x91] sm:$0xff]  ;;  %v6105_v14 = vld [vmem:[%s6839_s7 + $0x99] sm:$0xff] }
 0x3ac   : > { %v2791_v28 = vpop.permute.xlu0 %2790  ;;  %v2793_v29 = vpop.permute.xlu1 %2792 }
 0x3ad   : > { %2861 = vst.msk [vmem:[#allocation2 + $0x70] sm:$0xff] %vm2846_vm13, %v2791_v28  ;;  %2862 = vst.msk [vmem:[#allocation2 + $0x78] sm:$0xff] %vm2846_vm13, %v2793_v29 }
 0x3ae   : > { %3161 = vrot.lane.b32.xlu0 %v6080_v21, %s6737_s11  ;;  %3163 = vrot.lane.b32.xlu1 %v6081_v22, %s6737_s11  ;;  %v6106_v21 = vld [vmem:[%s6839_s7 + $0xa9] sm:$0xff]  ;;  %v6107_v22 = vld [vmem:[%s6839_s7 + $0xb1] sm:$0xff] }
 0x3b0   : > { %v2795_v44 = vpop.permute.xlu0 %2794  ;;  %v2797_v45 = vpop.permute.xlu1 %2796 }
 0x3b1   : > { %2863 = vst.msk [vmem:[#allocation2 + $0x80] sm:$0xff] %vm2846_vm13, %v2795_v44  ;;  %2864 = vst.msk [vmem:[#allocation2 + $0x88] sm:$0xff] %vm2846_vm13, %v2797_v45 }
 0x3b2   : > { %3165 = vrot.lane.b32.xlu0 %v6082_v35, %s6737_s11  ;;  %3167 = vrot.lane.b32.xlu1 %v6083_v37, %s6737_s11  ;;  %v6108_v35 = vld [vmem:[%s6839_s7 + $0xc1] sm:$0xff]  ;;  %v6109_v37 = vld [vmem:[%s6839_s7 + $0xc9] sm:$0xff] }
 0x3b4   : > { %v2799_v54 = vpop.permute.xlu0 %2798  ;;  %v2801_v55 = vpop.permute.xlu1 %2800 }
 0x3b5   : > { %2865 = vst.msk [vmem:[#allocation2 + $0x90] sm:$0xff] %vm2846_vm13, %v2799_v54  ;;  %2866 = vst.msk [vmem:[#allocation2 + $0x98] sm:$0xff] %vm2846_vm13, %v2801_v55 }
 0x3b6   : > { %3169 = vrot.lane.b32.xlu0 %v6084_v50, %s6737_s11  ;;  %3171 = vrot.lane.b32.xlu1 %v6085_v51, %s6737_s11  ;;  %v6110_v50 = vld [vmem:[%s6839_s7 + $0xd9] sm:$0xff]  ;;  %v6111_v51 = vld [vmem:[%s6839_s7 + $0xe1] sm:$0xff] }
 0x3b8   : > { %v2803_v60 = vpop.permute.xlu0 %2802  ;;  %v2805_v61 = vpop.permute.xlu1 %2804 }
 0x3b9   : > { %2867 = vst.msk [vmem:[#allocation2 + $0xa0] sm:$0xff] %vm2846_vm13, %v2803_v60  ;;  %2868 = vst.msk [vmem:[#allocation2 + $0xa8] sm:$0xff] %vm2846_vm13, %v2805_v61 }
 0x3ba   : > { %3173 = vrot.lane.b32.xlu0 %v6086_v58, %s6737_s11  ;;  %3175 = vrot.lane.b32.xlu1 %v6087_v59, %s6737_s11  ;;  %v6112_v58 = vld [vmem:[%s6839_s7 + $0xf1] sm:$0xff]  ;;  %v6113_v59 = vld [vmem:[%s6839_s7 + $0xf9] sm:$0xff] }
 0x3bc   : > { %v2807_v0 = vpop.permute.xlu0 %2806  ;;  %v2809_v1 = vpop.permute.xlu1 %2808 }
 0x3bd   : > { %2869 = vst.msk [vmem:[#allocation2 + $0xb0] sm:$0xff] %vm2846_vm13, %v2807_v0  ;;  %2870 = vst.msk [vmem:[#allocation2 + $0xb8] sm:$0xff] %vm2846_vm13, %v2809_v1 }
 0x3be   : > { %3177 = vrot.lane.b32.xlu0 %v6088_v62, %s6737_s11  ;;  %3179 = vrot.lane.b32.xlu1 %v6089_v63, %s6737_s11  ;;  %v6114_v62 = vld [vmem:[%s6839_s7 + $0x109] sm:$0xff]  ;;  %v6115_v63 = vld [vmem:[%s6839_s7 + $0x111] sm:$0xff] }
 0x3c0   : > { %v2811_v18 = vpop.permute.xlu0 %2810  ;;  %v2813_v19 = vpop.permute.xlu1 %2812 }
 0x3c1   : > { %2871 = vst.msk [vmem:[#allocation2 + $0xc0] sm:$0xff] %vm2846_vm13, %v2811_v18  ;;  %2872 = vst.msk [vmem:[#allocation2 + $0xc8] sm:$0xff] %vm2846_vm13, %v2813_v19 }
 0x3c2   : > { %3181 = vrot.lane.b32.xlu0 %v6090_v13, %s6737_s11  ;;  %3183 = vrot.lane.b32.xlu1 %v6091_v17, %s6737_s11  ;;  %v6116_v13 = vld [vmem:[%s6839_s7 + $0x121] sm:$0xff]  ;;  %v6117_v17 = vld [vmem:[%s6839_s7 + $0x129] sm:$0xff] }
 0x3c4   : > { %v2815_v24 = vpop.permute.xlu0 %2814  ;;  %v2817_v25 = vpop.permute.xlu1 %2816 }
 0x3c5   : > { %2873 = vst.msk [vmem:[#allocation2 + $0xd0] sm:$0xff] %vm2846_vm13, %v2815_v24  ;;  %2874 = vst.msk [vmem:[#allocation2 + $0xd8] sm:$0xff] %vm2846_vm13, %v2817_v25 }
 0x3c6   : > { %3185 = vrot.lane.b32.xlu0 %v6092_v20, %s6737_s11  ;;  %3187 = vrot.lane.b32.xlu1 %v6093_v23, %s6737_s11  ;;  %v6118_v20 = vld [vmem:[%s6839_s7 + $0x139] sm:$0xff]  ;;  %v6119_v23 = vld [vmem:[%s6839_s7 + $0x141] sm:$0xff] }
 0x3c8   : > { %v2884_v30 = vpop.permute.xlu0 %2883  ;;  %v2886_v31 = vpop.permute.xlu1 %2885 }
 0x3c9   : > { %2895 = vst.msk [vmem:[#allocation2 + $0xe0] sm:$0xff] %vm2846_vm13, %v2884_v30  ;;  %2896 = vst.msk [vmem:[#allocation2 + $0xe8] sm:$0xff] %vm2846_vm13, %v2886_v31 }
 0x3ca   : > { %3189 = vrot.lane.b32.xlu0 %v6094_v26, %s6737_s11  ;;  %3191 = vrot.lane.b32.xlu1 %v6095_v27, %s6737_s11  ;;  %v6120_v26 = vld [vmem:[%s6839_s7 + $0x151] sm:$0xff]  ;;  %v6121_v27 = vld [vmem:[%s6839_s7 + $0x159] sm:$0xff] }
 0x3cc   : > { %v2888_v34 = vpop.permute.xlu0 %2887  ;;  %v2890_v36 = vpop.permute.xlu1 %2889 }
 0x3cd   : > { %2897 = vst.msk [vmem:[#allocation2 + $0xf0] sm:$0xff] %vm2846_vm13, %v2888_v34  ;;  %2898 = vst.msk [vmem:[#allocation2 + $0xf8] sm:$0xff] %vm2846_vm13, %v2890_v36 }
 0x3ce   : > { %3193 = vrot.lane.b32.xlu0 %v6096_v32, %s6737_s11  ;;  %3195 = vrot.lane.b32.xlu1 %v6097_v33, %s6737_s11  ;;  %v6122_v32 = vld [vmem:[%s6839_s7 + $0x169] sm:$0xff]  ;;  %v6123_v33 = vld [vmem:[%s6839_s7 + $0x171] sm:$0xff] }
 0x3d0   : > { %v2956_v40 = vpop.permute.xlu0 %2955  ;;  %v2958_v41 = vpop.permute.xlu1 %2957 }
 0x3d1   : > { %3040 = vst.msk [vmem:[#allocation2] sm:$0xff] %vm3039_vm14, %v2956_v40  ;;  %3041 = vst.msk [vmem:[#allocation2 + $0x8] sm:$0xff] %vm3039_vm14, %v2958_v41 }
 0x3d2   : > { %3262 = vrot.lane.b32.xlu0 %v3250_v38, %s6737_s11  ;;  %3264 = vrot.lane.b32.xlu1 %v3251_v39, %s6737_s11  ;;  %v3444_v38 = vld [vmem:[%s7410_s22 + $0x1] sm:$0xff]  ;;  %v3445_v39 = vld [vmem:[%s7410_s22 + $0x9] sm:$0xff] }
 0x3d4   : > { %v2960_v46 = vpop.permute.xlu0 %2959  ;;  %v2962_v47 = vpop.permute.xlu1 %2961 }
 0x3d5   : > { %3042 = vst.msk [vmem:[#allocation2 + $0x10] sm:$0xff] %vm3039_vm14, %v2960_v46  ;;  %3043 = vst.msk [vmem:[#allocation2 + $0x18] sm:$0xff] %vm3039_vm14, %v2962_v47 }
 0x3d6   : > { %3266 = vrot.lane.b32.xlu0 %v3252_v42, %s6737_s11  ;;  %3268 = vrot.lane.b32.xlu1 %v3253_v43, %s6737_s11  ;;  %v3446_v42 = vld [vmem:[%s7410_s22 + $0x19] sm:$0xff]  ;;  %v3447_v43 = vld [vmem:[%s7410_s22 + $0x21] sm:$0xff] }
 0x3d8   : > { %v2964_v52 = vpop.permute.xlu0 %2963  ;;  %v2966_v53 = vpop.permute.xlu1 %2965 }
 0x3d9   : > { %3044 = vst.msk [vmem:[#allocation2 + $0x20] sm:$0xff] %vm3039_vm14, %v2964_v52  ;;  %3045 = vst.msk [vmem:[#allocation2 + $0x28] sm:$0xff] %vm3039_vm14, %v2966_v53 }
 0x3da   : > { %3270 = vrot.lane.b32.xlu0 %v3254_v48, %s6737_s11  ;;  %3272 = vrot.lane.b32.xlu1 %v3255_v49, %s6737_s11  ;;  %v3448_v48 = vld [vmem:[%s7410_s22 + $0x31] sm:$0xff]  ;;  %v3449_v49 = vld [vmem:[%s7410_s22 + $0x39] sm:$0xff]  ;;  %s6744_s11 = smov 88  }
 0x3dc   : > { %v2968_v56 = vpop.permute.xlu0 %2967  ;;  %v2970_v57 = vpop.permute.xlu1 %2969 }
 0x3dd   : > { %3046 = vst.msk [vmem:[#allocation2 + $0x30] sm:$0xff] %vm3039_vm14, %v2968_v56  ;;  %3047 = vst.msk [vmem:[#allocation2 + $0x38] sm:$0xff] %vm3039_vm14, %v2970_v57 }
 0x3de   : > { %3339 = vrot.lane.b32.xlu0 %v6098_v2, %s6738_s12  ;;  %3341 = vrot.lane.b32.xlu1 %v6099_v3, %s6738_s12  ;;  %v6124_v2 = vld [vmem:[%s6839_s7 + $0x4a] sm:$0xff]  ;;  %v6125_v3 = vld [vmem:[%s6839_s7 + $0x52] sm:$0xff] }
 0x3e0   : > { %v2972_v6 = vpop.permute.xlu0 %2971  ;;  %v2974_v7 = vpop.permute.xlu1 %2973 }
 0x3e1   : > { %3048 = vst.msk [vmem:[#allocation2 + $0x40] sm:$0xff] %vm3039_vm14, %v2972_v6  ;;  %3049 = vst.msk [vmem:[#allocation2 + $0x48] sm:$0xff] %vm3039_vm14, %v2974_v7  ;;  %v8499_v6 = vld [vmem:[%s6839_s7 + $0x62] sm:$0xff]  ;;  %v8502_v7 = vld [vmem:[%s6839_s7 + $0x6a] sm:$0xff] }
 0x3e2   : > { %3343 = vrot.lane.b32.xlu0 %v8391_v4, %s6738_s12  ;;  %3345 = vrot.lane.b32.xlu1 %v8394_v5, %s6738_s12 }
 0x3e4   : > { %v2976_v10 = vpop.permute.xlu0 %2975  ;;  %v2978_v11 = vpop.permute.xlu1 %2977 }
 0x3e5   : > { %3050 = vst.msk [vmem:[#allocation2 + $0x50] sm:$0xff] %vm3039_vm14, %v2976_v10  ;;  %3051 = vst.msk [vmem:[#allocation2 + $0x58] sm:$0xff] %vm3039_vm14, %v2978_v11 }
 0x3e6   : > { %3347 = vrot.lane.b32.xlu0 %v8403_v8, %s6738_s12  ;;  %3349 = vrot.lane.b32.xlu1 %v8406_v9, %s6738_s12 }
 0x3e8   : > { %v2980_v15 = vpop.permute.xlu0 %2979  ;;  %v2982_v16 = vpop.permute.xlu1 %2981 }
 0x3e9   : > { %3052 = vst.msk [vmem:[#allocation2 + $0x60] sm:$0xff] %vm3039_vm14, %v2980_v15  ;;  %3053 = vst.msk [vmem:[#allocation2 + $0x68] sm:$0xff] %vm3039_vm14, %v2982_v16 }
 0x3ea   : > { %3351 = vrot.lane.b32.xlu0 %v6104_v12, %s6738_s12  ;;  %3353 = vrot.lane.b32.xlu1 %v6105_v14, %s6738_s12  ;;  %v8511_v12 = vld [vmem:[%s6839_s7 + $0x7a] sm:$0xff]  ;;  %v8514_v14 = vld [vmem:[%s6839_s7 + $0x82] sm:$0xff] }
 0x3ec   : > { %v2984_v28 = vpop.permute.xlu0 %2983  ;;  %v2986_v29 = vpop.permute.xlu1 %2985 }
 0x3ed   : > { %3054 = vst.msk [vmem:[#allocation2 + $0x70] sm:$0xff] %vm3039_vm14, %v2984_v28  ;;  %3055 = vst.msk [vmem:[#allocation2 + $0x78] sm:$0xff] %vm3039_vm14, %v2986_v29 }
 0x3ee   : > { %3355 = vrot.lane.b32.xlu0 %v6106_v21, %s6738_s12  ;;  %3357 = vrot.lane.b32.xlu1 %v6107_v22, %s6738_s12  ;;  %v8523_v21 = vld [vmem:[%s6839_s7 + $0x92] sm:$0xff]  ;;  %v8526_v22 = vld [vmem:[%s6839_s7 + $0x9a] sm:$0xff] }
 0x3f0   : > { %v2988_v44 = vpop.permute.xlu0 %2987  ;;  %v2990_v45 = vpop.permute.xlu1 %2989 }
 0x3f1   : > { %3056 = vst.msk [vmem:[#allocation2 + $0x80] sm:$0xff] %vm3039_vm14, %v2988_v44  ;;  %3057 = vst.msk [vmem:[#allocation2 + $0x88] sm:$0xff] %vm3039_vm14, %v2990_v45 }
 0x3f2   : > { %3359 = vrot.lane.b32.xlu0 %v6108_v35, %s6738_s12  ;;  %3361 = vrot.lane.b32.xlu1 %v6109_v37, %s6738_s12  ;;  %v8535_v35 = vld [vmem:[%s6839_s7 + $0xaa] sm:$0xff]  ;;  %v8538_v37 = vld [vmem:[%s6839_s7 + $0xb2] sm:$0xff] }
 0x3f4   : > { %v2992_v54 = vpop.permute.xlu0 %2991  ;;  %v2994_v55 = vpop.permute.xlu1 %2993 }
 0x3f5   : > { %3058 = vst.msk [vmem:[#allocation2 + $0x90] sm:$0xff] %vm3039_vm14, %v2992_v54  ;;  %3059 = vst.msk [vmem:[#allocation2 + $0x98] sm:$0xff] %vm3039_vm14, %v2994_v55 }
 0x3f6   : > { %3363 = vrot.lane.b32.xlu0 %v6110_v50, %s6738_s12  ;;  %3365 = vrot.lane.b32.xlu1 %v6111_v51, %s6738_s12  ;;  %v8547_v50 = vld [vmem:[%s6839_s7 + $0xc2] sm:$0xff]  ;;  %v8550_v51 = vld [vmem:[%s6839_s7 + $0xca] sm:$0xff] }
 0x3f8   : > { %v2996_v60 = vpop.permute.xlu0 %2995  ;;  %v2998_v61 = vpop.permute.xlu1 %2997 }
 0x3f9   : > { %3060 = vst.msk [vmem:[#allocation2 + $0xa0] sm:$0xff] %vm3039_vm14, %v2996_v60  ;;  %3061 = vst.msk [vmem:[#allocation2 + $0xa8] sm:$0xff] %vm3039_vm14, %v2998_v61 }
 0x3fa   : > { %3367 = vrot.lane.b32.xlu0 %v6112_v58, %s6738_s12  ;;  %3369 = vrot.lane.b32.xlu1 %v6113_v59, %s6738_s12  ;;  %v8559_v58 = vld [vmem:[%s6839_s7 + $0xda] sm:$0xff]  ;;  %v8562_v59 = vld [vmem:[%s6839_s7 + $0xe2] sm:$0xff] }
 0x3fc   : > { %v3000_v0 = vpop.permute.xlu0 %2999  ;;  %v3002_v1 = vpop.permute.xlu1 %3001 }
 0x3fd   : > { %3062 = vst.msk [vmem:[#allocation2 + $0xb0] sm:$0xff] %vm3039_vm14, %v3000_v0  ;;  %3063 = vst.msk [vmem:[#allocation2 + $0xb8] sm:$0xff] %vm3039_vm14, %v3002_v1 }
 0x3fe   : > { %3371 = vrot.lane.b32.xlu0 %v6114_v62, %s6738_s12  ;;  %3373 = vrot.lane.b32.xlu1 %v6115_v63, %s6738_s12  ;;  %v6138_v62 = vld [vmem:[%s6839_s7 + $0xf2] sm:$0xff]  ;;  %v6139_v63 = vld [vmem:[%s6839_s7 + $0xfa] sm:$0xff] }
 0x400   : > { %v3004_v18 = vpop.permute.xlu0 %3003  ;;  %v3006_v19 = vpop.permute.xlu1 %3005 }
 0x401   : > { %3064 = vst.msk [vmem:[#allocation2 + $0xc0] sm:$0xff] %vm3039_vm14, %v3004_v18  ;;  %3065 = vst.msk [vmem:[#allocation2 + $0xc8] sm:$0xff] %vm3039_vm14, %v3006_v19 }
 0x402   : > { %3375 = vrot.lane.b32.xlu0 %v6116_v13, %s6738_s12  ;;  %3377 = vrot.lane.b32.xlu1 %v6117_v17, %s6738_s12  ;;  %v6140_v13 = vld [vmem:[%s6839_s7 + $0x10a] sm:$0xff]  ;;  %v6141_v17 = vld [vmem:[%s6839_s7 + $0x112] sm:$0xff] }
 0x404   : > { %v3008_v24 = vpop.permute.xlu0 %3007  ;;  %v3010_v25 = vpop.permute.xlu1 %3009 }
 0x405   : > { %3066 = vst.msk [vmem:[#allocation2 + $0xd0] sm:$0xff] %vm3039_vm14, %v3008_v24  ;;  %3067 = vst.msk [vmem:[#allocation2 + $0xd8] sm:$0xff] %vm3039_vm14, %v3010_v25 }
 0x406   : > { %3379 = vrot.lane.b32.xlu0 %v6118_v20, %s6738_s12  ;;  %3381 = vrot.lane.b32.xlu1 %v6119_v23, %s6738_s12  ;;  %v6142_v20 = vld [vmem:[%s6839_s7 + $0x122] sm:$0xff]  ;;  %v6143_v23 = vld [vmem:[%s6839_s7 + $0x12a] sm:$0xff] }
 0x408   : > { %v3077_v30 = vpop.permute.xlu0 %3076  ;;  %v3079_v31 = vpop.permute.xlu1 %3078 }
 0x409   : > { %3088 = vst.msk [vmem:[#allocation2 + $0xe0] sm:$0xff] %vm3039_vm14, %v3077_v30  ;;  %3089 = vst.msk [vmem:[#allocation2 + $0xe8] sm:$0xff] %vm3039_vm14, %v3079_v31 }
 0x40a   : > { %3383 = vrot.lane.b32.xlu0 %v6120_v26, %s6738_s12  ;;  %3385 = vrot.lane.b32.xlu1 %v6121_v27, %s6738_s12  ;;  %v6144_v26 = vld [vmem:[%s6839_s7 + $0x13a] sm:$0xff]  ;;  %v6145_v27 = vld [vmem:[%s6839_s7 + $0x142] sm:$0xff] }
 0x40c   : > { %v3081_v34 = vpop.permute.xlu0 %3080  ;;  %v3083_v36 = vpop.permute.xlu1 %3082 }
 0x40d   : > { %3090 = vst.msk [vmem:[#allocation2 + $0xf0] sm:$0xff] %vm3039_vm14, %v3081_v34  ;;  %3091 = vst.msk [vmem:[#allocation2 + $0xf8] sm:$0xff] %vm3039_vm14, %v3083_v36 }
 0x40e   : > { %3387 = vrot.lane.b32.xlu0 %v6122_v32, %s6738_s12  ;;  %3389 = vrot.lane.b32.xlu1 %v6123_v33, %s6738_s12  ;;  %v6146_v32 = vld [vmem:[%s6839_s7 + $0x152] sm:$0xff]  ;;  %v6147_v33 = vld [vmem:[%s6839_s7 + $0x15a] sm:$0xff] }
 0x410   : > { %v3146_v40 = vpop.permute.xlu0 %3145  ;;  %v3148_v41 = vpop.permute.xlu1 %3147 }
 0x411   : > { %3224 = vst.msk [vmem:[#allocation2] sm:$0xff] %vm3223_vm15, %v3146_v40  ;;  %3225 = vst.msk [vmem:[#allocation2 + $0x8] sm:$0xff] %vm3223_vm15, %v3148_v41 }
 0x412   : > { %3456 = vrot.lane.b32.xlu0 %v3444_v38, %s6738_s12  ;;  %3458 = vrot.lane.b32.xlu1 %v3445_v39, %s6738_s12  ;;  %v6148_v38 = vld [vmem:[%s6839_s7 + $0x16a] sm:$0xff]  ;;  %v6149_v39 = vld [vmem:[%s6839_s7 + $0x172] sm:$0xff] }
 0x414   : > { %v3150_v46 = vpop.permute.xlu0 %3149  ;;  %v3152_v47 = vpop.permute.xlu1 %3151 }
 0x415   : > { %3226 = vst.msk [vmem:[#allocation2 + $0x10] sm:$0xff] %vm3223_vm15, %v3150_v46  ;;  %3227 = vst.msk [vmem:[#allocation2 + $0x18] sm:$0xff] %vm3223_vm15, %v3152_v47 }
 0x416   : > { %3460 = vrot.lane.b32.xlu0 %v3446_v42, %s6738_s12  ;;  %3462 = vrot.lane.b32.xlu1 %v3447_v43, %s6738_s12  ;;  %v3637_v42 = vld [vmem:[%s7410_s22 + $0x2] sm:$0xff]  ;;  %v3638_v43 = vld [vmem:[%s7410_s22 + $0xa] sm:$0xff] }
 0x418   : > { %v3154_v52 = vpop.permute.xlu0 %3153  ;;  %v3156_v53 = vpop.permute.xlu1 %3155 }
 0x419   : > { %3228 = vst.msk [vmem:[#allocation2 + $0x20] sm:$0xff] %vm3223_vm15, %v3154_v52  ;;  %3229 = vst.msk [vmem:[#allocation2 + $0x28] sm:$0xff] %vm3223_vm15, %v3156_v53 }
 0x41a   : > { %3464 = vrot.lane.b32.xlu0 %v3448_v48, %s6738_s12  ;;  %3466 = vrot.lane.b32.xlu1 %v3449_v49, %s6738_s12  ;;  %v3639_v48 = vld [vmem:[%s7410_s22 + $0x1a] sm:$0xff]  ;;  %v3640_v49 = vld [vmem:[%s7410_s22 + $0x22] sm:$0xff] }
 0x41c   : > { %v3158_v56 = vpop.permute.xlu0 %3157  ;;  %v3160_v57 = vpop.permute.xlu1 %3159 }
 0x41d   : > { %3230 = vst.msk [vmem:[#allocation2 + $0x30] sm:$0xff] %vm3223_vm15, %v3158_v56  ;;  %3231 = vst.msk [vmem:[#allocation2 + $0x38] sm:$0xff] %vm3223_vm15, %v3160_v57 }
 0x41e   : > { %3532 = vrot.lane.b32.xlu0 %v6124_v2, %s6739_s13  ;;  %3534 = vrot.lane.b32.xlu1 %v6125_v3, %s6739_s13  ;;  %v3641_v2 = vld [vmem:[%s7410_s22 + $0x32] sm:$0xff]  ;;  %v3642_v3 = vld [vmem:[%s7410_s22 + $0x3a] sm:$0xff] }
 0x420   : > { %v3162_v10 = vpop.permute.xlu0 %3161  ;;  %v3164_v11 = vpop.permute.xlu1 %3163 }
 0x421   : > { %3232 = vst.msk [vmem:[#allocation2 + $0x40] sm:$0xff] %vm3223_vm15, %v3162_v10  ;;  %3233 = vst.msk [vmem:[#allocation2 + $0x48] sm:$0xff] %vm3223_vm15, %v3164_v11  ;;  %v6150_v10 = vld [vmem:[%s6839_s7 + $0x4b] sm:$0xff]  ;;  %v6151_v11 = vld [vmem:[%s6839_s7 + $0x53] sm:$0xff] }
 0x422   : > { %3536 = vrot.lane.b32.xlu0 %v8499_v6, %s6739_s13  ;;  %3538 = vrot.lane.b32.xlu1 %v8502_v7, %s6739_s13 }
 0x424   : > { %v3166_v15 = vpop.permute.xlu0 %3165  ;;  %v3168_v16 = vpop.permute.xlu1 %3167 }
 0x425   : > { %3234 = vst.msk [vmem:[#allocation2 + $0x50] sm:$0xff] %vm3223_vm15, %v3166_v15  ;;  %3235 = vst.msk [vmem:[#allocation2 + $0x58] sm:$0xff] %vm3223_vm15, %v3168_v16 }
 0x426   : > { %3540 = vrot.lane.b32.xlu0 %v8511_v12, %s6739_s13  ;;  %3542 = vrot.lane.b32.xlu1 %v8514_v14, %s6739_s13 }
 0x428   : > { %v3170_v28 = vpop.permute.xlu0 %3169  ;;  %v3172_v29 = vpop.permute.xlu1 %3171 }
 0x429   : > { %3236 = vst.msk [vmem:[#allocation2 + $0x60] sm:$0xff] %vm3223_vm15, %v3170_v28  ;;  %3237 = vst.msk [vmem:[#allocation2 + $0x68] sm:$0xff] %vm3223_vm15, %v3172_v29  ;;  %v8631_v28 = vld [vmem:[%s6839_s7 + $0x63] sm:$0xff]  ;;  %v8634_v29 = vld [vmem:[%s6839_s7 + $0x6b] sm:$0xff] }
 0x42a   : > { %3544 = vrot.lane.b32.xlu0 %v8523_v21, %s6739_s13  ;;  %3546 = vrot.lane.b32.xlu1 %v8526_v22, %s6739_s13 }
 0x42c   : > { %v3174_v44 = vpop.permute.xlu0 %3173  ;;  %v3176_v45 = vpop.permute.xlu1 %3175 }
 0x42d   : > { %3238 = vst.msk [vmem:[#allocation2 + $0x70] sm:$0xff] %vm3223_vm15, %v3174_v44  ;;  %3239 = vst.msk [vmem:[#allocation2 + $0x78] sm:$0xff] %vm3223_vm15, %v3176_v45 }
 0x42e   : > { %3548 = vrot.lane.b32.xlu0 %v8535_v35, %s6739_s13  ;;  %3550 = vrot.lane.b32.xlu1 %v8538_v37, %s6739_s13 }
 0x430   : > { %v3178_v54 = vpop.permute.xlu0 %3177  ;;  %v3180_v55 = vpop.permute.xlu1 %3179 }
 0x431   : > { %3240 = vst.msk [vmem:[#allocation2 + $0x80] sm:$0xff] %vm3223_vm15, %v3178_v54  ;;  %3241 = vst.msk [vmem:[#allocation2 + $0x88] sm:$0xff] %vm3223_vm15, %v3180_v55  ;;  %v8643_v54 = vld [vmem:[%s6839_s7 + $0x7b] sm:$0xff]  ;;  %v8646_v55 = vld [vmem:[%s6839_s7 + $0x83] sm:$0xff] }
 0x432   : > { %3552 = vrot.lane.b32.xlu0 %v8547_v50, %s6739_s13  ;;  %3554 = vrot.lane.b32.xlu1 %v8550_v51, %s6739_s13 }
 0x434   : > { %v3182_v60 = vpop.permute.xlu0 %3181  ;;  %v3184_v61 = vpop.permute.xlu1 %3183 }
 0x435   : > { %3242 = vst.msk [vmem:[#allocation2 + $0x90] sm:$0xff] %vm3223_vm15, %v3182_v60  ;;  %3243 = vst.msk [vmem:[#allocation2 + $0x98] sm:$0xff] %vm3223_vm15, %v3184_v61 }
 0x436   : > { %3556 = vrot.lane.b32.xlu0 %v8559_v58, %s6739_s13  ;;  %3558 = vrot.lane.b32.xlu1 %v8562_v59, %s6739_s13 }
 0x438   : > { %v3186_v0 = vpop.permute.xlu0 %3185  ;;  %v3188_v1 = vpop.permute.xlu1 %3187 }
 0x439   : > { %3244 = vst.msk [vmem:[#allocation2 + $0xa0] sm:$0xff] %vm3223_vm15, %v3186_v0  ;;  %3245 = vst.msk [vmem:[#allocation2 + $0xa8] sm:$0xff] %vm3223_vm15, %v3188_v1 }
 0x43a   : > { %3560 = vrot.lane.b32.xlu0 %v6138_v62, %s6739_s13  ;;  %3562 = vrot.lane.b32.xlu1 %v6139_v63, %s6739_s13  ;;  %v8655_v62 = vld [vmem:[%s6839_s7 + $0x93] sm:$0xff]  ;;  %v8658_v63 = vld [vmem:[%s6839_s7 + $0x9b] sm:$0xff] }
 0x43c   : > { %v3190_v18 = vpop.permute.xlu0 %3189  ;;  %v3192_v19 = vpop.permute.xlu1 %3191 }
 0x43d   : > { %3246 = vst.msk [vmem:[#allocation2 + $0xb0] sm:$0xff] %vm3223_vm15, %v3190_v18  ;;  %3247 = vst.msk [vmem:[#allocation2 + $0xb8] sm:$0xff] %vm3223_vm15, %v3192_v19 }
 0x43e   : > { %3564 = vrot.lane.b32.xlu0 %v6140_v13, %s6739_s13  ;;  %3566 = vrot.lane.b32.xlu1 %v6141_v17, %s6739_s13  ;;  %v8667_v13 = vld [vmem:[%s6839_s7 + $0xab] sm:$0xff]  ;;  %v8670_v17 = vld [vmem:[%s6839_s7 + $0xb3] sm:$0xff] }
 0x440   : > { %v3194_v24 = vpop.permute.xlu0 %3193  ;;  %v3196_v25 = vpop.permute.xlu1 %3195 }
 0x441   : > { %3248 = vst.msk [vmem:[#allocation2 + $0xc0] sm:$0xff] %vm3223_vm15, %v3194_v24  ;;  %3249 = vst.msk [vmem:[#allocation2 + $0xc8] sm:$0xff] %vm3223_vm15, %v3196_v25 }
 0x442   : > { %3568 = vrot.lane.b32.xlu0 %v6142_v20, %s6739_s13  ;;  %3570 = vrot.lane.b32.xlu1 %v6143_v23, %s6739_s13  ;;  %v8679_v20 = vld [vmem:[%s6839_s7 + $0xc3] sm:$0xff]  ;;  %v8682_v23 = vld [vmem:[%s6839_s7 + $0xcb] sm:$0xff] }
 0x444   : > { %v3263_v30 = vpop.permute.xlu0 %3262  ;;  %v3265_v31 = vpop.permute.xlu1 %3264 }
 0x445   : > { %3281 = vst.msk [vmem:[#allocation2 + $0xd0] sm:$0xff] %vm3223_vm15, %v3263_v30  ;;  %3282 = vst.msk [vmem:[#allocation2 + $0xd8] sm:$0xff] %vm3223_vm15, %v3265_v31 }
 0x446   : > { %3572 = vrot.lane.b32.xlu0 %v6144_v26, %s6739_s13  ;;  %3574 = vrot.lane.b32.xlu1 %v6145_v27, %s6739_s13  ;;  %v8691_v26 = vld [vmem:[%s6839_s7 + $0xdb] sm:$0xff]  ;;  %v8694_v27 = vld [vmem:[%s6839_s7 + $0xe3] sm:$0xff] }
 0x448   : > { %v3267_v34 = vpop.permute.xlu0 %3266  ;;  %v3269_v36 = vpop.permute.xlu1 %3268 }
 0x449   : > { %3283 = vst.msk [vmem:[#allocation2 + $0xe0] sm:$0xff] %vm3223_vm15, %v3267_v34  ;;  %3284 = vst.msk [vmem:[#allocation2 + $0xe8] sm:$0xff] %vm3223_vm15, %v3269_v36 }
 0x44a   : > { %3576 = vrot.lane.b32.xlu0 %v6146_v32, %s6739_s13  ;;  %3578 = vrot.lane.b32.xlu1 %v6147_v33, %s6739_s13  ;;  %v8703_v32 = vld [vmem:[%s6839_s7 + $0xf3] sm:$0xff]  ;;  %v8706_v33 = vld [vmem:[%s6839_s7 + $0xfb] sm:$0xff] }
 0x44c   : > { %v3271_v40 = vpop.permute.xlu0 %3270  ;;  %v3273_v41 = vpop.permute.xlu1 %3272 }
 0x44d   : > { %3285 = vst.msk [vmem:[#allocation2 + $0xf0] sm:$0xff] %vm3223_vm15, %v3271_v40  ;;  %3286 = vst.msk [vmem:[#allocation2 + $0xf8] sm:$0xff] %vm3223_vm15, %v3273_v41 }
 0x44e   : > { %3580 = vrot.lane.b32.xlu0 %v6148_v38, %s6739_s13  ;;  %3582 = vrot.lane.b32.xlu1 %v6149_v39, %s6739_s13  ;;  %v8715_v38 = vld [vmem:[%s6839_s7 + $0x10b] sm:$0xff]  ;;  %v8718_v39 = vld [vmem:[%s6839_s7 + $0x113] sm:$0xff] }
 0x450   : > { %v3340_v46 = vpop.permute.xlu0 %3339  ;;  %v3342_v47 = vpop.permute.xlu1 %3341 }
 0x451   : > { %3418 = vst.msk [vmem:[#allocation2] sm:$0xff] %vm3417_vm0, %v3340_v46  ;;  %3419 = vst.msk [vmem:[#allocation2 + $0x8] sm:$0xff] %vm3417_vm0, %v3342_v47 }
 0x452   : > { %3649 = vrot.lane.b32.xlu0 %v3637_v42, %s6739_s13  ;;  %3651 = vrot.lane.b32.xlu1 %v3638_v43, %s6739_s13  ;;  %v6168_v42 = vld [vmem:[%s6839_s7 + $0x123] sm:$0xff]  ;;  %v6169_v43 = vld [vmem:[%s6839_s7 + $0x12b] sm:$0xff] }
 0x454   : > { %v3344_v52 = vpop.permute.xlu0 %3343  ;;  %v3346_v53 = vpop.permute.xlu1 %3345 }
 0x455   : > { %3420 = vst.msk [vmem:[#allocation2 + $0x10] sm:$0xff] %vm3417_vm0, %v3344_v52  ;;  %3421 = vst.msk [vmem:[#allocation2 + $0x18] sm:$0xff] %vm3417_vm0, %v3346_v53 }
 0x456   : > { %3653 = vrot.lane.b32.xlu0 %v3639_v48, %s6739_s13  ;;  %3655 = vrot.lane.b32.xlu1 %v3640_v49, %s6739_s13  ;;  %v6170_v48 = vld [vmem:[%s6839_s7 + $0x13b] sm:$0xff]  ;;  %v6171_v49 = vld [vmem:[%s6839_s7 + $0x143] sm:$0xff] }
 0x458   : > { %v3348_v56 = vpop.permute.xlu0 %3347  ;;  %v3350_v57 = vpop.permute.xlu1 %3349 }
 0x459   : > { %3422 = vst.msk [vmem:[#allocation2 + $0x20] sm:$0xff] %vm3417_vm0, %v3348_v56  ;;  %3423 = vst.msk [vmem:[#allocation2 + $0x28] sm:$0xff] %vm3417_vm0, %v3350_v57 }
 0x45a   : > { %3657 = vrot.lane.b32.xlu0 %v3641_v2, %s6739_s13  ;;  %3659 = vrot.lane.b32.xlu1 %v3642_v3, %s6739_s13  ;;  %v6172_v2 = vld [vmem:[%s6839_s7 + $0x153] sm:$0xff]  ;;  %v6173_v3 = vld [vmem:[%s6839_s7 + $0x15b] sm:$0xff]  ;;  %s9636_s13 = scalar_lea.hbm %s9736_s3, %s6364_s10 }
 0x45c   : > { %v3352_v15 = vpop.permute.xlu0 %3351  ;;  %v3354_v16 = vpop.permute.xlu1 %3353 }
 0x45d   : > { %3424 = vst.msk [vmem:[#allocation2 + $0x30] sm:$0xff] %vm3417_vm0, %v3352_v15  ;;  %3425 = vst.msk [vmem:[#allocation2 + $0x38] sm:$0xff] %vm3417_vm0, %v3354_v16 }
 0x45e   : > { %3725 = vrot.lane.b32.xlu0 %v6150_v10, %s6740_s14  ;;  %3727 = vrot.lane.b32.xlu1 %v6151_v11, %s6740_s14  ;;  %v6174_v10 = vld [vmem:[%s6839_s7 + $0x16b] sm:$0xff]  ;;  %v6175_v11 = vld [vmem:[%s6839_s7 + $0x173] sm:$0xff] }
 0x460   : > { %v3356_v44 = vpop.permute.xlu0 %3355  ;;  %v3358_v45 = vpop.permute.xlu1 %3357 }
 0x461   : > { %3426 = vst.msk [vmem:[#allocation2 + $0x40] sm:$0xff] %vm3417_vm0, %v3356_v44  ;;  %3427 = vst.msk [vmem:[#allocation2 + $0x48] sm:$0xff] %vm3417_vm0, %v3358_v45  ;;  %v3830_v44 = vld [vmem:[%s7410_s22 + $0x3] sm:$0xff]  ;;  %v3831_v45 = vld [vmem:[%s7410_s22 + $0xb] sm:$0xff] }
 0x462   : > { %3729 = vrot.lane.b32.xlu0 %v8631_v28, %s6740_s14  ;;  %3731 = vrot.lane.b32.xlu1 %v8634_v29, %s6740_s14 }
 0x464   : > { %v3360_v60 = vpop.permute.xlu0 %3359  ;;  %v3362_v61 = vpop.permute.xlu1 %3361 }
 0x465   : > { %3428 = vst.msk [vmem:[#allocation2 + $0x50] sm:$0xff] %vm3417_vm0, %v3360_v60  ;;  %3429 = vst.msk [vmem:[#allocation2 + $0x58] sm:$0xff] %vm3417_vm0, %v3362_v61 }
 0x466   : > { %3733 = vrot.lane.b32.xlu0 %v8643_v54, %s6740_s14  ;;  %3735 = vrot.lane.b32.xlu1 %v8646_v55, %s6740_s14 }
 0x468   : > { %v3364_v0 = vpop.permute.xlu0 %3363  ;;  %v3366_v1 = vpop.permute.xlu1 %3365 }
 0x469   : > { %3430 = vst.msk [vmem:[#allocation2 + $0x60] sm:$0xff] %vm3417_vm0, %v3364_v0  ;;  %3431 = vst.msk [vmem:[#allocation2 + $0x68] sm:$0xff] %vm3417_vm0, %v3366_v1  ;;  %v3832_v0 = vld [vmem:[%s7410_s22 + $0x1b] sm:$0xff]  ;;  %v3833_v1 = vld [vmem:[%s7410_s22 + $0x23] sm:$0xff] }
 0x46a   : > { %3737 = vrot.lane.b32.xlu0 %v8655_v62, %s6740_s14  ;;  %3739 = vrot.lane.b32.xlu1 %v8658_v63, %s6740_s14 }
 0x46c   : > { %v3368_v18 = vpop.permute.xlu0 %3367  ;;  %v3370_v19 = vpop.permute.xlu1 %3369 }
 0x46d   : > { %3432 = vst.msk [vmem:[#allocation2 + $0x70] sm:$0xff] %vm3417_vm0, %v3368_v18  ;;  %3433 = vst.msk [vmem:[#allocation2 + $0x78] sm:$0xff] %vm3417_vm0, %v3370_v19 }
 0x46e   : > { %3741 = vrot.lane.b32.xlu0 %v8667_v13, %s6740_s14  ;;  %3743 = vrot.lane.b32.xlu1 %v8670_v17, %s6740_s14 }
 0x470   : > { %v3372_v24 = vpop.permute.xlu0 %3371  ;;  %v3374_v25 = vpop.permute.xlu1 %3373 }
 0x471   : > { %3434 = vst.msk [vmem:[#allocation2 + $0x80] sm:$0xff] %vm3417_vm0, %v3372_v24  ;;  %3435 = vst.msk [vmem:[#allocation2 + $0x88] sm:$0xff] %vm3417_vm0, %v3374_v25  ;;  %v3834_v24 = vld [vmem:[%s7410_s22 + $0x33] sm:$0xff]  ;;  %v3835_v25 = vld [vmem:[%s7410_s22 + $0x3b] sm:$0xff] }
 0x472   : > { %3745 = vrot.lane.b32.xlu0 %v8679_v20, %s6740_s14  ;;  %3747 = vrot.lane.b32.xlu1 %v8682_v23, %s6740_s14 }
 0x474   : > { %v3376_v30 = vpop.permute.xlu0 %3375  ;;  %v3378_v31 = vpop.permute.xlu1 %3377 }
 0x475   : > { %3436 = vst.msk [vmem:[#allocation2 + $0x90] sm:$0xff] %vm3417_vm0, %v3376_v30  ;;  %3437 = vst.msk [vmem:[#allocation2 + $0x98] sm:$0xff] %vm3417_vm0, %v3378_v31 }
 0x476   : > { %3749 = vrot.lane.b32.xlu0 %v8691_v26, %s6740_s14  ;;  %3751 = vrot.lane.b32.xlu1 %v8694_v27, %s6740_s14 }
 0x478   : > { %v3380_v34 = vpop.permute.xlu0 %3379  ;;  %v3382_v36 = vpop.permute.xlu1 %3381 }
 0x479   : > { %3438 = vst.msk [vmem:[#allocation2 + $0xa0] sm:$0xff] %vm3417_vm0, %v3380_v34  ;;  %3439 = vst.msk [vmem:[#allocation2 + $0xa8] sm:$0xff] %vm3417_vm0, %v3382_v36  ;;  %v6176_v34 = vld [vmem:[%s6839_s7 + $0x4c] sm:$0xff]  ;;  %v6177_v36 = vld [vmem:[%s6839_s7 + $0x54] sm:$0xff] }
 0x47a   : > { %3753 = vrot.lane.b32.xlu0 %v8703_v32, %s6740_s14  ;;  %3755 = vrot.lane.b32.xlu1 %v8706_v33, %s6740_s14 }
 0x47c   : > { %v3384_v40 = vpop.permute.xlu0 %3383  ;;  %v3386_v41 = vpop.permute.xlu1 %3385 }
 0x47d   : > { %3440 = vst.msk [vmem:[#allocation2 + $0xb0] sm:$0xff] %vm3417_vm0, %v3384_v40  ;;  %3441 = vst.msk [vmem:[#allocation2 + $0xb8] sm:$0xff] %vm3417_vm0, %v3386_v41 }
 0x47e   : > { %3757 = vrot.lane.b32.xlu0 %v8715_v38, %s6740_s14  ;;  %3759 = vrot.lane.b32.xlu1 %v8718_v39, %s6740_s14 }
 0x480   : > { %v3388_v46 = vpop.permute.xlu0 %3387  ;;  %v3390_v47 = vpop.permute.xlu1 %3389 }
 0x481   : > { %3442 = vst.msk [vmem:[#allocation2 + $0xc0] sm:$0xff] %vm3417_vm0, %v3388_v46  ;;  %3443 = vst.msk [vmem:[#allocation2 + $0xc8] sm:$0xff] %vm3417_vm0, %v3390_v47 }
 0x482   : > { %3761 = vrot.lane.b32.xlu0 %v6168_v42, %s6740_s14  ;;  %3763 = vrot.lane.b32.xlu1 %v6169_v43, %s6740_s14  ;;  %v8775_v42 = vld [vmem:[%s6839_s7 + $0x64] sm:$0xff]  ;;  %v8778_v43 = vld [vmem:[%s6839_s7 + $0x6c] sm:$0xff] }
 0x484   : > { %v3457_v52 = vpop.permute.xlu0 %3456  ;;  %v3459_v53 = vpop.permute.xlu1 %3458 }
 0x485   : > { %3474 = vst.msk [vmem:[#allocation2 + $0xd0] sm:$0xff] %vm3417_vm0, %v3457_v52  ;;  %3475 = vst.msk [vmem:[#allocation2 + $0xd8] sm:$0xff] %vm3417_vm0, %v3459_v53 }
 0x486   : > { %3765 = vrot.lane.b32.xlu0 %v6170_v48, %s6740_s14  ;;  %3767 = vrot.lane.b32.xlu1 %v6171_v49, %s6740_s14  ;;  %v8787_v48 = vld [vmem:[%s6839_s7 + $0x7c] sm:$0xff]  ;;  %v8790_v49 = vld [vmem:[%s6839_s7 + $0x84] sm:$0xff] }
 0x488   : > { %v3461_v56 = vpop.permute.xlu0 %3460  ;;  %v3463_v57 = vpop.permute.xlu1 %3462 }
 0x489   : > { %3476 = vst.msk [vmem:[#allocation2 + $0xe0] sm:$0xff] %vm3417_vm0, %v3461_v56  ;;  %3477 = vst.msk [vmem:[#allocation2 + $0xe8] sm:$0xff] %vm3417_vm0, %v3463_v57 }
 0x48a   : > { %3769 = vrot.lane.b32.xlu0 %v6172_v2, %s6740_s14  ;;  %3771 = vrot.lane.b32.xlu1 %v6173_v3, %s6740_s14  ;;  %v8799_v2 = vld [vmem:[%s6839_s7 + $0x94] sm:$0xff]  ;;  %v8802_v3 = vld [vmem:[%s6839_s7 + $0x9c] sm:$0xff] }
 0x48c   : > { %v3465_v15 = vpop.permute.xlu0 %3464  ;;  %v3467_v16 = vpop.permute.xlu1 %3466 }
 0x48d   : > { %3478 = vst.msk [vmem:[#allocation2 + $0xf0] sm:$0xff] %vm3417_vm0, %v3465_v15  ;;  %3479 = vst.msk [vmem:[#allocation2 + $0xf8] sm:$0xff] %vm3417_vm0, %v3467_v16  ;;  %v8817_v16 = vld [vmem:[%s6839_s7 + $0xac] sm:$0xff] }
 0x48e   : > { %3773 = vrot.lane.b32.xlu0 %v6174_v10, %s6740_s14  ;;  %3775 = vrot.lane.b32.xlu1 %v6175_v11, %s6740_s14  ;;  %v5058_v10 = vld [vmem:[%s9735_s2] sm:$0xff]  ;;  %v5059_v11 = vld [vmem:[%s9735_s2 + $0x8] sm:$0xff] }
 0x48f   : > { %v6484_v15 = vpack.c.bf16 %v5059_v11, %v5058_v10 }
 0x490   : > { %v3533_v60 = vpop.permute.xlu0 %3532  ;;  %v3535_v61 = vpop.permute.xlu1 %3534 }
 0x491   : > { %3611 = vst.msk [vmem:[#allocation2] sm:$0xff] %vm3610_vm1, %v3533_v60  ;;  %3612 = vst.msk [vmem:[#allocation2 + $0x8] sm:$0xff] %vm3610_vm1, %v3535_v61  ;;  %6485 = vmatprep.subr.bf16.mxu0 %v6484_v15  ;;  %6508 = vmatprep.subr.bf16.mxu1 %v6484_v15  ;;  %v5060_v61 = vld [vmem:[%s9735_s2 + $0x10] sm:$0xff] }
 0x492   : > { %3842 = vrot.lane.b32.xlu0 %v3830_v44, %s6740_s14  ;;  %3844 = vrot.lane.b32.xlu1 %v3831_v45, %s6740_s14  ;;  %v8820_v44 = vld [vmem:[%s6839_s7 + $0xb4] sm:$0xff] }
 0x493   : > { %6487 = vmatpush3.bf16.msra.mxu0 %v6484_v15  ;;  %6515 = vmatpush3.bf16.msra.mxu1 %v6484_v15  ;;  %v5068_v15 = vld [vmem:[%s9735_s2 + $0x50] sm:$0xff] }
 0x494   : > { %v3537_v18 = vpop.permute.xlu0 %3536  ;;  %v3539_v19 = vpop.permute.xlu1 %3538 }
 0x495   : > { %3613 = vst.msk [vmem:[#allocation2 + $0x10] sm:$0xff] %vm3610_vm1, %v3537_v18  ;;  %3614 = vst.msk [vmem:[#allocation2 + $0x18] sm:$0xff] %vm3610_vm1, %v3539_v19  ;;  %v6202_v18 = vld [vmem:[%s6839_s7 + $0x60] sm:$0xff]  ;;  %v6203_v19 = vld [vmem:[%s6839_s7 + $0x68] sm:$0xff] }
 0x496   : > { %3846 = vrot.lane.b32.xlu0 %v3832_v0, %s6740_s14  ;;  %3848 = vrot.lane.b32.xlu1 %v3833_v1, %s6740_s14  ;;  %v5061_v0 = vld [vmem:[%s9735_s2 + $0x18] sm:$0xff] }
 0x497   : > { %v6488_v1 = vpack.c.bf16 %v5061_v0, %v5060_v61  ;;  %v6205_v61 = vld [vmem:[%s6839_s7 + $0x80] sm:$0xff] }
 0x498   : > { %v3541_v30 = vpop.permute.xlu0 %3540  ;;  %v3543_v31 = vpop.permute.xlu1 %3542 }
 0x499   : > { %3615 = vst.msk [vmem:[#allocation2 + $0x20] sm:$0xff] %vm3610_vm1, %v3541_v30  ;;  %3616 = vst.msk [vmem:[#allocation2 + $0x28] sm:$0xff] %vm3610_vm1, %v3543_v31  ;;  %6489 = vmatprep.subr.bf16.mxu0 %v6488_v1  ;;  %6509 = vmatprep.subr.bf16.mxu1 %v6488_v1  ;;  %v5062_v30 = vld [vmem:[%s9735_s2 + $0x20] sm:$0xff]  ;;  %v5063_v31 = vld [vmem:[%s9735_s2 + $0x28] sm:$0xff] }
 0x49a   : > { %3850 = vrot.lane.b32.xlu0 %v3834_v24, %s6740_s14  ;;  %3852 = vrot.lane.b32.xlu1 %v3835_v25, %s6740_s14  ;;  %s6742_s14 = smov 80  }
 0x49b   : > { %6491 = vmatpush3.bf16.msra.mxu0 %v6488_v1  ;;  %6516 = vmatpush3.bf16.msra.mxu1 %v6488_v1 }
 0x49c   : > { %v3545_v40 = vpop.permute.xlu0 %3544  ;;  %v3547_v41 = vpop.permute.xlu1 %3546 }
 0x49d   : > { %3617 = vst.msk [vmem:[#allocation2 + $0x30] sm:$0xff] %vm3610_vm1, %v3545_v40  ;;  %3618 = vst.msk [vmem:[#allocation2 + $0x38] sm:$0xff] %vm3610_vm1, %v3547_v41  ;;  %v5064_v41 = vld [vmem:[%s9735_s2 + $0x30] sm:$0xff] }
 0x49e   : > { %3918 = vrot.lane.b32.xlu0 %v6176_v34, %s6741_s21  ;;  %3920 = vrot.lane.b32.xlu1 %v6177_v36, %s6741_s21  ;;  %v6492_v34 = vpack.c.bf16 %v5063_v31, %v5062_v30 }
 0x4a0   : > { %v3549_v46 = vpop.permute.xlu0 %3548  ;;  %v3551_v47 = vpop.permute.xlu1 %3550  ;;  %6493 = vmatprep.subr.bf16.mxu0 %v6492_v34  ;;  %6510 = vmatprep.subr.bf16.mxu1 %v6492_v34 }
 0x4a1   : > { %3619 = vst.msk [vmem:[#allocation2 + $0x40] sm:$0xff] %vm3610_vm1, %v3549_v46  ;;  %3620 = vst.msk [vmem:[#allocation2 + $0x48] sm:$0xff] %vm3610_vm1, %v3551_v47  ;;  %6495 = vmatpush3.bf16.msra.mxu0 %v6492_v34  ;;  %v5065_v46 = vld [vmem:[%s9735_s2 + $0x38] sm:$0xff]  ;;  %6517 = vmatpush3.bf16.msra.mxu1 %v6492_v34 }
 0x4a2   : > { %3922 = vrot.lane.b32.xlu0 %v8775_v42, %s6741_s21  ;;  %3924 = vrot.lane.b32.xlu1 %v8778_v43, %s6741_s21  ;;  %v6496_v47 = vpack.c.bf16 %v5065_v46, %v5064_v41 }
 0x4a4   : > { %v3553_v52 = vpop.permute.xlu0 %3552  ;;  %v3555_v53 = vpop.permute.xlu1 %3554  ;;  %6497 = vmatprep.subr.bf16.mxu0 %v6496_v47  ;;  %6511 = vmatprep.subr.bf16.mxu1 %v6496_v47 }
 0x4a5   : > { %3621 = vst.msk [vmem:[#allocation2 + $0x50] sm:$0xff] %vm3610_vm1, %v3553_v52  ;;  %3622 = vst.msk [vmem:[#allocation2 + $0x58] sm:$0xff] %vm3610_vm1, %v3555_v53  ;;  %6499 = vmatpush3.bf16.msra.mxu0 %v6496_v47  ;;  %6518 = vmatpush3.bf16.msra.mxu1 %v6496_v47 }
 0x4a6   : > { %3926 = vrot.lane.b32.xlu0 %v8787_v48, %s6741_s21  ;;  %3928 = vrot.lane.b32.xlu1 %v8790_v49, %s6741_s21 }
 0x4a8   : > { %v3557_v56 = vpop.permute.xlu0 %3556  ;;  %v3559_v57 = vpop.permute.xlu1 %3558 }
 0x4a9   : > { %3623 = vst.msk [vmem:[#allocation2 + $0x60] sm:$0xff] %vm3610_vm1, %v3557_v56  ;;  %3624 = vst.msk [vmem:[#allocation2 + $0x68] sm:$0xff] %vm3610_vm1, %v3559_v57  ;;  %v5066_v56 = vld [vmem:[%s9735_s2 + $0x40] sm:$0xff]  ;;  %v5067_v57 = vld [vmem:[%s9735_s2 + $0x48] sm:$0xff] }
 0x4aa   : > { %3930 = vrot.lane.b32.xlu0 %v8799_v2, %s6741_s21  ;;  %3932 = vrot.lane.b32.xlu1 %v8802_v3, %s6741_s21 }
 0x4ac   : > { %v3561_v45 = vpop.permute.xlu0 %3560  ;;  %v3563_v60 = vpop.permute.xlu1 %3562 }
 0x4ad   : > { %3625 = vst.msk [vmem:[#allocation2 + $0x70] sm:$0xff] %vm3610_vm1, %v3561_v45  ;;  %3626 = vst.msk [vmem:[#allocation2 + $0x78] sm:$0xff] %vm3610_vm1, %v3563_v60  ;;  %v5069_v45 = vld [vmem:[%s9735_s2 + $0x58] sm:$0xff] }
 0x4ae   : > { %3934 = vrot.lane.b32.xlu0 %v8817_v16, %s6741_s21  ;;  %3936 = vrot.lane.b32.xlu1 %v8820_v44, %s6741_s21 }
 0x4b0   : > { %v3565_v24 = vpop.permute.xlu0 %3564  ;;  %v3567_v25 = vpop.permute.xlu1 %3566 }
 0x4b1   : > { %3627 = vst.msk [vmem:[#allocation2 + $0x80] sm:$0xff] %vm3610_vm1, %v3565_v24  ;;  %3628 = vst.msk [vmem:[#allocation2 + $0x88] sm:$0xff] %vm3610_vm1, %v3567_v25 }
 0x4b2   : > { %4108 = vrot.lane.b32.xlu0 %v6202_v18, %s6742_s14  ;;  %4110 = vrot.lane.b32.xlu1 %v6203_v19, %s6742_s14 }
 0x4b4   : > { %v3569_v36 = vpop.permute.xlu0 %3568  ;;  %v3571_v40 = vpop.permute.xlu1 %3570 }
 0x4b5   : > { %3629 = vst.msk [vmem:[#allocation2 + $0x90] sm:$0xff] %vm3610_vm1, %v3569_v36  ;;  %3630 = vst.msk [vmem:[#allocation2 + $0x98] sm:$0xff] %vm3610_vm1, %v3571_v40  ;;  %v6208_v40 = vld [vmem:[%s6839_s7 + $0xa8] sm:$0xff] }
 0x4b6   : > { %4302 = vrot.lane.b32.xlu0 %v8391_v4, %s6743_s5  ;;  %4304 = vrot.lane.b32.xlu1 %v8394_v5, %s6743_s5  ;;  %v6500_v4 = vpack.c.bf16 %v5067_v57, %v5066_v56  ;;  %v6204_v5 = vld [vmem:[%s6839_s7 + $0x78] sm:$0xff] }
 0x4b8   : > { %v3573_v52 = vpop.permute.xlu0 %3572  ;;  %v3575_v53 = vpop.permute.xlu1 %3574  ;;  %6501 = vmatprep.subr.bf16.mxu0 %v6500_v4  ;;  %6512 = vmatprep.subr.bf16.mxu1 %v6500_v4 }
 0x4b9   : > { %3631 = vst.msk [vmem:[#allocation2 + $0xa0] sm:$0xff] %vm3610_vm1, %v3573_v52  ;;  %3632 = vst.msk [vmem:[#allocation2 + $0xa8] sm:$0xff] %vm3610_vm1, %v3575_v53  ;;  %6503 = vmatpush3.bf16.msra.mxu0 %v6500_v4  ;;  %6519 = vmatpush3.bf16.msra.mxu1 %v6500_v4  ;;  %v6210_v4 = vld [vmem:[%s6839_s7 + $0xc0] sm:$0xff] }
 0x4ba   : > { %4495 = vrot.lane.b32.xlu0 %v8499_v6, %s6744_s11  ;;  %4497 = vrot.lane.b32.xlu1 %v8502_v7, %s6744_s11  ;;  %v6504_v6 = vpack.c.bf16 %v5069_v45, %v5068_v15  ;;  %v6235_v45 = vld [vmem:[%s6839_s7 + $0xc9] sm:$0xff] }
 0x4bc   : > { %v3577_v10 = vpop.permute.xlu0 %3576  ;;  %v3579_v11 = vpop.permute.xlu1 %3578  ;;  %6505 = vmatprep.subr.bf16.mxu0 %v6504_v6  ;;  %6513 = vmatprep.subr.bf16.mxu1 %v6504_v6 }
 0x4bd   : > { %3633 = vst.msk [vmem:[#allocation2 + $0xb0] sm:$0xff] %vm3610_vm1, %v3577_v10  ;;  %3634 = vst.msk [vmem:[#allocation2 + $0xb8] sm:$0xff] %vm3610_vm1, %v3579_v11  ;;  %6507 = vmatpush3.bf16.msra.mxu0 %v6504_v6  ;;  %6520 = vmatpush3.bf16.msra.mxu1 %v6504_v6 }
 0x4be   : > { %4688 = vrot.lane.b32.xlu0 %v8631_v28, %s6745_s29  ;;  %4112 = vrot.lane.b32.xlu1 %v6204_v5, %s6742_s14  ;;  %v5070_v28 = vld [vmem:[%s9735_s2 + $0x60] sm:$0xf] }
 0x4bf   : > { %6434 = vmatprep.subr.msk.mxu0 %vm5168_vm2, %v5070_v28  ;;  %6514 = vmatprep.subr.msk.mxu1 %vm5168_vm2, %v5070_v28 }
 0x4c0   : > { %v3581_v7 = vpop.permute.xlu0 %3580  ;;  %v3583_v60 = vpop.permute.xlu1 %3582 }
 0x4c1   : > { %3635 = vst.msk [vmem:[#allocation2 + $0xc0] sm:$0xff] %vm3610_vm1, %v3581_v7  ;;  %3636 = vst.msk [vmem:[#allocation2 + $0xc8] sm:$0xff] %vm3610_vm1, %v3583_v60  ;;  %6435 = vmatpush3.msk.msra.mxu0 %vm5168_vm2, %v5070_v28  ;;  %6521 = vmatpush3.msk.msra.mxu1 %vm5168_vm2, %v5070_v28 }
 0x4c2   : > { %4690 = vrot.lane.b32.xlu0 %v8634_v29, %s6745_s29  ;;  %4881 = vrot.lane.b32.xlu1 %v8775_v42, %s6746_s30 }
 0x4c4   : > { %v3650_v0 = vpop.permute.xlu0 %3649  ;;  %v3652_v1 = vpop.permute.xlu1 %3651 }
 0x4c5   : > { %3667 = vst.msk [vmem:[#allocation2 + $0xd0] sm:$0xff] %vm3610_vm1, %v3650_v0  ;;  %3668 = vst.msk [vmem:[#allocation2 + $0xd8] sm:$0xff] %vm3610_vm1, %v3652_v1  ;;  %v6212_v0 = vld [vmem:[%s6839_s7 + $0xd8] sm:$0xff] }
 0x4c6   : > { %4114 = vrot.lane.b32.xlu0 %v6205_v61, %s6742_s14  ;;  %4306 = vrot.lane.b32.xlu1 %v8403_v8, %s6743_s5  ;;  %v6206_v8 = vld [vmem:[%s6839_s7 + $0x90] sm:$0xff] }
 0x4c8   : > { %v3654_v29 = vpop.permute.xlu0 %3653  ;;  %v3656_v42 = vpop.permute.xlu1 %3655 }
 0x4c9   : > { %3669 = vst.msk [vmem:[#allocation2 + $0xe0] sm:$0xff] %vm3610_vm1, %v3654_v29  ;;  %3670 = vst.msk [vmem:[#allocation2 + $0xe8] sm:$0xff] %vm3610_vm1, %v3656_v42  ;;  %v6236_v42 = vld [vmem:[%s6839_s7 + $0xd9] sm:$0xff] }
 0x4ca   : > { %4883 = vrot.lane.b32.xlu0 %v8778_v43, %s6746_s30  ;;  %4308 = vrot.lane.b32.xlu1 %v8406_v9, %s6743_s5 }
 0x4cc   : > { %v3658_v18 = vpop.permute.xlu0 %3657  ;;  %v3660_v19 = vpop.permute.xlu1 %3659 }
 0x4cd   : > { %3671 = vst.msk [vmem:[#allocation2 + $0xf0] sm:$0xff] %vm3610_vm1, %v3658_v18  ;;  %3672 = vst.msk [vmem:[#allocation2 + $0xf8] sm:$0xff] %vm3610_vm1, %v3660_v19 }
 0x4ce   : > { %4499 = vrot.lane.b32.xlu0 %v8511_v12, %s6744_s11  ;;  %4501 = vrot.lane.b32.xlu1 %v8514_v14, %s6744_s11  ;;  %v6207_v14 = vld [vmem:[%s6839_s7 + $0x98] sm:$0xff] }
 0x4d0   : > { %v3726_v24 = vpop.permute.xlu0 %3725  ;;  %v3728_v43 = vpop.permute.xlu1 %3727 }
 0x4d1   : > { %3804 = vst.msk [vmem:[#allocation2] sm:$0xff] %vm3803_vm3, %v3726_v24  ;;  %3805 = vst.msk [vmem:[#allocation2 + $0x8] sm:$0xff] %vm3803_vm3, %v3728_v43 }
 0x4d2   : > { %4692 = vrot.lane.b32.xlu0 %v8643_v54, %s6745_s29  ;;  %4116 = vrot.lane.b32.xlu1 %v6206_v8, %s6742_s14  ;;  %v6609_v54 = vld [vmem:[%s6839_s7 + $0x91] sm:$0xff]  ;;  %v6237_v8 = vld [vmem:[%s6839_s7 + $0xe1] sm:$0xff] }
 0x4d4   : > { %v3730_v9 = vpop.permute.xlu0 %3729  ;;  %v3732_v12 = vpop.permute.xlu1 %3731 }
 0x4d5   : > { %3806 = vst.msk [vmem:[#allocation2 + $0x10] sm:$0xff] %vm3803_vm3, %v3730_v9  ;;  %3807 = vst.msk [vmem:[#allocation2 + $0x18] sm:$0xff] %vm3803_vm3, %v3732_v12 }
 0x4d6   : > { %4694 = vrot.lane.b32.xlu0 %v8646_v55, %s6745_s29  ;;  %4885 = vrot.lane.b32.xlu1 %v8787_v48, %s6746_s30  ;;  %v6610_v55 = vld [vmem:[%s6839_s7 + $0x99] sm:$0xff] }
 0x4d8   : > { %v3734_v25 = vpop.permute.xlu0 %3733  ;;  %v3736_v30 = vpop.permute.xlu1 %3735 }
 0x4d9   : > { %3808 = vst.msk [vmem:[#allocation2 + $0x20] sm:$0xff] %vm3803_vm3, %v3734_v25  ;;  %3809 = vst.msk [vmem:[#allocation2 + $0x28] sm:$0xff] %vm3803_vm3, %v3736_v30  ;;  %v6189_v30 = vld [vmem:[%s6839_s7 + $0xe4] sm:$0xff] }
 0x4da   : > { %4118 = vrot.lane.b32.xlu0 %v6207_v14, %s6742_s14  ;;  %4310 = vrot.lane.b32.xlu1 %v6609_v54, %s6743_s5  ;;  %v6214_v54 = vld [vmem:[%s6839_s7 + $0xf0] sm:$0xff] }
 0x4dc   : > { %v3738_v31 = vpop.permute.xlu0 %3737  ;;  %v3740_v34 = vpop.permute.xlu1 %3739 }
 0x4dd   : > { %3810 = vst.msk [vmem:[#allocation2 + $0x30] sm:$0xff] %vm3803_vm3, %v3738_v31  ;;  %3811 = vst.msk [vmem:[#allocation2 + $0x38] sm:$0xff] %vm3803_vm3, %v3740_v34 }
 0x4de   : > { %4887 = vrot.lane.b32.xlu0 %v8790_v49, %s6746_s30  ;;  %4312 = vrot.lane.b32.xlu1 %v6610_v55, %s6743_s5  ;;  %v6238_v55 = vld [vmem:[%s6839_s7 + $0xf1] sm:$0xff] }
 0x4e0   : > { %v3742_v48 = vpop.permute.xlu0 %3741  ;;  %v3744_v36 = vpop.permute.xlu1 %3743 }
 0x4e1   : > { %3812 = vst.msk [vmem:[#allocation2 + $0x40] sm:$0xff] %vm3803_vm3, %v3742_v48  ;;  %3813 = vst.msk [vmem:[#allocation2 + $0x48] sm:$0xff] %vm3803_vm3, %v3744_v36 }
 0x4e2   : > { %4503 = vrot.lane.b32.xlu0 %v8523_v21, %s6744_s11  ;;  %4505 = vrot.lane.b32.xlu1 %v8526_v22, %s6744_s11  ;;  %v6209_v21 = vld [vmem:[%s6839_s7 + $0xb0] sm:$0xff] }
 0x4e3   : > { %v6232_v22 = vld [vmem:[%s6839_s7 + $0xa9] sm:$0xff] }
 0x4e4   : > { %v3746_v41 = vpop.permute.xlu0 %3745  ;;  %v3748_v49 = vpop.permute.xlu1 %3747 }
 0x4e5   : > { %3814 = vst.msk [vmem:[#allocation2 + $0x50] sm:$0xff] %vm3803_vm3, %v3746_v41  ;;  %3815 = vst.msk [vmem:[#allocation2 + $0x58] sm:$0xff] %vm3803_vm3, %v3748_v49  ;;  %v6262_v49 = vld [vmem:[%s6839_s7 + $0xf2] sm:$0xff] }
 0x4e6   : > { %4696 = vrot.lane.b32.xlu0 %v8655_v62, %s6745_s29  ;;  %4120 = vrot.lane.b32.xlu1 %v6208_v40, %s6742_s14  ;;  %v6233_v62 = vld [vmem:[%s6839_s7 + $0xb1] sm:$0xff]  ;;  %v6239_v40 = vld [vmem:[%s6839_s7 + $0xf9] sm:$0xff] }
 0x4e8   : > { %v3750_v46 = vpop.permute.xlu0 %3749  ;;  %v3752_v47 = vpop.permute.xlu1 %3751 }
 0x4e9   : > { %3816 = vst.msk [vmem:[#allocation2 + $0x60] sm:$0xff] %vm3803_vm3, %v3750_v46  ;;  %3817 = vst.msk [vmem:[#allocation2 + $0x68] sm:$0xff] %vm3803_vm3, %v3752_v47  ;;  %v6190_v46 = vld [vmem:[%s6839_s7 + $0xf4] sm:$0xff] }
 0x4ea   : > { %4698 = vrot.lane.b32.xlu0 %v8658_v63, %s6745_s29  ;;  %4889 = vrot.lane.b32.xlu1 %v8799_v2, %s6746_s30 }
 0x4ec   : > { %v3754_v52 = vpop.permute.xlu0 %3753  ;;  %v3756_v53 = vpop.permute.xlu1 %3755 }
 0x4ed   : > { %3818 = vst.msk [vmem:[#allocation2 + $0x70] sm:$0xff] %vm3803_vm3, %v3754_v52  ;;  %3819 = vst.msk [vmem:[#allocation2 + $0x78] sm:$0xff] %vm3803_vm3, %v3756_v53 }
 0x4ee   : > { %4122 = vrot.lane.b32.xlu0 %v6209_v21, %s6742_s14  ;;  %4314 = vrot.lane.b32.xlu1 %v6232_v22, %s6743_s5  ;;  %v6263_v22 = vld [vmem:[%s6839_s7 + $0xfa] sm:$0xff] }
 0x4f0   : > { %v3758_v56 = vpop.permute.xlu0 %3757  ;;  %v3760_v57 = vpop.permute.xlu1 %3759 }
 0x4f1   : > { %3820 = vst.msk [vmem:[#allocation2 + $0x80] sm:$0xff] %vm3803_vm3, %v3758_v56  ;;  %3821 = vst.msk [vmem:[#allocation2 + $0x88] sm:$0xff] %vm3803_vm3, %v3760_v57  ;;  %v6191_v56 = vld [vmem:[%s6839_s7 + $0xfc] sm:$0xff]  ;;  %v6216_v57 = vld [vmem:[%s6839_s7 + $0x108] sm:$0xff] }
 0x4f2   : > { %4891 = vrot.lane.b32.xlu0 %v8802_v3, %s6746_s30  ;;  %4316 = vrot.lane.b32.xlu1 %v6233_v62, %s6743_s5 }
 0x4f4   : > { %v3762_v63 = vpop.permute.xlu0 %3761  ;;  %v3764_v2 = vpop.permute.xlu1 %3763 }
 0x4f5   : > { %3822 = vst.msk [vmem:[#allocation2 + $0x90] sm:$0xff] %vm3803_vm3, %v3762_v63  ;;  %3823 = vst.msk [vmem:[#allocation2 + $0x98] sm:$0xff] %vm3803_vm3, %v3764_v2 }
 0x4f6   : > { %4507 = vrot.lane.b32.xlu0 %v8535_v35, %s6744_s11  ;;  %4509 = vrot.lane.b32.xlu1 %v8538_v37, %s6744_s11  ;;  %v6211_v35 = vld [vmem:[%s6839_s7 + $0xc8] sm:$0xff] }
 0x4f7   : > { %v6234_v37 = vld [vmem:[%s6839_s7 + $0xc1] sm:$0xff] }
 0x4f8   : > { %v3766_v5 = vpop.permute.xlu0 %3765  ;;  %v3768_v10 = vpop.permute.xlu1 %3767 }
 0x4f9   : > { %3824 = vst.msk [vmem:[#allocation2 + $0xa0] sm:$0xff] %vm3803_vm3, %v3766_v5  ;;  %3825 = vst.msk [vmem:[#allocation2 + $0xa8] sm:$0xff] %vm3803_vm3, %v3768_v10 }
 0x4fa   : > { %4700 = vrot.lane.b32.xlu0 %v8667_v13, %s6745_s29  ;;  %4124 = vrot.lane.b32.xlu1 %v6210_v4, %s6742_s14 }
 0x4fc   : > { %v3770_v3 = vpop.permute.xlu0 %3769  ;;  %v3772_v11 = vpop.permute.xlu1 %3771 }
 0x4fd   : > { %3826 = vst.msk [vmem:[#allocation2 + $0xb0] sm:$0xff] %vm3803_vm3, %v3770_v3  ;;  %3827 = vst.msk [vmem:[#allocation2 + $0xb8] sm:$0xff] %vm3803_vm3, %v3772_v11  ;;  %v6240_v3 = vld [vmem:[%s6839_s7 + $0x109] sm:$0xff] }
 0x4fe   : > { %4702 = vrot.lane.b32.xlu0 %v8670_v17, %s6745_s29  ;;  %4893 = vrot.lane.b32.xlu1 %v8817_v16, %s6746_s30  ;;  %v6186_v17 = vld [vmem:[%s6839_s7 + $0xc4] sm:$0xff] }
 0x500   : > { %v3774_v15 = vpop.permute.xlu0 %3773  ;;  %v3776_v13 = vpop.permute.xlu1 %3775 }
 0x501   : > { %3828 = vst.msk [vmem:[#allocation2 + $0xc0] sm:$0xff] %vm3803_vm3, %v3774_v15  ;;  %3829 = vst.msk [vmem:[#allocation2 + $0xc8] sm:$0xff] %vm3803_vm3, %v3776_v13  ;;  %v6264_v13 = vld [vmem:[%s6839_s7 + $0x10a] sm:$0xff] }
 0x502   : > { %4126 = vrot.lane.b32.xlu0 %v6211_v35, %s6742_s14  ;;  %4318 = vrot.lane.b32.xlu1 %v6234_v37, %s6743_s5  ;;  %v6241_v37 = vld [vmem:[%s6839_s7 + $0x111] sm:$0xff] }
 0x504   : > { %v3843_v6 = vpop.permute.xlu0 %3842  ;;  %v3845_v7 = vpop.permute.xlu1 %3844 }
 0x505   : > { %3860 = vst.msk [vmem:[#allocation2 + $0xd0] sm:$0xff] %vm3803_vm3, %v3843_v6  ;;  %3861 = vst.msk [vmem:[#allocation2 + $0xd8] sm:$0xff] %vm3803_vm3, %v3845_v7 }
 0x506   : > { %4895 = vrot.lane.b32.xlu0 %v8820_v44, %s6746_s30  ;;  %4320 = vrot.lane.b32.xlu1 %v6235_v45, %s6743_s5  ;;  %v6187_v44 = vld [vmem:[%s6839_s7 + $0xcc] sm:$0xff] }
 0x507   : > { %v6192_v45 = vld [vmem:[%s6839_s7 + $0x10c] sm:$0xff] }
 0x508   : > { %v3847_v16 = vpop.permute.xlu0 %3846  ;;  %v3849_v60 = vpop.permute.xlu1 %3848 }
 0x509   : > { %3862 = vst.msk [vmem:[#allocation2 + $0xe0] sm:$0xff] %vm3803_vm3, %v3847_v16  ;;  %3863 = vst.msk [vmem:[#allocation2 + $0xe8] sm:$0xff] %vm3803_vm3, %v3849_v60  ;;  %v6265_v16 = vld [vmem:[%s6839_s7 + $0x112] sm:$0xff] }
 0x50a   : > { %4511 = vrot.lane.b32.xlu0 %v8547_v50, %s6744_s11  ;;  %3938 = vrot.lane.b32.xlu1 %v6186_v17, %s6741_s21 }
 0x50c   : > { %v3851_v28 = vpop.permute.xlu0 %3850  ;;  %v3853_v61 = vpop.permute.xlu1 %3852 }
 0x50d   : > { %3864 = vst.msk [vmem:[#allocation2 + $0xf0] sm:$0xff] %vm3803_vm3, %v3851_v28  ;;  %3865 = vst.msk [vmem:[#allocation2 + $0xf8] sm:$0xff] %vm3803_vm3, %v3853_v61  ;;  %v6193_v61 = vld [vmem:[%s6839_s7 + $0x114] sm:$0xff] }
 0x50e   : > { %4513 = vrot.lane.b32.xlu0 %v8550_v51, %s6744_s11  ;;  %4704 = vrot.lane.b32.xlu1 %v8679_v20, %s6745_s29  ;;  %v6213_v20 = vld [vmem:[%s6839_s7 + $0xe0] sm:$0xff] }
 0x510   : > { %v3919_v50 = vpop.permute.xlu0 %3918  ;;  %v3921_v1 = vpop.permute.xlu1 %3920 }
 0x511   : > { %3997 = vst.msk [vmem:[#allocation2] sm:$0xff] %vm3996_vm4, %v3919_v50  ;;  %3998 = vst.msk [vmem:[#allocation2 + $0x8] sm:$0xff] %vm3996_vm4, %v3921_v1 }
 0x512   : > { %3940 = vrot.lane.b32.xlu0 %v6187_v44, %s6741_s21  ;;  %4128 = vrot.lane.b32.xlu1 %v6212_v0, %s6742_s14 }
 0x514   : > { %v3923_v51 = vpop.permute.xlu0 %3922  ;;  %v3925_v29 = vpop.permute.xlu1 %3924 }
 0x515   : > { %3999 = vst.msk [vmem:[#allocation2 + $0x10] sm:$0xff] %vm3996_vm4, %v3923_v51  ;;  %4000 = vst.msk [vmem:[#allocation2 + $0x18] sm:$0xff] %vm3996_vm4, %v3925_v29  ;;  %v6219_v29 = vld [vmem:[%s6839_s7 + $0x128] sm:$0xff] }
 0x516   : > { %4706 = vrot.lane.b32.xlu0 %v8682_v23, %s6745_s29  ;;  %4897 = vrot.lane.b32.xlu1 %v6186_v17, %s6746_s30  ;;  %v6188_v23 = vld [vmem:[%s6839_s7 + $0xdc] sm:$0xff] }
 0x518   : > { %v3927_v18 = vpop.permute.xlu0 %3926  ;;  %v3929_v19 = vpop.permute.xlu1 %3928 }
 0x519   : > { %4001 = vst.msk [vmem:[#allocation2 + $0x20] sm:$0xff] %vm3996_vm4, %v3927_v18  ;;  %4002 = vst.msk [vmem:[#allocation2 + $0x28] sm:$0xff] %vm3996_vm4, %v3929_v19  ;;  %v6243_v19 = vld [vmem:[%s6839_s7 + $0x129] sm:$0xff] }
 0x51a   : > { %4130 = vrot.lane.b32.xlu0 %v6213_v20, %s6742_s14  ;;  %4322 = vrot.lane.b32.xlu1 %v6236_v42, %s6743_s5  ;;  %v6242_v20 = vld [vmem:[%s6839_s7 + $0x121] sm:$0xff] }
 0x51c   : > { %v3931_v24 = vpop.permute.xlu0 %3930  ;;  %v3933_v43 = vpop.permute.xlu1 %3932 }
 0x51d   : > { %4003 = vst.msk [vmem:[#allocation2 + $0x30] sm:$0xff] %vm3996_vm4, %v3931_v24  ;;  %4004 = vst.msk [vmem:[#allocation2 + $0x38] sm:$0xff] %vm3996_vm4, %v3933_v43  ;;  %v6266_v43 = vld [vmem:[%s6839_s7 + $0x122] sm:$0xff] }
 0x51e   : > { %4899 = vrot.lane.b32.xlu0 %v6187_v44, %s6746_s30  ;;  %4324 = vrot.lane.b32.xlu1 %v6237_v8, %s6743_s5  ;;  %v6218_v44 = vld [vmem:[%s6839_s7 + $0x120] sm:$0xff] }
 0x520   : > { %v3935_v9 = vpop.permute.xlu0 %3934  ;;  %v3937_v12 = vpop.permute.xlu1 %3936 }
 0x521   : > { %4005 = vst.msk [vmem:[#allocation2 + $0x40] sm:$0xff] %vm3996_vm4, %v3935_v9  ;;  %4006 = vst.msk [vmem:[#allocation2 + $0x48] sm:$0xff] %vm3996_vm4, %v3937_v12 }
 0x522   : > { %4515 = vrot.lane.b32.xlu0 %v8559_v58, %s6744_s11  ;;  %3942 = vrot.lane.b32.xlu1 %v6188_v23, %s6741_s21 }
 0x524   : > { %v4109_v14 = vpop.permute.xlu0 %4108  ;;  %v4111_v25 = vpop.permute.xlu1 %4110 }
 0x525   : > { %4181 = vst.msk [vmem:[#allocation2] sm:$0xff] %vm4180_vm5, %v4109_v14  ;;  %4182 = vst.msk [vmem:[#allocation2 + $0x8] sm:$0xff] %vm4180_vm5, %v4111_v25  ;;  %v6267_v14 = vld [vmem:[%s6839_s7 + $0x12a] sm:$0xff] }
 0x526   : > { %4517 = vrot.lane.b32.xlu0 %v8562_v59, %s6744_s11  ;;  %4708 = vrot.lane.b32.xlu1 %v8691_v26, %s6745_s29  ;;  %v6215_v26 = vld [vmem:[%s6839_s7 + $0xf8] sm:$0xff]  ;;  %v6290_v25 = vld [vmem:[%s6839_s7 + $0x123] sm:$0xff] }
 0x528   : > { %v4303_v58 = vpop.permute.xlu0 %4302  ;;  %v4305_v31 = vpop.permute.xlu1 %4304 }
 0x529   : > { %4375 = vst.msk [vmem:[#allocation2] sm:$0xff] %vm4374_vm6, %v4303_v58  ;;  %4376 = vst.msk [vmem:[#allocation2 + $0x8] sm:$0xff] %vm4374_vm6, %v4305_v31  ;;  %v6195_v31 = vld [vmem:[%s6839_s7 + $0x12c] sm:$0xff] }
 0x52a   : > { %3944 = vrot.lane.b32.xlu0 %v6189_v30, %s6741_s21  ;;  %4132 = vrot.lane.b32.xlu1 %v6214_v54, %s6742_s14 }
 0x52c   : > { %v4496_v59 = vpop.permute.xlu0 %4495  ;;  %v4498_v34 = vpop.permute.xlu1 %4497 }
 0x52d   : > { %4568 = vst.msk [vmem:[#allocation2] sm:$0xff] %vm4567_vm7, %v4496_v59  ;;  %4569 = vst.msk [vmem:[#allocation2 + $0x8] sm:$0xff] %vm4567_vm7, %v4498_v34  ;;  %v6220_v59 = vld [vmem:[%s6839_s7 + $0x138] sm:$0xff] }
 0x52e   : > { %4710 = vrot.lane.b32.xlu0 %v8694_v27, %s6745_s29  ;;  %4901 = vrot.lane.b32.xlu1 %v6188_v23, %s6746_s30  ;;  %v6194_v23 = vld [vmem:[%s6839_s7 + $0x124] sm:$0xff] }
 0x530   : > { %v4689_v48 = vpop.permute.xlu0 %4688  ;;  %v4113_v36 = vpop.permute.xlu1 %4112 }
 0x531   : > { %4761 = vst.msk [vmem:[#allocation2] sm:$0xff] %vm4760_vm8, %v4689_v48 }
 0x532   : > { %4183 = vst.msk [vmem:[#allocation2 + $0x10] sm:$0xff] %vm4180_vm5, %v4113_v36  ;;  %4134 = vrot.lane.b32.xlu0 %v6215_v26, %s6742_s14  ;;  %4326 = vrot.lane.b32.xlu1 %v6238_v55, %s6743_s5  ;;  %v6291_v55 = vld [vmem:[%s6839_s7 + $0x12b] sm:$0xff] }
 0x534   : > { %v4691_v27 = vpop.permute.xlu0 %4690  ;;  %v4882_v41 = vpop.permute.xlu1 %4881 }
 0x535   : > { %4762 = vst.msk [vmem:[#allocation2 + $0x8] sm:$0xff] %vm4760_vm8, %v4691_v27  ;;  %v6244_v27 = vld [vmem:[%s6839_s7 + $0x139] sm:$0xff] }
 0x536   : > { %4954 = vst.msk [vmem:[#allocation2] sm:$0xff] %vm4953_vm9, %v4882_v41  ;;  %4903 = vrot.lane.b32.xlu0 %v6189_v30, %s6746_s30  ;;  %4328 = vrot.lane.b32.xlu1 %v6239_v40, %s6743_s5  ;;  %v6221_v40 = vld [vmem:[%s6839_s7 + $0x140] sm:$0xff] }
 0x538   : > { %v4115_v47 = vpop.permute.xlu0 %4114  ;;  %v4307_v21 = vpop.permute.xlu1 %4306 }
 0x539   : > { %4184 = vst.msk [vmem:[#allocation2 + $0x18] sm:$0xff] %vm4180_vm5, %v4115_v47  ;;  %v6245_v47 = vld [vmem:[%s6839_s7 + $0x141] sm:$0xff] }
 0x53a   : > { %4377 = vst.msk [vmem:[#allocation2 + $0x10] sm:$0xff] %vm4374_vm6, %v4307_v21  ;;  %4519 = vrot.lane.b32.xlu0 %v6262_v49, %s6744_s11  ;;  %3946 = vrot.lane.b32.xlu1 %v6190_v46, %s6741_s21 }
 0x53c   : > { %v4884_v52 = vpop.permute.xlu0 %4883  ;;  %v4309_v53 = vpop.permute.xlu1 %4308 }
 0x53d   : > { %v5026_v62 = vld [vmem:[#allocation2] sm:$0xff]  ;;  %4955 = vst.msk [vmem:[#allocation2 + $0x8] sm:$0xff] %vm4953_vm9, %v4884_v52 }
 0x53e   : > { %4378 = vst.msk [vmem:[#allocation2 + $0x18] sm:$0xff] %vm4374_vm6, %v4309_v53  ;;  %6436 = vmatprep.mubr.msk.f32.mxu0 %vm5071_vm10, %v5026_v62  ;;  %4521 = vrot.lane.b32.xlu0 %v6263_v22, %s6744_s11  ;;  %v6268_v52 = vld [vmem:[%s6839_s7 + $0x13a] sm:$0xff] }
 0x53f   : > { %4712 = vrot.lane.b32.xlu1 %v8703_v32, %s6745_s29  ;;  %v6217_v32 = vld [vmem:[%s6839_s7 + $0x110] sm:$0xff]  ;;  %v6196_v53 = vld [vmem:[%s6839_s7 + $0x13c] sm:$0xff] }
 0x540   : > { %v4500_v63 = vpop.permute.xlu0 %4499  ;;  %v4502_v2 = vpop.permute.xlu1 %4501 }
 0x541   : > { %4570 = vst.msk [vmem:[#allocation2 + $0x10] sm:$0xff] %vm4567_vm7, %v4500_v63  ;;  %4571 = vst.msk [vmem:[#allocation2 + $0x18] sm:$0xff] %vm4567_vm7, %v4502_v2  ;;  %v6269_v63 = vld [vmem:[%s6839_s7 + $0x142] sm:$0xff] }
 0x542   : > { %3948 = vrot.lane.b32.xlu0 %v6191_v56, %s6741_s21  ;;  %v6292_v2 = vld [vmem:[%s6839_s7 + $0x13b] sm:$0xff] }
 0x543   : > { %4136 = vrot.lane.b32.xlu1 %v6216_v57, %s6742_s14 }
 0x544   : > { %v4693_v4 = vpop.permute.xlu0 %4692  ;;  %v4117_v5 = vpop.permute.xlu1 %4116  ;;  %v5027_v10 = vld [vmem:[#allocation2 + $0x8] sm:$0xff] }
 0x545   : > { %4763 = vst.msk [vmem:[#allocation2 + $0x10] sm:$0xff] %vm4760_vm8, %v4693_v4  ;;  %6437 = vmatmul.mubr.msk.f32.vlgmr.msra.gmra.mrb[0].mxu0 %vm5071_vm10, %v5027_v10  ;;  %v6197_v10 = vld [vmem:[%s6839_s7 + $0x144] sm:$0xff] }
 0x546   : > { %4185 = vst.msk [vmem:[#allocation2 + $0x20] sm:$0xff] %vm4180_vm5, %v4117_v5  ;;  %4714 = vrot.lane.b32.xlu0 %v8706_v33, %s6745_s29 }
 0x547   : > { %4905 = vrot.lane.b32.xlu1 %v6190_v46, %s6746_s30 }
 0x548   : > { %v4695_v11 = vpop.permute.xlu0 %4694  ;;  %v4886_v35 = vpop.permute.xlu1 %4885 }
 0x549   : > { %4764 = vst.msk [vmem:[#allocation2 + $0x18] sm:$0xff] %vm4760_vm8, %v4695_v11 }
 0x54a   : > { %4956 = vst.msk [vmem:[#allocation2 + $0x10] sm:$0xff] %vm4953_vm9, %v4886_v35  ;;  %4138 = vrot.lane.b32.xlu0 %v6217_v32, %s6742_s14  ;;  %v6222_v32 = vld [vmem:[%s6839_s7 + $0x150] sm:$0xff]  ;;  %v6293_v35 = vld [vmem:[%s6839_s7 + $0x143] sm:$0xff] }
 0x54b   : > { %4330 = vrot.lane.b32.xlu1 %v6240_v3, %s6743_s5 }
 0x54c   : > { %v4119_v15 = vpop.permute.xlu0 %4118  ;;  %v4311_v33 = vpop.permute.xlu1 %4310 }
 0x54d   : > { %4186 = vst.msk [vmem:[#allocation2 + $0x28] sm:$0xff] %vm4180_vm5, %v4119_v15 }
 0x54e   : > { %4379 = vst.msk [vmem:[#allocation2 + $0x20] sm:$0xff] %vm4374_vm6, %v4311_v33  ;;  %4907 = vrot.lane.b32.xlu0 %v6191_v56, %s6746_s30  ;;  %v6223_v33 = vld [vmem:[%s6839_s7 + $0x158] sm:$0xff] }
 0x54f   : > { %4332 = vrot.lane.b32.xlu1 %v6241_v37, %s6743_s5 }
 0x550   : > { %v4888_v6 = vpop.permute.xlu0 %4887  ;;  %v4313_v7 = vpop.permute.xlu1 %4312 }
 0x551   : > { %v5028_v17 = vld [vmem:[#allocation2 + $0x10] sm:$0xff]  ;;  %4957 = vst.msk [vmem:[#allocation2 + $0x18] sm:$0xff] %vm4953_vm9, %v4888_v6 }
 0x552   : > { %4380 = vst.msk [vmem:[#allocation2 + $0x28] sm:$0xff] %vm4374_vm6, %v4313_v7  ;;  %6439 = vmatprep.mubr.msk.f32.mxu0 %vm5071_vm10, %v5028_v17  ;;  %4523 = vrot.lane.b32.xlu0 %v6264_v13, %s6744_s11  ;;  %v6246_v13 = vld [vmem:[%s6839_s7 + $0x151] sm:$0xff]  ;;  %v6247_v17 = vld [vmem:[%s6839_s7 + $0x159] sm:$0xff] }
 0x553   : > { %3950 = vrot.lane.b32.xlu1 %v6192_v45, %s6741_s21 }
 0x554   : > { %v4504_v60 = vpop.permute.xlu0 %4503  ;;  %v4506_v28 = vpop.permute.xlu1 %4505 }
 0x555   : > { %4572 = vst.msk [vmem:[#allocation2 + $0x20] sm:$0xff] %vm4567_vm7, %v4504_v60  ;;  %4573 = vst.msk [vmem:[#allocation2 + $0x28] sm:$0xff] %vm4567_vm7, %v4506_v28  ;;  %v6270_v28 = vld [vmem:[%s6839_s7 + $0x152] sm:$0xff] }
 0x556   : > { %4525 = vrot.lane.b32.xlu0 %v6265_v16, %s6744_s11 }
 0x557   : > { %4716 = vrot.lane.b32.xlu1 %v8715_v38, %s6745_s29 }
 0x558   : > { %v4697_v0 = vpop.permute.xlu0 %4696  ;;  %v4121_v50 = vpop.permute.xlu1 %4120  ;;  %v5029_v1 = vld [vmem:[#allocation2 + $0x18] sm:$0xff] }
 0x559   : > { %4765 = vst.msk [vmem:[#allocation2 + $0x20] sm:$0xff] %vm4760_vm8, %v4697_v0  ;;  %6440 = vmatmul.mubr.msk.f32.gmra.mrb[2].mxu0 %vm5071_vm10, %v5029_v1  ;;  %v6271_v1 = vld [vmem:[%s6839_s7 + $0x15a] sm:$0xff] }
 0x55a   : > { %4187 = vst.msk [vmem:[#allocation2 + $0x30] sm:$0xff] %vm4180_vm5, %v4121_v50  ;;  %3952 = vrot.lane.b32.xlu0 %v6193_v61, %s6741_s21 }
 0x55b   : > { %4140 = vrot.lane.b32.xlu1 %v6218_v44, %s6742_s14 }
 0x55c   : > { %v4699_v51 = vpop.permute.xlu0 %4698  ;;  %v4890_v38 = vpop.permute.xlu1 %4889 }
 0x55d   : > { %4766 = vst.msk [vmem:[#allocation2 + $0x28] sm:$0xff] %vm4760_vm8, %v4699_v51  ;;  %v6294_v51 = vld [vmem:[%s6839_s7 + $0x153] sm:$0xff] }
 0x55e   : > { %4958 = vst.msk [vmem:[#allocation2 + $0x20] sm:$0xff] %vm4953_vm9, %v4890_v38  ;;  %4718 = vrot.lane.b32.xlu0 %v8718_v39, %s6745_s29 }
 0x55f   : > { %4909 = vrot.lane.b32.xlu1 %v6192_v45, %s6746_s30 }
 0x560   : > { %v4123_v42 = vpop.permute.xlu0 %4122  ;;  %v4315_v18 = vpop.permute.xlu1 %4314 }
 0x561   : > { %4188 = vst.msk [vmem:[#allocation2 + $0x38] sm:$0xff] %vm4180_vm5, %v4123_v42  ;;  %v6224_v42 = vld [vmem:[%s6839_s7 + $0x168] sm:$0xff] }
 0x562   : > { %4381 = vst.msk [vmem:[#allocation2 + $0x30] sm:$0xff] %vm4374_vm6, %v4315_v18  ;;  %4142 = vrot.lane.b32.xlu0 %v6219_v29, %s6742_s14 }
 0x563   : > { %4334 = vrot.lane.b32.xlu1 %v6242_v20, %s6743_s5  ;;  %v6199_v20 = vld [vmem:[%s6839_s7 + $0x15c] sm:$0xff] }
 0x564   : > { %v4892_v8 = vpop.permute.xlu0 %4891  ;;  %v4317_v39 = vpop.permute.xlu1 %4316 }
 0x565   : > { %v5030_v24 = vld [vmem:[#allocation2 + $0x20] sm:$0xff]  ;;  %4959 = vst.msk [vmem:[#allocation2 + $0x28] sm:$0xff] %vm4953_vm9, %v4892_v8 }
 0x566   : > { %4382 = vst.msk [vmem:[#allocation2 + $0x38] sm:$0xff] %vm4374_vm6, %v4317_v39  ;;  %6442 = vmatprep.mubr.msk.f32.mxu0 %vm5071_vm10, %v5030_v24  ;;  %4911 = vrot.lane.b32.xlu0 %v6193_v61, %s6746_s30  ;;  %v6198_v61 = vld [vmem:[%s6839_s7 + $0x154] sm:$0xff] }
 0x567   : > { %4336 = vrot.lane.b32.xlu1 %v6243_v19, %s6743_s5  ;;  %v6295_v8 = vld [vmem:[%s6839_s7 + $0x15b] sm:$0xff] }
 0x568   : > { %v4508_v9 = vpop.permute.xlu0 %4507  ;;  %v4510_v12 = vpop.permute.xlu1 %4509 }
 0x569   : > { %4574 = vst.msk [vmem:[#allocation2 + $0x30] sm:$0xff] %vm4567_vm7, %v4508_v9  ;;  %4575 = vst.msk [vmem:[#allocation2 + $0x38] sm:$0xff] %vm4567_vm7, %v4510_v12 }
 0x56a   : > { %4527 = vrot.lane.b32.xlu0 %v6266_v43, %s6744_s11  ;;  %v6225_v43 = vld [vmem:[%s6839_s7 + $0x170] sm:$0xff] }
 0x56b   : > { %3954 = vrot.lane.b32.xlu1 %v6194_v23, %s6741_s21 }
 0x56c   : > { %v4701_v30 = vpop.permute.xlu0 %4700  ;;  %v4125_v54 = vpop.permute.xlu1 %4124  ;;  %v5031_v58 = vld [vmem:[#allocation2 + $0x28] sm:$0xff] }
 0x56d   : > { %4767 = vst.msk [vmem:[#allocation2 + $0x30] sm:$0xff] %vm4760_vm8, %v4701_v30  ;;  %6443 = vmatmul.mubr.msk.f32.gmra.mrb[4].mxu0 %vm5071_vm10, %v5031_v58  ;;  %v6272_v58 = vld [vmem:[%s6839_s7 + $0x16a] sm:$0xff] }
 0x56e   : > { %4189 = vst.msk [vmem:[#allocation2 + $0x40] sm:$0xff] %vm4180_vm5, %v4125_v54  ;;  %4529 = vrot.lane.b32.xlu0 %v6267_v14, %s6744_s11 }
 0x56f   : > { %4720 = vrot.lane.b32.xlu1 %v6290_v25, %s6745_s29  ;;  %v6249_v25 = vld [vmem:[%s6839_s7 + $0x171] sm:$0xff] }
 0x570   : > { %v4703_v34 = vpop.permute.xlu0 %4702  ;;  %v4894_v26 = vpop.permute.xlu1 %4893 }
 0x571   : > { %4768 = vst.msk [vmem:[#allocation2 + $0x38] sm:$0xff] %vm4760_vm8, %v4703_v34 }
 0x572   : > { %4960 = vst.msk [vmem:[#allocation2 + $0x30] sm:$0xff] %vm4953_vm9, %v4894_v26  ;;  %3956 = vrot.lane.b32.xlu0 %v6195_v31, %s6741_s21 }
 0x573   : > { %4144 = vrot.lane.b32.xlu1 %v6220_v59, %s6742_s14 }
 0x574   : > { %v4127_v48 = vpop.permute.xlu0 %4126  ;;  %v4319_v36 = vpop.permute.xlu1 %4318 }
 0x575   : > { %4190 = vst.msk [vmem:[#allocation2 + $0x48] sm:$0xff] %vm4180_vm5, %v4127_v48  ;;  %v6296_v48 = vld [vmem:[%s6839_s7 + $0x16b] sm:$0xff] }
 0x576   : > { %4383 = vst.msk [vmem:[#allocation2 + $0x40] sm:$0xff] %vm4374_vm6, %v4319_v36  ;;  %4722 = vrot.lane.b32.xlu0 %v6291_v55, %s6745_s29  ;;  %v6273_v55 = vld [vmem:[%s6839_s7 + $0x172] sm:$0xff] }
 0x577   : > { %4913 = vrot.lane.b32.xlu1 %v6194_v23, %s6746_s30  ;;  %v6248_v23 = vld [vmem:[%s6839_s7 + $0x169] sm:$0xff] }
 0x578   : > { %v4896_v41 = vpop.permute.xlu0 %4895  ;;  %v4321_v49 = vpop.permute.xlu1 %4320 }
 0x579   : > { %v5032_v46 = vld [vmem:[#allocation2 + $0x30] sm:$0xff]  ;;  %4961 = vst.msk [vmem:[#allocation2 + $0x38] sm:$0xff] %vm4953_vm9, %v4896_v41  ;;  %v4205_v41 = vld [vmem:[%s7410_s22] sm:$0xff] }
 0x57a   : > { %4384 = vst.msk [vmem:[#allocation2 + $0x48] sm:$0xff] %vm4374_vm6, %v4321_v49  ;;  %6445 = vmatprep.mubr.msk.f32.mxu0 %vm5071_vm10, %v5032_v46  ;;  %4146 = vrot.lane.b32.xlu0 %v6221_v40, %s6742_s14 }
 0x57b   : > { %4338 = vrot.lane.b32.xlu1 %v6244_v27, %s6743_s5  ;;  %v6201_v27 = vld [vmem:[%s6839_s7 + $0x174] sm:$0xff] }
 0x57c   : > { %v4512_v21 = vpop.permute.xlu0 %4511  ;;  %v3939_v22 = vpop.permute.xlu1 %3938 }
 0x57d   : > { %4576 = vst.msk [vmem:[#allocation2 + $0x40] sm:$0xff] %vm4567_vm7, %v4512_v21 }
 0x57e   : > { %4007 = vst.msk [vmem:[#allocation2 + $0x50] sm:$0xff] %vm3996_vm4, %v3939_v22  ;;  %4915 = vrot.lane.b32.xlu0 %v6195_v31, %s6746_s30  ;;  %v6200_v31 = vld [vmem:[%s6839_s7 + $0x16c] sm:$0xff] }
 0x57f   : > { %4340 = vrot.lane.b32.xlu1 %v6245_v47, %s6743_s5  ;;  %v6297_v47 = vld [vmem:[%s6839_s7 + $0x173] sm:$0xff]  ;;  %s9576_s7 = sand.u32 1, %s6705_s16  }
 0x580   : > { %v4514_v62 = vpop.permute.xlu0 %4513  ;;  %v4705_v56 = vpop.permute.xlu1 %4704  ;;  %v5033_v57 = vld [vmem:[#allocation2 + $0x38] sm:$0xff]  ;;  %s5605_s24 = scalar_lea.sflag [#allocation4], %s9576_s7 }
 0x581   : > { %4577 = vst.msk [vmem:[#allocation2 + $0x48] sm:$0xff] %vm4567_vm7, %v4514_v62  ;;  %6446 = vmatmul.mubr.msk.f32.gmra.mrb[6].mxu0 %vm5071_vm10, %v5033_v57 }
 0x582   : > { %4769 = vst.msk [vmem:[#allocation2 + $0x40] sm:$0xff] %vm4760_vm8, %v4705_v56  ;;  %4531 = vrot.lane.b32.xlu0 %v6268_v52, %s6744_s11  ;;  %v4206_v52 = vld [vmem:[%s7410_s22 + $0x8] sm:$0xff] }
 0x583   : > { %3958 = vrot.lane.b32.xlu1 %v6196_v53, %s6741_s21 }
 0x584   : > { %v3941_v4 = vpop.permute.xlu0 %3940  ;;  %v4129_v5 = vpop.permute.xlu1 %4128 }
 0x585   : > { %4008 = vst.msk [vmem:[#allocation2 + $0x58] sm:$0xff] %vm3996_vm4, %v3941_v4 }
 0x586   : > { %4191 = vst.msk [vmem:[#allocation2 + $0x50] sm:$0xff] %vm4180_vm5, %v4129_v5  ;;  %4533 = vrot.lane.b32.xlu0 %v6269_v63, %s6744_s11  ;;  %v4400_v63 = vld [vmem:[%s7410_s22 + $0x9] sm:$0xff] }
 0x587   : > { %4724 = vrot.lane.b32.xlu1 %v6292_v2, %s6745_s29  ;;  %v4592_v5 = vld [vmem:[%s7410_s22 + $0x2] sm:$0xff] }
 0x588   : > { %v4707_v3 = vpop.permute.xlu0 %4706  ;;  %v4898_v11 = vpop.permute.xlu1 %4897 }
 0x589   : > { %4770 = vst.msk [vmem:[#allocation2 + $0x48] sm:$0xff] %vm4760_vm8, %v4707_v3 }
 0x58a   : > { %4962 = vst.msk [vmem:[#allocation2 + $0x40] sm:$0xff] %vm4953_vm9, %v4898_v11  ;;  %3960 = vrot.lane.b32.xlu0 %v6197_v10, %s6741_s21 }
 0x58b   : > { %4148 = vrot.lane.b32.xlu1 %v6222_v32, %s6742_s14 }
 0x58c   : > { %v4131_v37 = vpop.permute.xlu0 %4130  ;;  %v4323_v15 = vpop.permute.xlu1 %4322 }
 0x58d   : > { %4192 = vst.msk [vmem:[#allocation2 + $0x58] sm:$0xff] %vm4180_vm5, %v4131_v37  ;;  %v4785_v37 = vld [vmem:[%s7410_s22 + $0x3] sm:$0xff] }
 0x58e   : > { %4385 = vst.msk [vmem:[#allocation2 + $0x50] sm:$0xff] %vm4374_vm6, %v4323_v15  ;;  %4726 = vrot.lane.b32.xlu0 %v6293_v35, %s6745_s29  ;;  %v4593_v35 = vld [vmem:[%s7410_s22 + $0xa] sm:$0xff] }
 0x58f   : > { %4917 = vrot.lane.b32.xlu1 %v6196_v53, %s6746_s30  ;;  %v4399_v53 = vld [vmem:[%s7410_s22 + $0x1] sm:$0xff] }
 0x590   : > { %v4900_v45 = vpop.permute.xlu0 %4899  ;;  %v4325_v6 = vpop.permute.xlu1 %4324 }
 0x591   : > { %v5034_v7 = vld [vmem:[#allocation2 + $0x40] sm:$0xff]  ;;  %4963 = vst.msk [vmem:[#allocation2 + $0x48] sm:$0xff] %vm4953_vm9, %v4900_v45  ;;  %v4207_v45 = vld [vmem:[%s7410_s22 + $0x18] sm:$0xff] }
 0x592   : > { %4386 = vst.msk [vmem:[#allocation2 + $0x58] sm:$0xff] %vm4374_vm6, %v4325_v6  ;;  %6448 = vmatprep.mubr.msk.f32.mxu0 %vm5071_vm10, %v5034_v7  ;;  %4150 = vrot.lane.b32.xlu0 %v6223_v33, %s6742_s14 }
 0x593   : > { %4342 = vrot.lane.b32.xlu1 %v6246_v13, %s6743_s5  ;;  %v4024_v13 = vld [vmem:[%s7410_s22 + $0xc] sm:$0xff] }
 0x594   : > { %v4516_v16 = vpop.permute.xlu0 %4515  ;;  %v3943_v60 = vpop.permute.xlu1 %3942 }
 0x595   : > { %4578 = vst.msk [vmem:[#allocation2 + $0x50] sm:$0xff] %vm4567_vm7, %v4516_v16 }
 0x596   : > { %4009 = vst.msk [vmem:[#allocation2 + $0x60] sm:$0xff] %vm3996_vm4, %v3943_v60  ;;  %4919 = vrot.lane.b32.xlu0 %v6197_v10, %s6746_s30  ;;  %v4023_v10 = vld [vmem:[%s7410_s22 + $0x4] sm:$0xff] }
 0x597   : > { %4344 = vrot.lane.b32.xlu1 %v6247_v17, %s6743_s5  ;;  %v4786_v17 = vld [vmem:[%s7410_s22 + $0xb] sm:$0xff] }
 0x598   : > { %v4518_v44 = vpop.permute.xlu0 %4517  ;;  %v4709_v0 = vpop.permute.xlu1 %4708  ;;  %v5035_v50 = vld [vmem:[#allocation2 + $0x48] sm:$0xff] }
 0x599   : > { %4579 = vst.msk [vmem:[#allocation2 + $0x58] sm:$0xff] %vm4567_vm7, %v4518_v44  ;;  %6449 = vmatmul.mubr.msk.f32.gmra.mrb[8].mxu0 %vm5071_vm10, %v5035_v50 }
 0x59a   : > { %4771 = vst.msk [vmem:[#allocation2 + $0x50] sm:$0xff] %vm4760_vm8, %v4709_v0  ;;  %4535 = vrot.lane.b32.xlu0 %v6270_v28, %s6744_s11  ;;  %v4208_v28 = vld [vmem:[%s7410_s22 + $0x20] sm:$0xff] }
 0x59b   : > { %3962 = vrot.lane.b32.xlu1 %v6198_v61, %s6741_s21 }
 0x59c   : > { %v3945_v38 = vpop.permute.xlu0 %3944  ;;  %v4133_v29 = vpop.permute.xlu1 %4132 }
 0x59d   : > { %4010 = vst.msk [vmem:[#allocation2 + $0x68] sm:$0xff] %vm3996_vm4, %v3945_v38 }
 0x59e   : > { %4193 = vst.msk [vmem:[#allocation2 + $0x60] sm:$0xff] %vm4180_vm5, %v4133_v29  ;;  %4537 = vrot.lane.b32.xlu0 %v6271_v1, %s6744_s11  ;;  %v4402_v1 = vld [vmem:[%s7410_s22 + $0x21] sm:$0xff] }
 0x59f   : > { %4728 = vrot.lane.b32.xlu1 %v6294_v51, %s6745_s29  ;;  %v4594_v29 = vld [vmem:[%s7410_s22 + $0x1a] sm:$0xff] }
 0x5a0   : > { %v4711_v18 = vpop.permute.xlu0 %4710  ;;  %v4902_v19 = vpop.permute.xlu1 %4901 }
 0x5a1   : > { %4772 = vst.msk [vmem:[#allocation2 + $0x58] sm:$0xff] %vm4760_vm8, %v4711_v18 }
 0x5a2   : > { %4964 = vst.msk [vmem:[#allocation2 + $0x50] sm:$0xff] %vm4953_vm9, %v4902_v19  ;;  %3964 = vrot.lane.b32.xlu0 %v6199_v20, %s6741_s21 }
 0x5a3   : > { %4152 = vrot.lane.b32.xlu1 %v6224_v42, %s6742_s14 }
 0x5a4   : > { %v4135_v39 = vpop.permute.xlu0 %4134  ;;  %v4327_v24 = vpop.permute.xlu1 %4326 }
 0x5a5   : > { %4194 = vst.msk [vmem:[#allocation2 + $0x68] sm:$0xff] %vm4180_vm5, %v4135_v39  ;;  %v4787_v39 = vld [vmem:[%s7410_s22 + $0x1b] sm:$0xff] }
 0x5a6   : > { %4387 = vst.msk [vmem:[#allocation2 + $0x60] sm:$0xff] %vm4374_vm6, %v4327_v24  ;;  %4730 = vrot.lane.b32.xlu0 %v6295_v8, %s6745_s29  ;;  %v4595_v8 = vld [vmem:[%s7410_s22 + $0x22] sm:$0xff] }
 0x5a7   : > { %4921 = vrot.lane.b32.xlu1 %v6198_v61, %s6746_s30  ;;  %v4401_v61 = vld [vmem:[%s7410_s22 + $0x19] sm:$0xff] }
 0x5a8   : > { %v4904_v9 = vpop.permute.xlu0 %4903  ;;  %v4329_v12 = vpop.permute.xlu1 %4328 }
 0x5a9   : > { %v5036_v14 = vld [vmem:[#allocation2 + $0x50] sm:$0xff]  ;;  %4965 = vst.msk [vmem:[#allocation2 + $0x58] sm:$0xff] %vm4953_vm9, %v4904_v9 }
 0x5aa   : > { %4388 = vst.msk [vmem:[#allocation2 + $0x68] sm:$0xff] %vm4374_vm6, %v4329_v12  ;;  %6451 = vmatprep.mubr.msk.f32.mxu0 %vm5071_vm10, %v5036_v14  ;;  %4154 = vrot.lane.b32.xlu0 %v6225_v43, %s6742_s14  ;;  %v4209_v9 = vld [vmem:[%s7410_s22 + $0x30] sm:$0xff] }
 0x5ab   : > { %4346 = vrot.lane.b32.xlu1 %v6248_v23, %s6743_s5  ;;  %v4026_v23 = vld [vmem:[%s7410_s22 + $0x24] sm:$0xff] }
 0x5ac   : > { %v4520_v30 = vpop.permute.xlu0 %4519  ;;  %v3947_v54 = vpop.permute.xlu1 %3946 }
 0x5ad   : > { %4580 = vst.msk [vmem:[#allocation2 + $0x60] sm:$0xff] %vm4567_vm7, %v4520_v30 }
 0x5ae   : > { %4011 = vst.msk [vmem:[#allocation2 + $0x70] sm:$0xff] %vm3996_vm4, %v3947_v54  ;;  %4923 = vrot.lane.b32.xlu0 %v6199_v20, %s6746_s30  ;;  %v4025_v20 = vld [vmem:[%s7410_s22 + $0x1c] sm:$0xff] }
 0x5af   : > { %4348 = vrot.lane.b32.xlu1 %v6249_v25, %s6743_s5  ;;  %v4788_v25 = vld [vmem:[%s7410_s22 + $0x23] sm:$0xff] }
 0x5b0   : > { %v4522_v59 = vpop.permute.xlu0 %4521  ;;  %v5037_v26 = vld [vmem:[#allocation2 + $0x58] sm:$0xff] }
 0x5b1   : > { %v4713_v34 = vpop.permute.xlu1 %4712  ;;  %4581 = vst.msk [vmem:[#allocation2 + $0x68] sm:$0xff] %vm4567_vm7, %v4522_v59  ;;  %6452 = vmatmul.mubr.msk.f32.gmra.mrb[10].mxu0 %vm5071_vm10, %v5037_v26 }
 0x5b2   : > { %4773 = vst.msk [vmem:[#allocation2 + $0x60] sm:$0xff] %vm4760_vm8, %v4713_v34  ;;  %4539 = vrot.lane.b32.xlu0 %v6272_v58, %s6744_s11  ;;  %v4210_v58 = vld [vmem:[%s7410_s22 + $0x38] sm:$0xff] }
 0x5b3   : > { %3966 = vrot.lane.b32.xlu1 %v6200_v31, %s6741_s21 }
 0x5b4   : > { %v3949_v36 = vpop.permute.xlu0 %3948 }
 0x5b5   : > { %v4137_v40 = vpop.permute.xlu1 %4136  ;;  %4012 = vst.msk [vmem:[#allocation2 + $0x78] sm:$0xff] %vm3996_vm4, %v3949_v36 }
 0x5b6   : > { %4195 = vst.msk [vmem:[#allocation2 + $0x70] sm:$0xff] %vm4180_vm5, %v4137_v40  ;;  %4541 = vrot.lane.b32.xlu0 %v6273_v55, %s6744_s11  ;;  %v4404_v55 = vld [vmem:[%s7410_s22 + $0x39] sm:$0xff] }
 0x5b7   : > { %4732 = vrot.lane.b32.xlu1 %v6296_v48, %s6745_s29  ;;  %v4596_v40 = vld [vmem:[%s7410_s22 + $0x32] sm:$0xff] }
 0x5b8   : > { %v4715_v49 = vpop.permute.xlu0 %4714 }
 0x5b9   : > { %v4906_v46 = vpop.permute.xlu1 %4905  ;;  %4774 = vst.msk [vmem:[#allocation2 + $0x68] sm:$0xff] %vm4760_vm8, %v4715_v49 }
 0x5ba   : > { %4966 = vst.msk [vmem:[#allocation2 + $0x60] sm:$0xff] %vm4953_vm9, %v4906_v46  ;;  %3968 = vrot.lane.b32.xlu0 %v6201_v27, %s6741_s21 }
 0x5bb   : > { %4221 = vrot.lane.b32.xlu1 %v4205_v41, %s6742_s14 }
 0x5bc   : > { %v4139_v21 = vpop.permute.xlu0 %4138 }
 0x5bd   : > { %v4331_v22 = vpop.permute.xlu1 %4330  ;;  %4196 = vst.msk [vmem:[#allocation2 + $0x78] sm:$0xff] %vm4180_vm5, %v4139_v21  ;;  %v4789_v21 = vld [vmem:[%s7410_s22 + $0x33] sm:$0xff] }
 0x5be   : > { %4389 = vst.msk [vmem:[#allocation2 + $0x70] sm:$0xff] %vm4374_vm6, %v4331_v22  ;;  %4734 = vrot.lane.b32.xlu0 %v6297_v47, %s6745_s29  ;;  %v4597_v47 = vld [vmem:[%s7410_s22 + $0x3a] sm:$0xff] }
 0x5bf   : > { %4925 = vrot.lane.b32.xlu1 %v6200_v31, %s6746_s30  ;;  %v4403_v31 = vld [vmem:[%s7410_s22 + $0x31] sm:$0xff] }
 0x5c0   : > { %v4908_v62 = vpop.permute.xlu0 %4907 }
 0x5c1   : > { %v4333_v56 = vpop.permute.xlu1 %4332  ;;  %v5038_v57 = vld [vmem:[#allocation2 + $0x60] sm:$0xff]  ;;  %4967 = vst.msk [vmem:[#allocation2 + $0x68] sm:$0xff] %vm4953_vm9, %v4908_v62  ;;  %v4211_v62 = vld [vmem:[%s7410_s22 + $0x48] sm:$0xff] }
 0x5c2   : > { %4390 = vst.msk [vmem:[#allocation2 + $0x78] sm:$0xff] %vm4374_vm6, %v4333_v56  ;;  %6454 = vmatprep.mubr.msk.f32.mxu0 %vm5071_vm10, %v5038_v57  ;;  %4223 = vrot.lane.b32.xlu0 %v4206_v52, %s6742_s14 }
 0x5c3   : > { %4415 = vrot.lane.b32.xlu1 %v4399_v53, %s6743_s5  ;;  %v4028_v53 = vld [vmem:[%s7410_s22 + $0x3c] sm:$0xff] }
 0x5c4   : > { %v4524_v2 = vpop.permute.xlu0 %4523 }
 0x5c5   : > { %v3951_v4 = vpop.permute.xlu1 %3950  ;;  %4582 = vst.msk [vmem:[#allocation2 + $0x70] sm:$0xff] %vm4567_vm7, %v4524_v2 }
 0x5c6   : > { %4013 = vst.msk [vmem:[#allocation2 + $0x80] sm:$0xff] %vm3996_vm4, %v3951_v4  ;;  %4927 = vrot.lane.b32.xlu0 %v6201_v27, %s6746_s30  ;;  %v4027_v27 = vld [vmem:[%s7410_s22 + $0x34] sm:$0xff] }
 0x5c7   : > { %4417 = vrot.lane.b32.xlu1 %v4400_v63, %s6743_s5  ;;  %v4790_v63 = vld [vmem:[%s7410_s22 + $0x3b] sm:$0xff] }
 0x5c8   : > { %v4526_v32 = vpop.permute.xlu0 %4525  ;;  %v5039_v11 = vld [vmem:[#allocation2 + $0x68] sm:$0xff] }
 0x5c9   : > { %v4717_v3 = vpop.permute.xlu1 %4716  ;;  %4583 = vst.msk [vmem:[#allocation2 + $0x78] sm:$0xff] %vm4567_vm7, %v4526_v32  ;;  %6455 = vmatmul.mubr.msk.f32.gmra.mrb[12].mxu0 %vm5071_vm10, %v5039_v11 }
 0x5ca   : > { %4775 = vst.msk [vmem:[#allocation2 + $0x70] sm:$0xff] %vm4760_vm8, %v4717_v3  ;;  %4608 = vrot.lane.b32.xlu0 %v4592_v5, %s6744_s11  ;;  %v4212_v5 = vld [vmem:[%s7410_s22 + $0x50] sm:$0xff] }
 0x5cb   : > { %4035 = vrot.lane.b32.xlu1 %v4023_v10, %s6741_s21 }
 0x5cc   : > { %v3953_v15 = vpop.permute.xlu0 %3952 }
 0x5cd   : > { %v4141_v33 = vpop.permute.xlu1 %4140  ;;  %4014 = vst.msk [vmem:[#allocation2 + $0x88] sm:$0xff] %vm3996_vm4, %v3953_v15 }
 0x5ce   : > { %4197 = vst.msk [vmem:[#allocation2 + $0x80] sm:$0xff] %vm4180_vm5, %v4141_v33  ;;  %4610 = vrot.lane.b32.xlu0 %v4593_v35, %s6744_s11  ;;  %v4406_v35 = vld [vmem:[%s7410_s22 + $0x51] sm:$0xff] }
 0x5cf   : > { %4801 = vrot.lane.b32.xlu1 %v4785_v37, %s6745_s29  ;;  %v4598_v33 = vld [vmem:[%s7410_s22 + $0x4a] sm:$0xff] }
 0x5d0   : > { %v4719_v6 = vpop.permute.xlu0 %4718 }
 0x5d1   : > { %v4910_v7 = vpop.permute.xlu1 %4909  ;;  %4776 = vst.msk [vmem:[#allocation2 + $0x78] sm:$0xff] %vm4760_vm8, %v4719_v6 }
 0x5d2   : > { %4968 = vst.msk [vmem:[#allocation2 + $0x70] sm:$0xff] %vm4953_vm9, %v4910_v7  ;;  %4037 = vrot.lane.b32.xlu0 %v4024_v13, %s6741_s21 }
 0x5d3   : > { %4225 = vrot.lane.b32.xlu1 %v4207_v45, %s6742_s14 }
 0x5d4   : > { %v4143_v16 = vpop.permute.xlu0 %4142 }
 0x5d5   : > { %v4335_v60 = vpop.permute.xlu1 %4334  ;;  %4198 = vst.msk [vmem:[#allocation2 + $0x88] sm:$0xff] %vm4180_vm5, %v4143_v16  ;;  %v4792_v16 = vld [vmem:[%s7410_s22 + $0x53] sm:$0xff] }
 0x5d6   : > { %4391 = vst.msk [vmem:[#allocation2 + $0x80] sm:$0xff] %vm4374_vm6, %v4335_v60  ;;  %4803 = vrot.lane.b32.xlu0 %v4786_v17, %s6745_s29  ;;  %v4791_v17 = vld [vmem:[%s7410_s22 + $0x4b] sm:$0xff] }
 0x5d7   : > { %4994 = vrot.lane.b32.xlu1 %v4023_v10, %s6746_s30  ;;  %v4405_v10 = vld [vmem:[%s7410_s22 + $0x49] sm:$0xff] }
 0x5d8   : > { %v4912_v44 = vpop.permute.xlu0 %4911 }
 0x5d9   : > { %v4337_v0 = vpop.permute.xlu1 %4336  ;;  %v5040_v50 = vld [vmem:[#allocation2 + $0x70] sm:$0xff]  ;;  %4969 = vst.msk [vmem:[#allocation2 + $0x78] sm:$0xff] %vm4953_vm9, %v4912_v44 }
 0x5da   : > { %4392 = vst.msk [vmem:[#allocation2 + $0x88] sm:$0xff] %vm4374_vm6, %v4337_v0  ;;  %6457 = vmatprep.mubr.msk.f32.mxu0 %vm5071_vm10, %v5040_v50  ;;  %4227 = vrot.lane.b32.xlu0 %v4208_v28, %s6742_s14  ;;  %v4985_v44 = vld [vmem:[%s7410_s22 + $0x54] sm:$0xff] }
 0x5db   : > { %4419 = vrot.lane.b32.xlu1 %v4401_v61, %s6743_s5  ;;  %v4984_v61 = vld [vmem:[%s7410_s22 + $0x4c] sm:$0xff] }
 0x5dc   : > { %v4528_v51 = vpop.permute.xlu0 %4527 }
 0x5dd   : > { %v3955_v38 = vpop.permute.xlu1 %3954  ;;  %4584 = vst.msk [vmem:[#allocation2 + $0x80] sm:$0xff] %vm4567_vm7, %v4528_v51 }
 0x5de   : > { %4015 = vst.msk [vmem:[#allocation2 + $0x90] sm:$0xff] %vm3996_vm4, %v3955_v38  ;;  %4996 = vrot.lane.b32.xlu0 %v4024_v13, %s6746_s30  ;;  %v4599_v13 = vld [vmem:[%s7410_s22 + $0x52] sm:$0xff]  ;;  %s5778_s22 = sshll.u32 %s9576_s7, 4 }
 0x5df   : > { %4421 = vrot.lane.b32.xlu1 %v4402_v1, %s6743_s5 }
 0x5e0   : > { %v4530_v42 = vpop.permute.xlu0 %4529  ;;  %v5041_v19 = vld [vmem:[#allocation2 + $0x78] sm:$0xff] }
 0x5e1   : > { %v4721_v18 = vpop.permute.xlu1 %4720  ;;  %4585 = vst.msk [vmem:[#allocation2 + $0x88] sm:$0xff] %vm4567_vm7, %v4530_v42  ;;  %6458 = vmatmul.mubr.msk.f32.gmra.mrb[14].mxu0 %vm5071_vm10, %v5041_v19 }
 0x5e2   : > { %4777 = vst.msk [vmem:[#allocation2 + $0x80] sm:$0xff] %vm4760_vm8, %v4721_v18  ;;  %4612 = vrot.lane.b32.xlu0 %v4594_v29, %s6744_s11 }
 0x5e3   : > { %4039 = vrot.lane.b32.xlu1 %v4025_v20, %s6741_s21 }
 0x5e4   : > { %v3957_v24 = vpop.permute.xlu0 %3956 }
 0x5e5   : > { %v4145_v43 = vpop.permute.xlu1 %4144  ;;  %4016 = vst.msk [vmem:[#allocation2 + $0x98] sm:$0xff] %vm3996_vm4, %v3957_v24 }
 0x5e6   : > { %4199 = vst.msk [vmem:[#allocation2 + $0x90] sm:$0xff] %vm4180_vm5, %v4145_v43  ;;  %4614 = vrot.lane.b32.xlu0 %v4595_v8, %s6744_s11 }
 0x5e7   : > { %4805 = vrot.lane.b32.xlu1 %v4787_v39, %s6745_s29 }
 0x5e8   : > { %v4723_v12 = vpop.permute.xlu0 %4722 }
 0x5e9   : > { %v4914_v14 = vpop.permute.xlu1 %4913  ;;  %4778 = vst.msk [vmem:[#allocation2 + $0x88] sm:$0xff] %vm4760_vm8, %v4723_v12 }
 0x5ea   : > { %4970 = vst.msk [vmem:[#allocation2 + $0x80] sm:$0xff] %vm4953_vm9, %v4914_v14  ;;  %4041 = vrot.lane.b32.xlu0 %v4026_v23, %s6741_s21 }
 0x5eb   : > { %4229 = vrot.lane.b32.xlu1 %v4209_v9, %s6742_s14 }
 0x5ec   : > { %v4147_v30 = vpop.permute.xlu0 %4146 }
 0x5ed   : > { %v4339_v54 = vpop.permute.xlu1 %4338  ;;  %4200 = vst.msk [vmem:[#allocation2 + $0x98] sm:$0xff] %vm4180_vm5, %v4147_v30 }
 0x5ee   : > { %4393 = vst.msk [vmem:[#allocation2 + $0x90] sm:$0xff] %vm4374_vm6, %v4339_v54  ;;  %4807 = vrot.lane.b32.xlu0 %v4788_v25, %s6745_s29 }
 0x5ef   : > { %4998 = vrot.lane.b32.xlu1 %v4025_v20, %s6746_s30 }
 0x5f0   : > { %v4916_v59 = vpop.permute.xlu0 %4915 }
 0x5f1   : > { %v4341_v34 = vpop.permute.xlu1 %4340  ;;  %v5042_v26 = vld [vmem:[#allocation2 + $0x80] sm:$0xff]  ;;  %4971 = vst.msk [vmem:[#allocation2 + $0x88] sm:$0xff] %vm4953_vm9, %v4916_v59 }
 0x5f2   : > { %4394 = vst.msk [vmem:[#allocation2 + $0x98] sm:$0xff] %vm4374_vm6, %v4341_v34  ;;  %6460 = vmatprep.mubr.msk.f32.mxu1 %vm5071_vm10, %v5042_v26  ;;  %4231 = vrot.lane.b32.xlu0 %v4210_v58, %s6742_s14 }
 0x5f3   : > { %4423 = vrot.lane.b32.xlu1 %v4403_v31, %s6743_s5 }
 0x5f4   : > { %v4532_v48 = vpop.permute.xlu0 %4531 }
 0x5f5   : > { %v3959_v36 = vpop.permute.xlu1 %3958  ;;  %4586 = vst.msk [vmem:[#allocation2 + $0x90] sm:$0xff] %vm4567_vm7, %v4532_v48 }
 0x5f6   : > { %4017 = vst.msk [vmem:[#allocation2 + $0xa0] sm:$0xff] %vm3996_vm4, %v3959_v36  ;;  %5000 = vrot.lane.b32.xlu0 %v4026_v23, %s6746_s30 }
 0x5f7   : > { %4425 = vrot.lane.b32.xlu1 %v4404_v55, %s6743_s5 }
 0x5f8   : > { %v4534_v41 = vpop.permute.xlu0 %4533  ;;  %v5043_v46 = vld [vmem:[#allocation2 + $0x88] sm:$0xff] }
 0x5f9   : > { %v4725_v49 = vpop.permute.xlu1 %4724  ;;  %4587 = vst.msk [vmem:[#allocation2 + $0x98] sm:$0xff] %vm4567_vm7, %v4534_v41  ;;  %6461 = vmatmul.mubr.msk.f32.vlgmr.msra.gmra.mrb[0].mxu1 %vm5071_vm10, %v5043_v46 }
 0x5fa   : > { %4779 = vst.msk [vmem:[#allocation2 + $0x90] sm:$0xff] %vm4760_vm8, %v4725_v49  ;;  %4616 = vrot.lane.b32.xlu0 %v4596_v40, %s6744_s11 }
 0x5fb   : > { %4043 = vrot.lane.b32.xlu1 %v4027_v27, %s6741_s21 }
 0x5fc   : > { %v3961_v22 = vpop.permute.xlu0 %3960 }
 0x5fd   : > { %v4149_v52 = vpop.permute.xlu1 %4148  ;;  %4018 = vst.msk [vmem:[#allocation2 + $0xa8] sm:$0xff] %vm3996_vm4, %v3961_v22 }
 0x5fe   : > { %4201 = vst.msk [vmem:[#allocation2 + $0xa0] sm:$0xff] %vm4180_vm5, %v4149_v52  ;;  %4618 = vrot.lane.b32.xlu0 %v4597_v47, %s6744_s11 }
 0x5ff   : > { %4809 = vrot.lane.b32.xlu1 %v4789_v21, %s6745_s29 }
 0x600   : > { %v4727_v56 = vpop.permute.xlu0 %4726 }
 0x601   : > { %v4918_v57 = vpop.permute.xlu1 %4917  ;;  %4780 = vst.msk [vmem:[#allocation2 + $0x98] sm:$0xff] %vm4760_vm8, %v4727_v56 }
 0x602   : > { %4972 = vst.msk [vmem:[#allocation2 + $0x90] sm:$0xff] %vm4953_vm9, %v4918_v57  ;;  %4045 = vrot.lane.b32.xlu0 %v4028_v53, %s6741_s21  ;;  %s9579_s21 = scalar_lea.vmem [#allocation3], %s5778_s22 }
 0x603   : > { %4233 = vrot.lane.b32.xlu1 %v4211_v62, %s6742_s14  ;;  %s5626_s9 = sshll.u32 %s9579_s21, 4  ;;  %s9631_s9 = int_to_ptr.vmem [resolvable:$true] %s5626_s9 }
 0x604   : > { %v4151_v2 = vpop.permute.xlu0 %4150  ;;  %s6611_s26 = scalar_lea.vmem %s9631_s9, 256 }
 0x605   : > { %v4343_v4 = vpop.permute.xlu1 %4342  ;;  %4202 = vst.msk [vmem:[#allocation2 + $0xa8] sm:$0xff] %vm4180_vm5, %v4151_v2  ;;  %p6612_p12 = scmp.ne.s32.totalorder %s9631_s9, %s6611_s26 }
 0x606   : > { %4395 = vst.msk [vmem:[#allocation2 + $0xa0] sm:$0xff] %vm4374_vm6, %v4343_v4  ;;  %4811 = vrot.lane.b32.xlu0 %v4790_v63, %s6745_s29 }
 0x607   : > { %5002 = vrot.lane.b32.xlu1 %v4027_v27, %s6746_s30  ;;  %p6613_p13 = pnand %p6612_p12, %p6814_p4 }
 0x608   : > { %v4920_v32 = vpop.permute.xlu0 %4919 }
 0x609   : > { %v4345_v3 = vpop.permute.xlu1 %4344  ;;  %v5044_v11 = vld [vmem:[#allocation2 + $0x90] sm:$0xff]  ;;  %4973 = vst.msk [vmem:[#allocation2 + $0x98] sm:$0xff] %vm4953_vm9, %v4920_v32  ;;  %p6614_p0 = pneg %p6613_p13 }
 0x60a   : > { %4396 = vst.msk [vmem:[#allocation2 + $0xa8] sm:$0xff] %vm4374_vm6, %v4345_v3  ;;  %6463 = vmatprep.mubr.msk.f32.mxu1 %vm5071_vm10, %v5044_v11  ;;  %4235 = vrot.lane.b32.xlu0 %v4212_v5, %s6742_s14  ;;  %s5779_s14 = sshll.u32 %s9576_s7, 1 }
 0x60b   : > { %4427 = vrot.lane.b32.xlu1 %v4405_v10, %s6743_s5 }
 0x60c   : > { %v4536_v37 = vpop.permute.xlu0 %4535 }
 0x60d   : > { %v3963_v15 = vpop.permute.xlu1 %3962  ;;  %4588 = vst.msk [vmem:[#allocation2 + $0xa0] sm:$0xff] %vm4567_vm7, %v4536_v37 }
 0x60e   : > { %4019 = vst.msk [vmem:[#allocation2 + $0xb0] sm:$0xff] %vm3996_vm4, %v3963_v15  ;;  %5004 = vrot.lane.b32.xlu0 %v4028_v53, %s6746_s30 }
 0x60f   : > { %4429 = vrot.lane.b32.xlu1 %v4406_v35, %s6743_s5  ;;  %s9583_s5 = scalar_lea.vmem [#allocation5], %s5779_s14 }
 0x610   : > { %v4538_v45 = vpop.permute.xlu0 %4537  ;;  %v5045_v7 = vld [vmem:[#allocation2 + $0x98] sm:$0xff] }
 0x611   : > { %v4729_v6 = vpop.permute.xlu1 %4728  ;;  %4589 = vst.msk [vmem:[#allocation2 + $0xa8] sm:$0xff] %vm4567_vm7, %v4538_v45  ;;  %6464 = vmatmul.mubr.msk.f32.gmra.mrb[2].mxu1 %vm5071_vm10, %v5045_v7 }
 0x612   : > { %4781 = vst.msk [vmem:[#allocation2 + $0xa0] sm:$0xff] %vm4760_vm8, %v4729_v6  ;;  %4620 = vrot.lane.b32.xlu0 %v4598_v33, %s6744_s11 }
 0x613   : > { %4622 = vrot.lane.b32.xlu1 %v4599_v13, %s6744_s11 }
 0x614   : > { %v3965_v60 = vpop.permute.xlu0 %3964 }
 0x615   : > { %v4153_v28 = vpop.permute.xlu1 %4152  ;;  %4020 = vst.msk [vmem:[#allocation2 + $0xb8] sm:$0xff] %vm3996_vm4, %v3965_v60 }
 0x616   : > { %4203 = vst.msk [vmem:[#allocation2 + $0xb0] sm:$0xff] %vm4180_vm5, %v4153_v28  ;;  %4813 = vrot.lane.b32.xlu0 %v4791_v17, %s6745_s29 }
 0x617   : > { %4815 = vrot.lane.b32.xlu1 %v4792_v16, %s6745_s29  ;;  %s6747_s29 = smov [#allocation3]  }
 0x618   : > { %v4731_v0 = vpop.permute.xlu0 %4730  ;;  %v9401_v50 = vpop.f32.mrb[0].mxu0 }
 0x619   : > { %4782 = vst.msk [vmem:[#allocation2 + $0xa8] sm:$0xff] %vm4760_vm8, %v4731_v0  ;;  %v4922_v1 = vpop.permute.xlu1 %4921  ;;  %v9404_v51 = vpop.f32.mrb[1].mxu0 }
 0x61a   : > { %4974 = vst.msk [vmem:[#allocation2 + $0xa0] sm:$0xff] %vm4953_vm9, %v4922_v1  ;;  %v5463_v38 = vadd.f32 %v9401_v50, %v9404_v51  ;;  %5006 = vrot.lane.b32.xlu0 %v4984_v61, %s6746_s30 }
 0x61b   : > { %5008 = vrot.lane.b32.xlu1 %v4985_v44, %s6746_s30  ;;  %s6615_s30 = sshll.u32 %s6747_s29, 4  ;;  %s6616_s30 = int_to_ptr.vmem [resolvable:$false] %s6615_s30 }
 0x61c   : > { %v4155_v29 = vpop.permute.xlu0 %4154  ;;  %s6617_s6 = scalar_lea.vmem %s6616_s30, 512  ;;  %p6618_p1 = scmp.lt.s32.totalorder %s9631_s9, %s6616_s30 }
 0x61d   : > { %4204 = vst.msk [vmem:[#allocation2 + $0xb8] sm:$0xff] %vm4180_vm5, %v4155_v29  ;;  %v4347_v20 = vpop.permute.xlu1 %4346  ;;  %p6619_p2 = scmp.lt.s32.totalorder %s6617_s6, %s6611_s26 }
 0x61e   : > { %4397 = vst.msk [vmem:[#allocation2 + $0xb0] sm:$0xff] %vm4374_vm6, %v4347_v20 }
 0x61f   : > { %p6620_p3 = por %p6619_p2, %p6618_p1 }
 0x620   : > { %v4924_v42 = vpop.permute.xlu0 %4923 }
 0x621   : > { %4975 = vst.msk [vmem:[#allocation2 + $0xa8] sm:$0xff] %vm4953_vm9, %v4924_v42  ;;  %v4349_v18 = vpop.permute.xlu1 %4348  ;;  %v5046_v19 = vld [vmem:[#allocation2 + $0xa0] sm:$0xff]  ;;  %p6621_p5 = pnand %p6620_p3, %p6614_p0 }
 0x622   : > { %4398 = vst.msk [vmem:[#allocation2 + $0xb8] sm:$0xff] %vm4374_vm6, %v4349_v18  ;;  %6466 = vmatprep.mubr.msk.f32.mxu1 %vm5071_vm10, %v5046_v19 }
 0x624   : > { %v4540_v8 = vpop.permute.xlu0 %4539 }
 0x625   : > { %4590 = vst.msk [vmem:[#allocation2 + $0xb0] sm:$0xff] %vm4567_vm7, %v4540_v8  ;;  %v3967_v39 = vpop.permute.xlu1 %3966 }
 0x626   : > { %4021 = vst.msk [vmem:[#allocation2 + $0xc0] sm:$0xff] %vm3996_vm4, %v3967_v39 }
 0x628   : > { %v4542_v24 = vpop.permute.xlu0 %4541  ;;  %v5047_v43 = vld [vmem:[#allocation2 + $0xa8] sm:$0xff] }
 0x629   : > { %4591 = vst.msk [vmem:[#allocation2 + $0xb8] sm:$0xff] %vm4567_vm7, %v4542_v24  ;;  %v4733_v23 = vpop.permute.xlu1 %4732  ;;  %6467 = vmatmul.mubr.msk.f32.gmra.mrb[4].mxu1 %vm5071_vm10, %v5047_v43 }
 0x62a   : > { %4783 = vst.msk [vmem:[#allocation2 + $0xb0] sm:$0xff] %vm4760_vm8, %v4733_v23 }
 0x62c   : > { %v3969_v9 = vpop.permute.xlu0 %3968  ;;  %v9421_v12 = vpop.f32.mrb[2].mxu0 }
 0x62d   : > { %4022 = vst.msk [vmem:[#allocation2 + $0xc8] sm:$0xff] %vm3996_vm4, %v3969_v9  ;;  %v4222_v14 = vpop.permute.xlu1 %4221  ;;  %v9424_v25 = vpop.f32.mrb[3].mxu0 }
 0x62e   : > { %4246 = vst.msk [vmem:[#allocation2 + $0xc0] sm:$0xff] %vm4180_vm5, %v4222_v14  ;;  %v5464_v30 = vadd.f32 %v5463_v38, %v9424_v25 }
 0x630   : > { %v4735_v54 = vpop.permute.xlu0 %4734  ;;  %v5465_v58 = vadd.f32 %v9421_v12, %v5464_v30 }
 0x631   : > { %4784 = vst.msk [vmem:[#allocation2 + $0xb8] sm:$0xff] %vm4760_vm8, %v4735_v54  ;;  %v4926_v31 = vpop.permute.xlu1 %4925 }
 0x632   : > { %4976 = vst.msk [vmem:[#allocation2 + $0xb0] sm:$0xff] %vm4953_vm9, %v4926_v31 }
 0x634   : > { %v4224_v59 = vpop.permute.xlu0 %4223 }
 0x635   : > { %4247 = vst.msk [vmem:[#allocation2 + $0xc8] sm:$0xff] %vm4180_vm5, %v4224_v59  ;;  %v4416_v34 = vpop.permute.xlu1 %4415 }
 0x636   : > { %4439 = vst.msk [vmem:[#allocation2 + $0xc0] sm:$0xff] %vm4374_vm6, %v4416_v34 }
 0x638   : > { %v4928_v26 = vpop.permute.xlu0 %4927  ;;  %5397 = vxpose.xlu0.b32.start [1/16] (narrow) %v9404_v51, 8 }
 0x639   : > { %4977 = vst.msk [vmem:[#allocation2 + $0xb8] sm:$0xff] %vm4953_vm9, %v4928_v26  ;;  %v4418_v55 = vpop.permute.xlu1 %4417  ;;  %v5048_v48 = vld [vmem:[#allocation2 + $0xb0] sm:$0xff] }
 0x63a   : > { %4440 = vst.msk [vmem:[#allocation2 + $0xc8] sm:$0xff] %vm4374_vm6, %v4418_v55  ;;  %6469 = vmatprep.mubr.msk.f32.mxu1 %vm5071_vm10, %v5048_v48 }
 0x63c   : > { %v4609_v36 = vpop.permute.xlu0 %4608  ;;  %5398 = vxpose.xlu0.b32.cont [2/16] (narrow) %v9401_v50, 8 }
 0x63d   : > { %4632 = vst.msk [vmem:[#allocation2 + $0xc0] sm:$0xff] %vm4567_vm7, %v4609_v36  ;;  %v4036_v40 = vpop.permute.xlu1 %4035 }
 0x63e   : > { %4053 = vst.msk [vmem:[#allocation2 + $0xd0] sm:$0xff] %vm3996_vm4, %v4036_v40 }
 0x640   : > { %v4611_v27 = vpop.permute.xlu0 %4610  ;;  %5399 = vxpose.xlu0.b32.cont [3/16] (narrow) %v9424_v25, 8  ;;  %v9441_v41 = vpop.f32.mrb[4].mxu0  ;;  %v5049_v49 = vld [vmem:[#allocation2 + $0xb8] sm:$0xff] }
 0x641   : > { %4633 = vst.msk [vmem:[#allocation2 + $0xc8] sm:$0xff] %vm4567_vm7, %v4611_v27  ;;  %v4802_v46 = vpop.permute.xlu1 %4801  ;;  %v9444_v47 = vpop.f32.mrb[5].mxu0  ;;  %6470 = vmatmul.mubr.msk.f32.gmra.mrb[6].mxu1 %vm5071_vm10, %v5049_v49 }
 0x642   : > { %4825 = vst.msk [vmem:[#allocation2 + $0xc0] sm:$0xff] %vm4760_vm8, %v4802_v46  ;;  %v5466_v21 = vadd.f32 %v5465_v58, %v9444_v47 }
 0x644   : > { %v4038_v22 = vpop.permute.xlu0 %4037  ;;  %5400 = vxpose.xlu0.b32.cont [4/16] (narrow) %v9421_v12, 8  ;;  %v5467_v52 = vadd.f32 %v9441_v41, %v5466_v21 }
 0x645   : > { %4054 = vst.msk [vmem:[#allocation2 + $0xd8] sm:$0xff] %vm3996_vm4, %v4038_v22  ;;  %v4226_v53 = vpop.permute.xlu1 %4225 }
 0x646   : > { %4248 = vst.msk [vmem:[#allocation2 + $0xd0] sm:$0xff] %vm4180_vm5, %v4226_v53 }
 0x648   : > { %v4804_v62 = vpop.permute.xlu0 %4803  ;;  %5401 = vxpose.xlu0.b32.cont [5/16] (narrow) %v9444_v47, 8 }
 0x649   : > { %4826 = vst.msk [vmem:[#allocation2 + $0xc8] sm:$0xff] %vm4760_vm8, %v4804_v62  ;;  %v4995_v56 = vpop.permute.xlu1 %4994 }
 0x64a   : > { %5018 = vst.msk [vmem:[#allocation2 + $0xc0] sm:$0xff] %vm4953_vm9, %v4995_v56 }
 0x64c   : > { %v4228_v57 = vpop.permute.xlu0 %4227  ;;  %5402 = vxpose.xlu0.b32.cont [6/16] (narrow) %v9441_v41, 8 }
 0x64d   : > { %4249 = vst.msk [vmem:[#allocation2 + $0xd8] sm:$0xff] %vm4180_vm5, %v4228_v57  ;;  %v4420_v63 = vpop.permute.xlu1 %4419 }
 0x64e   : > { %4441 = vst.msk [vmem:[#allocation2 + $0xd0] sm:$0xff] %vm4374_vm6, %v4420_v63 }
 0x650   : > { %v4997_v2 = vpop.permute.xlu0 %4996 }
 0x651   : > { %5019 = vst.msk [vmem:[#allocation2 + $0xc8] sm:$0xff] %vm4953_vm9, %v4997_v2  ;;  %v4422_v4 = vpop.permute.xlu1 %4421  ;;  %v5050_v5 = vld [vmem:[#allocation2 + $0xc0] sm:$0xff] }
 0x652   : > { %4442 = vst.msk [vmem:[#allocation2 + $0xd8] sm:$0xff] %vm4374_vm6, %v4422_v4  ;;  %6472 = vmatprep.mubr.msk.f32.mxu1 %vm5071_vm10, %v5050_v5 }
 0x654   : > { %v4613_v10 = vpop.permute.xlu0 %4612  ;;  %v9462_v32 = vpop.f32.mrb[6].mxu0 }
 0x655   : > { %4634 = vst.msk [vmem:[#allocation2 + $0xd0] sm:$0xff] %vm4567_vm7, %v4613_v10  ;;  %v4040_v3 = vpop.permute.xlu1 %4039  ;;  %v9465_v11 = vpop.f32.mrb[7].mxu0 }
 0x656   : > { %4055 = vst.msk [vmem:[#allocation2 + $0xe0] sm:$0xff] %vm3996_vm4, %v4040_v3  ;;  %v5468_v35 = vadd.f32 %v5467_v52, %v9465_v11  ;;  %5403 = vxpose.xlu0.b32.cont [7/16] (narrow) %v9465_v11, 8 }
 0x658   : > { %v4615_v37 = vpop.permute.xlu0 %4614  ;;  %v5051_v15 = vld [vmem:[#allocation2 + $0xc8] sm:$0xff]  ;;  %v5469_v33 = vadd.f32 %v9462_v32, %v5468_v35 }
 0x659   : > { %4635 = vst.msk [vmem:[#allocation2 + $0xd8] sm:$0xff] %vm4567_vm7, %v4615_v37  ;;  %v4806_v13 = vpop.permute.xlu1 %4805  ;;  %6473 = vmatmul.mubr.msk.f32.gmra.mrb[8].mxu1 %vm5071_vm10, %v5051_v15 }
 0x65a   : > { %4827 = vst.msk [vmem:[#allocation2 + $0xd0] sm:$0xff] %vm4760_vm8, %v4806_v13  ;;  %5404 = vxpose.xlu0.b32.cont [8/16] (narrow) %v9462_v32, 8 }
 0x65c   : > { %v4042_v45 = vpop.permute.xlu0 %4041 }
 0x65d   : > { %4056 = vst.msk [vmem:[#allocation2 + $0xe8] sm:$0xff] %vm3996_vm4, %v4042_v45  ;;  %v4230_v6 = vpop.permute.xlu1 %4229 }
 0x65e   : > { %4250 = vst.msk [vmem:[#allocation2 + $0xe0] sm:$0xff] %vm4180_vm5, %v4230_v6 }
 0x660   : > { %v4808_v7 = vpop.permute.xlu0 %4807 }
 0x661   : > { %4828 = vst.msk [vmem:[#allocation2 + $0xd8] sm:$0xff] %vm4760_vm8, %v4808_v7  ;;  %v4999_v17 = vpop.permute.xlu1 %4998 }
 0x662   : > { %5020 = vst.msk [vmem:[#allocation2 + $0xd0] sm:$0xff] %vm4953_vm9, %v4999_v17 }
 0x664   : > { %v4232_v16 = vpop.permute.xlu0 %4231 }
 0x665   : > { %4251 = vst.msk [vmem:[#allocation2 + $0xe8] sm:$0xff] %vm4180_vm5, %v4232_v16  ;;  %v4424_v60 = vpop.permute.xlu1 %4423 }
 0x666   : > { %4443 = vst.msk [vmem:[#allocation2 + $0xe0] sm:$0xff] %vm4374_vm6, %v4424_v60 }
 0x668   : > { %v5001_v28 = vpop.permute.xlu0 %5000 }
 0x669   : > { %5021 = vst.msk [vmem:[#allocation2 + $0xd8] sm:$0xff] %vm4953_vm9, %v5001_v28  ;;  %v4426_v61 = vpop.permute.xlu1 %4425  ;;  %v5052_v44 = vld [vmem:[#allocation2 + $0xd0] sm:$0xff] }
 0x66a   : > { %4444 = vst.msk [vmem:[#allocation2 + $0xe8] sm:$0xff] %vm4374_vm6, %v4426_v61  ;;  %6475 = vmatprep.mubr.msk.f32.mxu1 %vm5071_vm10, %v5052_v44 }
 0x66c   : > { %v4617_v0 = vpop.permute.xlu0 %4616  ;;  %v9484_v1 = vpop.f32.mrb[8].mxu0 }
 0x66d   : > { %4636 = vst.msk [vmem:[#allocation2 + $0xe0] sm:$0xff] %vm4567_vm7, %v4617_v0  ;;  %v4044_v38 = vpop.permute.xlu1 %4043  ;;  %v9487_v29 = vpop.f32.mrb[9].mxu0 }
 0x66e   : > { %4057 = vst.msk [vmem:[#allocation2 + $0xf0] sm:$0xff] %vm3996_vm4, %v4044_v38  ;;  %v5470_v20 = vadd.f32 %v5469_v33, %v9487_v29  ;;  %5405 = vxpose.xlu0.b32.cont [9/16] (narrow) %v9487_v29, 8 }
 0x670   : > { %v4619_v42 = vpop.permute.xlu0 %4618  ;;  %v5053_v18 = vld [vmem:[#allocation2 + $0xd8] sm:$0xff]  ;;  %v5471_v19 = vadd.f32 %v9484_v1, %v5470_v20 }
 0x671   : > { %4637 = vst.msk [vmem:[#allocation2 + $0xe8] sm:$0xff] %vm4567_vm7, %v4619_v42  ;;  %v4810_v8 = vpop.permute.xlu1 %4809  ;;  %6476 = vmatmul.mubr.msk.f32.gmra.mrb[10].mxu1 %vm5071_vm10, %v5053_v18 }
 0x672   : > { %4829 = vst.msk [vmem:[#allocation2 + $0xe0] sm:$0xff] %vm4760_vm8, %v4810_v8  ;;  %5406 = vxpose.xlu0.b32.cont [10/16] (narrow) %v9484_v1, 8 }
 0x674   : > { %v4046_v39 = vpop.permute.xlu0 %4045 }
 0x675   : > { %4058 = vst.msk [vmem:[#allocation2 + $0xf8] sm:$0xff] %vm3996_vm4, %v4046_v39  ;;  %v4234_v24 = vpop.permute.xlu1 %4233 }
 0x676   : > { %4252 = vst.msk [vmem:[#allocation2 + $0xf0] sm:$0xff] %vm4180_vm5, %v4234_v24 }
 0x678   : > { %v4812_v43 = vpop.permute.xlu0 %4811 }
 0x679   : > { %4830 = vst.msk [vmem:[#allocation2 + $0xe8] sm:$0xff] %vm4760_vm8, %v4812_v43  ;;  %v5003_v23 = vpop.permute.xlu1 %5002 }
 0x67a   : > { %5022 = vst.msk [vmem:[#allocation2 + $0xe0] sm:$0xff] %vm4953_vm9, %v5003_v23 }
 0x67c   : > { %v4236_v9 = vpop.permute.xlu0 %4235 }
 0x67d   : > { %4253 = vst.msk [vmem:[#allocation2 + $0xf8] sm:$0xff] %vm4180_vm5, %v4236_v9  ;;  %v4428_v14 = vpop.permute.xlu1 %4427 }
 0x67e   : > { %4445 = vst.msk [vmem:[#allocation2 + $0xf0] sm:$0xff] %vm4374_vm6, %v4428_v14 }
 0x680   : > { %v5005_v30 = vpop.permute.xlu0 %5004 }
 0x681   : > { %5023 = vst.msk [vmem:[#allocation2 + $0xe8] sm:$0xff] %vm4953_vm9, %v5005_v30  ;;  %v4430_v54 = vpop.permute.xlu1 %4429  ;;  %v5054_v58 = vld [vmem:[#allocation2 + $0xe0] sm:$0xff] }
 0x682   : > { %4446 = vst.msk [vmem:[#allocation2 + $0xf8] sm:$0xff] %vm4374_vm6, %v4430_v54  ;;  %6478 = vmatprep.mubr.msk.f32.mxu1 %vm5071_vm10, %v5054_v58 }
 0x684   : > { %v4621_v31 = vpop.permute.xlu0 %4620  ;;  %v9506_v59 = vpop.f32.mrb[10].mxu0 }
 0x685   : > { %4638 = vst.msk [vmem:[#allocation2 + $0xf0] sm:$0xff] %vm4567_vm7, %v4621_v31  ;;  %v4623_v34 = vpop.permute.xlu1 %4622  ;;  %v9509_v26 = vpop.f32.mrb[11].mxu0 }
 0x686   : > { %4639 = vst.msk [vmem:[#allocation2 + $0xf8] sm:$0xff] %vm4567_vm7, %v4623_v34  ;;  %v5472_v55 = vadd.f32 %v5471_v19, %v9509_v26  ;;  %5407 = vxpose.xlu0.b32.cont [11/16] (narrow) %v9509_v26, 8 }
 0x688   : > { %v4814_v48 = vpop.permute.xlu0 %4813  ;;  %v5055_v36 = vld [vmem:[#allocation2 + $0xe8] sm:$0xff]  ;;  %v5473_v40 = vadd.f32 %v9506_v59, %v5472_v55 }
 0x689   : > { %4831 = vst.msk [vmem:[#allocation2 + $0xf0] sm:$0xff] %vm4760_vm8, %v4814_v48  ;;  %v4816_v27 = vpop.permute.xlu1 %4815  ;;  %6479 = vmatmul.mubr.msk.f32.gmra.mrb[12].mxu1 %vm5071_vm10, %v5055_v36 }
 0x68a   : > { %4832 = vst.msk [vmem:[#allocation2 + $0xf8] sm:$0xff] %vm4760_vm8, %v4816_v27  ;;  %5408 = vxpose.xlu0.b32.cont [12/16] (narrow) %v9506_v59, 8 }
 0x68c   : > { %v5007_v49 = vpop.permute.xlu0 %5006 }
 0x68d   : > { %5024 = vst.msk [vmem:[#allocation2 + $0xf0] sm:$0xff] %vm4953_vm9, %v5007_v49  ;;  %v5009_v46 = vpop.permute.xlu1 %5008 }
 0x68e   : > { %5025 = vst.msk [vmem:[#allocation2 + $0xf8] sm:$0xff] %vm4953_vm9, %v5009_v46 }
 0x694   : > { %v5056_v21 = vld [vmem:[#allocation2 + $0xf0] sm:$0xff] }
 0x695   : > { %6481 = vmatprep.mubr.msk.f32.mxu1 %vm5071_vm10, %v5056_v21  ;;  %v5057_v22 = vld [vmem:[#allocation2 + $0xf8] sm:$0xff] }
 0x696   : > { %6482 = vmatmul.mubr.msk.f32.gmra.mrb[14].mxu1 %vm5071_vm10, %v5057_v22 }
 0x69c   : > { %v9523_v52 = vpop.f32.mrb[12].mxu0 }
 0x69d   : > { %v9525_v53 = vpop.f32.mrb[13].mxu0 }
 0x69e   : > { %v5474_v62 = vadd.f32 %v5473_v40, %v9525_v53  ;;  %5409 = vxpose.xlu0.b32.cont [13/16] (narrow) %v9525_v53, 8 }
 0x6a0   : > { %v5475_v56 = vadd.f32 %v9523_v52, %v5474_v62 }
 0x6a2   : > { %5410 = vxpose.xlu0.b32.cont [14/16] (narrow) %v9523_v52, 8 }
 0x6b4   : > { %v9531_v57 = vpop.f32.mrb[14].mxu0 }
 0x6b5   : > { %v9533_v63 = vpop.f32.mrb[15].mxu0 }
 0x6b6   : > { %v5476_v2 = vadd.f32 %v5475_v56, %v9533_v63  ;;  %5411 = vxpose.xlu0.b32.cont [15/16] (narrow) %v9533_v63, 8 }
 0x6b8   : > { %v5477_v4 = vadd.f32 %v9531_v57, %v5476_v2 }
 0x6ba   : > { %5412 = vxpose.xlu0.b32.end [16/16] (narrow) %v9531_v57, 8 }
 0x6cc   : > { %v9539_v5 = vpop.f32.mrb[0].mxu1 }
 0x6cd   : > { %v9541_v10 = vpop.f32.mrb[1].mxu1 }
 0x6ce   : > { %v5478_v3 = vadd.f32 %v5477_v4, %v9541_v10  ;;  %5429 = vxpose.xlu1.b32.start [1/16] (narrow) %v9541_v10, 8 }
 0x6d0   : > { %v5479_v35 = vadd.f32 %v9539_v5, %v5478_v3 }
 0x6d2   : > { %5430 = vxpose.xlu1.b32.cont [2/16] (narrow) %v9539_v5, 8 }
 0x6e4   : > { %v9547_v37 = vpop.f32.mrb[2].mxu1 }
 0x6e5   : > { %v9549_v15 = vpop.f32.mrb[3].mxu1 }
 0x6e6   : > { %v5480_v33 = vadd.f32 %v5479_v35, %v9549_v15  ;;  %5431 = vxpose.xlu1.b32.cont [3/16] (narrow) %v9549_v15, 8 }
 0x6e8   : > { %v5481_v13 = vadd.f32 %v9547_v37, %v5480_v33 }
 0x6ea   : > { %5432 = vxpose.xlu1.b32.cont [4/16] (narrow) %v9547_v37, 8 }
 0x6fc   : > { %v9555_v45 = vpop.f32.mrb[4].mxu1 }
 0x6fd   : > { %v9557_v6 = vpop.f32.mrb[5].mxu1 }
 0x6fe   : > { %v5482_v7 = vadd.f32 %v5481_v13, %v9557_v6  ;;  %5433 = vxpose.xlu1.b32.cont [5/16] (narrow) %v9557_v6, 8  ;;  %v5413_v39 = vpop.trf.xlu0 }
 0x6ff   : > { %5461 = vst [vmem:[%s9579_s21] sm:$0xff] %v5413_v39 }
 0x700   : > { %v5483_v17 = vadd.f32 %v9555_v45, %v5482_v7 }
 0x702   : > { %5434 = vxpose.xlu1.b32.cont [6/16] (narrow) %v9555_v45, 8 }
 0x714   : > { %v9563_v16 = vpop.f32.mrb[6].mxu1 }
 0x715   : > { %v9565_v60 = vpop.f32.mrb[7].mxu1 }
 0x716   : > { %v5484_v28 = vadd.f32 %v5483_v17, %v9565_v60  ;;  %5435 = vxpose.xlu1.b32.cont [7/16] (narrow) %v9565_v60, 8 }
 0x718   : > { %v5485_v61 = vadd.f32 %v9563_v16, %v5484_v28 }
 0x71a   : > { %5436 = vxpose.xlu1.b32.cont [8/16] (narrow) %v9563_v16, 8 }
 0x72c   : > { %v9571_v44 = vpop.f32.mrb[8].mxu1 }
 0x72d   : > { %v5358_v0 = vpop.f32.mrb[9].mxu1 }
 0x72e   : > { %v5486_v38 = vadd.f32 %v5485_v61, %v5358_v0  ;;  %5437 = vxpose.xlu1.b32.cont [9/16] (narrow) %v5358_v0, 8 }
 0x730   : > { %v5487_v20 = vadd.f32 %v9571_v44, %v5486_v38 }
 0x732   : > { %5438 = vxpose.xlu1.b32.cont [10/16] (narrow) %v9571_v44, 8 }
 0x744   : > { %v6477_v42 = vpop.f32.mrb[10].mxu1 }
 0x745   : > { %v5368_v18 = vpop.f32.mrb[11].mxu1 }
 0x746   : > { %v5488_v19 = vadd.f32 %v5487_v20, %v5368_v18  ;;  %5439 = vxpose.xlu1.b32.cont [11/16] (narrow) %v5368_v18, 8 }
 0x748   : > { %v5489_v8 = vadd.f32 %v6477_v42, %v5488_v19 }
 0x74a   : > { %5440 = vxpose.xlu1.b32.cont [12/16] (narrow) %v6477_v42, 8 }
 0x75c   : > { %v6480_v24 = vpop.f32.mrb[12].mxu1 }
 0x75d   : > { %v5378_v43 = vpop.f32.mrb[13].mxu1 }
 0x75e   : > { %v5490_v23 = vadd.f32 %v5489_v8, %v5378_v43  ;;  %5441 = vxpose.xlu1.b32.cont [13/16] (narrow) %v5378_v43, 8 }
 0x760   : > { %v5491_v9 = vadd.f32 %v6480_v24, %v5490_v23 }
 0x762   : > { %5442 = vxpose.xlu1.b32.cont [14/16] (narrow) %v6480_v24, 8 }
 0x769   : > { %v6483_v14 = vpop.f32.mrb[14].mxu1 }
 0x76a   : > { %v5388_v30 = vpop.f32.mrb[15].mxu1 }
 0x76b   : > { %v5492_v54 = vadd.f32 %v5491_v9, %v5388_v30  ;;  %5443 = vxpose.xlu1.b32.cont [15/16] (narrow) %v5388_v30, 8 }
 0x76d   : > { %v5493_v58 = vadd.f32 %v6483_v14, %v5492_v54 }
 0x76f   : > { %v5494_v31 = vrot.slane %v5493_v58, 4  ;;  %5444 = vxpose.xlu1.b32.end [16/16] (narrow) %v6483_v14, 8 }
 0x771   : > { %v5495_v34 = vadd.f32 %v5494_v31, %v5493_v58 }
 0x773   : > { %v5496_v55 = vrot.slane %v5495_v34, 2 }
 0x775   : > { %v5497_v48 = vadd.f32 %v5496_v55, %v5495_v34 }
 0x777   : > { %v5498_v36 = vrot.slane %v5497_v48, 1 }
 0x779   : > { %v5499_v40 = vadd.f32 %v5498_v36, %v5497_v48 }
 0x77b   : > { %v5500_v27 = vmul.f32 0.00390625, %v5499_v40  ;;  %5533 = vst [vmem:[%s9583_s5] sm:$0x1] %v5499_v40 }
 0x77d   : > { %v5501_v49 = vsub.f32 %v9404_v51, %v5500_v27  ;;  %v5502_v46 = vsub.f32 %v9401_v50, %v5500_v27  ;;  %v5503_v21 = vsub.f32 %v9424_v25, %v5500_v27  ;;  %v5504_v22 = vsub.f32 %v9421_v12, %v5500_v27 }
 0x77e   : > { %v5505_v62 = vsub.f32 %v9444_v47, %v5500_v27  ;;  %v5506_v56 = vsub.f32 %v9441_v41, %v5500_v27  ;;  %v5507_v2 = vsub.f32 %v9465_v11, %v5500_v27  ;;  %v5508_v4 = vsub.f32 %v9462_v32, %v5500_v27 }
 0x77f   : > { %v5509_v3 = vsub.f32 %v9487_v29, %v5500_v27  ;;  %v5510_v35 = vsub.f32 %v9484_v1, %v5500_v27  ;;  %v5511_v51 = vsub.f32 %v9509_v26, %v5500_v27  ;;  %v5512_v50 = vsub.f32 %v9506_v59, %v5500_v27 }
 0x780   : > { %v5513_v25 = vsub.f32 %v9525_v53, %v5500_v27  ;;  %v5514_v12 = vsub.f32 %v9523_v52, %v5500_v27  ;;  %v5515_v47 = vsub.f32 %v9533_v63, %v5500_v27  ;;  %v5516_v41 = vsub.f32 %v9531_v57, %v5500_v27 }
 0x781   : > { %v5517_v11 = vsub.f32 %v9541_v10, %v5500_v27  ;;  %v5518_v32 = vsub.f32 %v9539_v5, %v5500_v27  ;;  %v5519_v29 = vsub.f32 %v9549_v15, %v5500_v27  ;;  %v5520_v1 = vsub.f32 %v9547_v37, %v5500_v27 }
 0x782   : > { %v5521_v26 = vsub.f32 %v9557_v6, %v5500_v27  ;;  %v5522_v59 = vsub.f32 %v9555_v45, %v5500_v27  ;;  %v5523_v53 = vsub.f32 %v9565_v60, %v5500_v27  ;;  %v9610_v52 = vsub.f32 %v9563_v16, %v5500_v27 }
 0x783   : > { %v9612_v63 = vsub.f32 %v5358_v0, %v5500_v27  ;;  %v9615_v57 = vsub.f32 %v9571_v44, %v5500_v27  ;;  %v9617_v10 = vsub.f32 %v5368_v18, %v5500_v27  ;;  %v9619_v5 = vsub.f32 %v6477_v42, %v5500_v27 }
 0x784   : > { %v9621_v15 = vsub.f32 %v5378_v43, %v5500_v27  ;;  %v9623_v37 = vsub.f32 %v6480_v24, %v5500_v27  ;;  %v9625_v33 = vsub.f32 %v5388_v30, %v5500_v27  ;;  %v9627_v13 = vsub.f32 %v6483_v14, %v5500_v27 }
 0x785   : > { %v5534_v45 = vmul.f32 %v5501_v49, %v5501_v49  ;;  %v5535_v6 = vmul.f32 %v5502_v46, %v5502_v46  ;;  %v5536_v7 = vmul.f32 %v5503_v21, %v5503_v21  ;;  %v5537_v16 = vmul.f32 %v5504_v22, %v5504_v22 }
 0x786   : > { %v5538_v28 = vmul.f32 %v5505_v62, %v5505_v62  ;;  %v5539_v44 = vmul.f32 %v5506_v56, %v5506_v56  ;;  %v5540_v38 = vmul.f32 %v5507_v2, %v5507_v2  ;;  %v5541_v42 = vmul.f32 %v5508_v4, %v5508_v4 }
 0x787   : > { %v5566_v17 = vadd.f32 %v5535_v6, %v5534_v45  ;;  %v5542_v19 = vmul.f32 %v5509_v3, %v5509_v3  ;;  %v5543_v39 = vmul.f32 %v5510_v35, %v5510_v35  ;;  %v5544_v43 = vmul.f32 %v5511_v51, %v5511_v51 }
 0x788   : > { %v5545_v9 = vmul.f32 %v5512_v50, %v5512_v50  ;;  %v5546_v30 = vmul.f32 %v5513_v25, %v5513_v25  ;;  %v5547_v58 = vmul.f32 %v5514_v12, %v5514_v12  ;;  %v5548_v34 = vmul.f32 %v5515_v47, %v5515_v47 }
 0x789   : > { %v5567_v60 = vadd.f32 %v5566_v17, %v5536_v7  ;;  %v5549_v48 = vmul.f32 %v5516_v41, %v5516_v41  ;;  %v5550_v40 = vmul.f32 %v5517_v11, %v5517_v11  ;;  %v5551_v49 = vmul.f32 %v5518_v32, %v5518_v32 }
 0x78a   : > { %v5552_v21 = vmul.f32 %v5519_v29, %v5519_v29  ;;  %v5553_v62 = vmul.f32 %v5520_v1, %v5520_v1  ;;  %v5554_v2 = vmul.f32 %v5521_v26, %v5521_v26  ;;  %v5555_v3 = vmul.f32 %v5522_v59, %v5522_v59 }
 0x78b   : > { %v5568_v61 = vadd.f32 %v5567_v60, %v5537_v16  ;;  %v5556_v50 = vmul.f32 %v5523_v53, %v5523_v53 }
 0x78d   : > { %v5569_v0 = vadd.f32 %v5568_v61, %v5538_v28 }
 0x78f   : > { %v5570_v20 = vadd.f32 %v5569_v0, %v5539_v44 }
 0x791   : > { %v5571_v18 = vadd.f32 %v5570_v20, %v5540_v38 }
 0x793   : > { %v5572_v8 = vadd.f32 %v5571_v18, %v5541_v42 }
 0x795   : > { %v5573_v24 = vadd.f32 %v5572_v8, %v5542_v19 }
 0x797   : > { %v5574_v23 = vadd.f32 %v5573_v24, %v5543_v39 }
 0x799   : > { %v5575_v14 = vadd.f32 %v5574_v23, %v5544_v43 }
 0x79b   : > { %v5576_v54 = vadd.f32 %v5575_v14, %v5545_v9 }
 0x79d   : > { %v5577_v31 = vadd.f32 %v5576_v54, %v5546_v30 }
 0x79f   : > { %v5578_v55 = vadd.f32 %v5577_v31, %v5547_v58 }
 0x7a1   : > { %v5579_v36 = vadd.f32 %v5578_v55, %v5548_v34 }
 0x7a3   : > { %v5580_v27 = vadd.f32 %v5579_v36, %v5549_v48 }
 0x7a5   : > { %v5581_v46 = vadd.f32 %v5580_v27, %v5550_v40 }
 0x7a7   : > { %v5582_v22 = vadd.f32 %v5581_v46, %v5551_v49 }
 0x7a9   : > { %v5583_v56 = vadd.f32 %v5582_v22, %v5552_v21 }
 0x7ab   : > { %v5584_v4 = vadd.f32 %v5583_v56, %v5553_v62 }
 0x7ad   : > { %v5585_v35 = vadd.f32 %v5584_v4, %v5554_v2 }
 0x7af   : > { %v5586_v25 = vadd.f32 %v5585_v35, %v5555_v3 }
 0x7b3   : > { %v5445_v51 = vpop.trf.xlu1 }
 0x7b4   : > { %5462 = vst [vmem:[%s9579_s21 + $0x8] sm:$0xff] %v5445_v51 }
 0x7b5   : > { %6624 = shalt.err (!%p6621_p5)
}
 0x7b6   : > { %s6625_s8 = scalar_lea.hbm %s9636_s13, 256  ;;  %s6629_s14 = scalar_lea.hbm %s9736_s3, 512 }
 0x7b7   : > { %p6626_p6 = scmp.ne.s32.totalorder %s9636_s13, %s6625_s8  ;;  %p6630_p10 = scmp.lt.u32.totalorder %s9636_s13, %s9736_s3 }
 0x7b8   : > { %p6631_p11 = scmp.lt.u32.totalorder %s6629_s14, %s6625_s8  ;;  %p6633_p13 = scmp.lt.u32.totalorder %s6625_s8, %s9636_s13 }
 0x7b9   : > { %p6627_p7 = pnand %p6626_p6, %p6814_p4 }
 0x7ba   : > { %p6632_p12 = por %p6631_p11, %p6630_p10 }
 0x7bb   : > { %p6628_p9 = pneg %p6627_p7 }
 0x7bc   : > { %p6634_p0 = por %p6633_p13, %p6632_p12 }
 0x7be   : > { %p6635_p1 = pnand %p6634_p0, %p6628_p9 }
 0x7c0   : > { %6638 = shalt.err (!%p6635_p1)
}
 0x7c1   : > { %6524 = dma.vmem_to_hbm [thread:$0]  (%p6814_p4), %s9631_s9, 256, %s9636_s13, %s5605_s24   ;;  %v5557_v12 = vmul.f32 %v9610_v52, %v9610_v52  ;;  %v5587_v47 = vadd.f32 %v5586_v25, %v5556_v50  ;;  %v5558_v41 = vmul.f32 %v9612_v63, %v9612_v63  ;;  %v5559_v32 = vmul.f32 %v9615_v57, %v9615_v57 }
 0x7c2   : > { %v5560_v1 = vmul.f32 %v9617_v10, %v9617_v10  ;;  %v5561_v59 = vmul.f32 %v9619_v5, %v9619_v5  ;;  %v5562_v52 = vmul.f32 %v9621_v15, %v9621_v15  ;;  %v5563_v63 = vmul.f32 %v9623_v37, %v9623_v37  ;;  %s6359_s9 = sshll.u32 %s6713_s18, 5  ;;  %s5640_s12 = sshll.u32 %s9583_s5, 4  ;;  %s9686_s12 = int_to_ptr.vmem [resolvable:$true] %s5640_s12 }
 0x7c3   : > { %v5588_v11 = vadd.f32 %v5587_v47, %v5557_v12  ;;  %v5564_v57 = vmul.f32 %v9625_v33, %v9625_v33  ;;  %v5565_v7 = vmul.f32 %v9627_v13, %v9627_v13  ;;  %s9684_s26 = scalar_lea.hbm %s9737_s4, %s6359_s9  ;;  %s5610_s29 = scalar_lea.sflag [#allocation6], %s9576_s7 }
 0x7c4   : > { %s6639_s30 = scalar_lea.vmem %s9686_s12, 32  ;;  %s6748_s18 = smov [#allocation5]  }
 0x7c5   : > { %v5589_v29 = vadd.f32 %v5588_v11, %v5558_v41  ;;  %p6640_p2 = scmp.ne.s32.totalorder %s9686_s12, %s6639_s30  ;;  %s6643_s6 = sshll.u32 %s6748_s18, 4  ;;  %s6644_s6 = int_to_ptr.vmem [resolvable:$false] %s6643_s6 }
 0x7c6   : > { %s6645_s8 = scalar_lea.vmem %s6644_s6, 64  ;;  %p6646_p6 = scmp.lt.s32.totalorder %s9686_s12, %s6644_s6 }
 0x7c7   : > { %v5590_v26 = vadd.f32 %v5589_v29, %v5559_v32  ;;  %p6641_p3 = pnand %p6640_p2, %p6814_p4  ;;  %p6647_p7 = scmp.lt.s32.totalorder %s6645_s8, %s6639_s30 }
 0x7c9   : > { %v5591_v53 = vadd.f32 %v5590_v26, %v5560_v1  ;;  %p6642_p5 = pneg %p6641_p3  ;;  %p6648_p9 = por %p6647_p7, %p6646_p6 }
 0x7cb   : > { %v5592_v45 = vadd.f32 %v5591_v53, %v5561_v59  ;;  %p6649_p10 = pnand %p6648_p9, %p6642_p5 }
 0x7cd   : > { %v5593_v6 = vadd.f32 %v5592_v45, %v5562_v52 }
 0x7cf   : > { %v5594_v10 = vadd.f32 %v5593_v6, %v5563_v63 }
 0x7d1   : > { %v5595_v5 = vadd.f32 %v5594_v10, %v5564_v57 }
 0x7d3   : > { %v5596_v17 = vadd.f32 %v5595_v5, %v5565_v7 }
 0x7d5   : > { %v5597_v16 = vrot.slane %v5596_v17, 4 }
 0x7d7   : > { %v5598_v60 = vadd.f32 %v5597_v16, %v5596_v17 }
 0x7d9   : > { %v5599_v15 = vrot.slane %v5598_v60, 2 }
 0x7db   : > { %v5600_v28 = vadd.f32 %v5599_v15, %v5598_v60 }
 0x7dd   : > { %v5601_v37 = vrot.slane %v5600_v28, 1 }
 0x7df   : > { %v5602_v61 = vadd.f32 %v5601_v37, %v5600_v28 }
 0x7e1   : > { %5603 = vst [vmem:[%s9583_s5 + $0x1] sm:$0x1] %v5602_v61 }
 0x7e2   : > { %6652 = shalt.err (!%p6649_p10)
}
 0x7e3   : > { %s6653_s7 = scalar_lea.hbm %s9684_s26, 32  ;;  %s6657_s21 = scalar_lea.hbm %s9737_s4, 64 }
 0x7e4   : > { %p6654_p11 = scmp.ne.s32.totalorder %s9684_s26, %s6653_s7  ;;  %p6658_p0 = scmp.lt.u32.totalorder %s9684_s26, %s9737_s4 }
 0x7e5   : > { %p6659_p1 = scmp.lt.u32.totalorder %s6657_s21, %s6653_s7  ;;  %p6661_p3 = scmp.lt.u32.totalorder %s6653_s7, %s9684_s26 }
 0x7e6   : > { %p6655_p12 = pnand %p6654_p11, %p6814_p4 }
 0x7e7   : > { %p6660_p2 = por %p6659_p1, %p6658_p0 }
 0x7e8   : > { %p6656_p13 = pneg %p6655_p12 }
 0x7e9   : > { %p6662_p5 = por %p6661_p3, %p6660_p2 }
 0x7eb   : > { %p6663_p6 = pnand %p6662_p5, %p6656_p13 }
 0x7ed   : > { %6666 = shalt.err (!%p6663_p6)
}
 0x7ee   : > { %6525 = dma.vmem_to_hbm [thread:$0]  (%p6814_p4), %s9686_s12, 32, %s9684_s26, %s5610_s29  }
 0x7ef PF: > { %p6536_p7 = scmp.ge.s32.totalorder %s6721_s20, 2  ;;  %s5652_s11 = sand.u32 1, %s6701_s15  }
 0x7f0   : > { %s5653_s9 = scalar_lea.sflag [#allocation4], %s5652_s11 }
 0x7f1   : > { %p6529_p9 = pnand %p6536_p7, %p6821_p8 }
 0x7f3   : > { %6692 = dma.done.wait (!%p6529_p9), %s5653_s9, 256  }
 0x7f4   : > { %6694 = vsyncadd (!%p6529_p9), %s5653_s9, 4294967040  ;;  %s5662_s13 = scalar_lea.sflag [#allocation6], %s5652_s11 }
 0x7f5   : > { %6696 = dma.done.wait (!%p6529_p9), %s5662_s13, 32  }
 0x7f6   : > { %6698 = vsyncadd (!%p6529_p9), %s5662_s13, 4294967264  ;;  %s21_s20 = sadd.s32 1, %s6721_s20   ;;  %s9740_s15 = smov %s6705_s16 }
 0x7f7   : > { %p18_p10 = scmp.ge.s32.totalorder %s21_s20, 4   ;;  %s9741_s16 = smov %s6709_s17 }
 0x7f8   : > { %s9742_s17 = smov %s6827_s28  ;;  %s9743_s18 = smov %s6717_s19 }
 0x7f9   : > { %s9744_s19 = smov %s9746_s23  ;;  %20 = sbr.rel (!%p18_p10) target bundleno = 6 (0x6), region = 95 }
 0x800   :  { %5667 = vsyncpa [#allocation4], 1 }
 0x801   :  { %5669 = vsyncpa [#allocation4 + $0x1], 1 }
 0x802   :  { %5670 = vsyncpa [#allocation6], 1 }
 0x803   :  { %5672 = vsyncpa [#allocation6 + $0x1], 1 }

</bundles_post_ra>
